<compile_context>
chip_gen: v5e
topology: v5e:2x2
jax: 0.10.0
libtpu: 0.0.40
codegen_flags: <defaults>
</compile_context>

<pallas_src>
import jax
import jax.numpy as jnp
from jax import lax
from jax.experimental import pallas as pl
from jax.experimental.pallas import tpu as pltpu

EPS = 1e-5                      # PyTorch BatchNorm default eps
VMEM_LIMIT = 32 * 1024 * 1024   # safe scoped-VMEM request on v5e/v6e/v7x; blocks here are small


def _round_up(v, m):
    return (v + m - 1) // m * m


def _pick_td(D, Hp, Wp, CIN, budget_bytes=4 << 20):
    """Depth-tile size: divides D, capped so the (TD+2)-slab bf16 window stays small in VMEM.
    (For very large H/W/C an additional H-tiling grid axis would be needed; not required here.)"""
    slab_bytes = Hp * Wp * CIN * 2
    cap = int(max(1, min(8, budget_bytes // max(slab_bytes, 1) - 2)))
    for t in range(min(D, cap), 0, -1):
        if D % t == 0:
            return t
    return 1


def _pick_rows(R, cap=1024):
    """Row tile: a multiple of 8 that divides R (else the full R, which is always legal)."""
    upper = min(cap, (R // 8) * 8)
    for t in range(upper, 0, -8):
        if R % t == 0:
            return t
    return R


# --------------------------------------------------------------------------- #
# Kernel 1: fused  relu(norm1(x)) -> conv2(3x3x3, 'same')  + BN2 partial sums
# Grid: (N, D // TD). Each step produces TD depth slices of conv2's output and
# accumulates (sum, sum^2) of the f32 conv output into a per-n resident block.
# --------------------------------------------------------------------------- #
def _conv2_fused_kernel(xm_ref, h1_ref, h2_ref, w_ref, sc1_ref, sh1_ref,
                        y_ref, sums_ref):
    TD, Hp, Wp, CIN = xm_ref.shape          # main view: TD padded-depth slabs
    _, HW, C = y_ref.shape                  # bf16 output: only the valid C channels
    CP = w_ref.shape[-1]                    # lane-dense matmul output channels
    H, W = Hp - 2, Wp - 2

    d = pl.program_id(1)
    D = TD * pl.num_programs(1)             # true (unpadded) depth

    scale1 = sc1_ref[...].reshape(1, 1, CIN)
    shift1 = sh1_ref[...].reshape(1, 1, CIN)

    # 'same' zero padding must stay exactly zero in h-space (BN1 affine of 0 is not 0):
    # mask the h/w ring; the depth pad slices are handled by a scalar multiplier below.
    hh = lax.broadcasted_iota(jnp.int32, (Hp, Wp, 1), 0)
    ww = lax.broadcasted_iota(jnp.int32, (Hp, Wp, 1), 1)
    interior_hw = (hh >= 1) & (hh <= H) & (ww >= 1) & (ww <= W)

    def prep(slab_bf16, j):
        # BN1 affine + ReLU + padding mask, computed in f32, cast to bf16 ONCE per slab.
        g = d * TD + j                                     # global padded-depth index
        d_ok = jnp.logical_and(g >= 1, g <= D).astype(jnp.float32)
        h = jnp.maximum(slab_bf16.astype(jnp.float32) * scale1 + shift1, 0.0)
        h = jnp.where(interior_hw, h, 0.0) * d_ok
        return h.astype(jnp.bfloat16)

    def im2col(slab):
        # (Hp, Wp, CIN) -> (HW, 9*CIN), tap order (kh, kw, cin) matching the weight layout.
        cols = [slab[kh:kh + H, kw:kw + W, :].reshape(HW, CIN)
                for kh in range(3) for kw in range(3)]
        return jnp.concatenate(cols, axis=-1)

    # Preprocess + im2col every window slab exactly once (TD + 2 slabs per step).
    patches = [im2col(prep(xm_ref[j], j)) for j in range(TD)]
    patches.append(im2col(prep(h1_ref[...], TD)))
    patches.append(im2col(prep(h2_ref[...], TD + 1)))

    wk = [w_ref[0], w_ref[1], w_ref[2]]     # (9*CIN, CP) bf16, VMEM-resident

    s_acc = jnp.zeros((2, CP), jnp.float32)
    for t in range(TD):
        acc = jnp.zeros((HW, CP), jnp.float32)
        for kd in range(3):                 # 3 deep matmuls, K = 9*CIN (v5e: ~128-sized chunks)
            acc = acc + jnp.dot(patches[t + kd], wk[kd],
                                preferred_element_type=jnp.float32)
        y_ref[t] = acc[:, :C].astype(y_ref.dtype)          # bf16, unpadded channels
        s_acc = s_acc + jnp.concatenate(
            [jnp.sum(acc, axis=0, keepdims=True),
             jnp.sum(acc * acc, axis=0, keepdims=True)], axis=0)

    # Per-n resident accumulator (constant index_map along the 'arbitrary' d axis).
    @pl.when(d == 0)
    def _():
        sums_ref[...] = jnp.zeros_like(sums_ref)
    sums_ref[...] += s_acc


def _conv2_fused_call(xp_bf16, w2k_bf16, scale1, shift1, TD):
    N, Dp, Hp, Wp, CIN = xp_bf16.shape
    D, H, W = Dp - 2, Hp - 2, Wp - 2
    HW = H * W
    CP = w2k_bf16.shape[-1]
    K = w2k_bf16.shape[1]                   # 9*CIN
    C = scale1.shape[-1] if False else None  # unused; kept for clarity
    C_out = None  # derived below from the out_shape

    n_dt = D // TD
    C_out = CP  # placeholder; real C passed through out_shape by caller

    def call(C_real):
        main_spec = pl.BlockSpec((None, TD, Hp, Wp, CIN),
                                 lambda n, d: (n, d, 0, 0, 0))
        halo1_spec = pl.BlockSpec((None, None, Hp, Wp, CIN),
                                  lambda n, d: (n, d * TD + TD, 0, 0, 0))
        halo2_spec = pl.BlockSpec((None, None, Hp, Wp, CIN),
                                  lambda n, d: (n, d * TD + TD + 1, 0, 0, 0))
        return pl.pallas_call(
            _conv2_fused_kernel,
            out_shape=(jax.ShapeDtypeStruct((N, D, HW, C_real), jnp.bfloat16),
                       jax.ShapeDtypeStruct((N, 2, CP), jnp.float32)),
            grid=(N, n_dt),
            in_specs=[
                main_spec, halo1_spec, halo2_spec,
                pl.BlockSpec((3, K, CP), lambda n, d: (0, 0, 0)),   # weights: VMEM-resident
                pl.BlockSpec((1, CIN), lambda n, d: (0, 0)),        # BN1 scale: resident
                pl.BlockSpec((1, CIN), lambda n, d: (0, 0)),        # BN1 shift: resident
            ],
            out_specs=(
                pl.BlockSpec((None, TD, HW, C_real), lambda n, d: (n, d, 0, 0)),
                pl.BlockSpec((None, 2, CP), lambda n, d: (n, 0, 0)),
            ),
            compiler_params=pltpu.CompilerParams(
                dimension_semantics=("parallel", "arbitrary"),   # N -> megacore, d -> resident sums
                vmem_limit_bytes=VMEM_LIMIT),
        )(xp_bf16, xp_bf16, xp_bf16, w2k_bf16, scale1, shift1)

    return call


# --------------------------------------------------------------------------- #
# Kernel 2: tiled, unpadded elementwise epilogue  out = relu(y*scale2 + shift2 + residual)
# --------------------------------------------------------------------------- #
def _epilogue_kernel(y_ref, r_ref, sc_ref, sh_ref, o_ref):
    o_ref[...] = jnp.maximum(
        y_ref[...].astype(jnp.float32) * sc_ref[...] + sh_ref[...] + r_ref[...], 0.0)


def _epilogue_call(y2d, r2d, sc, sh, tile_rows=1024):
    R, Ccols = y2d.shape
    tm = _pick_rows(R, tile_rows)
    return pl.pallas_call(
        _epilogue_kernel,
        out_shape=jax.ShapeDtypeStruct((R, Ccols), jnp.float32),
        grid=(pl.cdiv(R, tm),),
        in_specs=[
            pl.BlockSpec((tm, Ccols), lambda i: (i, 0)),
            pl.BlockSpec((tm, Ccols), lambda i: (i, 0)),
            pl.BlockSpec((1, Ccols), lambda i: (0, 0)),
            pl.BlockSpec((1, Ccols), lambda i: (0, 0)),
        ],
        out_specs=pl.BlockSpec((tm, Ccols), lambda i: (i, 0)),
        compiler_params=pltpu.CompilerParams(
            dimension_semantics=("parallel",),
            vmem_limit_bytes=VMEM_LIMIT),
    )(y2d, r2d, sc, sh)


# ------------------------------- JAX glue ----------------------------------- #
def init_params(key, channels):
    """Parameters for BasicBlockBase(in_ch == out_ch == channels), default init.
    Conv weights: (27, C_in, C_out), bias-free (ME default). BN: weight=1, bias=0."""
    k1, k2 = jax.random.split(key)
    scale = 1.0 / jnp.sqrt(jnp.float32(27 * channels))
    w1 = jax.random.normal(k1, (27, channels, channels), jnp.float32) * scale
    w2 = jax.random.normal(k2, (27, channels, channels), jnp.float32) * scale
    ones = jnp.ones((channels,), jnp.float32)
    zeros = jnp.zeros((channels,), jnp.float32)
    return dict(w1=w1, w2=w2, gamma1=ones, beta1=zeros, gamma2=ones, beta2=zeros)


def basic_block_forward(x, params):
    """x: (N, D, H, W, C) dense channels-last tensor. Returns the same shape."""
    N, D, H, W, C = x.shape
    M = N * D * H * W
    CIN = _round_up(C, 16)    # bf16-friendly contraction dim (input channels)
    CP = _round_up(C, 128)    # lane-dense matmul output channels (never hits HBM)
    x2d = x.reshape(M, C)

    # `out = self.conv1(x)` is immediately overwritten by `out = self.norm1(x)`
    # in the reference forward, so conv1 contributes nothing to the output and
    # its compute is skipped (params["w1"] kept only for interface faithfulness).

    # ---- norm1: training-mode batch statistics of x (cheap (M, C) reduction) ----
    mean1 = jnp.mean(x2d, axis=0)
    var1 = jnp.mean(jnp.square(x2d - mean1[None, :]), axis=0)        # biased
    scale1 = params["gamma1"] * lax.rsqrt(var1 + EPS)
    shift1 = params["beta1"] - mean1 * scale1
    scale1p = jnp.pad(scale1, (0, CIN - C)).reshape(1, CIN)
    shift1p = jnp.pad(shift1, (0, CIN - C)).reshape(1, CIN)

    # ---- pad x once ('same' zero padding + channel pad), cast to bf16 for the MXU ----
    xp_bf16 = jnp.pad(x, ((0, 0), (1, 1), (1, 1), (1, 1),
                          (0, CIN - C))).astype(jnp.bfloat16)
    # weights: (27, C, C) -> (3, 9*CIN, CP), inner order (kh, kw, cin) to match the im2col
    w2p = jnp.pad(params["w2"], ((0, 0), (0, CIN - C), (0, CP - C)))
    w2k = w2p.reshape(3, 3, 3, CIN, CP).reshape(3, 9 * CIN, CP).astype(jnp.bfloat16)

    Hp, Wp = H + 2, W + 2
    TD = _pick_td(D, Hp, Wp, CIN)

    # ---- K1: fused relu(norm1(x)) -> conv2 (bf16 y), plus f32 partial sums for norm2 ----
    y, sums = _conv2_fused_call(xp_bf16, w2k, scale1p, shift1p, TD)(C)

    # ---- norm2: global batch stats from f32 in-kernel partial sums (one-pass formula;
    #      adequate here, a second pass would be needed for extreme M / activation means) ----
    tot = jnp.sum(sums[:, 0, :C], axis=0)
    totsq = jnp.sum(sums[:, 1, :C], axis=0)
    mean2 = tot / M
    var2 = jnp.maximum(totsq / M - jnp.square(mean2), 0.0)           # biased
    inv2 = lax.rsqrt(var2 + EPS)
    scale2 = params["gamma2"] * inv2
    shift2 = params["beta2"] - mean2 * scale2

    # ---- K2: unpadded epilogue  relu(y*scale2 + shift2 + residual), residual = x ----
    L = M * C
    if L % 128 == 0 and 128 % C == 0:
        # Fold spatial into lanes: fully lane-dense (R, 128) tiles, zero padding tax.
        R = L // 128
        reps = 128 // C
        out = _epilogue_call(y.reshape(R, 128), x.reshape(R, 128),
                             jnp.tile(scale2, reps).reshape(1, 128),
                             jnp.tile(shift2, reps).reshape(1, 128))
    else:
        # Fallback: (M, C) blocks (C is the full last dim, so the layout is legal).
        out = _epilogue_call(y.reshape(M, C), x2d,
                             scale2.reshape(1, C), shift2.reshape(1, C))

    # TODO(synk): sparse MinkowskiEngine coordinate maps and the optional `downsample`
    # branch (None in the default config) have no dense Pallas equivalent; this is the
    # dense stride-1/dilation-1 analogue with zero padding.
    return out.reshape(N, D, H, W, C)


# ------------------------ pure-JAX reference (f32) --------------------------- #
def _reference_forward(x, params):
    N, D, H, W, C = x.shape
    M = N * D * H * W
    x2d = x.reshape(M, C)
    mean1 = x2d.mean(axis=0)
    var1 = jnp.mean(jnp.square(x2d - mean1), axis=0)
    h = jnp.maximum((x2d - mean1) * lax.rsqrt(var1 + EPS)
                    * params["gamma1"] + params["beta1"], 0.0)
    hp = jnp.pad(h.reshape(N, D, H, W, C),
                 ((0, 0), (1, 1), (1, 1), (1, 1), (0, 0)))
    y = jnp.zeros((N, D, H, W, C), jnp.float32)
    t = 0
    for kd in range(3):
        for kh in range(3):
            for kw in range(3):
                win = hp[:, kd:kd + D, kh:kh + H, kw:kw + W, :]
                y = y + jnp.einsum("ndhwc,co->ndhwo", win, params["w2"][t],
                                   precision=lax.Precision.HIGHEST)
                t += 1
    y2d = y.reshape(M, C)
    mean2 = y2d.mean(axis=0)
    var2 = jnp.mean(jnp.square(y2d - mean2), axis=0)
    o = ((y2d - mean2) * lax.rsqrt(var2 + EPS) * params["gamma2"]
         + params["beta2"] + x2d)
    return jnp.maximum(o, 0.0).reshape(N, D, H, W, C)


if __name__ == "__main__":
    # in_channels == out_channels is required by the reference forward
    # (norm1, built for out_channels, is applied to x; the residual add needs it too).
    N, D, H, W, C = 2, 8, 8, 8, 4

    key = jax.random.PRNGKey(0)
    kx, kp = jax.random.split(key)
    x = jax.random.normal(kx, (N, D, H, W, C), jnp.float32)
    params = init_params(kp, C)

    out = jax.jit(basic_block_forward)(x, params)
    jax.block_until_ready(out)

    assert out.shape == (N, D, H, W, C)
    assert out.dtype == jnp.float32
    assert bool(jnp.all(out >= 0.0))          # final ReLU

    ref = _reference_forward(x, params)
    max_err = float(jnp.max(jnp.abs(out - ref)))
    assert max_err < 1e-1, f"mismatch vs f32 reference: {max_err}"

    print("KERNEL_OK")
</pallas_src>

<mosaic_0001>
module attributes {stable_mosaic.version = 11 : i64} {
  func.func @_conv2_fused_kernel(%arg0: i32, %arg1: i32, %arg2: memref<1x8x10x10x16xbf16, #tpu.memory_space<vmem>>, %arg3: memref<1x1x10x10x16xbf16, #tpu.memory_space<vmem>>, %arg4: memref<1x1x10x10x16xbf16, #tpu.memory_space<vmem>>, %arg5: memref<3x144x128xbf16, #tpu.memory_space<vmem>>, %arg6: memref<1x16xf32, #tpu.memory_space<vmem>>, %arg7: memref<1x16xf32, #tpu.memory_space<vmem>>, %arg8: memref<1x8x64x4xbf16, #tpu.memory_space<vmem>>, %arg9: memref<1x2x128xf32, #tpu.memory_space<vmem>>) attributes {dimension_semantics = [#tpu.dimension_semantics<parallel>, #tpu.dimension_semantics<arbitrary>], iteration_bounds = array<i64: 2, 1>, scalar_prefetch = 0 : i64, scratch_operands = 0 : i64, tpu.core_type = #tpu.core_type<tc>, window_params = [{transform_indices = @transform_0, window_bounds = array<i64: 1, 8, 10, 10, 16>}, {transform_indices = @transform_1, window_bounds = array<i64: 1, 1, 10, 10, 16>}, {transform_indices = @transform_2, window_bounds = array<i64: 1, 1, 10, 10, 16>}, {pipeline_mode = #tpu.pipeline_mode<synchronous>, transform_indices = @transform_3, window_bounds = array<i64: 3, 144, 128>}, {pipeline_mode = #tpu.pipeline_mode<synchronous>, transform_indices = @transform_4, window_bounds = array<i64: 1, 16>}, {pipeline_mode = #tpu.pipeline_mode<synchronous>, transform_indices = @transform_5, window_bounds = array<i64: 1, 16>}, {transform_indices = @transform_6, window_bounds = array<i64: 1, 8, 64, 4>}, {transform_indices = @transform_7, window_bounds = array<i64: 1, 2, 128>}]} {
    %c0 = arith.constant 0 : index
    %c0_0 = arith.constant 0 : index
    %0 = vector.load %arg6[%c0, %c0_0] : memref<1x16xf32, #tpu.memory_space<vmem>>, vector<1x16xf32>
    %1 = vector.shape_cast %0 : vector<1x16xf32> to vector<1x1x16xf32>
    %c0_1 = arith.constant 0 : index
    %c0_2 = arith.constant 0 : index
    %2 = vector.load %arg7[%c0_1, %c0_2] : memref<1x16xf32, #tpu.memory_space<vmem>>, vector<1x16xf32>
    %3 = vector.shape_cast %2 : vector<1x16xf32> to vector<1x1x16xf32>
    %4 = tpu.iota {dimensions = array<i32: 0>} : vector<10x10x1xi32>
    %5 = tpu.iota {dimensions = array<i32: 1>} : vector<10x10x1xi32>
    %c1_i32 = arith.constant 1 : i32
    %6 = vector.broadcast %c1_i32 : i32 to vector<10x10x1xi32>
    %7 = arith.cmpi sge, %4, %6 : vector<10x10x1xi32>
    %c8_i32 = arith.constant 8 : i32
    %8 = vector.broadcast %c8_i32 : i32 to vector<10x10x1xi32>
    %9 = arith.cmpi sle, %4, %8 : vector<10x10x1xi32>
    %10 = arith.andi %7, %9 : vector<10x10x1xi1>
    %c1_i32_3 = arith.constant 1 : i32
    %11 = vector.broadcast %c1_i32_3 : i32 to vector<10x10x1xi32>
    %12 = arith.cmpi sge, %5, %11 : vector<10x10x1xi32>
    %13 = arith.andi %10, %12 : vector<10x10x1xi1>
    %c8_i32_4 = arith.constant 8 : i32
    %14 = vector.broadcast %c8_i32_4 : i32 to vector<10x10x1xi32>
    %15 = arith.cmpi sle, %5, %14 : vector<10x10x1xi32>
    %16 = arith.andi %13, %15 : vector<10x10x1xi1>
    %c0_5 = arith.constant 0 : index
    %c0_6 = arith.constant 0 : index
    %c0_7 = arith.constant 0 : index
    %c0_8 = arith.constant 0 : index
    %c0_9 = arith.constant 0 : index
    %17 = vector.load %arg2[%c0_5, %c0_6, %c0_7, %c0_8, %c0_9] : memref<1x8x10x10x16xbf16, #tpu.memory_space<vmem>>, vector<1x1x10x10x16xbf16>
    %18 = vector.shape_cast %17 : vector<1x1x10x10x16xbf16> to vector<10x10x16xbf16>
    %c8_i32_10 = arith.constant 8 : i32
    %19 = arith.muli %arg1, %c8_i32_10 : i32
    %c0_i32 = arith.constant 0 : i32
    %20 = arith.addi %19, %c0_i32 : i32
    %c1_i32_11 = arith.constant 1 : i32
    %21 = arith.cmpi sge, %20, %c1_i32_11 : i32
    %c8_i32_12 = arith.constant 8 : i32
    %22 = arith.cmpi sle, %20, %c8_i32_12 : i32
    %23 = arith.andi %21, %22 : i1
    %24 = arith.extui %23 : i1 to i32
    %25 = arith.sitofp %24 : i32 to f32
    %26 = arith.extf %18 : vector<10x10x16xbf16> to vector<10x10x16xf32>
    %27 = vector.broadcast %1 : vector<1x1x16xf32> to vector<10x10x16xf32>
    %28 = arith.mulf %26, %27 : vector<10x10x16xf32>
    %29 = vector.broadcast %3 : vector<1x1x16xf32> to vector<10x10x16xf32>
    %30 = arith.addf %28, %29 : vector<10x10x16xf32>
    %cst = arith.constant 0.000000e+00 : f32
    %31 = vector.broadcast %cst : f32 to vector<10x10x16xf32>
    %32 = arith.maximumf %30, %31 : vector<10x10x16xf32>
    %cst_13 = arith.constant 0.000000e+00 : f32
    %33 = vector.shape_cast %16 : vector<10x10x1xi1> to vector<10x10x1xi1>
    %34 = vector.broadcast %33 : vector<10x10x1xi1> to vector<10x10x16xi1>
    %35 = vector.broadcast %cst_13 : f32 to vector<10x10x16xf32>
    %36 = arith.select %34, %32, %35 : vector<10x10x16xi1>, vector<10x10x16xf32>
    %37 = vector.broadcast %25 : f32 to vector<10x10x16xf32>
    %38 = arith.mulf %36, %37 : vector<10x10x16xf32>
    %39 = arith.truncf %38 : vector<10x10x16xf32> to vector<10x10x16xbf16>
    %40 = vector.extract_strided_slice %39 {offsets = [0, 0, 0], sizes = [8, 8, 16], strides = [1, 1, 1]} : vector<10x10x16xbf16> to vector<8x8x16xbf16>
    %41 = vector.shape_cast %40 : vector<8x8x16xbf16> to vector<64x16xbf16>
    %42 = vector.extract_strided_slice %39 {offsets = [0, 1, 0], sizes = [8, 8, 16], strides = [1, 1, 1]} : vector<10x10x16xbf16> to vector<8x8x16xbf16>
    %43 = vector.shape_cast %42 : vector<8x8x16xbf16> to vector<64x16xbf16>
    %44 = vector.extract_strided_slice %39 {offsets = [0, 2, 0], sizes = [8, 8, 16], strides = [1, 1, 1]} : vector<10x10x16xbf16> to vector<8x8x16xbf16>
    %45 = vector.shape_cast %44 : vector<8x8x16xbf16> to vector<64x16xbf16>
    %46 = vector.extract_strided_slice %39 {offsets = [1, 0, 0], sizes = [8, 8, 16], strides = [1, 1, 1]} : vector<10x10x16xbf16> to vector<8x8x16xbf16>
    %47 = vector.shape_cast %46 : vector<8x8x16xbf16> to vector<64x16xbf16>
    %48 = vector.extract_strided_slice %39 {offsets = [1, 1, 0], sizes = [8, 8, 16], strides = [1, 1, 1]} : vector<10x10x16xbf16> to vector<8x8x16xbf16>
    %49 = vector.shape_cast %48 : vector<8x8x16xbf16> to vector<64x16xbf16>
    %50 = vector.extract_strided_slice %39 {offsets = [1, 2, 0], sizes = [8, 8, 16], strides = [1, 1, 1]} : vector<10x10x16xbf16> to vector<8x8x16xbf16>
    %51 = vector.shape_cast %50 : vector<8x8x16xbf16> to vector<64x16xbf16>
    %52 = vector.extract_strided_slice %39 {offsets = [2, 0, 0], sizes = [8, 8, 16], strides = [1, 1, 1]} : vector<10x10x16xbf16> to vector<8x8x16xbf16>
    %53 = vector.shape_cast %52 : vector<8x8x16xbf16> to vector<64x16xbf16>
    %54 = vector.extract_strided_slice %39 {offsets = [2, 1, 0], sizes = [8, 8, 16], strides = [1, 1, 1]} : vector<10x10x16xbf16> to vector<8x8x16xbf16>
    %55 = vector.shape_cast %54 : vector<8x8x16xbf16> to vector<64x16xbf16>
    %56 = vector.extract_strided_slice %39 {offsets = [2, 2, 0], sizes = [8, 8, 16], strides = [1, 1, 1]} : vector<10x10x16xbf16> to vector<8x8x16xbf16>
    %57 = vector.shape_cast %56 : vector<8x8x16xbf16> to vector<64x16xbf16>
    %58 = tpu.concatenate %41, %43, %45, %47, %49, %51, %53, %55, %57 in 1 : vector<64x16xbf16>, vector<64x16xbf16>, vector<64x16xbf16>, vector<64x16xbf16>, vector<64x16xbf16>, vector<64x16xbf16>, vector<64x16xbf16>, vector<64x16xbf16>, vector<64x16xbf16> -> vector<64x144xbf16>
    %c0_14 = arith.constant 0 : index
    %c1 = arith.constant 1 : index
    %c0_15 = arith.constant 0 : index
    %c0_16 = arith.constant 0 : index
    %c0_17 = arith.constant 0 : index
    %59 = vector.load %arg2[%c0_14, %c1, %c0_15, %c0_16, %c0_17] : memref<1x8x10x10x16xbf16, #tpu.memory_space<vmem>>, vector<1x1x10x10x16xbf16>
    %60 = vector.shape_cast %59 : vector<1x1x10x10x16xbf16> to vector<10x10x16xbf16>
    %c8_i32_18 = arith.constant 8 : i32
    %61 = arith.muli %arg1, %c8_i32_18 : i32
    %c1_i32_19 = arith.constant 1 : i32
    %62 = arith.addi %61, %c1_i32_19 : i32
    %c1_i32_20 = arith.constant 1 : i32
    %63 = arith.cmpi sge, %62, %c1_i32_20 : i32
    %c8_i32_21 = arith.constant 8 : i32
    %64 = arith.cmpi sle, %62, %c8_i32_21 : i32
    %65 = arith.andi %63, %64 : i1
    %66 = arith.extui %65 : i1 to i32
    %67 = arith.sitofp %66 : i32 to f32
    %68 = arith.extf %60 : vector<10x10x16xbf16> to vector<10x10x16xf32>
    %69 = vector.broadcast %1 : vector<1x1x16xf32> to vector<10x10x16xf32>
    %70 = arith.mulf %68, %69 : vector<10x10x16xf32>
    %71 = vector.broadcast %3 : vector<1x1x16xf32> to vector<10x10x16xf32>
    %72 = arith.addf %70, %71 : vector<10x10x16xf32>
    %cst_22 = arith.constant 0.000000e+00 : f32
    %73 = vector.broadcast %cst_22 : f32 to vector<10x10x16xf32>
    %74 = arith.maximumf %72, %73 : vector<10x10x16xf32>
    %cst_23 = arith.constant 0.000000e+00 : f32
    %75 = vector.shape_cast %16 : vector<10x10x1xi1> to vector<10x10x1xi1>
    %76 = vector.broadcast %75 : vector<10x10x1xi1> to vector<10x10x16xi1>
    %77 = vector.broadcast %cst_23 : f32 to vector<10x10x16xf32>
    %78 = arith.select %76, %74, %77 : vector<10x10x16xi1>, vector<10x10x16xf32>
    %79 = vector.broadcast %67 : f32 to vector<10x10x16xf32>
    %80 = arith.mulf %78, %79 : vector<10x10x16xf32>
    %81 = arith.truncf %80 : vector<10x10x16xf32> to vector<10x10x16xbf16>
    %82 = vector.extract_strided_slice %81 {offsets = [0, 0, 0], sizes = [8, 8, 16], strides = [1, 1, 1]} : vector<10x10x16xbf16> to vector<8x8x16xbf16>
    %83 = vector.shape_cast %82 : vector<8x8x16xbf16> to vector<64x16xbf16>
    %84 = vector.extract_strided_slice %81 {offsets = [0, 1, 0], sizes = [8, 8, 16], strides = [1, 1, 1]} : vector<10x10x16xbf16> to vector<8x8x16xbf16>
    %85 = vector.shape_cast %84 : vector<8x8x16xbf16> to vector<64x16xbf16>
    %86 = vector.extract_strided_slice %81 {offsets = [0, 2, 0], sizes = [8, 8, 16], strides = [1, 1, 1]} : vector<10x10x16xbf16> to vector<8x8x16xbf16>
    %87 = vector.shape_cast %86 : vector<8x8x16xbf16> to vector<64x16xbf16>
    %88 = vector.extract_strided_slice %81 {offsets = [1, 0, 0], sizes = [8, 8, 16], strides = [1, 1, 1]} : vector<10x10x16xbf16> to vector<8x8x16xbf16>
    %89 = vector.shape_cast %88 : vector<8x8x16xbf16> to vector<64x16xbf16>
    %90 = vector.extract_strided_slice %81 {offsets = [1, 1, 0], sizes = [8, 8, 16], strides = [1, 1, 1]} : vector<10x10x16xbf16> to vector<8x8x16xbf16>
    %91 = vector.shape_cast %90 : vector<8x8x16xbf16> to vector<64x16xbf16>
    %92 = vector.extract_strided_slice %81 {offsets = [1, 2, 0], sizes = [8, 8, 16], strides = [1, 1, 1]} : vector<10x10x16xbf16> to vector<8x8x16xbf16>
    %93 = vector.shape_cast %92 : vector<8x8x16xbf16> to vector<64x16xbf16>
    %94 = vector.extract_strided_slice %81 {offsets = [2, 0, 0], sizes = [8, 8, 16], strides = [1, 1, 1]} : vector<10x10x16xbf16> to vector<8x8x16xbf16>
    %95 = vector.shape_cast %94 : vector<8x8x16xbf16> to vector<64x16xbf16>
    %96 = vector.extract_strided_slice %81 {offsets = [2, 1, 0], sizes = [8, 8, 16], strides = [1, 1, 1]} : vector<10x10x16xbf16> to vector<8x8x16xbf16>
    %97 = vector.shape_cast %96 : vector<8x8x16xbf16> to vector<64x16xbf16>
    %98 = vector.extract_strided_slice %81 {offsets = [2, 2, 0], sizes = [8, 8, 16], strides = [1, 1, 1]} : vector<10x10x16xbf16> to vector<8x8x16xbf16>
    %99 = vector.shape_cast %98 : vector<8x8x16xbf16> to vector<64x16xbf16>
    %100 = tpu.concatenate %83, %85, %87, %89, %91, %93, %95, %97, %99 in 1 : vector<64x16xbf16>, vector<64x16xbf16>, vector<64x16xbf16>, vector<64x16xbf16>, vector<64x16xbf16>, vector<64x16xbf16>, vector<64x16xbf16>, vector<64x16xbf16>, vector<64x16xbf16> -> vector<64x144xbf16>
    %c0_24 = arith.constant 0 : index
    %c2 = arith.constant 2 : index
    %c0_25 = arith.constant 0 : index
    %c0_26 = arith.constant 0 : index
    %c0_27 = arith.constant 0 : index
    %101 = vector.load %arg2[%c0_24, %c2, %c0_25, %c0_26, %c0_27] : memref<1x8x10x10x16xbf16, #tpu.memory_space<vmem>>, vector<1x1x10x10x16xbf16>
    %102 = vector.shape_cast %101 : vector<1x1x10x10x16xbf16> to vector<10x10x16xbf16>
    %c8_i32_28 = arith.constant 8 : i32
    %103 = arith.muli %arg1, %c8_i32_28 : i32
    %c2_i32 = arith.constant 2 : i32
    %104 = arith.addi %103, %c2_i32 : i32
    %c1_i32_29 = arith.constant 1 : i32
    %105 = arith.cmpi sge, %104, %c1_i32_29 : i32
    %c8_i32_30 = arith.constant 8 : i32
    %106 = arith.cmpi sle, %104, %c8_i32_30 : i32
    %107 = arith.andi %105, %106 : i1
    %108 = arith.extui %107 : i1 to i32
    %109 = arith.sitofp %108 : i32 to f32
    %110 = arith.extf %102 : vector<10x10x16xbf16> to vector<10x10x16xf32>
    %111 = vector.broadcast %1 : vector<1x1x16xf32> to vector<10x10x16xf32>
    %112 = arith.mulf %110, %111 : vector<10x10x16xf32>
    %113 = vector.broadcast %3 : vector<1x1x16xf32> to vector<10x10x16xf32>
    %114 = arith.addf %112, %113 : vector<10x10x16xf32>
    %cst_31 = arith.constant 0.000000e+00 : f32
    %115 = vector.broadcast %cst_31 : f32 to vector<10x10x16xf32>
    %116 = arith.maximumf %114, %115 : vector<10x10x16xf32>
    %cst_32 = arith.constant 0.000000e+00 : f32
    %117 = vector.shape_cast %16 : vector<10x10x1xi1> to vector<10x10x1xi1>
    %118 = vector.broadcast %117 : vector<10x10x1xi1> to vector<10x10x16xi1>
    %119 = vector.broadcast %cst_32 : f32 to vector<10x10x16xf32>
    %120 = arith.select %118, %116, %119 : vector<10x10x16xi1>, vector<10x10x16xf32>
    %121 = vector.broadcast %109 : f32 to vector<10x10x16xf32>
    %122 = arith.mulf %120, %121 : vector<10x10x16xf32>
    %123 = arith.truncf %122 : vector<10x10x16xf32> to vector<10x10x16xbf16>
    %124 = vector.extract_strided_slice %123 {offsets = [0, 0, 0], sizes = [8, 8, 16], strides = [1, 1, 1]} : vector<10x10x16xbf16> to vector<8x8x16xbf16>
    %125 = vector.shape_cast %124 : vector<8x8x16xbf16> to vector<64x16xbf16>
    %126 = vector.extract_strided_slice %123 {offsets = [0, 1, 0], sizes = [8, 8, 16], strides = [1, 1, 1]} : vector<10x10x16xbf16> to vector<8x8x16xbf16>
    %127 = vector.shape_cast %126 : vector<8x8x16xbf16> to vector<64x16xbf16>
    %128 = vector.extract_strided_slice %123 {offsets = [0, 2, 0], sizes = [8, 8, 16], strides = [1, 1, 1]} : vector<10x10x16xbf16> to vector<8x8x16xbf16>
    %129 = vector.shape_cast %128 : vector<8x8x16xbf16> to vector<64x16xbf16>
    %130 = vector.extract_strided_slice %123 {offsets = [1, 0, 0], sizes = [8, 8, 16], strides = [1, 1, 1]} : vector<10x10x16xbf16> to vector<8x8x16xbf16>
    %131 = vector.shape_cast %130 : vector<8x8x16xbf16> to vector<64x16xbf16>
    %132 = vector.extract_strided_slice %123 {offsets = [1, 1, 0], sizes = [8, 8, 16], strides = [1, 1, 1]} : vector<10x10x16xbf16> to vector<8x8x16xbf16>
    %133 = vector.shape_cast %132 : vector<8x8x16xbf16> to vector<64x16xbf16>
    %134 = vector.extract_strided_slice %123 {offsets = [1, 2, 0], sizes = [8, 8, 16], strides = [1, 1, 1]} : vector<10x10x16xbf16> to vector<8x8x16xbf16>
    %135 = vector.shape_cast %134 : vector<8x8x16xbf16> to vector<64x16xbf16>
    %136 = vector.extract_strided_slice %123 {offsets = [2, 0, 0], sizes = [8, 8, 16], strides = [1, 1, 1]} : vector<10x10x16xbf16> to vector<8x8x16xbf16>
    %137 = vector.shape_cast %136 : vector<8x8x16xbf16> to vector<64x16xbf16>
    %138 = vector.extract_strided_slice %123 {offsets = [2, 1, 0], sizes = [8, 8, 16], strides = [1, 1, 1]} : vector<10x10x16xbf16> to vector<8x8x16xbf16>
    %139 = vector.shape_cast %138 : vector<8x8x16xbf16> to vector<64x16xbf16>
    %140 = vector.extract_strided_slice %123 {offsets = [2, 2, 0], sizes = [8, 8, 16], strides = [1, 1, 1]} : vector<10x10x16xbf16> to vector<8x8x16xbf16>
    %141 = vector.shape_cast %140 : vector<8x8x16xbf16> to vector<64x16xbf16>
    %142 = tpu.concatenate %125, %127, %129, %131, %133, %135, %137, %139, %141 in 1 : vector<64x16xbf16>, vector<64x16xbf16>, vector<64x16xbf16>, vector<64x16xbf16>, vector<64x16xbf16>, vector<64x16xbf16>, vector<64x16xbf16>, vector<64x16xbf16>, vector<64x16xbf16> -> vector<64x144xbf16>
    %c0_33 = arith.constant 0 : index
    %c3 = arith.constant 3 : index
    %c0_34 = arith.constant 0 : index
    %c0_35 = arith.constant 0 : index
    %c0_36 = arith.constant 0 : index
    %143 = vector.load %arg2[%c0_33, %c3, %c0_34, %c0_35, %c0_36] : memref<1x8x10x10x16xbf16, #tpu.memory_space<vmem>>, vector<1x1x10x10x16xbf16>
    %144 = vector.shape_cast %143 : vector<1x1x10x10x16xbf16> to vector<10x10x16xbf16>
    %c8_i32_37 = arith.constant 8 : i32
    %145 = arith.muli %arg1, %c8_i32_37 : i32
    %c3_i32 = arith.constant 3 : i32
    %146 = arith.addi %145, %c3_i32 : i32
    %c1_i32_38 = arith.constant 1 : i32
    %147 = arith.cmpi sge, %146, %c1_i32_38 : i32
    %c8_i32_39 = arith.constant 8 : i32
    %148 = arith.cmpi sle, %146, %c8_i32_39 : i32
    %149 = arith.andi %147, %148 : i1
    %150 = arith.extui %149 : i1 to i32
    %151 = arith.sitofp %150 : i32 to f32
    %152 = arith.extf %144 : vector<10x10x16xbf16> to vector<10x10x16xf32>
    %153 = vector.broadcast %1 : vector<1x1x16xf32> to vector<10x10x16xf32>
    %154 = arith.mulf %152, %153 : vector<10x10x16xf32>
    %155 = vector.broadcast %3 : vector<1x1x16xf32> to vector<10x10x16xf32>
    %156 = arith.addf %154, %155 : vector<10x10x16xf32>
    %cst_40 = arith.constant 0.000000e+00 : f32
    %157 = vector.broadcast %cst_40 : f32 to vector<10x10x16xf32>
    %158 = arith.maximumf %156, %157 : vector<10x10x16xf32>
    %cst_41 = arith.constant 0.000000e+00 : f32
    %159 = vector.shape_cast %16 : vector<10x10x1xi1> to vector<10x10x1xi1>
    %160 = vector.broadcast %159 : vector<10x10x1xi1> to vector<10x10x16xi1>
    %161 = vector.broadcast %cst_41 : f32 to vector<10x10x16xf32>
    %162 = arith.select %160, %158, %161 : vector<10x10x16xi1>, vector<10x10x16xf32>
    %163 = vector.broadcast %151 : f32 to vector<10x10x16xf32>
    %164 = arith.mulf %162, %163 : vector<10x10x16xf32>
    %165 = arith.truncf %164 : vector<10x10x16xf32> to vector<10x10x16xbf16>
    %166 = vector.extract_strided_slice %165 {offsets = [0, 0, 0], sizes = [8, 8, 16], strides = [1, 1, 1]} : vector<10x10x16xbf16> to vector<8x8x16xbf16>
    %167 = vector.shape_cast %166 : vector<8x8x16xbf16> to vector<64x16xbf16>
    %168 = vector.extract_strided_slice %165 {offsets = [0, 1, 0], sizes = [8, 8, 16], strides = [1, 1, 1]} : vector<10x10x16xbf16> to vector<8x8x16xbf16>
    %169 = vector.shape_cast %168 : vector<8x8x16xbf16> to vector<64x16xbf16>
    %170 = vector.extract_strided_slice %165 {offsets = [0, 2, 0], sizes = [8, 8, 16], strides = [1, 1, 1]} : vector<10x10x16xbf16> to vector<8x8x16xbf16>
    %171 = vector.shape_cast %170 : vector<8x8x16xbf16> to vector<64x16xbf16>
    %172 = vector.extract_strided_slice %165 {offsets = [1, 0, 0], sizes = [8, 8, 16], strides = [1, 1, 1]} : vector<10x10x16xbf16> to vector<8x8x16xbf16>
    %173 = vector.shape_cast %172 : vector<8x8x16xbf16> to vector<64x16xbf16>
    %174 = vector.extract_strided_slice %165 {offsets = [1, 1, 0], sizes = [8, 8, 16], strides = [1, 1, 1]} : vector<10x10x16xbf16> to vector<8x8x16xbf16>
    %175 = vector.shape_cast %174 : vector<8x8x16xbf16> to vector<64x16xbf16>
    %176 = vector.extract_strided_slice %165 {offsets = [1, 2, 0], sizes = [8, 8, 16], strides = [1, 1, 1]} : vector<10x10x16xbf16> to vector<8x8x16xbf16>
    %177 = vector.shape_cast %176 : vector<8x8x16xbf16> to vector<64x16xbf16>
    %178 = vector.extract_strided_slice %165 {offsets = [2, 0, 0], sizes = [8, 8, 16], strides = [1, 1, 1]} : vector<10x10x16xbf16> to vector<8x8x16xbf16>
    %179 = vector.shape_cast %178 : vector<8x8x16xbf16> to vector<64x16xbf16>
    %180 = vector.extract_strided_slice %165 {offsets = [2, 1, 0], sizes = [8, 8, 16], strides = [1, 1, 1]} : vector<10x10x16xbf16> to vector<8x8x16xbf16>
    %181 = vector.shape_cast %180 : vector<8x8x16xbf16> to vector<64x16xbf16>
    %182 = vector.extract_strided_slice %165 {offsets = [2, 2, 0], sizes = [8, 8, 16], strides = [1, 1, 1]} : vector<10x10x16xbf16> to vector<8x8x16xbf16>
    %183 = vector.shape_cast %182 : vector<8x8x16xbf16> to vector<64x16xbf16>
    %184 = tpu.concatenate %167, %169, %171, %173, %175, %177, %179, %181, %183 in 1 : vector<64x16xbf16>, vector<64x16xbf16>, vector<64x16xbf16>, vector<64x16xbf16>, vector<64x16xbf16>, vector<64x16xbf16>, vector<64x16xbf16>, vector<64x16xbf16>, vector<64x16xbf16> -> vector<64x144xbf16>
    %c0_42 = arith.constant 0 : index
    %c4 = arith.constant 4 : index
    %c0_43 = arith.constant 0 : index
    %c0_44 = arith.constant 0 : index
    %c0_45 = arith.constant 0 : index
    %185 = vector.load %arg2[%c0_42, %c4, %c0_43, %c0_44, %c0_45] : memref<1x8x10x10x16xbf16, #tpu.memory_space<vmem>>, vector<1x1x10x10x16xbf16>
    %186 = vector.shape_cast %185 : vector<1x1x10x10x16xbf16> to vector<10x10x16xbf16>
    %c8_i32_46 = arith.constant 8 : i32
    %187 = arith.muli %arg1, %c8_i32_46 : i32
    %c4_i32 = arith.constant 4 : i32
    %188 = arith.addi %187, %c4_i32 : i32
    %c1_i32_47 = arith.constant 1 : i32
    %189 = arith.cmpi sge, %188, %c1_i32_47 : i32
    %c8_i32_48 = arith.constant 8 : i32
    %190 = arith.cmpi sle, %188, %c8_i32_48 : i32
    %191 = arith.andi %189, %190 : i1
    %192 = arith.extui %191 : i1 to i32
    %193 = arith.sitofp %192 : i32 to f32
    %194 = arith.extf %186 : vector<10x10x16xbf16> to vector<10x10x16xf32>
    %195 = vector.broadcast %1 : vector<1x1x16xf32> to vector<10x10x16xf32>
    %196 = arith.mulf %194, %195 : vector<10x10x16xf32>
    %197 = vector.broadcast %3 : vector<1x1x16xf32> to vector<10x10x16xf32>
    %198 = arith.addf %196, %197 : vector<10x10x16xf32>
    %cst_49 = arith.constant 0.000000e+00 : f32
    %199 = vector.broadcast %cst_49 : f32 to vector<10x10x16xf32>
    %200 = arith.maximumf %198, %199 : vector<10x10x16xf32>
    %cst_50 = arith.constant 0.000000e+00 : f32
    %201 = vector.shape_cast %16 : vector<10x10x1xi1> to vector<10x10x1xi1>
    %202 = vector.broadcast %201 : vector<10x10x1xi1> to vector<10x10x16xi1>
    %203 = vector.broadcast %cst_50 : f32 to vector<10x10x16xf32>
    %204 = arith.select %202, %200, %203 : vector<10x10x16xi1>, vector<10x10x16xf32>
    %205 = vector.broadcast %193 : f32 to vector<10x10x16xf32>
    %206 = arith.mulf %204, %205 : vector<10x10x16xf32>
    %207 = arith.truncf %206 : vector<10x10x16xf32> to vector<10x10x16xbf16>
    %208 = vector.extract_strided_slice %207 {offsets = [0, 0, 0], sizes = [8, 8, 16], strides = [1, 1, 1]} : vector<10x10x16xbf16> to vector<8x8x16xbf16>
    %209 = vector.shape_cast %208 : vector<8x8x16xbf16> to vector<64x16xbf16>
    %210 = vector.extract_strided_slice %207 {offsets = [0, 1, 0], sizes = [8, 8, 16], strides = [1, 1, 1]} : vector<10x10x16xbf16> to vector<8x8x16xbf16>
    %211 = vector.shape_cast %210 : vector<8x8x16xbf16> to vector<64x16xbf16>
    %212 = vector.extract_strided_slice %207 {offsets = [0, 2, 0], sizes = [8, 8, 16], strides = [1, 1, 1]} : vector<10x10x16xbf16> to vector<8x8x16xbf16>
    %213 = vector.shape_cast %212 : vector<8x8x16xbf16> to vector<64x16xbf16>
    %214 = vector.extract_strided_slice %207 {offsets = [1, 0, 0], sizes = [8, 8, 16], strides = [1, 1, 1]} : vector<10x10x16xbf16> to vector<8x8x16xbf16>
    %215 = vector.shape_cast %214 : vector<8x8x16xbf16> to vector<64x16xbf16>
    %216 = vector.extract_strided_slice %207 {offsets = [1, 1, 0], sizes = [8, 8, 16], strides = [1, 1, 1]} : vector<10x10x16xbf16> to vector<8x8x16xbf16>
    %217 = vector.shape_cast %216 : vector<8x8x16xbf16> to vector<64x16xbf16>
    %218 = vector.extract_strided_slice %207 {offsets = [1, 2, 0], sizes = [8, 8, 16], strides = [1, 1, 1]} : vector<10x10x16xbf16> to vector<8x8x16xbf16>
    %219 = vector.shape_cast %218 : vector<8x8x16xbf16> to vector<64x16xbf16>
    %220 = vector.extract_strided_slice %207 {offsets = [2, 0, 0], sizes = [8, 8, 16], strides = [1, 1, 1]} : vector<10x10x16xbf16> to vector<8x8x16xbf16>
    %221 = vector.shape_cast %220 : vector<8x8x16xbf16> to vector<64x16xbf16>
    %222 = vector.extract_strided_slice %207 {offsets = [2, 1, 0], sizes = [8, 8, 16], strides = [1, 1, 1]} : vector<10x10x16xbf16> to vector<8x8x16xbf16>
    %223 = vector.shape_cast %222 : vector<8x8x16xbf16> to vector<64x16xbf16>
    %224 = vector.extract_strided_slice %207 {offsets = [2, 2, 0], sizes = [8, 8, 16], strides = [1, 1, 1]} : vector<10x10x16xbf16> to vector<8x8x16xbf16>
    %225 = vector.shape_cast %224 : vector<8x8x16xbf16> to vector<64x16xbf16>
    %226 = tpu.concatenate %209, %211, %213, %215, %217, %219, %221, %223, %225 in 1 : vector<64x16xbf16>, vector<64x16xbf16>, vector<64x16xbf16>, vector<64x16xbf16>, vector<64x16xbf16>, vector<64x16xbf16>, vector<64x16xbf16>, vector<64x16xbf16>, vector<64x16xbf16> -> vector<64x144xbf16>
    %c0_51 = arith.constant 0 : index
    %c5 = arith.constant 5 : index
    %c0_52 = arith.constant 0 : index
    %c0_53 = arith.constant 0 : index
    %c0_54 = arith.constant 0 : index
    %227 = vector.load %arg2[%c0_51, %c5, %c0_52, %c0_53, %c0_54] : memref<1x8x10x10x16xbf16, #tpu.memory_space<vmem>>, vector<1x1x10x10x16xbf16>
    %228 = vector.shape_cast %227 : vector<1x1x10x10x16xbf16> to vector<10x10x16xbf16>
    %c8_i32_55 = arith.constant 8 : i32
    %229 = arith.muli %arg1, %c8_i32_55 : i32
    %c5_i32 = arith.constant 5 : i32
    %230 = arith.addi %229, %c5_i32 : i32
    %c1_i32_56 = arith.constant 1 : i32
    %231 = arith.cmpi sge, %230, %c1_i32_56 : i32
    %c8_i32_57 = arith.constant 8 : i32
    %232 = arith.cmpi sle, %230, %c8_i32_57 : i32
    %233 = arith.andi %231, %232 : i1
    %234 = arith.extui %233 : i1 to i32
    %235 = arith.sitofp %234 : i32 to f32
    %236 = arith.extf %228 : vector<10x10x16xbf16> to vector<10x10x16xf32>
    %237 = vector.broadcast %1 : vector<1x1x16xf32> to vector<10x10x16xf32>
    %238 = arith.mulf %236, %237 : vector<10x10x16xf32>
    %239 = vector.broadcast %3 : vector<1x1x16xf32> to vector<10x10x16xf32>
    %240 = arith.addf %238, %239 : vector<10x10x16xf32>
    %cst_58 = arith.constant 0.000000e+00 : f32
    %241 = vector.broadcast %cst_58 : f32 to vector<10x10x16xf32>
    %242 = arith.maximumf %240, %241 : vector<10x10x16xf32>
    %cst_59 = arith.constant 0.000000e+00 : f32
    %243 = vector.shape_cast %16 : vector<10x10x1xi1> to vector<10x10x1xi1>
    %244 = vector.broadcast %243 : vector<10x10x1xi1> to vector<10x10x16xi1>
    %245 = vector.broadcast %cst_59 : f32 to vector<10x10x16xf32>
    %246 = arith.select %244, %242, %245 : vector<10x10x16xi1>, vector<10x10x16xf32>
    %247 = vector.broadcast %235 : f32 to vector<10x10x16xf32>
    %248 = arith.mulf %246, %247 : vector<10x10x16xf32>
    %249 = arith.truncf %248 : vector<10x10x16xf32> to vector<10x10x16xbf16>
    %250 = vector.extract_strided_slice %249 {offsets = [0, 0, 0], sizes = [8, 8, 16], strides = [1, 1, 1]} : vector<10x10x16xbf16> to vector<8x8x16xbf16>
    %251 = vector.shape_cast %250 : vector<8x8x16xbf16> to vector<64x16xbf16>
    %252 = vector.extract_strided_slice %249 {offsets = [0, 1, 0], sizes = [8, 8, 16], strides = [1, 1, 1]} : vector<10x10x16xbf16> to vector<8x8x16xbf16>
    %253 = vector.shape_cast %252 : vector<8x8x16xbf16> to vector<64x16xbf16>
    %254 = vector.extract_strided_slice %249 {offsets = [0, 2, 0], sizes = [8, 8, 16], strides = [1, 1, 1]} : vector<10x10x16xbf16> to vector<8x8x16xbf16>
    %255 = vector.shape_cast %254 : vector<8x8x16xbf16> to vector<64x16xbf16>
    %256 = vector.extract_strided_slice %249 {offsets = [1, 0, 0], sizes = [8, 8, 16], strides = [1, 1, 1]} : vector<10x10x16xbf16> to vector<8x8x16xbf16>
    %257 = vector.shape_cast %256 : vector<8x8x16xbf16> to vector<64x16xbf16>
    %258 = vector.extract_strided_slice %249 {offsets = [1, 1, 0], sizes = [8, 8, 16], strides = [1, 1, 1]} : vector<10x10x16xbf16> to vector<8x8x16xbf16>
    %259 = vector.shape_cast %258 : vector<8x8x16xbf16> to vector<64x16xbf16>
    %260 = vector.extract_strided_slice %249 {offsets = [1, 2, 0], sizes = [8, 8, 16], strides = [1, 1, 1]} : vector<10x10x16xbf16> to vector<8x8x16xbf16>
    %261 = vector.shape_cast %260 : vector<8x8x16xbf16> to vector<64x16xbf16>
    %262 = vector.extract_strided_slice %249 {offsets = [2, 0, 0], sizes = [8, 8, 16], strides = [1, 1, 1]} : vector<10x10x16xbf16> to vector<8x8x16xbf16>
    %263 = vector.shape_cast %262 : vector<8x8x16xbf16> to vector<64x16xbf16>
    %264 = vector.extract_strided_slice %249 {offsets = [2, 1, 0], sizes = [8, 8, 16], strides = [1, 1, 1]} : vector<10x10x16xbf16> to vector<8x8x16xbf16>
    %265 = vector.shape_cast %264 : vector<8x8x16xbf16> to vector<64x16xbf16>
    %266 = vector.extract_strided_slice %249 {offsets = [2, 2, 0], sizes = [8, 8, 16], strides = [1, 1, 1]} : vector<10x10x16xbf16> to vector<8x8x16xbf16>
    %267 = vector.shape_cast %266 : vector<8x8x16xbf16> to vector<64x16xbf16>
    %268 = tpu.concatenate %251, %253, %255, %257, %259, %261, %263, %265, %267 in 1 : vector<64x16xbf16>, vector<64x16xbf16>, vector<64x16xbf16>, vector<64x16xbf16>, vector<64x16xbf16>, vector<64x16xbf16>, vector<64x16xbf16>, vector<64x16xbf16>, vector<64x16xbf16> -> vector<64x144xbf16>
    %c0_60 = arith.constant 0 : index
    %c6 = arith.constant 6 : index
    %c0_61 = arith.constant 0 : index
    %c0_62 = arith.constant 0 : index
    %c0_63 = arith.constant 0 : index
    %269 = vector.load %arg2[%c0_60, %c6, %c0_61, %c0_62, %c0_63] : memref<1x8x10x10x16xbf16, #tpu.memory_space<vmem>>, vector<1x1x10x10x16xbf16>
    %270 = vector.shape_cast %269 : vector<1x1x10x10x16xbf16> to vector<10x10x16xbf16>
    %c8_i32_64 = arith.constant 8 : i32
    %271 = arith.muli %arg1, %c8_i32_64 : i32
    %c6_i32 = arith.constant 6 : i32
    %272 = arith.addi %271, %c6_i32 : i32
    %c1_i32_65 = arith.constant 1 : i32
    %273 = arith.cmpi sge, %272, %c1_i32_65 : i32
    %c8_i32_66 = arith.constant 8 : i32
    %274 = arith.cmpi sle, %272, %c8_i32_66 : i32
    %275 = arith.andi %273, %274 : i1
    %276 = arith.extui %275 : i1 to i32
    %277 = arith.sitofp %276 : i32 to f32
    %278 = arith.extf %270 : vector<10x10x16xbf16> to vector<10x10x16xf32>
    %279 = vector.broadcast %1 : vector<1x1x16xf32> to vector<10x10x16xf32>
    %280 = arith.mulf %278, %279 : vector<10x10x16xf32>
    %281 = vector.broadcast %3 : vector<1x1x16xf32> to vector<10x10x16xf32>
    %282 = arith.addf %280, %281 : vector<10x10x16xf32>
    %cst_67 = arith.constant 0.000000e+00 : f32
    %283 = vector.broadcast %cst_67 : f32 to vector<10x10x16xf32>
    %284 = arith.maximumf %282, %283 : vector<10x10x16xf32>
    %cst_68 = arith.constant 0.000000e+00 : f32
    %285 = vector.shape_cast %16 : vector<10x10x1xi1> to vector<10x10x1xi1>
    %286 = vector.broadcast %285 : vector<10x10x1xi1> to vector<10x10x16xi1>
    %287 = vector.broadcast %cst_68 : f32 to vector<10x10x16xf32>
    %288 = arith.select %286, %284, %287 : vector<10x10x16xi1>, vector<10x10x16xf32>
    %289 = vector.broadcast %277 : f32 to vector<10x10x16xf32>
    %290 = arith.mulf %288, %289 : vector<10x10x16xf32>
    %291 = arith.truncf %290 : vector<10x10x16xf32> to vector<10x10x16xbf16>
    %292 = vector.extract_strided_slice %291 {offsets = [0, 0, 0], sizes = [8, 8, 16], strides = [1, 1, 1]} : vector<10x10x16xbf16> to vector<8x8x16xbf16>
    %293 = vector.shape_cast %292 : vector<8x8x16xbf16> to vector<64x16xbf16>
    %294 = vector.extract_strided_slice %291 {offsets = [0, 1, 0], sizes = [8, 8, 16], strides = [1, 1, 1]} : vector<10x10x16xbf16> to vector<8x8x16xbf16>
    %295 = vector.shape_cast %294 : vector<8x8x16xbf16> to vector<64x16xbf16>
    %296 = vector.extract_strided_slice %291 {offsets = [0, 2, 0], sizes = [8, 8, 16], strides = [1, 1, 1]} : vector<10x10x16xbf16> to vector<8x8x16xbf16>
    %297 = vector.shape_cast %296 : vector<8x8x16xbf16> to vector<64x16xbf16>
    %298 = vector.extract_strided_slice %291 {offsets = [1, 0, 0], sizes = [8, 8, 16], strides = [1, 1, 1]} : vector<10x10x16xbf16> to vector<8x8x16xbf16>
    %299 = vector.shape_cast %298 : vector<8x8x16xbf16> to vector<64x16xbf16>
    %300 = vector.extract_strided_slice %291 {offsets = [1, 1, 0], sizes = [8, 8, 16], strides = [1, 1, 1]} : vector<10x10x16xbf16> to vector<8x8x16xbf16>
    %301 = vector.shape_cast %300 : vector<8x8x16xbf16> to vector<64x16xbf16>
    %302 = vector.extract_strided_slice %291 {offsets = [1, 2, 0], sizes = [8, 8, 16], strides = [1, 1, 1]} : vector<10x10x16xbf16> to vector<8x8x16xbf16>
    %303 = vector.shape_cast %302 : vector<8x8x16xbf16> to vector<64x16xbf16>
    %304 = vector.extract_strided_slice %291 {offsets = [2, 0, 0], sizes = [8, 8, 16], strides = [1, 1, 1]} : vector<10x10x16xbf16> to vector<8x8x16xbf16>
    %305 = vector.shape_cast %304 : vector<8x8x16xbf16> to vector<64x16xbf16>
    %306 = vector.extract_strided_slice %291 {offsets = [2, 1, 0], sizes = [8, 8, 16], strides = [1, 1, 1]} : vector<10x10x16xbf16> to vector<8x8x16xbf16>
    %307 = vector.shape_cast %306 : vector<8x8x16xbf16> to vector<64x16xbf16>
    %308 = vector.extract_strided_slice %291 {offsets = [2, 2, 0], sizes = [8, 8, 16], strides = [1, 1, 1]} : vector<10x10x16xbf16> to vector<8x8x16xbf16>
    %309 = vector.shape_cast %308 : vector<8x8x16xbf16> to vector<64x16xbf16>
    %310 = tpu.concatenate %293, %295, %297, %299, %301, %303, %305, %307, %309 in 1 : vector<64x16xbf16>, vector<64x16xbf16>, vector<64x16xbf16>, vector<64x16xbf16>, vector<64x16xbf16>, vector<64x16xbf16>, vector<64x16xbf16>, vector<64x16xbf16>, vector<64x16xbf16> -> vector<64x144xbf16>
    %c0_69 = arith.constant 0 : index
    %c7 = arith.constant 7 : index
    %c0_70 = arith.constant 0 : index
    %c0_71 = arith.constant 0 : index
    %c0_72 = arith.constant 0 : index
    %311 = vector.load %arg2[%c0_69, %c7, %c0_70, %c0_71, %c0_72] : memref<1x8x10x10x16xbf16, #tpu.memory_space<vmem>>, vector<1x1x10x10x16xbf16>
    %312 = vector.shape_cast %311 : vector<1x1x10x10x16xbf16> to vector<10x10x16xbf16>
    %c8_i32_73 = arith.constant 8 : i32
    %313 = arith.muli %arg1, %c8_i32_73 : i32
    %c7_i32 = arith.constant 7 : i32
    %314 = arith.addi %313, %c7_i32 : i32
    %c1_i32_74 = arith.constant 1 : i32
    %315 = arith.cmpi sge, %314, %c1_i32_74 : i32
    %c8_i32_75 = arith.constant 8 : i32
    %316 = arith.cmpi sle, %314, %c8_i32_75 : i32
    %317 = arith.andi %315, %316 : i1
    %318 = arith.extui %317 : i1 to i32
    %319 = arith.sitofp %318 : i32 to f32
    %320 = arith.extf %312 : vector<10x10x16xbf16> to vector<10x10x16xf32>
    %321 = vector.broadcast %1 : vector<1x1x16xf32> to vector<10x10x16xf32>
    %322 = arith.mulf %320, %321 : vector<10x10x16xf32>
    %323 = vector.broadcast %3 : vector<1x1x16xf32> to vector<10x10x16xf32>
    %324 = arith.addf %322, %323 : vector<10x10x16xf32>
    %cst_76 = arith.constant 0.000000e+00 : f32
    %325 = vector.broadcast %cst_76 : f32 to vector<10x10x16xf32>
    %326 = arith.maximumf %324, %325 : vector<10x10x16xf32>
    %cst_77 = arith.constant 0.000000e+00 : f32
    %327 = vector.shape_cast %16 : vector<10x10x1xi1> to vector<10x10x1xi1>
    %328 = vector.broadcast %327 : vector<10x10x1xi1> to vector<10x10x16xi1>
    %329 = vector.broadcast %cst_77 : f32 to vector<10x10x16xf32>
    %330 = arith.select %328, %326, %329 : vector<10x10x16xi1>, vector<10x10x16xf32>
    %331 = vector.broadcast %319 : f32 to vector<10x10x16xf32>
    %332 = arith.mulf %330, %331 : vector<10x10x16xf32>
    %333 = arith.truncf %332 : vector<10x10x16xf32> to vector<10x10x16xbf16>
    %334 = vector.extract_strided_slice %333 {offsets = [0, 0, 0], sizes = [8, 8, 16], strides = [1, 1, 1]} : vector<10x10x16xbf16> to vector<8x8x16xbf16>
    %335 = vector.shape_cast %334 : vector<8x8x16xbf16> to vector<64x16xbf16>
    %336 = vector.extract_strided_slice %333 {offsets = [0, 1, 0], sizes = [8, 8, 16], strides = [1, 1, 1]} : vector<10x10x16xbf16> to vector<8x8x16xbf16>
    %337 = vector.shape_cast %336 : vector<8x8x16xbf16> to vector<64x16xbf16>
    %338 = vector.extract_strided_slice %333 {offsets = [0, 2, 0], sizes = [8, 8, 16], strides = [1, 1, 1]} : vector<10x10x16xbf16> to vector<8x8x16xbf16>
    %339 = vector.shape_cast %338 : vector<8x8x16xbf16> to vector<64x16xbf16>
    %340 = vector.extract_strided_slice %333 {offsets = [1, 0, 0], sizes = [8, 8, 16], strides = [1, 1, 1]} : vector<10x10x16xbf16> to vector<8x8x16xbf16>
    %341 = vector.shape_cast %340 : vector<8x8x16xbf16> to vector<64x16xbf16>
    %342 = vector.extract_strided_slice %333 {offsets = [1, 1, 0], sizes = [8, 8, 16], strides = [1, 1, 1]} : vector<10x10x16xbf16> to vector<8x8x16xbf16>
    %343 = vector.shape_cast %342 : vector<8x8x16xbf16> to vector<64x16xbf16>
    %344 = vector.extract_strided_slice %333 {offsets = [1, 2, 0], sizes = [8, 8, 16], strides = [1, 1, 1]} : vector<10x10x16xbf16> to vector<8x8x16xbf16>
    %345 = vector.shape_cast %344 : vector<8x8x16xbf16> to vector<64x16xbf16>
    %346 = vector.extract_strided_slice %333 {offsets = [2, 0, 0], sizes = [8, 8, 16], strides = [1, 1, 1]} : vector<10x10x16xbf16> to vector<8x8x16xbf16>
    %347 = vector.shape_cast %346 : vector<8x8x16xbf16> to vector<64x16xbf16>
    %348 = vector.extract_strided_slice %333 {offsets = [2, 1, 0], sizes = [8, 8, 16], strides = [1, 1, 1]} : vector<10x10x16xbf16> to vector<8x8x16xbf16>
    %349 = vector.shape_cast %348 : vector<8x8x16xbf16> to vector<64x16xbf16>
    %350 = vector.extract_strided_slice %333 {offsets = [2, 2, 0], sizes = [8, 8, 16], strides = [1, 1, 1]} : vector<10x10x16xbf16> to vector<8x8x16xbf16>
    %351 = vector.shape_cast %350 : vector<8x8x16xbf16> to vector<64x16xbf16>
    %352 = tpu.concatenate %335, %337, %339, %341, %343, %345, %347, %349, %351 in 1 : vector<64x16xbf16>, vector<64x16xbf16>, vector<64x16xbf16>, vector<64x16xbf16>, vector<64x16xbf16>, vector<64x16xbf16>, vector<64x16xbf16>, vector<64x16xbf16>, vector<64x16xbf16> -> vector<64x144xbf16>
    %c0_78 = arith.constant 0 : index
    %c0_79 = arith.constant 0 : index
    %c0_80 = arith.constant 0 : index
    %c0_81 = arith.constant 0 : index
    %c0_82 = arith.constant 0 : index
    %353 = vector.load %arg3[%c0_78, %c0_79, %c0_80, %c0_81, %c0_82] : memref<1x1x10x10x16xbf16, #tpu.memory_space<vmem>>, vector<1x1x10x10x16xbf16>
    %354 = vector.shape_cast %353 : vector<1x1x10x10x16xbf16> to vector<10x10x16xbf16>
    %c8_i32_83 = arith.constant 8 : i32
    %355 = arith.muli %arg1, %c8_i32_83 : i32
    %c8_i32_84 = arith.constant 8 : i32
    %356 = arith.addi %355, %c8_i32_84 : i32
    %c1_i32_85 = arith.constant 1 : i32
    %357 = arith.cmpi sge, %356, %c1_i32_85 : i32
    %c8_i32_86 = arith.constant 8 : i32
    %358 = arith.cmpi sle, %356, %c8_i32_86 : i32
    %359 = arith.andi %357, %358 : i1
    %360 = arith.extui %359 : i1 to i32
    %361 = arith.sitofp %360 : i32 to f32
    %362 = arith.extf %354 : vector<10x10x16xbf16> to vector<10x10x16xf32>
    %363 = vector.broadcast %1 : vector<1x1x16xf32> to vector<10x10x16xf32>
    %364 = arith.mulf %362, %363 : vector<10x10x16xf32>
    %365 = vector.broadcast %3 : vector<1x1x16xf32> to vector<10x10x16xf32>
    %366 = arith.addf %364, %365 : vector<10x10x16xf32>
    %cst_87 = arith.constant 0.000000e+00 : f32
    %367 = vector.broadcast %cst_87 : f32 to vector<10x10x16xf32>
    %368 = arith.maximumf %366, %367 : vector<10x10x16xf32>
    %cst_88 = arith.constant 0.000000e+00 : f32
    %369 = vector.shape_cast %16 : vector<10x10x1xi1> to vector<10x10x1xi1>
    %370 = vector.broadcast %369 : vector<10x10x1xi1> to vector<10x10x16xi1>
    %371 = vector.broadcast %cst_88 : f32 to vector<10x10x16xf32>
    %372 = arith.select %370, %368, %371 : vector<10x10x16xi1>, vector<10x10x16xf32>
    %373 = vector.broadcast %361 : f32 to vector<10x10x16xf32>
    %374 = arith.mulf %372, %373 : vector<10x10x16xf32>
    %375 = arith.truncf %374 : vector<10x10x16xf32> to vector<10x10x16xbf16>
    %376 = vector.extract_strided_slice %375 {offsets = [0, 0, 0], sizes = [8, 8, 16], strides = [1, 1, 1]} : vector<10x10x16xbf16> to vector<8x8x16xbf16>
    %377 = vector.shape_cast %376 : vector<8x8x16xbf16> to vector<64x16xbf16>
    %378 = vector.extract_strided_slice %375 {offsets = [0, 1, 0], sizes = [8, 8, 16], strides = [1, 1, 1]} : vector<10x10x16xbf16> to vector<8x8x16xbf16>
    %379 = vector.shape_cast %378 : vector<8x8x16xbf16> to vector<64x16xbf16>
    %380 = vector.extract_strided_slice %375 {offsets = [0, 2, 0], sizes = [8, 8, 16], strides = [1, 1, 1]} : vector<10x10x16xbf16> to vector<8x8x16xbf16>
    %381 = vector.shape_cast %380 : vector<8x8x16xbf16> to vector<64x16xbf16>
    %382 = vector.extract_strided_slice %375 {offsets = [1, 0, 0], sizes = [8, 8, 16], strides = [1, 1, 1]} : vector<10x10x16xbf16> to vector<8x8x16xbf16>
    %383 = vector.shape_cast %382 : vector<8x8x16xbf16> to vector<64x16xbf16>
    %384 = vector.extract_strided_slice %375 {offsets = [1, 1, 0], sizes = [8, 8, 16], strides = [1, 1, 1]} : vector<10x10x16xbf16> to vector<8x8x16xbf16>
    %385 = vector.shape_cast %384 : vector<8x8x16xbf16> to vector<64x16xbf16>
    %386 = vector.extract_strided_slice %375 {offsets = [1, 2, 0], sizes = [8, 8, 16], strides = [1, 1, 1]} : vector<10x10x16xbf16> to vector<8x8x16xbf16>
    %387 = vector.shape_cast %386 : vector<8x8x16xbf16> to vector<64x16xbf16>
    %388 = vector.extract_strided_slice %375 {offsets = [2, 0, 0], sizes = [8, 8, 16], strides = [1, 1, 1]} : vector<10x10x16xbf16> to vector<8x8x16xbf16>
    %389 = vector.shape_cast %388 : vector<8x8x16xbf16> to vector<64x16xbf16>
    %390 = vector.extract_strided_slice %375 {offsets = [2, 1, 0], sizes = [8, 8, 16], strides = [1, 1, 1]} : vector<10x10x16xbf16> to vector<8x8x16xbf16>
    %391 = vector.shape_cast %390 : vector<8x8x16xbf16> to vector<64x16xbf16>
    %392 = vector.extract_strided_slice %375 {offsets = [2, 2, 0], sizes = [8, 8, 16], strides = [1, 1, 1]} : vector<10x10x16xbf16> to vector<8x8x16xbf16>
    %393 = vector.shape_cast %392 : vector<8x8x16xbf16> to vector<64x16xbf16>
    %394 = tpu.concatenate %377, %379, %381, %383, %385, %387, %389, %391, %393 in 1 : vector<64x16xbf16>, vector<64x16xbf16>, vector<64x16xbf16>, vector<64x16xbf16>, vector<64x16xbf16>, vector<64x16xbf16>, vector<64x16xbf16>, vector<64x16xbf16>, vector<64x16xbf16> -> vector<64x144xbf16>
    %c0_89 = arith.constant 0 : index
    %c0_90 = arith.constant 0 : index
    %c0_91 = arith.constant 0 : index
    %c0_92 = arith.constant 0 : index
    %c0_93 = arith.constant 0 : index
    %395 = vector.load %arg4[%c0_89, %c0_90, %c0_91, %c0_92, %c0_93] : memref<1x1x10x10x16xbf16, #tpu.memory_space<vmem>>, vector<1x1x10x10x16xbf16>
    %396 = vector.shape_cast %395 : vector<1x1x10x10x16xbf16> to vector<10x10x16xbf16>
    %c8_i32_94 = arith.constant 8 : i32
    %397 = arith.muli %arg1, %c8_i32_94 : i32
    %c9_i32 = arith.constant 9 : i32
    %398 = arith.addi %397, %c9_i32 : i32
    %c1_i32_95 = arith.constant 1 : i32
    %399 = arith.cmpi sge, %398, %c1_i32_95 : i32
    %c8_i32_96 = arith.constant 8 : i32
    %400 = arith.cmpi sle, %398, %c8_i32_96 : i32
    %401 = arith.andi %399, %400 : i1
    %402 = arith.extui %401 : i1 to i32
    %403 = arith.sitofp %402 : i32 to f32
    %404 = arith.extf %396 : vector<10x10x16xbf16> to vector<10x10x16xf32>
    %405 = vector.broadcast %1 : vector<1x1x16xf32> to vector<10x10x16xf32>
    %406 = arith.mulf %404, %405 : vector<10x10x16xf32>
    %407 = vector.broadcast %3 : vector<1x1x16xf32> to vector<10x10x16xf32>
    %408 = arith.addf %406, %407 : vector<10x10x16xf32>
    %cst_97 = arith.constant 0.000000e+00 : f32
    %409 = vector.broadcast %cst_97 : f32 to vector<10x10x16xf32>
    %410 = arith.maximumf %408, %409 : vector<10x10x16xf32>
    %cst_98 = arith.constant 0.000000e+00 : f32
    %411 = vector.shape_cast %16 : vector<10x10x1xi1> to vector<10x10x1xi1>
    %412 = vector.broadcast %411 : vector<10x10x1xi1> to vector<10x10x16xi1>
    %413 = vector.broadcast %cst_98 : f32 to vector<10x10x16xf32>
    %414 = arith.select %412, %410, %413 : vector<10x10x16xi1>, vector<10x10x16xf32>
    %415 = vector.broadcast %403 : f32 to vector<10x10x16xf32>
    %416 = arith.mulf %414, %415 : vector<10x10x16xf32>
    %417 = arith.truncf %416 : vector<10x10x16xf32> to vector<10x10x16xbf16>
    %418 = vector.extract_strided_slice %417 {offsets = [0, 0, 0], sizes = [8, 8, 16], strides = [1, 1, 1]} : vector<10x10x16xbf16> to vector<8x8x16xbf16>
    %419 = vector.shape_cast %418 : vector<8x8x16xbf16> to vector<64x16xbf16>
    %420 = vector.extract_strided_slice %417 {offsets = [0, 1, 0], sizes = [8, 8, 16], strides = [1, 1, 1]} : vector<10x10x16xbf16> to vector<8x8x16xbf16>
    %421 = vector.shape_cast %420 : vector<8x8x16xbf16> to vector<64x16xbf16>
    %422 = vector.extract_strided_slice %417 {offsets = [0, 2, 0], sizes = [8, 8, 16], strides = [1, 1, 1]} : vector<10x10x16xbf16> to vector<8x8x16xbf16>
    %423 = vector.shape_cast %422 : vector<8x8x16xbf16> to vector<64x16xbf16>
    %424 = vector.extract_strided_slice %417 {offsets = [1, 0, 0], sizes = [8, 8, 16], strides = [1, 1, 1]} : vector<10x10x16xbf16> to vector<8x8x16xbf16>
    %425 = vector.shape_cast %424 : vector<8x8x16xbf16> to vector<64x16xbf16>
    %426 = vector.extract_strided_slice %417 {offsets = [1, 1, 0], sizes = [8, 8, 16], strides = [1, 1, 1]} : vector<10x10x16xbf16> to vector<8x8x16xbf16>
    %427 = vector.shape_cast %426 : vector<8x8x16xbf16> to vector<64x16xbf16>
    %428 = vector.extract_strided_slice %417 {offsets = [1, 2, 0], sizes = [8, 8, 16], strides = [1, 1, 1]} : vector<10x10x16xbf16> to vector<8x8x16xbf16>
    %429 = vector.shape_cast %428 : vector<8x8x16xbf16> to vector<64x16xbf16>
    %430 = vector.extract_strided_slice %417 {offsets = [2, 0, 0], sizes = [8, 8, 16], strides = [1, 1, 1]} : vector<10x10x16xbf16> to vector<8x8x16xbf16>
    %431 = vector.shape_cast %430 : vector<8x8x16xbf16> to vector<64x16xbf16>
    %432 = vector.extract_strided_slice %417 {offsets = [2, 1, 0], sizes = [8, 8, 16], strides = [1, 1, 1]} : vector<10x10x16xbf16> to vector<8x8x16xbf16>
    %433 = vector.shape_cast %432 : vector<8x8x16xbf16> to vector<64x16xbf16>
    %434 = vector.extract_strided_slice %417 {offsets = [2, 2, 0], sizes = [8, 8, 16], strides = [1, 1, 1]} : vector<10x10x16xbf16> to vector<8x8x16xbf16>
    %435 = vector.shape_cast %434 : vector<8x8x16xbf16> to vector<64x16xbf16>
    %436 = tpu.concatenate %419, %421, %423, %425, %427, %429, %431, %433, %435 in 1 : vector<64x16xbf16>, vector<64x16xbf16>, vector<64x16xbf16>, vector<64x16xbf16>, vector<64x16xbf16>, vector<64x16xbf16>, vector<64x16xbf16>, vector<64x16xbf16>, vector<64x16xbf16> -> vector<64x144xbf16>
    %c0_99 = arith.constant 0 : index
    %c0_100 = arith.constant 0 : index
    %c0_101 = arith.constant 0 : index
    %437 = vector.load %arg5[%c0_99, %c0_100, %c0_101] : memref<3x144x128xbf16, #tpu.memory_space<vmem>>, vector<1x144x128xbf16>
    %438 = vector.shape_cast %437 : vector<1x144x128xbf16> to vector<144x128xbf16>
    %c1_102 = arith.constant 1 : index
    %c0_103 = arith.constant 0 : index
    %c0_104 = arith.constant 0 : index
    %439 = vector.load %arg5[%c1_102, %c0_103, %c0_104] : memref<3x144x128xbf16, #tpu.memory_space<vmem>>, vector<1x144x128xbf16>
    %440 = vector.shape_cast %439 : vector<1x144x128xbf16> to vector<144x128xbf16>
    %c2_105 = arith.constant 2 : index
    %c0_106 = arith.constant 0 : index
    %c0_107 = arith.constant 0 : index
    %441 = vector.load %arg5[%c2_105, %c0_106, %c0_107] : memref<3x144x128xbf16, #tpu.memory_space<vmem>>, vector<1x144x128xbf16>
    %442 = vector.shape_cast %441 : vector<1x144x128xbf16> to vector<144x128xbf16>
    %cst_108 = arith.constant 0.000000e+00 : f32
    %443 = vector.broadcast %cst_108 : f32 to vector<2x128xf32>
    %cst_109 = arith.constant 0.000000e+00 : f32
    %444 = vector.broadcast %cst_109 : f32 to vector<64x128xf32>
    %cst_110 = arith.constant dense<0.000000e+00> : vector<64x128xf32>
    %445 = tpu.matmul %58, %438, %cst_110 {dimension_numbers = #tpu.dot_dimension_numbers<[1], [0], [0], [1], [0, 0, 1, 1], [], []>} : vector<64x144xbf16>, vector<144x128xbf16>, vector<64x128xf32> -> vector<64x128xf32>
    %446 = arith.addf %444, %445 : vector<64x128xf32>
    %cst_111 = arith.constant dense<0.000000e+00> : vector<64x128xf32>
    %447 = tpu.matmul %100, %440, %cst_111 {dimension_numbers = #tpu.dot_dimension_numbers<[1], [0], [0], [1], [0, 0, 1, 1], [], []>} : vector<64x144xbf16>, vector<144x128xbf16>, vector<64x128xf32> -> vector<64x128xf32>
    %448 = arith.addf %446, %447 : vector<64x128xf32>
    %cst_112 = arith.constant dense<0.000000e+00> : vector<64x128xf32>
    %449 = tpu.matmul %142, %442, %cst_112 {dimension_numbers = #tpu.dot_dimension_numbers<[1], [0], [0], [1], [0, 0, 1, 1], [], []>} : vector<64x144xbf16>, vector<144x128xbf16>, vector<64x128xf32> -> vector<64x128xf32>
    %450 = arith.addf %448, %449 : vector<64x128xf32>
    %451 = vector.extract_strided_slice %450 {offsets = [0, 0], sizes = [64, 4], strides = [1, 1]} : vector<64x128xf32> to vector<64x4xf32>
    %452 = arith.truncf %451 : vector<64x4xf32> to vector<64x4xbf16>
    %c0_113 = arith.constant 0 : index
    %c0_114 = arith.constant 0 : index
    %c0_115 = arith.constant 0 : index
    %c0_116 = arith.constant 0 : index
    %453 = vector.load %arg8[%c0_113, %c0_114, %c0_115, %c0_116] : memref<1x8x64x4xbf16, #tpu.memory_space<vmem>>, vector<1x1x64x4xbf16>
    %454 = vector.shape_cast %453 : vector<1x1x64x4xbf16> to vector<64x4xbf16>
    %455 = vector.shape_cast %452 : vector<64x4xbf16> to vector<1x1x64x4xbf16>
    tpu.vector_store %arg8[%c0_113, %c0_114, %c0_115, %c0_116], %455 {strides = array<i32>} : memref<1x8x64x4xbf16, #tpu.memory_space<vmem>>, vector<1x1x64x4xbf16>,
    %cst_117 = arith.constant dense<0.000000e+00> : vector<128xf32>
    %456 = vector.multi_reduction <add>, %450, %cst_117 [0] : vector<64x128xf32> to vector<128xf32>
    %457 = vector.shape_cast %456 : vector<128xf32> to vector<1x128xf32>
    %458 = arith.mulf %450, %450 : vector<64x128xf32>
    %cst_118 = arith.constant dense<0.000000e+00> : vector<128xf32>
    %459 = vector.multi_reduction <add>, %458, %cst_118 [0] : vector<64x128xf32> to vector<128xf32>
    %460 = vector.shape_cast %459 : vector<128xf32> to vector<1x128xf32>
    %461 = tpu.concatenate %457, %460 in 0 : vector<1x128xf32>, vector<1x128xf32> -> vector<2x128xf32>
    %462 = arith.addf %443, %461 : vector<2x128xf32>
    %cst_119 = arith.constant 0.000000e+00 : f32
    %463 = vector.broadcast %cst_119 : f32 to vector<64x128xf32>
    %cst_120 = arith.constant dense<0.000000e+00> : vector<64x128xf32>
    %464 = tpu.matmul %100, %438, %cst_120 {dimension_numbers = #tpu.dot_dimension_numbers<[1], [0], [0], [1], [0, 0, 1, 1], [], []>} : vector<64x144xbf16>, vector<144x128xbf16>, vector<64x128xf32> -> vector<64x128xf32>
    %465 = arith.addf %463, %464 : vector<64x128xf32>
    %cst_121 = arith.constant dense<0.000000e+00> : vector<64x128xf32>
    %466 = tpu.matmul %142, %440, %cst_121 {dimension_numbers = #tpu.dot_dimension_numbers<[1], [0], [0], [1], [0, 0, 1, 1], [], []>} : vector<64x144xbf16>, vector<144x128xbf16>, vector<64x128xf32> -> vector<64x128xf32>
    %467 = arith.addf %465, %466 : vector<64x128xf32>
    %cst_122 = arith.constant dense<0.000000e+00> : vector<64x128xf32>
    %468 = tpu.matmul %184, %442, %cst_122 {dimension_numbers = #tpu.dot_dimension_numbers<[1], [0], [0], [1], [0, 0, 1, 1], [], []>} : vector<64x144xbf16>, vector<144x128xbf16>, vector<64x128xf32> -> vector<64x128xf32>
    %469 = arith.addf %467, %468 : vector<64x128xf32>
    %470 = vector.extract_strided_slice %469 {offsets = [0, 0], sizes = [64, 4], strides = [1, 1]} : vector<64x128xf32> to vector<64x4xf32>
    %471 = arith.truncf %470 : vector<64x4xf32> to vector<64x4xbf16>
    %c0_123 = arith.constant 0 : index
    %c1_124 = arith.constant 1 : index
    %c0_125 = arith.constant 0 : index
    %c0_126 = arith.constant 0 : index
    %472 = vector.load %arg8[%c0_123, %c1_124, %c0_125, %c0_126] : memref<1x8x64x4xbf16, #tpu.memory_space<vmem>>, vector<1x1x64x4xbf16>
    %473 = vector.shape_cast %472 : vector<1x1x64x4xbf16> to vector<64x4xbf16>
    %474 = vector.shape_cast %471 : vector<64x4xbf16> to vector<1x1x64x4xbf16>
    tpu.vector_store %arg8[%c0_123, %c1_124, %c0_125, %c0_126], %474 {strides = array<i32>} : memref<1x8x64x4xbf16, #tpu.memory_space<vmem>>, vector<1x1x64x4xbf16>,
    %cst_127 = arith.constant dense<0.000000e+00> : vector<128xf32>
    %475 = vector.multi_reduction <add>, %469, %cst_127 [0] : vector<64x128xf32> to vector<128xf32>
    %476 = vector.shape_cast %475 : vector<128xf32> to vector<1x128xf32>
    %477 = arith.mulf %469, %469 : vector<64x128xf32>
    %cst_128 = arith.constant dense<0.000000e+00> : vector<128xf32>
    %478 = vector.multi_reduction <add>, %477, %cst_128 [0] : vector<64x128xf32> to vector<128xf32>
    %479 = vector.shape_cast %478 : vector<128xf32> to vector<1x128xf32>
    %480 = tpu.concatenate %476, %479 in 0 : vector<1x128xf32>, vector<1x128xf32> -> vector<2x128xf32>
    %481 = arith.addf %462, %480 : vector<2x128xf32>
    %cst_129 = arith.constant 0.000000e+00 : f32
    %482 = vector.broadcast %cst_129 : f32 to vector<64x128xf32>
    %cst_130 = arith.constant dense<0.000000e+00> : vector<64x128xf32>
    %483 = tpu.matmul %142, %438, %cst_130 {dimension_numbers = #tpu.dot_dimension_numbers<[1], [0], [0], [1], [0, 0, 1, 1], [], []>} : vector<64x144xbf16>, vector<144x128xbf16>, vector<64x128xf32> -> vector<64x128xf32>
    %484 = arith.addf %482, %483 : vector<64x128xf32>
    %cst_131 = arith.constant dense<0.000000e+00> : vector<64x128xf32>
    %485 = tpu.matmul %184, %440, %cst_131 {dimension_numbers = #tpu.dot_dimension_numbers<[1], [0], [0], [1], [0, 0, 1, 1], [], []>} : vector<64x144xbf16>, vector<144x128xbf16>, vector<64x128xf32> -> vector<64x128xf32>
    %486 = arith.addf %484, %485 : vector<64x128xf32>
    %cst_132 = arith.constant dense<0.000000e+00> : vector<64x128xf32>
    %487 = tpu.matmul %226, %442, %cst_132 {dimension_numbers = #tpu.dot_dimension_numbers<[1], [0], [0], [1], [0, 0, 1, 1], [], []>} : vector<64x144xbf16>, vector<144x128xbf16>, vector<64x128xf32> -> vector<64x128xf32>
    %488 = arith.addf %486, %487 : vector<64x128xf32>
    %489 = vector.extract_strided_slice %488 {offsets = [0, 0], sizes = [64, 4], strides = [1, 1]} : vector<64x128xf32> to vector<64x4xf32>
    %490 = arith.truncf %489 : vector<64x4xf32> to vector<64x4xbf16>
    %c0_133 = arith.constant 0 : index
    %c2_134 = arith.constant 2 : index
    %c0_135 = arith.constant 0 : index
    %c0_136 = arith.constant 0 : index
    %491 = vector.load %arg8[%c0_133, %c2_134, %c0_135, %c0_136] : memref<1x8x64x4xbf16, #tpu.memory_space<vmem>>, vector<1x1x64x4xbf16>
    %492 = vector.shape_cast %491 : vector<1x1x64x4xbf16> to vector<64x4xbf16>
    %493 = vector.shape_cast %490 : vector<64x4xbf16> to vector<1x1x64x4xbf16>
    tpu.vector_store %arg8[%c0_133, %c2_134, %c0_135, %c0_136], %493 {strides = array<i32>} : memref<1x8x64x4xbf16, #tpu.memory_space<vmem>>, vector<1x1x64x4xbf16>,
    %cst_137 = arith.constant dense<0.000000e+00> : vector<128xf32>
    %494 = vector.multi_reduction <add>, %488, %cst_137 [0] : vector<64x128xf32> to vector<128xf32>
    %495 = vector.shape_cast %494 : vector<128xf32> to vector<1x128xf32>
    %496 = arith.mulf %488, %488 : vector<64x128xf32>
    %cst_138 = arith.constant dense<0.000000e+00> : vector<128xf32>
    %497 = vector.multi_reduction <add>, %496, %cst_138 [0] : vector<64x128xf32> to vector<128xf32>
    %498 = vector.shape_cast %497 : vector<128xf32> to vector<1x128xf32>
    %499 = tpu.concatenate %495, %498 in 0 : vector<1x128xf32>, vector<1x128xf32> -> vector<2x128xf32>
    %500 = arith.addf %481, %499 : vector<2x128xf32>
    %cst_139 = arith.constant 0.000000e+00 : f32
    %501 = vector.broadcast %cst_139 : f32 to vector<64x128xf32>
    %cst_140 = arith.constant dense<0.000000e+00> : vector<64x128xf32>
    %502 = tpu.matmul %184, %438, %cst_140 {dimension_numbers = #tpu.dot_dimension_numbers<[1], [0], [0], [1], [0, 0, 1, 1], [], []>} : vector<64x144xbf16>, vector<144x128xbf16>, vector<64x128xf32> -> vector<64x128xf32>
    %503 = arith.addf %501, %502 : vector<64x128xf32>
    %cst_141 = arith.constant dense<0.000000e+00> : vector<64x128xf32>
    %504 = tpu.matmul %226, %440, %cst_141 {dimension_numbers = #tpu.dot_dimension_numbers<[1], [0], [0], [1], [0, 0, 1, 1], [], []>} : vector<64x144xbf16>, vector<144x128xbf16>, vector<64x128xf32> -> vector<64x128xf32>
    %505 = arith.addf %503, %504 : vector<64x128xf32>
    %cst_142 = arith.constant dense<0.000000e+00> : vector<64x128xf32>
    %506 = tpu.matmul %268, %442, %cst_142 {dimension_numbers = #tpu.dot_dimension_numbers<[1], [0], [0], [1], [0, 0, 1, 1], [], []>} : vector<64x144xbf16>, vector<144x128xbf16>, vector<64x128xf32> -> vector<64x128xf32>
    %507 = arith.addf %505, %506 : vector<64x128xf32>
    %508 = vector.extract_strided_slice %507 {offsets = [0, 0], sizes = [64, 4], strides = [1, 1]} : vector<64x128xf32> to vector<64x4xf32>
    %509 = arith.truncf %508 : vector<64x4xf32> to vector<64x4xbf16>
    %c0_143 = arith.constant 0 : index
    %c3_144 = arith.constant 3 : index
    %c0_145 = arith.constant 0 : index
    %c0_146 = arith.constant 0 : index
    %510 = vector.load %arg8[%c0_143, %c3_144, %c0_145, %c0_146] : memref<1x8x64x4xbf16, #tpu.memory_space<vmem>>, vector<1x1x64x4xbf16>
    %511 = vector.shape_cast %510 : vector<1x1x64x4xbf16> to vector<64x4xbf16>
    %512 = vector.shape_cast %509 : vector<64x4xbf16> to vector<1x1x64x4xbf16>
    tpu.vector_store %arg8[%c0_143, %c3_144, %c0_145, %c0_146], %512 {strides = array<i32>} : memref<1x8x64x4xbf16, #tpu.memory_space<vmem>>, vector<1x1x64x4xbf16>,
    %cst_147 = arith.constant dense<0.000000e+00> : vector<128xf32>
    %513 = vector.multi_reduction <add>, %507, %cst_147 [0] : vector<64x128xf32> to vector<128xf32>
    %514 = vector.shape_cast %513 : vector<128xf32> to vector<1x128xf32>
    %515 = arith.mulf %507, %507 : vector<64x128xf32>
    %cst_148 = arith.constant dense<0.000000e+00> : vector<128xf32>
    %516 = vector.multi_reduction <add>, %515, %cst_148 [0] : vector<64x128xf32> to vector<128xf32>
    %517 = vector.shape_cast %516 : vector<128xf32> to vector<1x128xf32>
    %518 = tpu.concatenate %514, %517 in 0 : vector<1x128xf32>, vector<1x128xf32> -> vector<2x128xf32>
    %519 = arith.addf %500, %518 : vector<2x128xf32>
    %cst_149 = arith.constant 0.000000e+00 : f32
    %520 = vector.broadcast %cst_149 : f32 to vector<64x128xf32>
    %cst_150 = arith.constant dense<0.000000e+00> : vector<64x128xf32>
    %521 = tpu.matmul %226, %438, %cst_150 {dimension_numbers = #tpu.dot_dimension_numbers<[1], [0], [0], [1], [0, 0, 1, 1], [], []>} : vector<64x144xbf16>, vector<144x128xbf16>, vector<64x128xf32> -> vector<64x128xf32>
    %522 = arith.addf %520, %521 : vector<64x128xf32>
    %cst_151 = arith.constant dense<0.000000e+00> : vector<64x128xf32>
    %523 = tpu.matmul %268, %440, %cst_151 {dimension_numbers = #tpu.dot_dimension_numbers<[1], [0], [0], [1], [0, 0, 1, 1], [], []>} : vector<64x144xbf16>, vector<144x128xbf16>, vector<64x128xf32> -> vector<64x128xf32>
    %524 = arith.addf %522, %523 : vector<64x128xf32>
    %cst_152 = arith.constant dense<0.000000e+00> : vector<64x128xf32>
    %525 = tpu.matmul %310, %442, %cst_152 {dimension_numbers = #tpu.dot_dimension_numbers<[1], [0], [0], [1], [0, 0, 1, 1], [], []>} : vector<64x144xbf16>, vector<144x128xbf16>, vector<64x128xf32> -> vector<64x128xf32>
    %526 = arith.addf %524, %525 : vector<64x128xf32>
    %527 = vector.extract_strided_slice %526 {offsets = [0, 0], sizes = [64, 4], strides = [1, 1]} : vector<64x128xf32> to vector<64x4xf32>
    %528 = arith.truncf %527 : vector<64x4xf32> to vector<64x4xbf16>
    %c0_153 = arith.constant 0 : index
    %c4_154 = arith.constant 4 : index
    %c0_155 = arith.constant 0 : index
    %c0_156 = arith.constant 0 : index
    %529 = vector.load %arg8[%c0_153, %c4_154, %c0_155, %c0_156] : memref<1x8x64x4xbf16, #tpu.memory_space<vmem>>, vector<1x1x64x4xbf16>
    %530 = vector.shape_cast %529 : vector<1x1x64x4xbf16> to vector<64x4xbf16>
    %531 = vector.shape_cast %528 : vector<64x4xbf16> to vector<1x1x64x4xbf16>
    tpu.vector_store %arg8[%c0_153, %c4_154, %c0_155, %c0_156], %531 {strides = array<i32>} : memref<1x8x64x4xbf16, #tpu.memory_space<vmem>>, vector<1x1x64x4xbf16>,
    %cst_157 = arith.constant dense<0.000000e+00> : vector<128xf32>
    %532 = vector.multi_reduction <add>, %526, %cst_157 [0] : vector<64x128xf32> to vector<128xf32>
    %533 = vector.shape_cast %532 : vector<128xf32> to vector<1x128xf32>
    %534 = arith.mulf %526, %526 : vector<64x128xf32>
    %cst_158 = arith.constant dense<0.000000e+00> : vector<128xf32>
    %535 = vector.multi_reduction <add>, %534, %cst_158 [0] : vector<64x128xf32> to vector<128xf32>
    %536 = vector.shape_cast %535 : vector<128xf32> to vector<1x128xf32>
    %537 = tpu.concatenate %533, %536 in 0 : vector<1x128xf32>, vector<1x128xf32> -> vector<2x128xf32>
    %538 = arith.addf %519, %537 : vector<2x128xf32>
    %cst_159 = arith.constant 0.000000e+00 : f32
    %539 = vector.broadcast %cst_159 : f32 to vector<64x128xf32>
    %cst_160 = arith.constant dense<0.000000e+00> : vector<64x128xf32>
    %540 = tpu.matmul %268, %438, %cst_160 {dimension_numbers = #tpu.dot_dimension_numbers<[1], [0], [0], [1], [0, 0, 1, 1], [], []>} : vector<64x144xbf16>, vector<144x128xbf16>, vector<64x128xf32> -> vector<64x128xf32>
    %541 = arith.addf %539, %540 : vector<64x128xf32>
    %cst_161 = arith.constant dense<0.000000e+00> : vector<64x128xf32>
    %542 = tpu.matmul %310, %440, %cst_161 {dimension_numbers = #tpu.dot_dimension_numbers<[1], [0], [0], [1], [0, 0, 1, 1], [], []>} : vector<64x144xbf16>, vector<144x128xbf16>, vector<64x128xf32> -> vector<64x128xf32>
    %543 = arith.addf %541, %542 : vector<64x128xf32>
    %cst_162 = arith.constant dense<0.000000e+00> : vector<64x128xf32>
    %544 = tpu.matmul %352, %442, %cst_162 {dimension_numbers = #tpu.dot_dimension_numbers<[1], [0], [0], [1], [0, 0, 1, 1], [], []>} : vector<64x144xbf16>, vector<144x128xbf16>, vector<64x128xf32> -> vector<64x128xf32>
    %545 = arith.addf %543, %544 : vector<64x128xf32>
    %546 = vector.extract_strided_slice %545 {offsets = [0, 0], sizes = [64, 4], strides = [1, 1]} : vector<64x128xf32> to vector<64x4xf32>
    %547 = arith.truncf %546 : vector<64x4xf32> to vector<64x4xbf16>
    %c0_163 = arith.constant 0 : index
    %c5_164 = arith.constant 5 : index
    %c0_165 = arith.constant 0 : index
    %c0_166 = arith.constant 0 : index
    %548 = vector.load %arg8[%c0_163, %c5_164, %c0_165, %c0_166] : memref<1x8x64x4xbf16, #tpu.memory_space<vmem>>, vector<1x1x64x4xbf16>
    %549 = vector.shape_cast %548 : vector<1x1x64x4xbf16> to vector<64x4xbf16>
    %550 = vector.shape_cast %547 : vector<64x4xbf16> to vector<1x1x64x4xbf16>
    tpu.vector_store %arg8[%c0_163, %c5_164, %c0_165, %c0_166], %550 {strides = array<i32>} : memref<1x8x64x4xbf16, #tpu.memory_space<vmem>>, vector<1x1x64x4xbf16>,
    %cst_167 = arith.constant dense<0.000000e+00> : vector<128xf32>
    %551 = vector.multi_reduction <add>, %545, %cst_167 [0] : vector<64x128xf32> to vector<128xf32>
    %552 = vector.shape_cast %551 : vector<128xf32> to vector<1x128xf32>
    %553 = arith.mulf %545, %545 : vector<64x128xf32>
    %cst_168 = arith.constant dense<0.000000e+00> : vector<128xf32>
    %554 = vector.multi_reduction <add>, %553, %cst_168 [0] : vector<64x128xf32> to vector<128xf32>
    %555 = vector.shape_cast %554 : vector<128xf32> to vector<1x128xf32>
    %556 = tpu.concatenate %552, %555 in 0 : vector<1x128xf32>, vector<1x128xf32> -> vector<2x128xf32>
    %557 = arith.addf %538, %556 : vector<2x128xf32>
    %cst_169 = arith.constant 0.000000e+00 : f32
    %558 = vector.broadcast %cst_169 : f32 to vector<64x128xf32>
    %cst_170 = arith.constant dense<0.000000e+00> : vector<64x128xf32>
    %559 = tpu.matmul %310, %438, %cst_170 {dimension_numbers = #tpu.dot_dimension_numbers<[1], [0], [0], [1], [0, 0, 1, 1], [], []>} : vector<64x144xbf16>, vector<144x128xbf16>, vector<64x128xf32> -> vector<64x128xf32>
    %560 = arith.addf %558, %559 : vector<64x128xf32>
    %cst_171 = arith.constant dense<0.000000e+00> : vector<64x128xf32>
    %561 = tpu.matmul %352, %440, %cst_171 {dimension_numbers = #tpu.dot_dimension_numbers<[1], [0], [0], [1], [0, 0, 1, 1], [], []>} : vector<64x144xbf16>, vector<144x128xbf16>, vector<64x128xf32> -> vector<64x128xf32>
    %562 = arith.addf %560, %561 : vector<64x128xf32>
    %cst_172 = arith.constant dense<0.000000e+00> : vector<64x128xf32>
    %563 = tpu.matmul %394, %442, %cst_172 {dimension_numbers = #tpu.dot_dimension_numbers<[1], [0], [0], [1], [0, 0, 1, 1], [], []>} : vector<64x144xbf16>, vector<144x128xbf16>, vector<64x128xf32> -> vector<64x128xf32>
    %564 = arith.addf %562, %563 : vector<64x128xf32>
    %565 = vector.extract_strided_slice %564 {offsets = [0, 0], sizes = [64, 4], strides = [1, 1]} : vector<64x128xf32> to vector<64x4xf32>
    %566 = arith.truncf %565 : vector<64x4xf32> to vector<64x4xbf16>
    %c0_173 = arith.constant 0 : index
    %c6_174 = arith.constant 6 : index
    %c0_175 = arith.constant 0 : index
    %c0_176 = arith.constant 0 : index
    %567 = vector.load %arg8[%c0_173, %c6_174, %c0_175, %c0_176] : memref<1x8x64x4xbf16, #tpu.memory_space<vmem>>, vector<1x1x64x4xbf16>
    %568 = vector.shape_cast %567 : vector<1x1x64x4xbf16> to vector<64x4xbf16>
    %569 = vector.shape_cast %566 : vector<64x4xbf16> to vector<1x1x64x4xbf16>
    tpu.vector_store %arg8[%c0_173, %c6_174, %c0_175, %c0_176], %569 {strides = array<i32>} : memref<1x8x64x4xbf16, #tpu.memory_space<vmem>>, vector<1x1x64x4xbf16>,
    %cst_177 = arith.constant dense<0.000000e+00> : vector<128xf32>
    %570 = vector.multi_reduction <add>, %564, %cst_177 [0] : vector<64x128xf32> to vector<128xf32>
    %571 = vector.shape_cast %570 : vector<128xf32> to vector<1x128xf32>
    %572 = arith.mulf %564, %564 : vector<64x128xf32>
    %cst_178 = arith.constant dense<0.000000e+00> : vector<128xf32>
    %573 = vector.multi_reduction <add>, %572, %cst_178 [0] : vector<64x128xf32> to vector<128xf32>
    %574 = vector.shape_cast %573 : vector<128xf32> to vector<1x128xf32>
    %575 = tpu.concatenate %571, %574 in 0 : vector<1x128xf32>, vector<1x128xf32> -> vector<2x128xf32>
    %576 = arith.addf %557, %575 : vector<2x128xf32>
    %cst_179 = arith.constant 0.000000e+00 : f32
    %577 = vector.broadcast %cst_179 : f32 to vector<64x128xf32>
    %cst_180 = arith.constant dense<0.000000e+00> : vector<64x128xf32>
    %578 = tpu.matmul %352, %438, %cst_180 {dimension_numbers = #tpu.dot_dimension_numbers<[1], [0], [0], [1], [0, 0, 1, 1], [], []>} : vector<64x144xbf16>, vector<144x128xbf16>, vector<64x128xf32> -> vector<64x128xf32>
    %579 = arith.addf %577, %578 : vector<64x128xf32>
    %cst_181 = arith.constant dense<0.000000e+00> : vector<64x128xf32>
    %580 = tpu.matmul %394, %440, %cst_181 {dimension_numbers = #tpu.dot_dimension_numbers<[1], [0], [0], [1], [0, 0, 1, 1], [], []>} : vector<64x144xbf16>, vector<144x128xbf16>, vector<64x128xf32> -> vector<64x128xf32>
    %581 = arith.addf %579, %580 : vector<64x128xf32>
    %cst_182 = arith.constant dense<0.000000e+00> : vector<64x128xf32>
    %582 = tpu.matmul %436, %442, %cst_182 {dimension_numbers = #tpu.dot_dimension_numbers<[1], [0], [0], [1], [0, 0, 1, 1], [], []>} : vector<64x144xbf16>, vector<144x128xbf16>, vector<64x128xf32> -> vector<64x128xf32>
    %583 = arith.addf %581, %582 : vector<64x128xf32>
    %584 = vector.extract_strided_slice %583 {offsets = [0, 0], sizes = [64, 4], strides = [1, 1]} : vector<64x128xf32> to vector<64x4xf32>
    %585 = arith.truncf %584 : vector<64x4xf32> to vector<64x4xbf16>
    %c0_183 = arith.constant 0 : index
    %c7_184 = arith.constant 7 : index
    %c0_185 = arith.constant 0 : index
    %c0_186 = arith.constant 0 : index
    %586 = vector.load %arg8[%c0_183, %c7_184, %c0_185, %c0_186] : memref<1x8x64x4xbf16, #tpu.memory_space<vmem>>, vector<1x1x64x4xbf16>
    %587 = vector.shape_cast %586 : vector<1x1x64x4xbf16> to vector<64x4xbf16>
    %588 = vector.shape_cast %585 : vector<64x4xbf16> to vector<1x1x64x4xbf16>
    tpu.vector_store %arg8[%c0_183, %c7_184, %c0_185, %c0_186], %588 {strides = array<i32>} : memref<1x8x64x4xbf16, #tpu.memory_space<vmem>>, vector<1x1x64x4xbf16>,
    %cst_187 = arith.constant dense<0.000000e+00> : vector<128xf32>
    %589 = vector.multi_reduction <add>, %583, %cst_187 [0] : vector<64x128xf32> to vector<128xf32>
    %590 = vector.shape_cast %589 : vector<128xf32> to vector<1x128xf32>
    %591 = arith.mulf %583, %583 : vector<64x128xf32>
    %cst_188 = arith.constant dense<0.000000e+00> : vector<128xf32>
    %592 = vector.multi_reduction <add>, %591, %cst_188 [0] : vector<64x128xf32> to vector<128xf32>
    %593 = vector.shape_cast %592 : vector<128xf32> to vector<1x128xf32>
    %594 = tpu.concatenate %590, %593 in 0 : vector<1x128xf32>, vector<1x128xf32> -> vector<2x128xf32>
    %595 = arith.addf %576, %594 : vector<2x128xf32>
    %c0_i32_189 = arith.constant 0 : i32
    %596 = arith.cmpi eq, %arg1, %c0_i32_189 : i32
    %597 = arith.extui %596 : i1 to i32
    %c0_i32_190 = arith.constant 0 : i32
    %598 = arith.cmpi ne, %597, %c0_i32_190 : i32
    scf.if %598 {
      %cst_197 = arith.constant 0.000000e+00 : f32
      %605 = vector.broadcast %cst_197 : f32 to vector<2x128xf32>
      %c0_198 = arith.constant 0 : index
      %c0_199 = arith.constant 0 : index
      %c0_200 = arith.constant 0 : index
      %606 = vector.load %arg9[%c0_198, %c0_199, %c0_200] : memref<1x2x128xf32, #tpu.memory_space<vmem>>, vector<1x2x128xf32>
      %607 = vector.shape_cast %606 : vector<1x2x128xf32> to vector<2x128xf32>
      %608 = vector.shape_cast %605 : vector<2x128xf32> to vector<1x2x128xf32>
      tpu.vector_store %arg9[%c0_198, %c0_199, %c0_200], %608 {strides = array<i32>} : memref<1x2x128xf32, #tpu.memory_space<vmem>>, vector<1x2x128xf32>,
    } else {
    }
    %c0_191 = arith.constant 0 : index
    %c0_192 = arith.constant 0 : index
    %c0_193 = arith.constant 0 : index
    %599 = vector.load %arg9[%c0_191, %c0_192, %c0_193] : memref<1x2x128xf32, #tpu.memory_space<vmem>>, vector<1x2x128xf32>
    %600 = vector.shape_cast %599 : vector<1x2x128xf32> to vector<2x128xf32>
    %601 = arith.addf %600, %595 : vector<2x128xf32>
    %c0_194 = arith.constant 0 : index
    %c0_195 = arith.constant 0 : index
    %c0_196 = arith.constant 0 : index
    %602 = vector.load %arg9[%c0_194, %c0_195, %c0_196] : memref<1x2x128xf32, #tpu.memory_space<vmem>>, vector<1x2x128xf32>
    %603 = vector.shape_cast %602 : vector<1x2x128xf32> to vector<2x128xf32>
    %604 = vector.shape_cast %601 : vector<2x128xf32> to vector<1x2x128xf32>
    tpu.vector_store %arg9[%c0_194, %c0_195, %c0_196], %604 {strides = array<i32>} : memref<1x2x128xf32, #tpu.memory_space<vmem>>, vector<1x2x128xf32>,
    return
  }
  func.func @transform_0(%arg0: i32, %arg1: i32) -> (i32, i32, i32, i32, i32) {
    %c0_i32 = arith.constant 0 : i32
    %c0_i32_0 = arith.constant 0 : i32
    %c0_i32_1 = arith.constant 0 : i32
    %c0_i32_2 = arith.constant 0 : i32
    return %arg0, %arg1, %c0_i32, %c0_i32_0, %c0_i32_1 : i32, i32, i32, i32, i32
  }
  func.func @transform_1(%arg0: i32, %arg1: i32) -> (i32, i32, i32, i32, i32) {
    %c8_i32 = arith.constant 8 : i32
    %0 = arith.muli %arg1, %c8_i32 : i32
    %c8_i32_0 = arith.constant 8 : i32
    %1 = arith.addi %0, %c8_i32_0 : i32
    %c0_i32 = arith.constant 0 : i32
    %c0_i32_1 = arith.constant 0 : i32
    %c0_i32_2 = arith.constant 0 : i32
    %c0_i32_3 = arith.constant 0 : i32
    return %arg0, %1, %c0_i32, %c0_i32_1, %c0_i32_2 : i32, i32, i32, i32, i32
  }
  func.func @transform_2(%arg0: i32, %arg1: i32) -> (i32, i32, i32, i32, i32) {
    %c8_i32 = arith.constant 8 : i32
    %0 = arith.muli %arg1, %c8_i32 : i32
    %c8_i32_0 = arith.constant 8 : i32
    %1 = arith.addi %0, %c8_i32_0 : i32
    %c1_i32 = arith.constant 1 : i32
    %2 = arith.addi %1, %c1_i32 : i32
    %c0_i32 = arith.constant 0 : i32
    %c0_i32_1 = arith.constant 0 : i32
    %c0_i32_2 = arith.constant 0 : i32
    %c0_i32_3 = arith.constant 0 : i32
    return %arg0, %2, %c0_i32, %c0_i32_1, %c0_i32_2 : i32, i32, i32, i32, i32
  }
  func.func @transform_3(%arg0: i32, %arg1: i32) -> (i32, i32, i32) {
    %c0_i32 = arith.constant 0 : i32
    %c0_i32_0 = arith.constant 0 : i32
    %c0_i32_1 = arith.constant 0 : i32
    %c0_i32_2 = arith.constant 0 : i32
    return %c0_i32, %c0_i32_0, %c0_i32_1 : i32, i32, i32
  }
  func.func @transform_4(%arg0: i32, %arg1: i32) -> (i32, i32) {
    %c0_i32 = arith.constant 0 : i32
    %c0_i32_0 = arith.constant 0 : i32
    %c0_i32_1 = arith.constant 0 : i32
    return %c0_i32, %c0_i32_0 : i32, i32
  }
  func.func @transform_5(%arg0: i32, %arg1: i32) -> (i32, i32) {
    %c0_i32 = arith.constant 0 : i32
    %c0_i32_0 = arith.constant 0 : i32
    %c0_i32_1 = arith.constant 0 : i32
    return %c0_i32, %c0_i32_0 : i32, i32
  }
  func.func @transform_6(%arg0: i32, %arg1: i32) -> (i32, i32, i32, i32) {
    %c0_i32 = arith.constant 0 : i32
    %c0_i32_0 = arith.constant 0 : i32
    %c0_i32_1 = arith.constant 0 : i32
    return %arg0, %arg1, %c0_i32, %c0_i32_0 : i32, i32, i32, i32
  }
  func.func @transform_7(%arg0: i32, %arg1: i32) -> (i32, i32, i32) {
    %c0_i32 = arith.constant 0 : i32
    %c0_i32_0 = arith.constant 0 : i32
    %c0_i32_1 = arith.constant 0 : i32
    return %arg0, %c0_i32, %c0_i32_0 : i32, i32, i32
  }
}

module attributes {stable_mosaic.version = 11 : i64} {
  func.func @_epilogue_kernel(%arg0: i32, %arg1: memref<32x128xbf16, #tpu.memory_space<vmem>>, %arg2: memref<32x128xf32, #tpu.memory_space<vmem>>, %arg3: memref<1x128xf32, #tpu.memory_space<vmem>>, %arg4: memref<1x128xf32, #tpu.memory_space<vmem>>, %arg5: memref<32x128xf32, #tpu.memory_space<vmem>>) attributes {dimension_semantics = [#tpu.dimension_semantics<parallel>], iteration_bounds = array<i64: 1>, scalar_prefetch = 0 : i64, scratch_operands = 0 : i64, tpu.core_type = #tpu.core_type<tc>, window_params = [{transform_indices = @transform_0, window_bounds = array<i64: 32, 128>}, {transform_indices = @transform_1, window_bounds = array<i64: 32, 128>}, {pipeline_mode = #tpu.pipeline_mode<synchronous>, transform_indices = @transform_2, window_bounds = array<i64: 1, 128>}, {pipeline_mode = #tpu.pipeline_mode<synchronous>, transform_indices = @transform_3, window_bounds = array<i64: 1, 128>}, {transform_indices = @transform_4, window_bounds = array<i64: 32, 128>}]} {
    %c0 = arith.constant 0 : index
    %c0_0 = arith.constant 0 : index
    %0 = vector.load %arg1[%c0, %c0_0] : memref<32x128xbf16, #tpu.memory_space<vmem>>, vector<32x128xbf16>
    %1 = arith.extf %0 : vector<32x128xbf16> to vector<32x128xf32>
    %c0_1 = arith.constant 0 : index
    %c0_2 = arith.constant 0 : index
    %2 = vector.load %arg3[%c0_1, %c0_2] : memref<1x128xf32, #tpu.memory_space<vmem>>, vector<1x128xf32>
    %3 = vector.broadcast %2 : vector<1x128xf32> to vector<32x128xf32>
    %4 = arith.mulf %1, %3 : vector<32x128xf32>
    %c0_3 = arith.constant 0 : index
    %c0_4 = arith.constant 0 : index
    %5 = vector.load %arg4[%c0_3, %c0_4] : memref<1x128xf32, #tpu.memory_space<vmem>>, vector<1x128xf32>
    %6 = vector.broadcast %5 : vector<1x128xf32> to vector<32x128xf32>
    %7 = arith.addf %4, %6 : vector<32x128xf32>
    %c0_5 = arith.constant 0 : index
    %c0_6 = arith.constant 0 : index
    %8 = vector.load %arg2[%c0_5, %c0_6] : memref<32x128xf32, #tpu.memory_space<vmem>>, vector<32x128xf32>
    %9 = arith.addf %7, %8 : vector<32x128xf32>
    %cst = arith.constant 0.000000e+00 : f32
    %10 = vector.broadcast %cst : f32 to vector<32x128xf32>
    %11 = arith.maximumf %9, %10 : vector<32x128xf32>
    %c0_7 = arith.constant 0 : index
    %c0_8 = arith.constant 0 : index
    %12 = vector.load %arg5[%c0_7, %c0_8] : memref<32x128xf32, #tpu.memory_space<vmem>>, vector<32x128xf32>
    tpu.vector_store %arg5[%c0_7, %c0_8], %11 {strides = array<i32>} : memref<32x128xf32, #tpu.memory_space<vmem>>, vector<32x128xf32>,
    return
  }
  func.func @transform_0(%arg0: i32) -> (i32, i32) {
    %c0_i32 = arith.constant 0 : i32
    %c0_i32_0 = arith.constant 0 : i32
    return %arg0, %c0_i32 : i32, i32
  }
  func.func @transform_1(%arg0: i32) -> (i32, i32) {
    %c0_i32 = arith.constant 0 : i32
    %c0_i32_0 = arith.constant 0 : i32
    return %arg0, %c0_i32 : i32, i32
  }
  func.func @transform_2(%arg0: i32) -> (i32, i32) {
    %c0_i32 = arith.constant 0 : i32
    %c0_i32_0 = arith.constant 0 : i32
    %c0_i32_1 = arith.constant 0 : i32
    return %c0_i32, %c0_i32_0 : i32, i32
  }
  func.func @transform_3(%arg0: i32) -> (i32, i32) {
    %c0_i32 = arith.constant 0 : i32
    %c0_i32_0 = arith.constant 0 : i32
    %c0_i32_1 = arith.constant 0 : i32
    return %c0_i32, %c0_i32_0 : i32, i32
  }
  func.func @transform_4(%arg0: i32) -> (i32, i32) {
    %c0_i32 = arith.constant 0 : i32
    %c0_i32_0 = arith.constant 0 : i32
    return %arg0, %c0_i32 : i32, i32
  }
}

</mosaic_0001>

<bundles_post_ra>
// kernel: tile.13
= control target key start
LH: loop header
LB: loop body
LE: loop exit
PB: predicated region body
PF: predicated region fallthrough
CT: control target
= control target key end

     0   :  { %s40_s0 = inlined_call_operand.vmem [shape: f32[4], index: 0, kind: input, shape index: {}]   ;;  %s41_s1 = inlined_call_operand.vmem [shape: f32[32,4], index: 1, kind: output, shape index: {}]  }
   0x1   :  { %v4_v0 = vld [vmem:[%s40_s0] ss:$0 sm:$0xff] }
   0x2   :  { %5 = vst [vmem:[%s41_s1] sm:$0xff] %v4_v0 }
   0x3   :  { %12 = vst [vmem:[%s41_s1 + $0x8] sm:$0xff] %v4_v0 }
   0x4   :  { %13 = vst [vmem:[%s41_s1 + $0x10] sm:$0xff] %v4_v0 }
   0x5   :  { %14 = vst [vmem:[%s41_s1 + $0x18] sm:$0xff] %v4_v0 }

// kernel: tile.14
= control target key start
LH: loop header
LB: loop body
LE: loop exit
PB: predicated region body
PF: predicated region fallthrough
CT: control target
= control target key end

     0   :  { %s259_s10 = smov 124   ;;  %s260_s11 = smov 116   ;;  %vm3_vm0 = vcmask 31744   ;;  %vm9_vm1 = vcmask 1048544   ;;  %vm15_vm2 = vcmask 1015744   ;;  %vm21_vm3 = vcmask 982944   ;;  %s399_s0 = inlined_call_operand.vmem [shape: f32[32,4], index: 0, kind: input, shape index: {}]   ;;  %s400_s1 = inlined_call_operand.vmem [shape: f32[1,128], index: 1, kind: output, shape index: {}]  }
   0x1   :  { %v197_v0 = vld [vmem:[%s399_s0 + $0x1f] sm:$0x1]   ;;  %v199_v1 = vld [vmem:[%s399_s0 + $0x1d] sm:$0x1]   ;;  %v201_v2 = vld [vmem:[%s399_s0 + $0x1b] sm:$0x1]  }
   0x2   :  { %7 = vrot.lane.b32.xlu0 %v197_v0, %s259_s10  ;;  %19 = vrot.lane.b32.xlu1 %v199_v1, %s260_s11  ;;  %s261_s14 = smov 108   ;;  %v198_v3 = vld [vmem:[%s399_s0 + $0x1e] sm:$0x1]   ;;  %v200_v4 = vld [vmem:[%s399_s0 + $0x1c] sm:$0x1]   ;;  %s262_s19 = smov 120  }
   0x3   :  { %31 = vrot.lane.b32.xlu2 %v201_v2, %s261_s14  ;;  %s263_s20 = smov 112   ;;  %v202_v5 = vld [vmem:[%s399_s0 + $0x1a] sm:$0x1]   ;;  %s264_s23 = smov 104   ;;  %v203_v6 = vld [vmem:[%s399_s0 + $0x19] sm:$0x1]  }
   0x4   :  { %v204_v7 = vld [vmem:[%s399_s0 + $0x18] sm:$0x1]   ;;  %s265_s28 = smov 100   ;;  %s266_s29 = smov 96   ;;  %v205_v8 = vld [vmem:[%s399_s0 + $0x17] sm:$0x1]  }
   0x5   :  { %s267_s3 = smov 92   ;;  %v206_v9 = vld [vmem:[%s399_s0 + $0x16] sm:$0x1]   ;;  %v207_v10 = vld [vmem:[%s399_s0 + $0x15] sm:$0x1]   ;;  %s268_s8 = smov 88  }
   0x6   :  { %s269_s9 = smov 84   ;;  %v208_v11 = vld [vmem:[%s399_s0 + $0x14] sm:$0x1]   ;;  %s270_s12 = smov 80   ;;  %v209_v12 = vld [vmem:[%s399_s0 + $0x13] sm:$0x1]  }
   0x7   :  { %v210_v13 = vld [vmem:[%s399_s0 + $0x12] sm:$0x1]   ;;  %s271_s17 = smov 76   ;;  %s272_s18 = smov 72   ;;  %v211_v14 = vld [vmem:[%s399_s0 + $0x11] sm:$0x1]  }
   0x8   :  { %s273_s21 = smov 68   ;;  %v212_v15 = vld [vmem:[%s399_s0 + $0x10] sm:$0x1]   ;;  %v213_v16 = vld [vmem:[%s399_s0 + $0xf] sm:$0x1]   ;;  %s274_s26 = smov 64  }
   0x9   :  { %s275_s27 = smov 60   ;;  %v214_v17 = vld [vmem:[%s399_s0 + $0xe] sm:$0x1]   ;;  %s276_s30 = smov 56   ;;  %v215_v18 = vld [vmem:[%s399_s0 + $0xd] sm:$0x1]  }
   0xa   :  { %13 = vrot.lane.b32.xlu0 %v198_v3, %s262_s19  ;;  %25 = vrot.lane.b32.xlu1 %v200_v4, %s263_s20  ;;  %v216_v19 = vld [vmem:[%s399_s0 + $0xc] sm:$0x1]   ;;  %s277_s6 = smov 52   ;;  %s278_s7 = smov 48   ;;  %v217_v20 = vld [vmem:[%s399_s0 + $0xb] sm:$0x1]  }
   0xb   :  { %37 = vrot.lane.b32.xlu2 %v202_v5, %s264_s23  ;;  %s279_s10 = smov 44   ;;  %v218_v21 = vld [vmem:[%s399_s0 + $0xa] sm:$0x1]   ;;  %v219_v22 = vld [vmem:[%s399_s0 + $0x9] sm:$0x1]   ;;  %s280_s15 = smov 40  }
   0xc   :  { %s281_s16 = smov 36   ;;  %v220_v23 = vld [vmem:[%s399_s0 + $0x8] sm:$0x1]   ;;  %s282_s19 = smov 32   ;;  %v221_v24 = vld [vmem:[%s399_s0 + $0x7] sm:$0x1]  }
   0xd   :  { %v222_v25 = vld [vmem:[%s399_s0 + $0x6] sm:$0x1]   ;;  %s283_s24 = smov 28   ;;  %s284_s25 = smov 24   ;;  %v223_v26 = vld [vmem:[%s399_s0 + $0x5] sm:$0x1]  }
   0xe   :  { %v224_v27 = vld [vmem:[%s399_s0 + $0x4] sm:$0x1]   ;;  %v225_v28 = vld [vmem:[%s399_s0 + $0x3] sm:$0x1]   ;;  %s286_s4 = smov 16   ;;  %s287_s5 = smov 12  }
   0xf   :  { %v226_v29 = vld [vmem:[%s399_s0 + $0x2] sm:$0x1]   ;;  %v227_v30 = vld [vmem:[%s399_s0 + $0x1] sm:$0x1]   ;;  %s289_s11 = smov 4   ;;  %vm27_vm4 = vcmask 950144  }
  0x10   :  { %v2_v31 = vld [vmem:[%s399_s0] sm:$0x1]   ;;  %vm33_vm5 = vcmask 917344   ;;  %vm39_vm6 = vcmask 884544   ;;  %vm45_vm7 = vcmask 851744   ;;  %vm51_vm8 = vcmask 818944  }
  0x11   :  { %4 = vst.msk [vmem:[#allocation0] sm:$0x1] %vm3_vm0, %v2_v31   ;;  %vm57_vm9 = vcmask 786144   ;;  %vm63_vm10 = vcmask 753344   ;;  %vm69_vm11 = vcmask 720544   ;;  %vm75_vm12 = vcmask 687744  }
  0x12   :  { %43 = vrot.lane.b32.xlu0 %v203_v6, %s265_s28  ;;  %49 = vrot.lane.b32.xlu1 %v204_v7, %s266_s29  ;;  %s285_s28 = smov 20   ;;  %vm81_vm13 = vcmask 654944   ;;  %vm87_vm14 = vcmask 622144   ;;  %vm93_vm15 = vcmask 589344   ;;  %vm99_vm0 = vcmask 556544  }
  0x13   :  { %55 = vrot.lane.b32.xlu2 %v205_v8, %s267_s3 }
  0x1a   :  { %61 = vrot.lane.b32.xlu0 %v206_v9, %s268_s8  ;;  %67 = vrot.lane.b32.xlu1 %v207_v10, %s269_s9  ;;  %s288_s8 = smov 8  }
  0x1b   :  { %73 = vrot.lane.b32.xlu2 %v208_v11, %s270_s12 }
  0x22   :  { %79 = vrot.lane.b32.xlu0 %v209_v12, %s271_s17  ;;  %85 = vrot.lane.b32.xlu1 %v210_v13, %s272_s18 }
  0x23   :  { %91 = vrot.lane.b32.xlu2 %v211_v14, %s273_s21 }
  0x2a   :  { %97 = vrot.lane.b32.xlu0 %v212_v15, %s274_s26  ;;  %103 = vrot.lane.b32.xlu1 %v213_v16, %s275_s27 }
  0x2b   :  { %109 = vrot.lane.b32.xlu2 %v214_v17, %s276_s30 }
  0x32   :  { %115 = vrot.lane.b32.xlu0 %v215_v18, %s277_s6  ;;  %121 = vrot.lane.b32.xlu1 %v216_v19, %s278_s7 }
  0x33   :  { %127 = vrot.lane.b32.xlu2 %v217_v20, %s279_s10 }
  0x3a   :  { %133 = vrot.lane.b32.xlu0 %v218_v21, %s280_s15  ;;  %139 = vrot.lane.b32.xlu1 %v219_v22, %s281_s16 }
  0x3b   :  { %145 = vrot.lane.b32.xlu2 %v220_v23, %s282_s19 }
  0x42   :  { %151 = vrot.lane.b32.xlu0 %v221_v24, %s283_s24  ;;  %157 = vrot.lane.b32.xlu1 %v222_v25, %s284_s25 }
  0x43   :  { %163 = vrot.lane.b32.xlu2 %v223_v26, %s285_s28 }
  0x4a   :  { %169 = vrot.lane.b32.xlu0 %v224_v27, %s286_s4  ;;  %175 = vrot.lane.b32.xlu1 %v225_v28, %s287_s5 }
  0x4b   :  { %181 = vrot.lane.b32.xlu2 %v226_v29, %s288_s8 }
  0x52   :  { %187 = vrot.lane.b32.xlu0 %v227_v30, %s289_s11 }
  0x5d   :  { %v32_v32 = vpop.permute.xlu2 %31  }
  0x65   :  { %v38_v33 = vpop.permute.xlu2 %37  }
  0x6d   :  { %v56_v34 = vpop.permute.xlu2 %55  }
  0x74   :  { %v8_v35 = vpop.permute.xlu0 %7   ;;  %v20_v36 = vpop.permute.xlu1 %19  }
  0x75   :  { %10 = vst.msk [vmem:[#allocation0] sm:$0x1] %vm9_vm1, %v8_v35   ;;  %v74_v37 = vpop.permute.xlu2 %73   ;;  %vm105_vm1 = vcmask 523744  }
  0x7c   :  { %v14_v38 = vpop.permute.xlu0 %13   ;;  %v26_v39 = vpop.permute.xlu1 %25  }
  0x7d   :  { %16 = vst.msk [vmem:[#allocation0] sm:$0x1] %vm15_vm2, %v14_v38   ;;  %v92_v40 = vpop.permute.xlu2 %91   ;;  %vm111_vm2 = vcmask 490944  }
  0x7e   :  { %22 = vst.msk [vmem:[#allocation0] sm:$0x1] %vm21_vm3, %v20_v36   ;;  %vm117_vm3 = vcmask 458144  }
  0x7f   :  { %28 = vst.msk [vmem:[#allocation0] sm:$0x1] %vm27_vm4, %v26_v39   ;;  %vm123_vm4 = vcmask 425344  }
  0x80   :  { %34 = vst.msk [vmem:[#allocation0] sm:$0x1] %vm33_vm5, %v32_v32   ;;  %vm129_vm5 = vcmask 392544  }
  0x81   :  { %40 = vst.msk [vmem:[#allocation0] sm:$0x1] %vm39_vm6, %v38_v33   ;;  %vm135_vm6 = vcmask 359744  }
  0x84   :  { %v44_v41 = vpop.permute.xlu0 %43   ;;  %v50_v42 = vpop.permute.xlu1 %49  }
  0x85   :  { %46 = vst.msk [vmem:[#allocation0] sm:$0x1] %vm45_vm7, %v44_v41   ;;  %v110_v43 = vpop.permute.xlu2 %109   ;;  %vm141_vm7 = vcmask 326944  }
  0x86   :  { %52 = vst.msk [vmem:[#allocation0] sm:$0x1] %vm51_vm8, %v50_v42   ;;  %vm147_vm8 = vcmask 294144  }
  0x87   :  { %58 = vst.msk [vmem:[#allocation0] sm:$0x1] %vm57_vm9, %v56_v34   ;;  %vm153_vm9 = vcmask 261344  }
  0x8c   :  { %v62_v44 = vpop.permute.xlu0 %61   ;;  %v68_v45 = vpop.permute.xlu1 %67  }
  0x8d   :  { %64 = vst.msk [vmem:[#allocation0] sm:$0x1] %vm63_vm10, %v62_v44   ;;  %v128_v46 = vpop.permute.xlu2 %127   ;;  %vm159_vm10 = vcmask 228544  }
  0x8e   :  { %70 = vst.msk [vmem:[#allocation0] sm:$0x1] %vm69_vm11, %v68_v45   ;;  %vm165_vm11 = vcmask 195744  }
  0x8f   :  { %76 = vst.msk [vmem:[#allocation0] sm:$0x1] %vm75_vm12, %v74_v37   ;;  %vm171_vm12 = vcmask 162944  }
  0x94   :  { %v80_v47 = vpop.permute.xlu0 %79   ;;  %v86_v48 = vpop.permute.xlu1 %85  }
  0x95   :  { %82 = vst.msk [vmem:[#allocation0] sm:$0x1] %vm81_vm13, %v80_v47   ;;  %v146_v49 = vpop.permute.xlu2 %145   ;;  %vm177_vm13 = vcmask 130144  }
  0x96   :  { %88 = vst.msk [vmem:[#allocation0] sm:$0x1] %vm87_vm14, %v86_v48   ;;  %vm183_vm14 = vcmask 97344  }
  0x97   :  { %94 = vst.msk [vmem:[#allocation0] sm:$0x1] %vm93_vm15, %v92_v40   ;;  %vm189_vm15 = vcmask 64544  }
  0x9c   :  { %v98_v50 = vpop.permute.xlu0 %97   ;;  %v104_v51 = vpop.permute.xlu1 %103  }
  0x9d   :  { %100 = vst.msk [vmem:[#allocation0] sm:$0x1] %vm99_vm0, %v98_v50   ;;  %v164_v52 = vpop.permute.xlu2 %163  }
  0x9e   :  { %106 = vst.msk [vmem:[#allocation0] sm:$0x1] %vm105_vm1, %v104_v51  }
  0x9f   :  { %112 = vst.msk [vmem:[#allocation0] sm:$0x1] %vm111_vm2, %v110_v43  }
  0xa4   :  { %v116_v53 = vpop.permute.xlu0 %115   ;;  %v122_v54 = vpop.permute.xlu1 %121  }
  0xa5   :  { %118 = vst.msk [vmem:[#allocation0] sm:$0x1] %vm117_vm3, %v116_v53   ;;  %v182_v55 = vpop.permute.xlu2 %181  }
  0xa6   :  { %124 = vst.msk [vmem:[#allocation0] sm:$0x1] %vm123_vm4, %v122_v54  }
  0xa7   :  { %130 = vst.msk [vmem:[#allocation0] sm:$0x1] %vm129_vm5, %v128_v46  }
  0xac   :  { %v134_v56 = vpop.permute.xlu0 %133   ;;  %v140_v57 = vpop.permute.xlu1 %139  }
  0xad   :  { %136 = vst.msk [vmem:[#allocation0] sm:$0x1] %vm135_vm6, %v134_v56  }
  0xae   :  { %142 = vst.msk [vmem:[#allocation0] sm:$0x1] %vm141_vm7, %v140_v57  }
  0xaf   :  { %148 = vst.msk [vmem:[#allocation0] sm:$0x1] %vm147_vm8, %v146_v49  }
  0xb4   :  { %v152_v58 = vpop.permute.xlu0 %151   ;;  %v158_v59 = vpop.permute.xlu1 %157  }
  0xb5   :  { %154 = vst.msk [vmem:[#allocation0] sm:$0x1] %vm153_vm9, %v152_v58  }
  0xb6   :  { %160 = vst.msk [vmem:[#allocation0] sm:$0x1] %vm159_vm10, %v158_v59  }
  0xb7   :  { %166 = vst.msk [vmem:[#allocation0] sm:$0x1] %vm165_vm11, %v164_v52  }
  0xbc   :  { %v170_v60 = vpop.permute.xlu0 %169   ;;  %v176_v61 = vpop.permute.xlu1 %175  }
  0xbd   :  { %172 = vst.msk [vmem:[#allocation0] sm:$0x1] %vm171_vm12, %v170_v60  }
  0xbe   :  { %178 = vst.msk [vmem:[#allocation0] sm:$0x1] %vm177_vm13, %v176_v61  }
  0xbf   :  { %184 = vst.msk [vmem:[#allocation0] sm:$0x1] %vm183_vm14, %v182_v55  }
  0xc4   :  { %v188_v62 = vpop.permute.xlu0 %187  }
  0xc5   :  { %190 = vst.msk [vmem:[#allocation0] sm:$0x1] %vm189_vm15, %v188_v62  }
  0xcc   :  { %v193_v63 = vld [vmem:[#allocation0] sm:$0x1] }
  0xcd   :  { %196 = vst [vmem:[%s400_s1] sm:$0x1] %v193_v63 }

// kernel: basic_block_forward.3
= control target key start
LH: loop header
LB: loop body
LE: loop exit
PB: predicated region body
PF: predicated region fallthrough
CT: control target
= control target key end

     0   :  { %s133_s0 = inlined_call_operand.vmem [shape: bf16[32,128], index: 0, kind: input, shape index: {}]   ;;  %s134_s2 = inlined_call_operand.vmem [shape: f32[1,128], index: 2, kind: input, shape index: {}]   ;;  %s135_s3 = inlined_call_operand.vmem [shape: f32[1,128], index: 3, kind: input, shape index: {}]   ;;  %s136_s1 = inlined_call_operand.vmem [shape: f32[32,128], index: 1, kind: input, shape index: {}]   ;;  %s137_s4 = inlined_call_operand.vmem [shape: f32[32,128], index: 4, kind: output, shape index: {}]  }
   0x1   :  { %v62_v0 = vld [vmem:[%s133_s0] sm:$0xff]   ;;  %v69_v5 = vld [vmem:[%s133_s0 + $0x8] sm:$0xff]   ;;  %v43_v16 = vld [vmem:[%s136_s1 + $0x10] sm:$0xff] }
   0x2   :  { %v70_v1 = vld [vmem:[%s134_s2] ss:$0 sm:$0xff]  ;;  %v63_v2 = vunpack.c.l.bf16 %v62_v0  ;;  %v64_v4 = vunpack.c.h.bf16 %v62_v0  ;;  %v67_v8 = vunpack.c.l.bf16 %v69_v5  ;;  %v68_v9 = vunpack.c.h.bf16 %v69_v5  ;;  %v42_v11 = vld [vmem:[%s136_s1 + $0x8] sm:$0xff]  ;;  %v44_v17 = vld [vmem:[%s136_s1 + $0x18] sm:$0xff] }
   0x3   :  { %v71_v3 = vld [vmem:[%s135_s3] ss:$0 sm:$0xff] }
   0x4   :  { %v29_v6 = vmul.f32 %v70_v1, %v63_v2  ;;  %v30_v7 = vmul.f32 %v70_v1, %v64_v4  ;;  %v41_v10 = vld [vmem:[%s136_s1] sm:$0xff]  ;;  %v31_v14 = vmul.f32 %v70_v1, %v67_v8  ;;  %v32_v15 = vmul.f32 %v70_v1, %v68_v9 }
   0x6   :  { %v37_v12 = vadd.f32 %v71_v3, %v29_v6  ;;  %v38_v13 = vadd.f32 %v71_v3, %v30_v7  ;;  %v39_v20 = vadd.f32 %v71_v3, %v31_v14  ;;  %v40_v21 = vadd.f32 %v71_v3, %v32_v15 }
   0x8   :  { %v45_v18 = vadd.f32 %v41_v10, %v37_v12  ;;  %v46_v19 = vadd.f32 %v42_v11, %v38_v13  ;;  %v47_v24 = vadd.f32 %v43_v16, %v39_v20  ;;  %v48_v25 = vadd.f32 %v44_v17, %v40_v21 }
   0xa   :  { %v49_v22 = vmax.f32 %v45_v18, 0.0  ;;  %v50_v23 = vmax.f32 %v46_v19, 0.0  ;;  %v51_v26 = vmax.f32 %v47_v24, 0.0  ;;  %v52_v27 = vmax.f32 %v48_v25, 0.0 }
   0xc   :  { %53 = vst [vmem:[%s137_s4] sm:$0xff] %v49_v22 }
   0xd   :  { %54 = vst [vmem:[%s137_s4 + $0x8] sm:$0xff] %v50_v23 }
   0xe   :  { %55 = vst [vmem:[%s137_s4 + $0x10] sm:$0xff] %v51_v26 }
   0xf   :  { %56 = vst [vmem:[%s137_s4 + $0x18] sm:$0xff] %v52_v27 }

// kernel: basic_block_forward.2
= control target key start
LH: loop header
LB: loop body
LE: loop exit
PB: predicated region body
PF: predicated region fallthrough
CT: control target
= control target key end

     0   :  { %s9158_s24 = smov 0   ;;  %s9160_s25 = smov 0   ;;  %s15272_s0 = inlined_call_operand.vmem [shape: bf16[2,10,10,10,16], index: 0, kind: input, shape index: {}, may-alias: {0,1,2}]   ;;  %s15273_s1 = inlined_call_operand.vmem [shape: bf16[2,10,10,10,16], index: 1, kind: input, shape index: {}, may-alias: {0,1,2}]   ;;  %s15274_s2 = inlined_call_operand.vmem [shape: bf16[2,10,10,10,16], index: 2, kind: input, shape index: {}, may-alias: {0,1,2}]   ;;  %s15275_s3 = inlined_call_operand.vmem [shape: bf16[3,144,128], index: 3, kind: input, shape index: {}]   ;;  %s15276_s4 = inlined_call_operand.vmem [shape: f32[1,16], index: 4, kind: input, shape index: {}]   ;;  %s15277_s5 = inlined_call_operand.vmem [shape: f32[1,16], index: 5, kind: input, shape index: {}]   ;;  %s15278_s6 = inlined_call_operand.vmem [shape: bf16[2,8,64,4], index: 6, kind: output, shape index: {0}]   ;;  %s15279_s7 = inlined_call_operand.vmem [shape: f32[2,2,128], index: 7, kind: output, shape index: {1}]  }
   0x1   :  { %s9162_s26 = smov 0  }
   0x2 LB: > { %s30_s27 = sadd.s32 1, %s9102_s25  ;;  %p8362_p0 = scmp.ge.s32.totalorder %s9106_s26, 1  ;;  %s9106_s26 = sphi %s9162_s26, %s18_s26   ;;  %s9102_s25 = sphi %s9160_s25, %s15979_s25   ;;  %s9098_s24 = sphi %s9158_s24, %s15978_s24  }
   0x3   : > { %p32_p1 = scmp.ge.s32.totalorder %s30_s27, 2  ;;  %p322_p2 = scmp.lt.s32.totalorder %s9106_s26, 3 }
   0x5   : > { %s15981_s27 = smov (%p32_p1, %s30_s27), 0  ;;  %p323_p3 = pnand %p8362_p0, %p322_p2 }
   0x7   : > { %326 = sbr.rel (%p323_p3) target bundleno = 1186 (0x4a2), region = 44 }
   0xc   : > { %p403_p4 = scmp.lt.s32.totalorder %s9098_s24, 1  ;;  %v463_v0 = vlaneseq  ;;  %vm791_vm0 = vcmask 1042432   ;;  %vm792_vm1 = vcmask 1046532   ;;  %v9108_v2 = vmov 0   ;;  %v9189_v7 = vld [vmem:[%s15276_s4] ss:$0 sm:$0xff] }
   0xd   : > { %v666_v3 = vrot.slane %v9108_v2, 4  ;;  %v9183_v4 = vrot.slane %v9108_v2, 5  ;;  %v15286_v5 = vmov 0.0|0.0   ;;  %vm9191_vm2 = vmor %vm791_vm0, %vm792_vm1  ;;  %vm660_vm3 = vsmask.f32 3328  ;;  %s9110_s13 = smov 48  }
   0xe   : > { %s15983_s24 = smov (!%p403_p4, %s9098_s24), 1  ;;  %v9181_v1 = vshrl.u32 %v463_v0, 7  ;;  %v8369_v6 = vrot.slane %v15286_v5, 9  ;;  %v796_v9 = vrot.slane %v15286_v5, 5  ;;  %vm661_vm4 = vsmask.f32 7440 }
   0xf   : > { %s9179_s28 = smul.u32 800, %s15983_s24  ;;  %v670_v11 = vor.u32 %v9183_v4, %v666_v3  ;;  %v9212_v15 = vld [vmem:[%s15277_s5] ss:$0 sm:$0xff]  ;;  %vm9227_vm7 = vmor %vm660_vm3, %vm661_vm4  ;;  %s9111_s14 = smov 96   ;;  %vm979_vm8 = vcmask 130048   ;;  %vm992_vm9 = vcmask 261120  }
  0x10   : > { %15495 = vst [vmem:[#allocation2_spill] sm:$0xff] %v9181_v1  ;;  %v9203_v10 = vadd.s32 8, %v9181_v1  ;;  %v797_v21 = vsel %vm9191_vm2, %v8369_v6, %v796_v9  ;;  %vm466_vm5 = vcmp.ge.s32.totalorder %v9181_v1, 1  ;;  %s9112_s15 = smov 16   ;;  %s9113_s16 = smov 32   ;;  %vm1001_vm10 = vcmask 392192  }
  0x11   : > { %s9200_s10 = scalar_lea.vmem %s15272_s0, %s9179_s28  ;;  %v671_v24 = vrot.slane %v670_v11, 4  ;;  %v9233_v34 = vunpack.c.l.b16 %v797_v21  ;;  %s9114_s17 = smov 64   ;;  %vm1010_vm11 = vcmask 523264   ;;  %vm1019_vm12 = vcmask 654336  }
  0x12   : > { %15498 = vst [vmem:[#allocation3_spill] sm:$0xff] %v9203_v10  ;;  %v8381_v12 = vld [vmem:[%s9200_s10 + $0x58] sm:$0xf]  ;;  %v8383_v13 = vld [vmem:[%s9200_s10 + $0x60] sm:$0xf]  ;;  %vm473_vm6 = vcmp.le.s32.totalorder %v9203_v10, 8 }
  0x13   : > { %v480_v14 = vld [vmem:[%s9200_s10 + $0x8] sm:$0xf]  ;;  %v1080_v16 = vunpack.c.l.bf16 %v8381_v12  ;;  %v1082_v17 = vunpack.c.l.bf16 %v8383_v13  ;;  %v482_v18 = vld [vmem:[%s9200_s10 + $0x10] sm:$0xf]  ;;  %v8382_v25 = vld [vmem:[%s9200_s10 + $0x5c] sm:$0x1]  ;;  %v676_v42 = vsel %vm9227_vm7, %v671_v24, %v9183_v4 }
  0x14   : > { %v507_v19 = vunpack.c.l.bf16 %v480_v14  ;;  %v8385_v20 = vld [vmem:[%s9200_s10 + $0x68] sm:$0xf]  ;;  %v509_v22 = vunpack.c.l.bf16 %v482_v18  ;;  %v481_v26 = vld [vmem:[%s9200_s10 + $0xc] sm:$0x1]  ;;  %v1081_v33 = vunpack.c.l.bf16 %v8382_v25  ;;  %15501 = vst [vmem:[#allocation4_spill] sm:$0xff] %v9233_v34  ;;  %s9115_s18 = smov 112  }
  0x15   : > { %v1084_v23 = vunpack.c.l.bf16 %v8385_v20  ;;  %v1100_v27 = vmul.f32 %v9189_v7, %v1080_v16  ;;  %v1102_v28 = vmul.f32 %v9189_v7, %v1082_v17  ;;  %v508_v38 = vunpack.c.l.bf16 %v481_v26  ;;  %v8384_v39 = vld [vmem:[%s9200_s10 + $0x64] sm:$0x1]  ;;  %s9116_s19 = smov 80   ;;  %s8911_s22 = sshll.u32 %s15983_s24, 8 }
  0x16   : > { %v530_v29 = vmul.f32 %v9189_v7, %v507_v19  ;;  %v532_v31 = vmul.f32 %v9189_v7, %v509_v22  ;;  %v1101_v43 = vmul.f32 %v9189_v7, %v1081_v33  ;;  %v1083_v51 = vunpack.c.l.bf16 %v8384_v39  ;;  %s11657_s30 = scalar_lea.vmem %s15278_s6, %s8911_s22  ;;  %s8908_s9 = sadd.s32 640, %s9179_s28 }
  0x17   : > { %v1104_v32 = vmul.f32 %v9189_v7, %v1084_v23  ;;  %v1120_v35 = vadd.f32 %v9212_v15, %v1100_v27  ;;  %v1122_v36 = vadd.f32 %v9212_v15, %v1102_v28  ;;  %v531_v47 = vmul.f32 %v9189_v7, %v508_v38  ;;  %s13481_s20 = scalar_lea.vmem %s15273_s1, %s8908_s9  ;;  %s8910_s22 = sadd.s32 720, %s9179_s28 }
  0x18   : > { %v553_v37 = vadd.f32 %v9212_v15, %v530_v29  ;;  %v555_v40 = vadd.f32 %v9212_v15, %v532_v31  ;;  %v1121_v50 = vadd.f32 %v9212_v15, %v1101_v43  ;;  %v1103_v17 = vmul.f32 %v9189_v7, %v1083_v51  ;;  %s14128_s8 = scalar_lea.vmem %s15274_s2, %s8910_s22 }
  0x19   : > { %v1124_v41 = vadd.f32 %v9212_v15, %v1104_v32  ;;  %v1140_v44 = vmax.f32 %v1120_v35, 0.0  ;;  %v1142_v45 = vmax.f32 %v1122_v36, 0.0  ;;  %v554_v55 = vadd.f32 %v9212_v15, %v531_v47 }
  0x1a   : > { %v573_v46 = vmax.f32 %v553_v37, 0.0  ;;  %v575_v48 = vmax.f32 %v555_v40, 0.0  ;;  %v1141_v62 = vmax.f32 %v1121_v50, 0.0  ;;  %v9287_v23 = vunpack.c.l.b16 %v676_v42  ;;  %v8386_v40 = vld [vmem:[%s9200_s10 + $0x6c] sm:$0x1] }
  0x1b   : > { %v1144_v49 = vmax.f32 %v1124_v41, 0.0  ;;  %v1160_v52 = vsel %vm466_vm5, %v1140_v44, 0.0  ;;  %v1162_v53 = vsel %vm466_vm5, %v1142_v45, 0.0  ;;  %v574_v63 = vmax.f32 %v554_v55, 0.0 }
  0x1c   : > { %v601_v54 = vsel %vm466_vm5, %v573_v46, 0.0  ;;  %v9254_v56 = vpack.c.bf16 %v1160_v52, %v1160_v52  ;;  %v9256_v57 = vpack.c.bf16 %v1162_v53, %v1162_v53  ;;  %v603_v58 = vsel %vm466_vm5, %v575_v48, 0.0  ;;  %15502 = vst [vmem:[#allocation5_spill] sm:$0xff] %v9287_v23 }
  0x1d   : > { %v622_v59 = vmul.f32 0.0, %v601_v54  ;;  %v624_v60 = vmul.f32 0.0, %v603_v58  ;;  %v1164_v61 = vsel %vm466_vm5, %v1144_v49, 0.0  ;;  %v1161_v9 = vsel %vm473_vm6, %v1141_v62, 0.0 }
  0x1e   : > { %v15283_v0 = vunpack.c.l.b16 %v9254_v56  ;;  %v1421_v2 = vunpack.c.l.b16 %v9256_v57  ;;  %v9266_v4 = vpack.c.bf16 %v1164_v61, %v1164_v61  ;;  %v1234_v11 = vshrl.u32 %v9254_v56, 16 }
  0x1f   : > { %v9264_v3 = vpack.c.bf16 %v622_v59, %v622_v59  ;;  %v9268_v6 = vpack.c.bf16 %v624_v60, %v624_v60  ;;  %v1237_v12 = vshll.u32 %v9254_v56, 16  ;;  %v9280_v19 = vpack.c.bf16 %v1161_v9, %v1161_v9  ;;  %v484_v59 = vld [vmem:[%s9200_s10 + $0x18] sm:$0xf]  ;;  %v483_v60 = vld [vmem:[%s9200_s10 + $0x14] sm:$0x1] }
  0x20   : > { %v1472_v13 = vpack.c.b16 %v1421_v2, %v15283_v0  ;;  %v1422_v16 = vunpack.c.l.b16 %v9266_v4  ;;  %v1236_v20 = vrot.slane %v1234_v11, 4  ;;  %v602_v24 = vsel %vm473_vm6, %v574_v63, 0.0 }
  0x21   : > { %v15281_v14 = vunpack.c.l.b16 %v9264_v3  ;;  %v868_v18 = vunpack.c.l.b16 %v9268_v6  ;;  %v1239_v21 = vrot.slane %v1237_v12, 5  ;;  %v8370_v25 = vrot.slane %v9264_v3, 9 }
  0x22   : > { %1476 = vrot.lane.b32.xlu0 %v1472_v13, %s9110_s13  ;;  %v9285_v22 = vpack.c.b16 %v1422_v16, %v1421_v2  ;;  %v1243_v28 = vshll.u32 %v9280_v19, 16  ;;  %v623_v29 = vmul.f32 0.0, %v602_v24  ;;  %v1123_v31 = vadd.f32 %v9212_v15, %v1103_v17  ;;  %v485_v17 = vld [vmem:[%s9200_s10 + $0x1c] sm:$0x1] }
  0x23   : > { %v919_v26 = vpack.c.b16 %v868_v18, %v15281_v14  ;;  %v1240_v27 = vor.u32 %v1239_v21, %v1236_v20  ;;  %v1248_v32 = vshrl.u32 %v9256_v57, 16  ;;  %v1251_v33 = vshll.u32 %v9256_v57, 16 }
  0x24   : > { %v678_v35 = vshrl.u32 %v9264_v3, 16  ;;  %v1245_v37 = vrot.slane %v1243_v28, 5  ;;  %v643_v38 = vpack.c.bf16 %v623_v29, %v623_v29  ;;  %v681_v39 = vshll.u32 %v9264_v3, 16 }
  0x25   : > { %923 = vrot.lane.b32.xlu1 %v919_v26, %s9110_s13  ;;  %v1241_v36 = vrot.slane %v1240_v27, 4  ;;  %v1143_v41 = vmax.f32 %v1123_v31, 0.0  ;;  %v1250_v42 = vrot.slane %v1248_v32, 4  ;;  %v1253_v43 = vrot.slane %v1251_v33, 5 }
  0x26   : > { %v680_v44 = vrot.slane %v678_v35, 4  ;;  %v800_v46 = vrot.slane %v643_v38, 5  ;;  %v683_v47 = vrot.slane %v681_v39, 5  ;;  %v687_v48 = vshll.u32 %v643_v38, 16 }
  0x27   : > { %v1246_v45 = vsel %vm9227_vm7, %v1241_v36, %v1245_v37  ;;  %v1163_v50 = vsel %vm473_vm6, %v1143_v41, 0.0  ;;  %v1254_v51 = vor.u32 %v1253_v43, %v1250_v42  ;;  %v1085_v52 = vunpack.c.l.bf16 %v8386_v40 }
  0x28   : > { %v1432_v49 = vunpack.c.l.b16 %v1246_v45  ;;  %v9310_v53 = vsel %vm9191_vm2, %v8370_v25, %v800_v46  ;;  %v9312_v54 = vpack.c.bf16 %v1163_v50, %v1163_v50  ;;  %v684_v55 = vor.u32 %v683_v47, %v680_v44 }
  0x29   : > { %v689_v58 = vrot.slane %v687_v48, 5  ;;  %v899_v62 = vunpack.c.l.b16 %v9310_v53  ;;  %v1255_v63 = vrot.slane %v1254_v51, 4  ;;  %v1105_v2 = vmul.f32 %v9189_v7, %v1085_v52 }
  0x2a   : > { %1512 = vrot.lane.b32.xlu0 %v9285_v22, %s9111_s14  ;;  %v1439_v61 = vpack.c.b16 %v1432_v49, %v9287_v23  ;;  %v1257_v9 = vshll.u32 %v9312_v54, 16  ;;  %v685_v11 = vrot.slane %v684_v55, 4  ;;  %v1262_v12 = vshrl.u32 %v9266_v4, 16 }
  0x2b   : > { %v1265_v13 = vshll.u32 %v9266_v4, 16  ;;  %v1125_v20 = vadd.f32 %v9212_v15, %v1105_v2  ;;  %v511_v21 = vunpack.c.l.bf16 %v484_v59  ;;  %v510_v24 = vunpack.c.l.bf16 %v483_v60  ;;  %v486_v2 = vld [vmem:[%s9200_s10 + $0x20] sm:$0xf] }
  0x2c   : > { %v1259_v25 = vrot.slane %v1257_v9, 5  ;;  %v690_v26 = vsel %vm9227_vm7, %v685_v11, %v689_v58  ;;  %v1264_v27 = vrot.slane %v1262_v12, 4  ;;  %v906_v29 = vpack.c.b16 %v899_v62, %v9233_v34 }
  0x2d   : > { %1443 = vrot.lane.b32.xlu1 %v1439_v61, %s9112_s15  ;;  %v1267_v28 = vrot.slane %v1265_v13, 5  ;;  %v1145_v31 = vmax.f32 %v1125_v20, 0.0  ;;  %v534_v32 = vmul.f32 %v9189_v7, %v511_v21  ;;  %v512_v33 = vunpack.c.l.bf16 %v485_v17 }
  0x2e   : > { %v1260_v35 = vsel %vm9227_vm7, %v1255_v63, %v1259_v25  ;;  %v533_v37 = vmul.f32 %v9189_v7, %v510_v24  ;;  %v692_v38 = vshrl.u32 %v9268_v6, 16  ;;  %v9337_v40 = vunpack.c.l.b16 %v690_v26 }
  0x2f   : > { %v1268_v36 = vor.u32 %v1267_v28, %v1264_v27  ;;  %v1433_v39 = vunpack.c.l.b16 %v1260_v35  ;;  %v1165_v41 = vsel %vm473_vm6, %v1145_v31, 0.0  ;;  %v557_v42 = vadd.f32 %v9212_v15, %v534_v32 }
  0x30   : > { %v9342_v43 = vpack.c.bf16 %v1165_v41, %v1165_v41  ;;  %v535_v45 = vmul.f32 %v9189_v7, %v512_v33  ;;  %v556_v46 = vadd.f32 %v9212_v15, %v533_v37  ;;  %v694_v50 = vrot.slane %v692_v38, 4 }
  0x31   : > { %v1269_v44 = vrot.slane %v1268_v36, 4  ;;  %v1485_v47 = vpack.c.b16 %v1433_v39, %v1432_v49  ;;  %v577_v48 = vmax.f32 %v557_v42, 0.0  ;;  %v695_v51 = vshll.u32 %v9268_v6, 16 }
  0x32   : > { %910 = vrot.lane.b32.xlu0 %v906_v29, %s9113_s16  ;;  %v1271_v52 = vshll.u32 %v9342_v43, 16  ;;  %v558_v55 = vadd.f32 %v9212_v15, %v535_v45  ;;  %v576_v58 = vmax.f32 %v556_v46, 0.0  ;;  %v8400_v59 = vrot.slane %v9254_v56, 9 }
  0x33   : > { %v886_v60 = vpack.c.b16 %v9337_v40, %v9287_v23  ;;  %v605_v61 = vsel %vm466_vm5, %v577_v48, 0.0  ;;  %v697_v63 = vrot.slane %v695_v51, 5  ;;  %v1353_v49 = vrot.slane %v9280_v19, 5 }
  0x34   : > { %v1273_v9 = vrot.slane %v1271_v52, 5  ;;  %v626_v11 = vmul.f32 0.0, %v605_v61  ;;  %v578_v12 = vmax.f32 %v558_v55, 0.0  ;;  %v604_v13 = vsel %vm473_vm6, %v576_v58, 0.0  ;;  %v487_v58 = vld [vmem:[%s9200_s10 + $0x24] sm:$0x1] }
  0x35   : > { %1489 = vrot.lane.b32.xlu1 %v1485_v47, %s9114_s17  ;;  %v625_v17 = vmul.f32 0.0, %v604_v13  ;;  %v698_v20 = vor.u32 %v697_v63, %v694_v50  ;;  %v9362_v21 = vsel %vm9191_vm2, %v8400_v59, %v1353_v49  ;;  %v8371_v24 = vrot.slane %v9268_v6, 9  ;;  %v488_v59 = vld [vmem:[%s9200_s10 + $0x28] sm:$0xf] }
  0x36   : > { %v1274_v19 = vsel %vm9227_vm7, %v1269_v44, %v1273_v9  ;;  %v9367_v25 = vpack.c.bf16 %v626_v11, %v626_v11  ;;  %v606_v26 = vsel %vm473_vm6, %v578_v12, 0.0  ;;  %v513_v27 = vunpack.c.l.bf16 %v486_v2 }
  0x37   : > { %v9371_v28 = vunpack.c.l.b16 %v1274_v19  ;;  %v627_v29 = vmul.f32 0.0, %v606_v26  ;;  %v645_v31 = vpack.c.bf16 %v625_v17, %v625_v17  ;;  %v1452_v32 = vunpack.c.l.b16 %v9362_v21 }
  0x38   : > { %v869_v33 = vunpack.c.l.b16 %v9367_v25  ;;  %v699_v35 = vrot.slane %v698_v20, 4  ;;  %v706_v36 = vshrl.u32 %v9367_v25, 16  ;;  %v709_v37 = vshll.u32 %v9367_v25, 16 }
  0x39   : > { %v9379_v38 = vpack.c.b16 %v9371_v28, %v1433_v39  ;;  %v647_v41 = vpack.c.bf16 %v627_v29, %v627_v29  ;;  %v701_v42 = vshll.u32 %v645_v31, 16  ;;  %v804_v44 = vrot.slane %v645_v31, 5 }
  0x3a   : > { %890 = vrot.lane.b32.xlu0 %v886_v60, %s9112_s15  ;;  %v9385_v45 = vpack.c.b16 %v869_v33, %v868_v18  ;;  %v708_v46 = vrot.slane %v706_v36, 4  ;;  %v711_v47 = vrot.slane %v709_v37, 5  ;;  %v8372_v48 = vrot.slane %v9367_v25, 9  ;;  %v8388_v37 = vld [vmem:[%s9200_s10 + $0x74] sm:$0x1] }
  0x3b   : > { %v703_v50 = vrot.slane %v701_v42, 5  ;;  %v715_v51 = vshll.u32 %v647_v41, 16  ;;  %v808_v52 = vrot.slane %v647_v41, 5  ;;  %v805_v39 = vsel %vm9191_vm2, %v8371_v24, %v804_v44  ;;  %v8387_v24 = vld [vmem:[%s9200_s10 + $0x70] sm:$0xf] }
  0x3c   : > { %959 = vrot.lane.b32.xlu2 %v9385_v45, %s9111_s14  ;;  %v712_v6 = vor.u32 %v711_v47, %v708_v46  ;;  %v536_v18 = vmul.f32 %v9189_v7, %v513_v27  ;;  %v8401_v55 = vrot.slane %v9256_v57, 9  ;;  %v1357_v49 = vrot.slane %v9312_v54, 5 }
  0x3d   : > { %1522 = vrot.lane.b32.xlu1 %v9379_v38, %s9115_s18  ;;  %v704_v60 = vsel %vm9227_vm7, %v699_v35, %v703_v50  ;;  %v717_v61 = vrot.slane %v715_v51, 5  ;;  %v9402_v63 = vsel %vm9191_vm2, %v8372_v48, %v808_v52  ;;  %v1459_v11 = vpack.c.b16 %v1452_v32, %v9233_v34  ;;  %v8389_v51 = vld [vmem:[%s9200_s10 + $0x78] sm:$0xf] }
  0x3e   : > { %v713_v2 = vrot.slane %v712_v6, 4  ;;  %v880_v9 = vunpack.c.l.b16 %v704_v60  ;;  %v559_v57 = vadd.f32 %v9212_v15, %v536_v18  ;;  %v900_v12 = vunpack.c.l.b16 %v805_v39  ;;  %v8390_v18 = vld [vmem:[%s9200_s10 + $0x7c] sm:$0x1] }
  0x3f   : > { %v9411_v13 = vsel %vm9191_vm2, %v8401_v55, %v1357_v49  ;;  %v514_v17 = vunpack.c.l.bf16 %v487_v58  ;;  %v515_v20 = vunpack.c.l.bf16 %v488_v59  ;;  %v901_v26 = vunpack.c.l.b16 %v9402_v63 }
  0x40   : > { %v718_v54 = vsel %vm9227_vm7, %v713_v2, %v717_v61  ;;  %v932_v19 = vpack.c.b16 %v880_v9, %v9337_v40  ;;  %v579_v27 = vmax.f32 %v559_v57, 0.0  ;;  %v1453_v31 = vunpack.c.l.b16 %v9411_v13 }
  0x41   : > { %v9418_v29 = vunpack.c.l.b16 %v718_v54  ;;  %v537_v35 = vmul.f32 %v9189_v7, %v514_v17  ;;  %v538_v36 = vmul.f32 %v9189_v7, %v515_v20  ;;  %v8402_v42 = vrot.slane %v9266_v4, 9 }
  0x42   : > { %v607_v41 = vsel %vm466_vm5, %v579_v27, 0.0  ;;  %v1361_v40 = vrot.slane %v9342_v43, 5  ;;  %v1086_v44 = vunpack.c.l.bf16 %v8387_v24  ;;  %v9434_v50 = vpack.c.b16 %v900_v12, %v899_v62 }
  0x43   : > { %v9429_v46 = vpack.c.b16 %v9418_v29, %v880_v9  ;;  %v628_v47 = vmul.f32 0.0, %v607_v41  ;;  %v560_v48 = vadd.f32 %v9212_v15, %v537_v35  ;;  %v9441_v52 = vpack.c.b16 %v901_v26, %v900_v12 }
  0x44   : > { %1463 = vrot.lane.b32.xlu2 %v1459_v11, %s9113_s16  ;;  %v561_v43 = vadd.f32 %v9212_v15, %v538_v36  ;;  %v1087_v6 = vunpack.c.l.bf16 %v8388_v37  ;;  %v1106_v39 = vmul.f32 %v9189_v7, %v1086_v44  ;;  %v1498_v62 = vpack.c.b16 %v1453_v31, %v1452_v32 }
  0x45   : > { %936 = vrot.lane.b32.xlu1 %v932_v19, %s9114_s17  ;;  %969 = vrot.lane.b32.xlu0 %v9429_v46, %s9115_s18  ;;  %v648_v53 = vpack.c.bf16 %v628_v47, %v628_v47  ;;  %v580_v55 = vmax.f32 %v560_v48, 0.0  ;;  %v9454_v58 = vsel %vm9191_vm2, %v8402_v42, %v1361_v40  ;;  %v1088_v49 = vunpack.c.l.bf16 %v8389_v51 }
  0x46   : > { %v581_v59 = vmax.f32 %v561_v43, 0.0  ;;  %v1107_v60 = vmul.f32 %v9189_v7, %v1087_v6  ;;  %v1126_v61 = vadd.f32 %v9212_v15, %v1106_v39  ;;  %v1089_v21 = vunpack.c.l.bf16 %v8390_v18 }
  0x47   : > { %v870_v2 = vunpack.c.l.b16 %v648_v53  ;;  %v608_v9 = vsel %vm473_vm6, %v580_v55, 0.0  ;;  %v8373_v11 = vrot.slane %v648_v53, 9  ;;  %v720_v54 = vshrl.u32 %v648_v53, 16 }
  0x48   : > { %v629_v57 = vmul.f32 0.0, %v608_v9  ;;  %v609_v32 = vsel %vm466_vm5, %v581_v59, 0.0  ;;  %v1127_v12 = vadd.f32 %v9212_v15, %v1107_v60  ;;  %v1146_v17 = vmax.f32 %v1126_v61, 0.0  ;;  %v489_v59 = vld [vmem:[%s9200_s10 + $0x2c] sm:$0x1] }
  0x49   : > { %v920_v20 = vpack.c.b16 %v870_v2, %v869_v33  ;;  %v630_v24 = vmul.f32 0.0, %v609_v32  ;;  %v723_v19 = vshll.u32 %v648_v53, 16  ;;  %v1108_v37 = vmul.f32 %v9189_v7, %v1088_v49 }
  0x4a   : > { %v649_v27 = vpack.c.bf16 %v629_v57, %v629_v57  ;;  %v1147_v35 = vmax.f32 %v1127_v12, 0.0  ;;  %v1166_v36 = vsel %vm466_vm5, %v1146_v17, 0.0  ;;  %v722_v40 = vrot.slane %v720_v54, 4 }
  0x4b   : > { %v9468_v41 = vpack.c.bf16 %v630_v24, %v630_v24  ;;  %v9470_v42 = vpack.c.bf16 %v1166_v36, %v1166_v36  ;;  %v725_v44 = vrot.slane %v723_v19, 5  ;;  %v1109_v48 = vmul.f32 %v9189_v7, %v1089_v21 }
  0x4c   : > { %1502 = vrot.lane.b32.xlu2 %v1498_v62, %s9116_s19  ;;  %v812_v25 = vrot.slane %v649_v27, 5  ;;  %v1167_v33 = vsel %vm473_vm6, %v1147_v35, 0.0  ;;  %v729_v47 = vshll.u32 %v649_v27, 16  ;;  %v516_v24 = vunpack.c.l.bf16 %v489_v59  ;;  %v490_v35 = vld [vmem:[%s9200_s10 + $0x30] sm:$0xf] }
  0x4d   : > { %925 = vrot.lane.b32.xlu1 %v920_v20, %s9110_s13  ;;  %912 = vrot.lane.b32.xlu0 %v9441_v52, %s9113_s16  ;;  %v871_v51 = vunpack.c.l.b16 %v9468_v41  ;;  %v1208_v43 = vpack.c.bf16 %v1167_v33, %v1167_v33  ;;  %v1276_v6 = vshrl.u32 %v9470_v42, 16  ;;  %v1279_v39 = vshll.u32 %v9470_v42, 16 }
  0x4e   : > { %v9484_v18 = vsel %vm9191_vm2, %v8373_v11, %v812_v25  ;;  %v8403_v53 = vrot.slane %v9470_v42, 9  ;;  %v726_v62 = vor.u32 %v725_v44, %v722_v40  ;;  %v731_v55 = vrot.slane %v729_v47, 5 }
  0x4f   : > { %v902_v60 = vunpack.c.l.b16 %v9484_v18  ;;  %v9491_v61 = vpack.c.b16 %v871_v51, %v870_v2  ;;  %v1278_v49 = vrot.slane %v1276_v6, 4  ;;  %v1281_v9 = vrot.slane %v1279_v39, 5  ;;  %v8918_v18 = vld [vmem:[%s15275_s3 + $0x30] sm:$0xff] }
  0x50   : > { %v1285_v21 = vshll.u32 %v1208_v43, 16  ;;  %v1365_v57 = vrot.slane %v1208_v43, 5  ;;  %v727_v32 = vrot.slane %v726_v62, 4  ;;  %v1128_v11 = vadd.f32 %v9212_v15, %v1108_v37  ;;  %v491_v37 = vld [vmem:[%s9200_s10 + $0x34] sm:$0x1] }
  0x51   : > { %v946_v12 = vpack.c.b16 %v902_v60, %v901_v26  ;;  %v1282_v17 = vor.u32 %v1281_v9, %v1278_v49  ;;  %v1129_v20 = vadd.f32 %v9212_v15, %v1109_v48  ;;  %v1454_v2 = vunpack.c.l.b16 %v9454_v58 }
  0x52   : > { %v1148_v54 = vmax.f32 %v1128_v11, 0.0  ;;  %v9502_v19 = vsel %vm9191_vm2, %v8403_v53, %v1365_v57  ;;  %v539_v26 = vmul.f32 %v9189_v7, %v516_v24  ;;  %v734_v36 = vshrl.u32 %v9468_v41, 16  ;;  %v493_v24 = vld [vmem:[%s9200_s10 + $0x3c] sm:$0x1] }
  0x53   : > { %v1149_v27 = vmax.f32 %v1129_v20, 0.0  ;;  %v737_v58 = vshll.u32 %v9468_v41, 16  ;;  %v1283_v40 = vrot.slane %v1282_v17, 4  ;;  %v1287_v44 = vrot.slane %v1285_v21, 5 }
  0x54   : > { %949 = vrot.lane.b32.xlu2 %v9434_v50, %s9116_s19  ;;  %v1168_v63 = vsel %vm466_vm5, %v1148_v54, 0.0  ;;  %v732_v25 = vsel %vm9227_vm7, %v727_v32, %v731_v55  ;;  %v1455_v33 = vunpack.c.l.b16 %v9502_v19  ;;  %v562_v43 = vadd.f32 %v9212_v15, %v539_v26  ;;  %v8919_v19 = vld [vmem:[%s15275_s3 + $0x38] sm:$0xff] }
  0x55   : > { %961 = vrot.lane.b32.xlu1 %v9491_v61, %s9111_s14  ;;  %951 = vrot.lane.b32.xlu0 %v946_v12, %s9116_s19  ;;  %v1169_v50 = vsel %vm473_vm6, %v1149_v27, 0.0  ;;  %v9521_v47 = vpack.c.bf16 %v1168_v63, %v1168_v63  ;;  %v736_v6 = vrot.slane %v734_v36, 4  ;;  %v739_v39 = vrot.slane %v737_v58, 5  ;;  %v492_v12 = vld [vmem:[%s9200_s10 + $0x38] sm:$0xf] }
  0x56   : > { %v9523_v48 = vpack.c.bf16 %v1169_v50, %v1169_v50  ;;  %v517_v53 = vunpack.c.l.bf16 %v490_v35  ;;  %v518_v62 = vunpack.c.l.bf16 %v491_v37  ;;  %v9528_v55 = vpack.c.b16 %v1454_v2, %v1453_v31  ;;  %6208 = vmatpush.bf16.msra.mxu2 %v8919_v19 }
  0x57   : > { %v1290_v59 = vshrl.u32 %v9521_v47, 16  ;;  %v1293_v49 = vshll.u32 %v9521_v47, 16  ;;  %v882_v21 = vunpack.c.l.b16 %v732_v25  ;;  %v582_v57 = vmax.f32 %v562_v43, 0.0 }
  0x58   : > { %15503 = vst [vmem:[#allocation6_spill] sm:$0xff] %v9528_v55  ;;  %v1299_v9 = vshll.u32 %v9523_v48, 16  ;;  %v540_v32 = vmul.f32 %v9189_v7, %v517_v53  ;;  %v541_v11 = vmul.f32 %v9189_v7, %v518_v62  ;;  %v1288_v17 = vsel %vm9227_vm7, %v1283_v40, %v1287_v44 }
  0x59   : > { %v1499_v13 = vpack.c.b16 %v1455_v33, %v1454_v2  ;;  %v1292_v31 = vrot.slane %v1290_v59, 4  ;;  %v1295_v20 = vrot.slane %v1293_v49, 5  ;;  %v610_v54 = vsel %vm473_vm6, %v582_v57, 0.0 }
  0x5a   : > { %v740_v27 = vor.u32 %v739_v39, %v736_v6  ;;  %v563_v35 = vadd.f32 %v9212_v15, %v540_v32  ;;  %v564_v63 = vadd.f32 %v9212_v15, %v541_v11  ;;  %v1301_v36 = vrot.slane %v1299_v9, 5  ;;  %6209 = vmatpush.bf16.msra.mxu2 %v8918_v18 }
  0x5b   : > { %v1296_v26 = vor.u32 %v1295_v20, %v1292_v31  ;;  %v631_v2 = vmul.f32 0.0, %v610_v54  ;;  %v519_v58 = vunpack.c.l.bf16 %v492_v12  ;;  %v1435_v37 = vunpack.c.l.b16 %v1288_v17  ;;  %v8391_v12 = vld [vmem:[%s9200_s10 + $0x80] sm:$0xf] }
  0x5c   : > { %892 = vrot.lane.b32.xlu2 %v9429_v46, %s9112_s15  ;;  %v583_v40 = vmax.f32 %v563_v35, 0.0  ;;  %v584_v44 = vmax.f32 %v564_v63, 0.0  ;;  %v520_v25 = vunpack.c.l.bf16 %v493_v24  ;;  %v933_v50 = vpack.c.b16 %v882_v21, %v9418_v29 }
  0x5d   : > { %1465 = vrot.lane.b32.xlu1 %v9528_v55, %s9113_s16  ;;  %1445 = vrot.lane.b32.xlu0 %v9379_v38, %s9112_s15  ;;  %v1297_v43 = vrot.slane %v1296_v26, 4  ;;  %v9552_v6 = vpack.c.bf16 %v631_v2, %v631_v2  ;;  %v542_v39 = vmul.f32 %v9189_v7, %v519_v58  ;;  %v741_v46 = vrot.slane %v740_v27, 4 }
  0x5e   : > { %v611_v53 = vsel %vm466_vm5, %v583_v40, 0.0  ;;  %v612_v62 = vsel %vm473_vm6, %v584_v44, 0.0  ;;  %v543_v38 = vmul.f32 %v9189_v7, %v520_v25  ;;  %v1486_v57 = vpack.c.b16 %v1435_v37, %v9371_v28 }
  0x5f   : > { %v1302_v59 = vsel %vm9227_vm7, %v1297_v43, %v1301_v36  ;;  %v743_v49 = vshll.u32 %v9552_v6, 16  ;;  %v632_v29 = vmul.f32 0.0, %v611_v53  ;;  %v633_v9 = vmul.f32 0.0, %v612_v62 }
  0x60   : > { %v565_v32 = vadd.f32 %v9212_v15, %v542_v39  ;;  %v566_v11 = vadd.f32 %v9212_v15, %v543_v38  ;;  %v9571_v24 = vunpack.c.l.b16 %v1302_v59  ;;  %v1090_v26 = vunpack.c.l.bf16 %v8391_v12 }
  0x61   : > { %v745_v17 = vrot.slane %v743_v49, 5  ;;  %v9567_v31 = vpack.c.bf16 %v632_v29, %v632_v29  ;;  %v9569_v20 = vpack.c.bf16 %v633_v9, %v633_v9  ;;  %vm1028_vm13 = vcmask 785408  }
  0x62   : > { %v585_v54 = vmax.f32 %v565_v32, 0.0  ;;  %v586_v27 = vmax.f32 %v566_v11, 0.0  ;;  %v1110_v38 = vmul.f32 %v9189_v7, %v1090_v26  ;;  %v9590_v59 = vpack.c.b16 %v9571_v24, %v1435_v37 }
  0x63   : > { %v746_v28 = vsel %vm9227_vm7, %v741_v46, %v745_v17  ;;  %v748_v35 = vshrl.u32 %v9567_v31, 16  ;;  %v751_v63 = vshll.u32 %v9567_v31, 16  ;;  %v757_v2 = vshll.u32 %v9569_v20, 16  ;;  %v8393_v17 = vld [vmem:[%s9200_s10 + $0x88] sm:$0xf] }
  0x64   : > { %938 = vrot.lane.b32.xlu2 %v933_v50, %s9114_s17  ;;  %v883_v36 = vunpack.c.l.b16 %v746_v28  ;;  %v613_v58 = vsel %vm466_vm5, %v585_v54, 0.0  ;;  %v8392_v50 = vld [vmem:[%s9200_s10 + $0x84] sm:$0x1]  ;;  %v1130_v28 = vadd.f32 %v9212_v15, %v1110_v38  ;;  %vm1037_vm14 = vcmask 916480  }
  0x65   : > { %1504 = vrot.lane.b32.xlu1 %v1499_v13, %s9116_s19  ;;  %1491 = vrot.lane.b32.xlu0 %v1486_v57, %s9114_s17  ;;  %v614_v13 = vsel %vm473_vm6, %v586_v27, 0.0  ;;  %v750_v40 = vrot.slane %v748_v35, 4  ;;  %v753_v44 = vrot.slane %v751_v63, 5  ;;  %v634_v25 = vmul.f32 0.0, %v613_v58  ;;  %v9611_v63 = vld [vmem:[%s15275_s3 + $0x80] sm:$0xff] }
  0x66   : > { %v888_v43 = vpack.c.b16 %v883_v36, %v882_v21  ;;  %v635_v39 = vmul.f32 0.0, %v614_v13  ;;  %v759_v53 = vrot.slane %v757_v2, 5  ;;  %v1091_v29 = vunpack.c.l.bf16 %v8392_v50  ;;  %6084 = vmatpush.bf16.msra.mxu0 %v9611_v63 }
  0x67   : > { %v754_v46 = vor.u32 %v753_v44, %v750_v40  ;;  %v9586_v62 = vpack.c.bf16 %v634_v25, %v634_v25  ;;  %v1423_v21 = vunpack.c.l.b16 %v9470_v42  ;;  %v872_v42 = vunpack.c.l.b16 %v9567_v31  ;;  %v494_v40 = vld [vmem:[%s9200_s10 + $0x40] sm:$0xf] }
  0x68   : > { %v9592_v49 = vpack.c.bf16 %v635_v39, %v635_v39  ;;  %v1111_v12 = vmul.f32 %v9189_v7, %v1091_v29  ;;  %v1092_v13 = vunpack.c.l.bf16 %v8393_v17  ;;  %v1150_v39 = vmax.f32 %v1130_v28, 0.0  ;;  %v495_v29 = vld [vmem:[%s9200_s10 + $0x44] sm:$0x1]  ;;  %v9646_v17 = vld [vmem:[%s15275_s3 + $0x78] sm:$0xff] }
  0x69   : > { %v755_v9 = vrot.slane %v754_v46, 4  ;;  %v762_v57 = vshrl.u32 %v9586_v62, 16  ;;  %v765_v32 = vshll.u32 %v9586_v62, 16  ;;  %v1473_v44 = vpack.c.b16 %v1423_v21, %v1422_v16 }
  0x6a   : > { %v771_v11 = vshll.u32 %v9592_v49, 16  ;;  %v1131_v58 = vadd.f32 %v9212_v15, %v1111_v12  ;;  %v921_v46 = vpack.c.b16 %v872_v42, %v871_v51  ;;  %v1112_v38 = vmul.f32 %v9189_v7, %v1092_v13  ;;  %6085 = vmatpush.bf16.msra.mxu0 %v9646_v17 }
  0x6b   : > { %v760_v37 = vsel %vm9227_vm7, %v755_v9, %v759_v53  ;;  %v764_v54 = vrot.slane %v762_v57, 4  ;;  %v767_v27 = vrot.slane %v765_v32, 5  ;;  %v1369_v53 = vrot.slane %v9523_v48, 5 }
  0x6c   : > { %971 = vrot.lane.b32.xlu2 %v888_v43, %s9115_s18  ;;  %v884_v35 = vunpack.c.l.b16 %v760_v37  ;;  %v773_v2 = vrot.slane %v771_v11, 5  ;;  %v521_v9 = vunpack.c.l.bf16 %v494_v40  ;;  %v1151_v16 = vmax.f32 %v1131_v58, 0.0  ;;  %v8394_v58 = vld [vmem:[%s9200_s10 + $0x8c] sm:$0x1] }
  0x6d   : > { %894 = vrot.lane.b32.xlu1 %v888_v43, %s9112_s15  ;;  %1524 = vrot.lane.b32.xlu0 %v9590_v59, %s9115_s18  ;;  %v768_v26 = vor.u32 %v767_v27, %v764_v54  ;;  %v8404_v43 = vrot.slane %v9521_v47, 9  ;;  %v1424_v57 = vunpack.c.l.b16 %v9521_v47  ;;  %v816_v32 = vrot.slane %v9552_v6, 5 }
  0x6e   : > { %v934_v25 = vpack.c.b16 %v884_v35, %v883_v36  ;;  %v8374_v36 = vrot.slane %v9468_v41, 9  ;;  %v1170_v48 = vsel %vm466_vm5, %v1150_v39, 0.0  ;;  %v522_v11 = vunpack.c.l.bf16 %v495_v29 }
  0x6f   : > { %v769_v50 = vrot.slane %v768_v26, 4  ;;  %v544_v12 = vmul.f32 %v9189_v7, %v521_v9  ;;  %v15280_v47 = vunpack.c.l.b16 %v9586_v62  ;;  %v9640_v41 = vsel %vm9191_vm2, %v8404_v43, %v1369_v53 }
  0x70   : > { %v1132_v6 = vadd.f32 %v9212_v15, %v1112_v38  ;;  %v1171_v37 = vsel %vm473_vm6, %v1151_v16, 0.0  ;;  %v545_v54 = vmul.f32 %v9189_v7, %v522_v11  ;;  %v9652_v28 = vpack.c.bf16 %v1170_v48, %v1170_v48 }
  0x71   : > { %v774_v4 = vsel %vm9227_vm7, %v769_v50, %v773_v2  ;;  %v567_v27 = vadd.f32 %v9212_v15, %v544_v12  ;;  %v9656_v26 = vsel %vm9191_vm2, %v8374_v36, %v816_v32  ;;  %v9662_v2 = vld [vmem:[%s15275_s3 + $0x70] sm:$0xff]  ;;  %v9668_v40 = vpack.c.b16 %v1424_v57, %v1423_v21 }
  0x72   : > { %v9631_v51 = vunpack.c.l.b16 %v774_v4  ;;  %v9674_v50 = vpack.c.b16 %v15280_v47, %v872_v42  ;;  %v9676_v43 = vpack.c.bf16 %v1171_v37, %v1171_v37  ;;  %v1152_v39 = vmax.f32 %v1132_v6, 0.0  ;;  %6086 = vmatpush.bf16.msra.mxu0 %v9662_v2  ;;  %v8395_v4 = vld [vmem:[%s9200_s10 + $0x90] sm:$0xf] }
  0x73   : > { %v903_v53 = vunpack.c.l.b16 %v9656_v26  ;;  %v1425_v29 = vunpack.c.l.b16 %v9652_v28  ;;  %v8375_v21 = vrot.slane %v9567_v31, 9  ;;  %v820_v9 = vrot.slane %v9569_v20, 5 }
  0x74   : > { %1478 = vrot.lane.b32.xlu2 %v1473_v44, %s9110_s13  ;;  %v9666_v13 = vpack.c.b16 %v9631_v51, %v884_v35  ;;  %v1456_v44 = vunpack.c.l.b16 %v9640_v41  ;;  %v1093_v35 = vunpack.c.l.bf16 %v8394_v58  ;;  %v8405_v20 = vrot.slane %v9652_v28, 9 }
  0x75   : > { %940 = vrot.lane.b32.xlu1 %v934_v25, %s9114_s17  ;;  %927 = vrot.lane.b32.xlu0 %v921_v46, %s9110_s13  ;;  %v568_v25 = vadd.f32 %v9212_v15, %v545_v54  ;;  %v587_v46 = vmax.f32 %v567_v27, 0.0  ;;  %v1373_v36 = vrot.slane %v9676_v43, 5  ;;  %v1172_v32 = vsel %vm466_vm5, %v1152_v39, 0.0  ;;  %v8396_v27 = vld [vmem:[%s9200_s10 + $0x94] sm:$0x1] }
  0x76   : > { %v9694_v31 = vpack.c.b16 %v1456_v44, %v1455_v33  ;;  %v9710_v33 = vld [vmem:[%s15275_s3 + $0x68] sm:$0xff]  ;;  %v1113_v11 = vmul.f32 %v9189_v7, %v1093_v35  ;;  %v1304_v6 = vshrl.u32 %v9652_v28, 16  ;;  %v1307_v37 = vshll.u32 %v9652_v28, 16 }
  0x77   : > { %v588_v38 = vmax.f32 %v568_v25, 0.0  ;;  %v615_v42 = vsel %vm466_vm5, %v587_v46, 0.0  ;;  %v1094_v54 = vunpack.c.l.bf16 %v8395_v4  ;;  %v1474_v58 = vpack.c.b16 %v1425_v29, %v1424_v57  ;;  %6087 = vmatpush.bf16.msra.mxu0 %v9710_v33 }
  0x78   : > { %15504 = vst [vmem:[#allocation7_spill] sm:$0xff] %v9694_v31  ;;  %v636_v16 = vmul.f32 0.0, %v615_v42  ;;  %v9724_v25 = vpack.c.b16 %v903_v53, %v902_v60  ;;  %v9728_v7 = vsel %vm9191_vm2, %v8375_v21, %v820_v9  ;;  %v9731_v39 = vpack.c.bf16 %v1172_v32, %v1172_v32  ;;  %v9741_v60 = vld [vmem:[%s15275_s3 + $0x60] sm:$0xff] }
  0x79   : > { %v616_v48 = vsel %vm473_vm6, %v588_v38, 0.0  ;;  %v8376_v35 = vrot.slane %v9586_v62, 9  ;;  %v824_v21 = vrot.slane %v9592_v49, 5  ;;  %v1133_v9 = vadd.f32 %v9212_v15, %v1113_v11 }
  0x7a   : > { %v9713_v12 = vpack.c.bf16 %v636_v16, %v636_v16  ;;  %v637_v46 = vmul.f32 0.0, %v616_v48  ;;  %v1095_v42 = vunpack.c.l.bf16 %v8396_v27  ;;  %v9748_v4 = vsel %vm9191_vm2, %v8405_v20, %v1373_v36  ;;  %v9753_v48 = vld [vmem:[%s15276_s4] ss:$0 sm:$0xff] }
  0x7b   : > { %v1306_v16 = vrot.slane %v1304_v6, 4  ;;  %v1309_v32 = vrot.slane %v1307_v37, 5  ;;  %v1114_v19 = vmul.f32 %v9753_v48, %v1094_v54  ;;  %v904_v47 = vunpack.c.l.b16 %v9728_v7  ;;  %6088 = vmatpush.bf16.msra.mxu0 %v9741_v60  ;;  %v8917_v6 = vld [vmem:[%s15275_s3 + $0x28] sm:$0xff]  ;;  %v9771_v54 = vld [vmem:[%s15275_s3 + $0x58] sm:$0xff]  ;;  %v9776_v27 = vld [vmem:[%s15277_s5] ss:$0 sm:$0xff] }
  0x7c   : > { %1514 = vrot.lane.b32.xlu2 %v9668_v40, %s9111_s14  ;;  %v827_v38 = vshrl.u32 %v9713_v12, 16  ;;  %v830_v57 = vshll.u32 %v9713_v12, 16  ;;  %v15282_v15 = vunpack.c.l.b16 %v9731_v39  ;;  %v657_v49 = vpack.c.bf16 %v637_v46, %v637_v46  ;;  %6210 = vmatpush.bf16.msra.mxu2 %v8917_v6 }
  0x7d   : > { %973 = vrot.lane.b32.xlu1 %v9666_v13, %s9115_s18  ;;  %963 = vrot.lane.b32.xlu0 %v9674_v50, %s9111_s14  ;;  %v15284_v11 = vunpack.c.l.b16 %v9748_v4  ;;  %v1153_v37 = vmax.f32 %v1133_v9, 0.0  ;;  %v1115_v7 = vmul.f32 %v9753_v48, %v1095_v42  ;;  %v9782_v46 = vsel %vm9191_vm2, %v8376_v35, %v824_v21 }
  0x7e   : > { %v829_v20 = vrot.slane %v827_v38, 4  ;;  %v832_v36 = vrot.slane %v830_v57, 5  ;;  %v1310_v38 = vor.u32 %v1309_v32, %v1306_v16  ;;  %v1313_v57 = vshll.u32 %v9676_v43, 16  ;;  %v8916_v16 = vld [vmem:[%s15275_s3 + $0x20] sm:$0xff]  ;;  %v9803_v32 = vld [vmem:[%s15275_s3 + $0x50] sm:$0xff] }
  0x7f   : > { %v1318_v18 = vshrl.u32 %v9731_v39, 16  ;;  %v1321_v9 = vshll.u32 %v9731_v39, 16  ;;  %6089 = vmatpush.bf16.msra.mxu0 %v9771_v54  ;;  %v9793_v35 = vpack.c.b16 %v15282_v15, %v1425_v29  ;;  %v947_v43 = vpack.c.b16 %v904_v47, %v903_v53 }
  0x80   : > { %v833_v21 = vor.u32 %v832_v36, %v829_v20  ;;  %v836_v42 = vshll.u32 %v657_v49, 16  ;;  %v1500_v28 = vpack.c.b16 %v15284_v11, %v1456_v44  ;;  %v1173_v26 = vsel %vm473_vm6, %v1153_v37, 0.0  ;;  %6211 = vmatpush.bf16.msra.mxu2 %v8916_v16 }
  0x81   : > { %v15285_v20 = vunpack.c.l.b16 %v9782_v46  ;;  %v1311_v36 = vrot.slane %v1310_v38, 4  ;;  %v1315_v6 = vrot.slane %v1313_v57, 5  ;;  %v8377_v41 = vrot.slane %v9713_v12, 9  ;;  %v8412_v57 = vld [vmem:[%s9200_s10 + $0xac] sm:$0x1] }
  0x82   : > { %v844_v15 = vrot.slane %v657_v49, 5  ;;  %v1320_v0 = vrot.slane %v1318_v18, 4  ;;  %v1323_v44 = vrot.slane %v1321_v9, 5  ;;  %v838_v37 = vrot.slane %v836_v42, 5  ;;  %v8915_v49 = vld [vmem:[%s15275_s3 + $0x18] sm:$0xff] }
  0x83   : > { %6090 = vmatpush.bf16.msra.mxu0 %v9803_v32  ;;  %v9822_v38 = vpack.c.bf16 %v1173_v26, %v1173_v26  ;;  %v9845_v16 = vpack.c.b16 %v15285_v20, %v904_v47  ;;  %vm6406_vm15 = vcmask 27648   ;;  %vm6449_vm0 = vcmask 1040384  }
  0x84   : > { %914 = vrot.lane.b32.xlu2 %v9724_v25, %s9113_s16  ;;  %v9851_v26 = vsel %vm9191_vm2, %v8377_v41, %v844_v15  ;;  %6212 = vmatpush.bf16.msra.mxu2 %v8915_v49 }
  0x85   : > { %1480 = vrot.lane.b32.xlu1 %v1474_v58, %s9110_s13  ;;  %1467 = vrot.lane.b32.xlu0 %v9694_v31, %s9113_s16  ;;  %v1134_v58 = vadd.f32 %v9776_v27, %v1114_v19  ;;  %v1135_v19 = vadd.f32 %v9776_v27, %v1115_v7  ;;  %v8411_v7 = vld [vmem:[%s9200_s10 + $0xa8] sm:$0xf]  ;;  %v1327_v20 = vshll.u32 %v9822_v38, 16 }
  0x86   : > { %v1626_v42 = vunpack.c.l.bf16 %v8411_v7  ;;  %v8413_v7 = vld [vmem:[%s9200_s10 + $0xb0] sm:$0xf] }
  0x87   : > { %v1154_v14 = vmax.f32 %v1134_v58, 0.0  ;;  %v1155_v29 = vmax.f32 %v1135_v19, 0.0  ;;  %v1628_v15 = vunpack.c.l.bf16 %v8413_v7  ;;  %v8415_v7 = vld [vmem:[%s9200_s10 + $0xb8] sm:$0xf] }
  0x88   : > { %v1646_v11 = vmul.f32 %v9753_v48, %v1626_v42 }
  0x89   : > { %v1174_v53 = vsel %vm466_vm5, %v1154_v14, 0.0  ;;  %v834_v14 = vrot.slane %v833_v21, 4  ;;  %v1175_v18 = vsel %vm473_vm6, %v1155_v29, 0.0  ;;  %v9841_v21 = vld [vmem:[%s15275_s3 + $0x88] sm:$0xff]  ;;  %v1627_v29 = vunpack.c.l.bf16 %v8412_v57  ;;  %v8414_v57 = vld [vmem:[%s9200_s10 + $0xb4] sm:$0x1] }
  0x8a   : > { %v9814_v58 = vpack.c.bf16 %v1174_v53, %v1174_v53  ;;  %v1324_v53 = vor.u32 %v1323_v44, %v1320_v0  ;;  %v9859_v5 = vpack.c.bf16 %v1175_v18, %v1175_v18  ;;  %6120 = vmatpush.bf16.msra.mxu1 %v9841_v21  ;;  %v8914_v0 = vld [vmem:[%s15275_s3 + $0x10] sm:$0xff]  ;;  %v1666_v44 = vadd.f32 %v9776_v27, %v1646_v11 }
  0x8b   : > { %v839_v47 = vsel %vm9227_vm7, %v834_v14, %v838_v37  ;;  %v1647_v41 = vmul.f32 %v9753_v48, %v1627_v29  ;;  %v1648_v37 = vmul.f32 %v9753_v48, %v1628_v15  ;;  %v15287_v18 = vunpack.c.l.b16 %v9851_v26  ;;  %6213 = vmatpush.bf16.msra.mxu2 %v8914_v0 }
  0x8c   : > { %953 = vrot.lane.b32.xlu2 %v947_v43, %s9116_s19  ;;  %v1380_v9 = vshrl.u32 %v9814_v58, 16  ;;  %v1383_v19 = vshll.u32 %v9814_v58, 16  ;;  %v9836_v43 = vld [vmem:[%s15275_s3 + $0x48] sm:$0xff]  ;;  %v9882_v11 = vunpack.c.l.b16 %v839_v47  ;;  %v1325_v42 = vrot.slane %v1324_v53, 4 }
  0x8d   : > { %1516 = vrot.lane.b32.xlu1 %v9793_v35, %s9111_s14  ;;  %1506 = vrot.lane.b32.xlu0 %v1500_v28, %s9116_s19  ;;  %v1316_v28 = vsel %vm9227_vm7, %v1311_v36, %v1315_v6  ;;  %v1668_v29 = vadd.f32 %v9776_v27, %v1648_v37  ;;  %v1389_v15 = vshll.u32 %v9859_v5, 16  ;;  %v15505_v53 = vmov 0.0|0.0  }
  0x8e   : > { %6091 = vmatpush.bf16.msra.mxu0 %v9836_v43  ;;  %v1382_v36 = vrot.slane %v1380_v9, 4  ;;  %v1385_v6 = vrot.slane %v1383_v19, 5  ;;  %v9868_v14 = vunpack.c.l.b16 %v1316_v28  ;;  %8681 = vmatmul.msk.bf16.vlgmr.msra.gmra.mxu1 %vm979_vm8, %v9528_v55  ;;  %v1686_v9 = vmax.f32 %v1666_v44, 0.0 }
  0x8f   : > { %v1629_v19 = vunpack.c.l.bf16 %v8414_v57  ;;  %v1329_v28 = vrot.slane %v1327_v20, 5  ;;  %v9895_v20 = vunpack.c.l.b16 %v15505_v53 }
  0x90   : > { %v1386_v0 = vor.u32 %v1385_v6, %v1382_v36  ;;  %v15507_v36 = vunpack.c.l.b16 %v9782_v46  ;;  %v1487_v57 = vpack.c.b16 %v9868_v14, %v9571_v24  ;;  %v8912_v46 = vld [vmem:[%s15275_s3] sm:$0xff] }
  0x91   : > { %15506 = vst [vmem:[#allocation8_spill] sm:$0xff] %v9895_v20 }
  0x92   : > { %6452 = vmatpush.bf16.msrb.mxu0 %v9611_v63  ;;  %v1667_v63 = vadd.f32 %v9776_v27, %v1647_v41  ;;  %v8913_v41 = vld [vmem:[%s15275_s3 + $0x8] sm:$0xff]  ;;  %v948_v6 = vpack.c.b16 %v15287_v18, %v15507_v36  ;;  %v1387_v53 = vrot.slane %v1386_v0, 4  ;;  %v8416_v18 = vld [vmem:[%s9200_s10 + $0xbc] sm:$0x1] }
  0x93   : > { %6214 = vmatpush.bf16.msra.mxu2 %v8913_v41  ;;  %v1688_v41 = vmax.f32 %v1668_v29, 0.0 }
  0x94   : > { %v9872_v49 = vpop.permute.xlu0 %1476  ;;  %1447 = vrot.lane.b32.xlu2 %v9590_v59, %s9112_s15  ;;  %v1687_v44 = vmax.f32 %v1667_v63, 0.0  ;;  %v1649_v59 = vmul.f32 %v9753_v48, %v1629_v19  ;;  %v1330_v19 = vsel %vm9227_vm7, %v1325_v42, %v1329_v28  ;;  %v1391_v42 = vrot.slane %v1389_v15, 5 }
  0x95   : > { %916 = vrot.lane.b32.xlu1 %v9845_v16, %s9113_s16  ;;  %896 = vrot.lane.b32.xlu0 %v9666_v13, %s9112_s15  ;;  %v1630_v13 = vunpack.c.l.bf16 %v8415_v7  ;;  %v9918_v7 = vld [vmem:[%s15275_s3 + $0x40] sm:$0xff]  ;;  %v15508_v15 = vunpack.c.l.b16 %v9254_v56  ;;  %v1471_v56 = vunpack.c.l.b16 %v9814_v58 }
  0x96   : > { %6453 = vmatpush.bf16.msrb.mxu0 %v9646_v17  ;;  %v9899_v37 = vpop.permute.xlu2 %959  ;;  %v1706_v17 = vsel %vm466_vm5, %v1686_v9, 0.0  ;;  %v1669_v63 = vadd.f32 %v9776_v27, %v1649_v59  ;;  %v1707_v24 = vsel %vm473_vm6, %v1687_v44, 0.0  ;;  %v935_v59 = vpack.c.b16 %v9882_v11, %v9631_v51  ;;  %6244 = vmatpush.bf16.msra.mxu3 %v9918_v7 }
  0x97   : > { %v9897_v47 = vpop.permute.xlu1 %923  ;;  %v1650_v9 = vmul.f32 %v9753_v48, %v1630_v13  ;;  %v9927_v36 = vpack.c.bf16 %v1706_v17, %v1706_v17  ;;  %6215 = vmatpush.bf16.msra.mxu2 %v8912_v46  ;;  %v9932_v44 = vpack.c.bf16 %v1707_v24, %v1707_v24  ;;  %v9938_v51 = vunpack.c.l.b16 %v1330_v19 }
  0x98   : > { %v1689_v28 = vmax.f32 %v1669_v63, 0.0  ;;  %v1427_v13 = vpack.c.b16 %v15508_v15, %v9895_v20  ;;  %v1392_v17 = vsel %vm9227_vm7, %v1387_v53, %v1391_v42  ;;  %v968_v46 = vpack.c.b16 %v9287_v23, %v9882_v11 }
  0x99   : > { %v1670_v0 = vadd.f32 %v9776_v27, %v1650_v9  ;;  %8721 = vmatmul.msk.bf16.vlgmr.msra.gmra.mxu3 %vm979_vm8, %v9441_v52  ;;  %v8430_v24 = vrot.slane %v9927_v36, 9  ;;  %v1377_v9 = vrot.slane %v9822_v38, 5  ;;  %v9966_v11 = vunpack.c.l.b16 %v1392_v17 }
  0x9a   : > { %6454 = vmatpush.bf16.msrb.mxu0 %v9662_v2  ;;  %v1709_v29 = vsel %vm473_vm6, %v1689_v28, 0.0  ;;  %v1708_v2 = vsel %vm466_vm5, %v1688_v41, 0.0  ;;  %v1899_v41 = vrot.slane %v9932_v44, 5  ;;  %v918_v53 = vunpack.c.l.b16 %v9713_v12 }
  0x9b   : > { %6488 = vmatpush.bf16.msrb.mxu2 %v9841_v21  ;;  %v9960_v52 = vpack.c.bf16 %v1708_v2, %v1708_v2  ;;  %v1690_v42 = vmax.f32 %v1670_v0, 0.0  ;;  %v15509_v2 = vunpack.c.l.b16 %v9264_v3 }
  0x9c   : > { %v9930_v55 = vpop.permute.xlu0 %1512  ;;  %1493 = vrot.lane.b32.xlu2 %v1487_v57, %s9114_s17  ;;  %v1631_v57 = vunpack.c.l.bf16 %v8416_v18  ;;  %v8406_v18 = vrot.slane %v9731_v39, 9  ;;  %v1900_v15 = vsel %vm9191_vm2, %v8430_v24, %v1899_v41  ;;  %v15289_v24 = vunpack.c.l.b16 %v9927_v36 }
  0x9d   : > { %955 = vrot.lane.b32.xlu1 %v948_v6, %s9116_s19  ;;  %942 = vrot.lane.b32.xlu0 %v935_v59, %s9114_s17  ;;  %v9951_v6 = vpack.c.bf16 %v1709_v29, %v1709_v29  ;;  %v1442_v59 = vpack.c.b16 %v9938_v51, %v9868_v14  ;;  %v9976_v38 = vpack.c.b16 %v15509_v2, %v9895_v20  ;;  %v15510_v14 = vunpack.c.l.b16 %v9731_v39  ;;  %v8419_v2 = vld [vmem:[%s9200_s10 + $0xc8] sm:$0xf] }
  0x9e   : > { %v1464_v19 = vpop.permute.xlu2 %1463  ;;  %6455 = vmatpush.bf16.msrb.mxu0 %v9710_v33  ;;  %v8431_v33 = vrot.slane %v9960_v52, 9  ;;  %v1651_v29 = vmul.f32 %v9753_v48, %v1631_v57  ;;  %v9987_v3 = vsel %vm9191_vm2, %v8406_v18, %v1377_v9  ;;  %8682 = vmatmul.msk.bf16.gmra.mxu1 %vm979_vm8, %v9694_v31  ;;  %v15511_v39 = vunpack.c.l.b16 %v9586_v62  ;;  %v8417_v57 = vld [vmem:[%s9200_s10 + $0xc0] sm:$0xf] }
  0x9f   : > { %v1444_v63 = vpop.permute.xlu1 %1443  ;;  %v1903_v28 = vrot.slane %v9951_v6, 5  ;;  %v1475_v0 = vpack.c.b16 %v1471_v56, %v15510_v14  ;;  %v1710_v17 = vsel %vm466_vm5, %v1690_v42, 0.0  ;;  %v1998_v9 = vunpack.c.l.b16 %v1900_v15 }
  0xa0   : > { %v1534_v21 = vsel %vm979_vm8, %v1427_v13, %v1444_v63  ;;  %v1488_v63 = vpack.c.b16 %v9966_v11, %v9938_v51  ;;  %v1671_v41 = vadd.f32 %v9776_v27, %v1651_v29  ;;  %v15290_v42 = vunpack.c.l.b16 %v9987_v3 }
  0xa1   : > { %v1545_v13 = vsel %vm992_vm9, %v1534_v21, %v1464_v19  ;;  %v10005_v19 = vsel %vm9191_vm2, %v8431_v33, %v1903_v28  ;;  %v10014_v21 = vpack.c.bf16 %v1710_v17, %v1710_v17  ;;  %v1797_v33 = vshll.u32 %v9960_v52, 16 }
  0xa2   : > { %6456 = vmatpush.bf16.msrb.mxu0 %v9741_v60  ;;  %v922_v60 = vpack.c.b16 %v918_v53, %v15511_v39  ;;  %v1553_v51 = vsel %vm1001_vm10, %v1545_v13, %v9872_v49  ;;  %v1632_v28 = vunpack.c.l.bf16 %v8417_v57  ;;  %v8407_v14 = vrot.slane %v9814_v58, 9  ;;  %v8418_v39 = vld [vmem:[%s9200_s10 + $0xc4] sm:$0x1] }
  0xa3   : > { %v1397_v15 = vrot.slane %v9859_v5, 5  ;;  %v1521_v49 = vpack.c.b16 %v9287_v23, %v9966_v11  ;;  %v958_v13 = vpack.c.b16 %v9895_v20, %v918_v53  ;;  %v1691_v17 = vmax.f32 %v1671_v41, 0.0 }
  0xa4   : > { %v9979_v12 = vpop.permute.xlu0 %910  ;;  %1526 = vrot.lane.b32.xlu2 %v1442_v59, %s9115_s18  ;;  %v10029_v57 = vpack.c.b16 %v1998_v9, %v9233_v34  ;;  %v15512_v5 = vunpack.c.l.b16 %v9748_v4  ;;  %v1799_v53 = vrot.slane %v1797_v33, 5  ;;  %v1633_v41 = vunpack.c.l.bf16 %v8418_v39 }
  0xa5   : > { %1449 = vrot.lane.b32.xlu1 %v1442_v59, %s9112_s15  ;;  %975 = vrot.lane.b32.xlu0 %v968_v46, %s9115_s18  ;;  %v15291_v59 = vunpack.c.l.b16 %v9960_v52  ;;  %v1794_v46 = vshrl.u32 %v9960_v52, 16  ;;  %v15513_v4 = vunpack.c.l.b16 %v10005_v19 }
  0xa6   : > { %v1503_v18 = vpop.permute.xlu2 %1502  ;;  %6457 = vmatpush.bf16.msrb.mxu0 %v9771_v54  ;;  %v10023_v54 = vpack.c.b16 %v9895_v20, %v1471_v56  ;;  %v10041_v56 = vpack.c.b16 %v15290_v42, %v15512_v5 }
  0xa7   : > { %v1490_v62 = vpop.permute.xlu1 %1489  ;;  %v10035_v58 = vpack.c.b16 %v15291_v59, %v15289_v24  ;;  %v10051_v24 = vpack.c.b16 %v15513_v4, %v1998_v9  ;;  %v1653_v9 = vmul.f32 %v9753_v48, %v1633_v41  ;;  %v1634_v4 = vunpack.c.l.bf16 %v8419_v2 }
  0xa8   : > { %v1561_v29 = vsel %vm1010_vm11, %v1553_v51, %v1490_v62  ;;  %v1796_v62 = vrot.slane %v1794_v46, 4  ;;  %v1652_v51 = vmul.f32 %v9753_v48, %v1632_v28 }
  0xa9   : > { %v1569_v11 = vsel %vm1019_vm12, %v1561_v29, %v1503_v18  ;;  %v1808_v18 = vshrl.u32 %v10014_v21, 16  ;;  %v8420_v29 = vld [vmem:[%s9200_s10 + $0xcc] sm:$0x1]  ;;  %8722 = vmatmul.msk.bf16.gmra.mxu3 %vm979_vm8, %v9724_v25  ;;  %v1673_v42 = vadd.f32 %v9776_v27, %v1653_v9 }
  0xaa   : > { %6458 = vmatpush.bf16.msrb.mxu0 %v9803_v32  ;;  %v10056_v32 = vsel %vm9191_vm2, %v8407_v14, %v1397_v15  ;;  %v1672_v28 = vadd.f32 %v9776_v27, %v1652_v51  ;;  %v1577_v14 = vsel %vm1028_vm13, %v1569_v11, %v9930_v55  ;;  %v1780_v15 = vshrl.u32 %v9927_v36, 16 }
  0xab   : > { %v1800_v51 = vor.u32 %v1799_v53, %v1796_v62  ;;  %v1635_v2 = vunpack.c.l.bf16 %v8420_v29  ;;  %v1654_v11 = vmul.f32 %v9753_v48, %v1634_v4  ;;  %v15293_v29 = vunpack.c.l.b16 %v10056_v32 }
  0xac   : > { %929 = vrot.lane.b32.xlu2 %v922_v60, %s9110_s13  ;;  %v891_v33 = vpop.permute.xlu0 %890  ;;  %v1811_v60 = vshll.u32 %v10014_v21, 16  ;;  %v1692_v46 = vmax.f32 %v1672_v28, 0.0  ;;  %v1782_v53 = vrot.slane %v1780_v15, 4 }
  0xad   : > { %1495 = vrot.lane.b32.xlu1 %v1488_v63, %s9114_s17  ;;  %1482 = vrot.lane.b32.xlu0 %v1475_v0, %s9110_s13  ;;  %v1711_v63 = vsel %vm473_vm6, %v1691_v17, 0.0  ;;  %v1783_v0 = vshll.u32 %v9927_v36, 16  ;;  %v8421_v17 = vld [vmem:[%s9200_s10 + $0xd0] sm:$0xf]  ;;  %v982_v55 = vsel %vm979_vm8, %v9976_v38, %v891_v33  ;;  %v1674_v9 = vadd.f32 %v9776_v27, %v1654_v11  ;;  %v8422_v38 = vld [vmem:[%s9200_s10 + $0xd4] sm:$0x1] }
  0xae   : > { %v950_v5 = vpop.permute.xlu2 %949  ;;  %6459 = vmatpush.bf16.msrb.mxu0 %v9836_v43  ;;  %v1636_v25 = vunpack.c.l.bf16 %v8421_v17  ;;  %v10082_v59 = vpack.c.bf16 %v1711_v63, %v1711_v63  ;;  %v1810_v43 = vrot.slane %v1808_v18, 4  ;;  %v1813_v31 = vrot.slane %v1811_v60, 5  ;;  %8683 = vmatmul.msk.bf16.gmra.mxu1 %vm979_vm8, %v10041_v56 }
  0xaf   : > { %v1523_v39 = vpop.permute.xlu1 %1522  ;;  %v1712_v62 = vsel %vm466_vm5, %v1692_v46, 0.0  ;;  %v994_v33 = vsel %vm992_vm9, %v982_v55, %v9979_v12  ;;  %v15514_v46 = vunpack.c.l.b16 %v9960_v52  ;;  %v15515_v18 = vunpack.c.l.b16 %v10014_v21 }
  0xb0   : > { %v10075_v41 = vsel %vm1037_vm14, %v1577_v14, %v1523_v39  ;;  %v1785_v39 = vrot.slane %v1783_v0, 5  ;;  %v1656_v28 = vmul.f32 %v9753_v48, %v1636_v25  ;;  %v1693_v14 = vmax.f32 %v1673_v42, 0.0 }
  0xb1   : > { %6092 = vmatmul.bf16.vlgmr.msra.gmra.mxu0 %v10075_v41  ;;  %v10092_v63 = vpack.c.bf16 %v1712_v62, %v1712_v62  ;;  %v10102_v60 = vpack.c.b16 %v15515_v18, %v15514_v46  ;;  %v10104_v15 = vrot.slane %v1800_v51, 4  ;;  %v1803_v12 = vshll.u32 %v9951_v6, 16 }
  0xb2   : > { %v1655_v42 = vmul.f32 %v9753_v48, %v1635_v2  ;;  %v1814_v0 = vor.u32 %v1813_v31, %v1810_v43  ;;  %v1694_v4 = vmax.f32 %v1674_v9, 0.0  ;;  %v1003_v52 = vsel %vm1001_vm10, %v994_v33, %v9897_v47  ;;  %v8423_v33 = vld [vmem:[%s9200_s10 + $0xd8] sm:$0xf] }
  0xb3   : > { %v1817_v51 = vshll.u32 %v10082_v59, 16  ;;  %v1786_v11 = vor.u32 %v1785_v39, %v1782_v53  ;;  %v1676_v6 = vadd.f32 %v9776_v27, %v1656_v28  ;;  %v1713_v31 = vsel %vm473_vm6, %v1693_v14, 0.0 }
  0xb4   : > { %965 = vrot.lane.b32.xlu2 %v958_v13, %s9111_s14  ;;  %v1637_v13 = vunpack.c.l.bf16 %v8422_v38  ;;  %v8432_v47 = vrot.slane %v10014_v21, 9  ;;  %v1675_v62 = vadd.f32 %v9776_v27, %v1655_v42  ;;  %v1714_v53 = vsel %vm466_vm5, %v1694_v4, 0.0 }
  0xb5   : > { %1528 = vrot.lane.b32.xlu1 %v1521_v49, %s9115_s18  ;;  %1518 = vrot.lane.b32.xlu0 %v10023_v54, %s9111_s14  ;;  %v1789_v49 = vshll.u32 %v9932_v44, 16  ;;  %v1822_v44 = vshrl.u32 %v10092_v63, 16  ;;  %v1825_v54 = vshll.u32 %v10092_v63, 16  ;;  %v1907_v9 = vrot.slane %v10082_v59, 5 }
  0xb6   : > { %v893_v55 = vpop.permute.xlu2 %892  ;;  %v1657_v38 = vmul.f32 %v9753_v48, %v1637_v13  ;;  %v1787_v46 = vrot.slane %v1786_v11, 4  ;;  %v1696_v18 = vmax.f32 %v1676_v6, 0.0  ;;  %v1805_v42 = vrot.slane %v1803_v12, 5 }
  0xb7   : > { %v937_v17 = vpop.permute.xlu1 %936  ;;  %v970_v2 = vpop.permute.xlu0 %969  ;;  %v1791_v28 = vrot.slane %v1789_v49, 5  ;;  %v10133_v4 = vpack.c.bf16 %v1714_v53, %v1714_v53  ;;  %v1819_v59 = vrot.slane %v1817_v51, 5  ;;  %v1695_v49 = vmax.f32 %v1675_v62, 0.0 }
  0xb8   : > { %v1012_v25 = vsel %vm1010_vm11, %v1003_v52, %v937_v17  ;;  %v1824_v17 = vrot.slane %v1822_v44, 4  ;;  %v1827_v52 = vrot.slane %v1825_v54, 5  ;;  %v1638_v13 = vunpack.c.l.bf16 %v8423_v33  ;;  %v8424_v44 = vld [vmem:[%s9200_s10 + $0xdc] sm:$0x1] }
  0xb9   : > { %v1021_v43 = vsel %vm1019_vm12, %v1012_v25, %v950_v5  ;;  %v10131_v5 = vpack.c.bf16 %v1713_v31, %v1713_v31  ;;  %v15516_v12 = vunpack.c.l.b16 %v9987_v3  ;;  %v10147_v6 = vsel %vm9191_vm2, %v8432_v47, %v1907_v9  ;;  %8723 = vmatmul.msk.bf16.gmra.mxu3 %vm979_vm8, %v9845_v16 }
  0xba   : > { %v1030_v39 = vsel %vm1028_vm13, %v1021_v43, %v9899_v37  ;;  %v1815_v37 = vrot.slane %v1814_v0, 4  ;;  %v1677_v0 = vadd.f32 %v9776_v27, %v1657_v38  ;;  %v985_v51 = vsel %vm979_vm8, %v9385_v45, %v893_v55 }
  0xbb   : > { %v1039_v14 = vsel %vm1037_vm14, %v1030_v39, %v970_v2  ;;  %v1501_v11 = vpack.c.b16 %v15293_v29, %v15516_v12  ;;  %v1792_v3 = vsel %vm9227_vm7, %v1787_v46, %v1791_v28  ;;  %v1658_v31 = vmul.f32 %v9753_v48, %v1638_v13  ;;  %v8448_v29 = vld [vmem:[%s9200_s10 + $0x114] sm:$0x1] }
  0xbc   : > { %6216 = vmatmul.bf16.vlgmr.msra.gmra.mxu2 %v1039_v14  ;;  %1469 = vrot.lane.b32.xlu2 %v10041_v56, %s9113_s16  ;;  %v1806_v43 = vsel %vm9227_vm7, %v10104_v15, %v1805_v42  ;;  %v1828_v47 = vor.u32 %v1827_v52, %v1824_v17  ;;  %v1836_v45 = vshrl.u32 %v10133_v4, 16  ;;  %v1839_v55 = vshll.u32 %v10133_v4, 16 }
  0xbd   : > { %2022 = vrot.lane.b32.xlu1 %v10035_v58, %s9110_s13  ;;  %2009 = vrot.lane.b32.xlu0 %v10029_v57, %s9113_s16  ;;  %v1716_v58 = vsel %vm466_vm5, %v1696_v18, 0.0  ;;  %v1831_v57 = vshll.u32 %v10131_v5, 16  ;;  %v1820_v62 = vsel %vm9227_vm7, %v1815_v37, %v1819_v59  ;;  %v2000_v53 = vunpack.c.l.b16 %v10147_v6 }
  0xbe   : > { %v939_v25 = vpop.permute.xlu2 %938  ;;  %v1715_v39 = vsel %vm473_vm6, %v1695_v49, 0.0  ;;  %v10171_v9 = vpack.c.bf16 %v1716_v58, %v1716_v58  ;;  %v10174_v28 = vunpack.c.l.b16 %v1792_v3  ;;  %v1697_v15 = vmax.f32 %v1677_v0, 0.0 }
  0xbf   : > { %v926_v2 = vpop.permute.xlu1 %925  ;;  %v913_v54 = vpop.permute.xlu0 %912  ;;  %v1639_v38 = vunpack.c.l.bf16 %v8424_v44  ;;  %v1833_v33 = vrot.slane %v1831_v57, 5  ;;  %v8433_v14 = vrot.slane %v10092_v63, 9  ;;  %v1911_v46 = vrot.slane %v10131_v5, 5 }
  0xc0   : > { %v996_v16 = vsel %vm992_vm9, %v985_v51, %v913_v54  ;;  %v1678_v18 = vadd.f32 %v9776_v27, %v1658_v31  ;;  %v1829_v42 = vrot.slane %v1828_v47, 4  ;;  %v10179_v17 = vpack.c.bf16 %v1715_v39, %v1715_v39 }
  0xc1   : > { %v1838_v52 = vrot.slane %v1836_v45, 4  ;;  %v1841_v37 = vrot.slane %v1839_v55, 5  ;;  %v1005_v59 = vsel %vm1001_vm10, %v996_v16, %v926_v2  ;;  %v1850_v49 = vshrl.u32 %v10171_v9, 16 }
  0xc2   : > { %v1853_v13 = vshll.u32 %v10171_v9, 16  ;;  %v1979_v5 = vunpack.c.l.b16 %v1806_v43  ;;  %v10189_v12 = vunpack.c.l.b16 %v1820_v62  ;;  %v1717_v58 = vsel %vm473_vm6, %v1697_v15, 0.0 }
  0xc3   : > { %v1659_v0 = vmul.f32 %v9753_v48, %v1639_v38  ;;  %v15517_v3 = vunpack.c.l.b16 %v10005_v19  ;;  %v1985_v57 = vpack.c.b16 %v10174_v28, %v9287_v23  ;;  %v1698_v31 = vmax.f32 %v1678_v18, 0.0 }
  0xc4   : > { %1508 = vrot.lane.b32.xlu2 %v1501_v11, %s9116_s19  ;;  %v1014_v44 = vsel %vm1010_vm11, %v1005_v59, %v939_v25  ;;  %v1834_v43 = vsel %vm9227_vm7, %v1829_v42, %v1833_v33  ;;  %v1842_v47 = vor.u32 %v1841_v37, %v1838_v52  ;;  %v1845_v19 = vshll.u32 %v10179_v17, 16  ;;  %v8426_v59 = vld [vmem:[%s9200_s10 + $0xe4] sm:$0x1] }
  0xc5   : > { %2058 = vrot.lane.b32.xlu1 %v10102_v60, %s9111_s14  ;;  %2048 = vrot.lane.b32.xlu0 %v10051_v24, %s9116_s19  ;;  %v10198_v11 = vpack.c.b16 %v2000_v53, %v15517_v3  ;;  %v10204_v24 = vsel %vm9191_vm2, %v8433_v14, %v1911_v46  ;;  %v10211_v55 = vpack.c.bf16 %v1717_v58, %v1717_v58  ;;  %v1852_v62 = vrot.slane %v1850_v49, 4  ;;  %v8441_v49 = vld [vmem:[%s9200_s10 + $0xf8] sm:$0xf] }
  0xc6   : > { %v972_v2 = vpop.permute.xlu2 %971  ;;  %v1855_v39 = vrot.slane %v1853_v13, 5  ;;  %v10215_v15 = vpack.c.b16 %v10189_v12, %v1979_v5  ;;  %v1679_v25 = vadd.f32 %v9776_v27, %v1659_v0  ;;  %v1718_v33 = vsel %vm466_vm5, %v1698_v31, 0.0  ;;  %v8425_v0 = vld [vmem:[%s9200_s10 + $0xe0] sm:$0xf] }
  0xc7   : > { %v962_v51 = vpop.permute.xlu1 %961  ;;  %15518 = vst [vmem:[#allocation9_spill] sm:$0xff] %v10198_v11  ;;  %v952_v54 = vpop.permute.xlu0 %951  ;;  %v1981_v14 = vunpack.c.l.b16 %v1834_v43  ;;  %v2001_v46 = vunpack.c.l.b16 %v10204_v24  ;;  %v1847_v18 = vrot.slane %v1845_v19, 5  ;;  %v1843_v42 = vrot.slane %v1842_v47, 4 }
  0xc8   : > { %v1023_v45 = vsel %vm1019_vm12, %v1014_v44, %v952_v54  ;;  %v1856_v52 = vor.u32 %v1855_v39, %v1852_v62  ;;  %v1859_v37 = vshll.u32 %v10211_v55, 16  ;;  %v10230_v13 = vpack.c.bf16 %v1718_v33, %v1718_v33 }
  0xc9   : > { %v1032_v16 = vsel %vm1028_vm13, %v1023_v45, %v962_v51  ;;  %v1699_v58 = vmax.f32 %v1679_v25, 0.0  ;;  %v2172_v51 = vunpack.c.l.bf16 %v8441_v49  ;;  %v2045_v44 = vpack.c.b16 %v2001_v46, %v2000_v53 }
  0xca   : > { %v1042_v38 = vsel %vm1037_vm14, %v1032_v16, %v972_v2  ;;  %v2031_v54 = vpack.c.b16 %v1979_v5, %v10174_v28  ;;  %v1641_v43 = vunpack.c.l.bf16 %v8426_v59  ;;  %v1848_v47 = vsel %vm9227_vm7, %v1843_v42, %v1847_v18  ;;  %v8442_v5 = vld [vmem:[%s9200_s10 + $0xfc] sm:$0x1]  ;;  %v8443_v42 = vld [vmem:[%s9200_s10 + $0x100] sm:$0xf] }
  0xcb   : > { %v1857_v19 = vrot.slane %v1856_v52, 4  ;;  %v1861_v45 = vrot.slane %v1859_v37, 5  ;;  %v1640_v62 = vunpack.c.l.bf16 %v8425_v0  ;;  %v1719_v39 = vsel %vm473_vm6, %v1699_v58, 0.0 }
  0xcc   : > { %6221 = vmatmul.bf16.gmra.mxu2 %v1042_v38  ;;  %1989 = vrot.lane.b32.xlu2 %v1985_v57, %s9112_s15  ;;  %v2032_v57 = vpack.c.b16 %v1981_v14, %v10189_v12  ;;  %v1864_v12 = vshrl.u32 %v10230_v13, 16  ;;  %v1867_v6 = vshll.u32 %v10230_v13, 16  ;;  %v2192_v16 = vmul.f32 %v9753_v48, %v2172_v51 }
  0xcd   : > { %2011 = vrot.lane.b32.xlu1 %v10198_v11, %s9113_s16  ;;  %1991 = vrot.lane.b32.xlu0 %v10215_v15, %s9112_s15  ;;  %v1661_v28 = vmul.f32 %v9753_v48, %v1641_v43  ;;  %v10252_v25 = vunpack.c.l.b16 %v1848_v47  ;;  %v1862_v38 = vsel %vm9227_vm7, %v1857_v19, %v1861_v45  ;;  %v10256_v33 = vpack.c.bf16 %v1719_v39, %v1719_v39 }
  0xce   : > { %v1479_v3 = vpop.permute.xlu2 %1478  ;;  %v1660_v18 = vmul.f32 %v9753_v48, %v1640_v62  ;;  %v1869_v37 = vrot.slane %v1867_v6, 5  ;;  %v2212_v59 = vadd.f32 %v9776_v27, %v2192_v16  ;;  %v2173_v0 = vunpack.c.l.bf16 %v8442_v5 }
  0xcf   : > { %v1466_v2 = vpop.permute.xlu1 %1465  ;;  %v1446_v31 = vpop.permute.xlu0 %1445  ;;  %v10267_v47 = vunpack.c.l.b16 %v1862_v38  ;;  %v1873_v62 = vshll.u32 %v10256_v33, 16  ;;  %v1970_v6 = vunpack.c.l.b16 %v10133_v4  ;;  %v15519_v5 = vunpack.c.l.b16 %v10014_v21 }
  0xd0   : > { %v1537_v53 = vsel %vm979_vm8, %v9285_v22, %v1446_v31  ;;  %v1866_v22 = vrot.slane %v1864_v12, 4  ;;  %v1969_v31 = vunpack.c.l.b16 %v10092_v63  ;;  %v2232_v39 = vmax.f32 %v2212_v59, 0.0 }
  0xd1   : > { %v1547_v52 = vsel %vm992_vm9, %v1537_v53, %v1466_v2  ;;  %v1987_v2 = vpack.c.b16 %v10252_v25, %v1981_v14  ;;  %v2193_v12 = vmul.f32 %v9753_v48, %v2173_v0  ;;  %v8444_v53 = vld [vmem:[%s9200_s10 + $0x104] sm:$0x1]  ;;  %v1919_v21 = vrot.slane %v10211_v55, 5 }
  0xd2   : > { %v1555_v43 = vsel %vm1001_vm10, %v1547_v52, %v1479_v3  ;;  %v1870_v45 = vor.u32 %v1869_v37, %v1866_v22  ;;  %v2019_v38 = vpack.c.b16 %v1969_v31, %v15519_v5  ;;  %v1875_v22 = vrot.slane %v1873_v62, 5  ;;  %v8445_v62 = vld [vmem:[%s9200_s10 + $0x108] sm:$0xf] }
  0xd3   : > { %v2252_v37 = vsel %vm466_vm5, %v2232_v39, 0.0  ;;  %v2213_v0 = vadd.f32 %v9776_v27, %v2193_v12  ;;  %v8434_v12 = vrot.slane %v10133_v4, 9 }
  0xd4   : > { %2035 = vrot.lane.b32.xlu2 %v2031_v54, %s9114_s17  ;;  %v2174_v54 = vunpack.c.l.bf16 %v8443_v42  ;;  %v2033_v42 = vpack.c.b16 %v10267_v47, %v10252_v25  ;;  %v1871_v52 = vrot.slane %v1870_v45, 4  ;;  %v8436_v25 = vrot.slane %v10230_v13, 9 }
  0xd5   : > { %2050 = vrot.lane.b32.xlu1 %v2045_v44, %s9116_s19  ;;  %2037 = vrot.lane.b32.xlu0 %v2032_v57, %s9114_s17  ;;  %v1681_v44 = vadd.f32 %v9776_v27, %v1661_v28  ;;  %v1680_v57 = vadd.f32 %v9776_v27, %v1660_v18  ;;  %v1971_v28 = vunpack.c.l.b16 %v10171_v9  ;;  %v10304_v45 = vpack.c.bf16 %v2252_v37, %v2252_v37 }
  0xd6   : > { %v1515_v58 = vpop.permute.xlu2 %1514  ;;  %v2194_v3 = vmul.f32 %v9753_v48, %v2174_v54  ;;  %v1876_v39 = vsel %vm9227_vm7, %v1871_v52, %v1875_v22  ;;  %v2176_v52 = vunpack.c.l.bf16 %v8445_v62  ;;  %v8446_v62 = vld [vmem:[%s9200_s10 + $0x10c] sm:$0x1] }
  0xd7   : > { %v1505_v49 = vpop.permute.xlu1 %1504  ;;  %v1492_v51 = vpop.permute.xlu0 %1491  ;;  %v1701_v16 = vmax.f32 %v1681_v44, 0.0  ;;  %v1700_v18 = vmax.f32 %v1680_v57, 0.0  ;;  %v10327_v4 = vunpack.c.l.b16 %v1876_v39  ;;  %v2326_v22 = vshrl.u32 %v10304_v45, 16 }
  0xd8   : > { %v1563_v19 = vsel %vm1010_vm11, %v1555_v43, %v1492_v51  ;;  %v2175_v51 = vunpack.c.l.bf16 %v8444_v53 }
  0xd9   : > { %v1571_v14 = vsel %vm1019_vm12, %v1563_v19, %v1505_v49  ;;  %v8435_v49 = vrot.slane %v10171_v9, 9  ;;  %v1721_v43 = vsel %vm473_vm6, %v1701_v16, 0.0  ;;  %v1923_v19 = vrot.slane %v10256_v33, 5 }
  0xda   : > { %v1579_v44 = vsel %vm1028_vm13, %v1571_v14, %v1515_v58  ;;  %v1720_v55 = vsel %vm466_vm5, %v1700_v18, 0.0  ;;  %v2020_v58 = vpack.c.b16 %v1971_v28, %v1970_v6  ;;  %v1915_v16 = vrot.slane %v10179_v17, 5 }
  0xdb   : > { %v10316_v33 = vsel %vm9191_vm2, %v8435_v49, %v1919_v21  ;;  %v10318_v53 = vpack.c.bf16 %v1721_v43, %v1721_v43  ;;  %v2195_v14 = vmul.f32 %v9753_v48, %v2175_v51  ;;  %v10323_v18 = vpack.c.bf16 %v1720_v55, %v1720_v55 }
  0xdc   : > { %2068 = vrot.lane.b32.xlu2 %v10215_v15, %s9115_s18  ;;  %v10331_v17 = vsel %vm9191_vm2, %v8436_v25, %v1923_v19  ;;  %v2329_v49 = vshll.u32 %v10304_v45, 16  ;;  %v10358_v43 = vpack.c.b16 %v10327_v4, %v10267_v47  ;;  %v2328_v19 = vrot.slane %v2326_v22, 4  ;;  %v8938_v47 = vld [vmem:[%s15275_s3 + $0xd0] sm:$0xff] }
  0xdd   : > { %1993 = vrot.lane.b32.xlu1 %v1987_v2, %s9112_s15  ;;  %2070 = vrot.lane.b32.xlu0 %v1987_v2, %s9115_s18  ;;  %v2214_v2 = vadd.f32 %v9776_v27, %v2194_v3  ;;  %v2233_v3 = vmax.f32 %v2213_v0, 0.0  ;;  %v2215_v63 = vadd.f32 %v9776_v27, %v2195_v14 }
  0xde   : > { %v915_v59 = vpop.permute.xlu2 %914  ;;  %v2331_v55 = vrot.slane %v2329_v49, 5  ;;  %6368 = vmatpush.bf16.msrb.mxu3 %v8938_v47  ;;  %6616 = vmatpush.bf16.msra.mxu2 %v8938_v47 }
  0xdf   : > { %v895_v15 = vpop.permute.xlu1 %894  ;;  %v1525_v54 = vpop.permute.xlu0 %1524  ;;  %v2234_v37 = vmax.f32 %v2214_v2, 0.0  ;;  %v15296_v2 = vunpack.c.l.b16 %v10323_v18  ;;  %v2235_v14 = vmax.f32 %v2215_v63, 0.0  ;;  %v8460_v63 = vrot.slane %v10304_v45, 9 }
  0xe0   : > { %v10299_v57 = vsel %vm1037_vm14, %v1579_v44, %v1525_v54  ;;  %v988_v5 = vsel %vm979_vm8, %v9491_v61, %v895_v15  ;;  %v1972_v61 = vunpack.c.l.b16 %v10230_v13  ;;  %v10339_v15 = vpack.c.b16 %v1970_v6, %v1969_v31 }
  0xe1   : > { %15520 = vst [vmem:[#allocation10_spill] sm:$0xff] %v10299_v57  ;;  %6097 = vmatmul.bf16.gmra.mxu0 %v10299_v57  ;;  %v998_v21 = vsel %vm992_vm9, %v988_v5, %v915_v59  ;;  %v1943_v44 = vrot.slane %v10318_v53, 5  ;;  %v2253_v13 = vsel %vm473_vm6, %v2233_v3, 0.0  ;;  %v15294_v6 = vunpack.c.l.b16 %v10316_v33 }
  0xe2   : > { %v2004_v54 = vunpack.c.l.b16 %v10331_v17  ;;  %v2254_v25 = vsel %vm466_vm5, %v2234_v37, 0.0  ;;  %v2196_v59 = vmul.f32 %v9753_v48, %v2176_v52  ;;  %v10369_v3 = vpack.c.bf16 %v2253_v13, %v2253_v13  ;;  %6546 = vmatpush.bf16.msra.mxu3 %v9918_v7  ;;  %v8936_v17 = vld [vmem:[%s15275_s3 + $0xc0] sm:$0xff] }
  0xe3   : > { %v10378_v5 = vpack.c.bf16 %v2254_v25, %v2254_v25  ;;  %v2021_v49 = vpack.c.b16 %v15296_v2, %v1972_v61  ;;  %v2255_v25 = vsel %vm473_vm6, %v2235_v14, 0.0  ;;  %v1926_v14 = vshrl.u32 %v10323_v18, 16 }
  0xe4   : > { %2024 = vrot.lane.b32.xlu2 %v2019_v38, %s9110_s13  ;;  %v10343_v38 = vsel %vm9191_vm2, %v8434_v12, %v1915_v16  ;;  %v10366_v12 = vpack.c.b16 %v1972_v61, %v1971_v28  ;;  %v10384_v9 = vpack.c.b16 %v2004_v54, %v15294_v6  ;;  %v2177_v28 = vunpack.c.l.bf16 %v8446_v62  ;;  %v8937_v61 = vld [vmem:[%s15275_s3 + $0xc8] sm:$0xff] }
  0xe5   : > { %2039 = vrot.lane.b32.xlu1 %v2033_v42, %s9114_s17  ;;  %2026 = vrot.lane.b32.xlu0 %v2020_v58, %s9110_s13  ;;  %v8437_v42 = vrot.slane %v10323_v18, 9  ;;  %v8447_v58 = vld [vmem:[%s9200_s10 + $0x110] sm:$0xf]  ;;  %v15295_v16 = vunpack.c.l.b16 %v10343_v38  ;;  %v2216_v37 = vadd.f32 %v9776_v27, %v2196_v59  ;;  %v2340_v59 = vshrl.u32 %v10378_v5, 16 }
  0xe6   : > { %v954_v51 = vpop.permute.xlu2 %953  ;;  %15521 = vst [vmem:[#allocation11_spill] sm:$0xff] %v10384_v9  ;;  %v2178_v52 = vunpack.c.l.bf16 %v8447_v58  ;;  %v2343_v58 = vshll.u32 %v10378_v5, 16  ;;  %6332 = vmatpush.bf16.msrb.mxu1 %v8937_v61  ;;  %6580 = vmatpush.bf16.msra.mxu0 %v8937_v61 }
  0xe7   : > { %v941_v0 = vpop.permute.xlu1 %940  ;;  %v928_v31 = vpop.permute.xlu0 %927  ;;  %v10373_v48 = vsel %vm9191_vm2, %v8437_v42, %v1943_v44  ;;  %v2332_v42 = vor.u32 %v2331_v55, %v2328_v19  ;;  %v10400_v27 = vpack.c.b16 %v15295_v16, %v2001_v46  ;;  %v10410_v44 = vld [vmem:[%s15276_s4] ss:$0 sm:$0xff]  ;;  %v8449_v19 = vld [vmem:[%s9200_s10 + $0x118] sm:$0xf]  ;;  %v1929_v16 = vshll.u32 %v10323_v18, 16 }
  0xe8   : > { %v1007_v39 = vsel %vm1001_vm10, %v998_v21, %v928_v31  ;;  %v15298_v21 = vunpack.c.l.b16 %v10373_v48  ;;  %v2198_v24 = vmul.f32 %v10410_v44, %v2178_v52  ;;  %v2445_v31 = vrot.slane %v10369_v3, 5 }
  0xe9   : > { %v1016_v22 = vsel %vm1010_vm11, %v1007_v39, %v941_v0  ;;  %15522 = vst [vmem:[#allocation12_spill] sm:$0xff] %v10400_v27  ;;  %v2335_v0 = vshll.u32 %v10369_v3, 16  ;;  %v2197_v39 = vmul.f32 %v10410_v44, %v2177_v28  ;;  %v2236_v52 = vmax.f32 %v2216_v37, 0.0 }
  0xea   : > { %v1025_v55 = vsel %vm1019_vm12, %v1016_v22, %v954_v51  ;;  %v2333_v6 = vrot.slane %v2332_v42, 4  ;;  %v10431_v51 = vld [vmem:[%s15277_s5] ss:$0 sm:$0xff]  ;;  %v2180_v37 = vunpack.c.l.bf16 %v8449_v19  ;;  %v10434_v22 = vpack.c.bf16 %v2255_v25, %v2255_v25  ;;  %6333 = vmatpush.bf16.msrb.mxu1 %v8936_v17  ;;  %6581 = vmatpush.bf16.msra.mxu0 %v8936_v17 }
  0xeb   : > { %v2337_v47 = vrot.slane %v2335_v0, 5  ;;  %v2218_v28 = vadd.f32 %v10431_v51, %v2198_v24  ;;  %v2179_v42 = vunpack.c.l.bf16 %v8448_v29  ;;  %v2217_v2 = vadd.f32 %v10431_v51, %v2197_v39 }
  0xec   : > { %2060 = vrot.lane.b32.xlu2 %v10339_v15, %s9111_s14  ;;  %v2256_v61 = vsel %vm466_vm5, %v2236_v52, 0.0  ;;  %v2047_v0 = vpack.c.b16 %v15298_v21, %v2004_v54  ;;  %v1928_v24 = vrot.slane %v1926_v14, 4  ;;  %v1931_v29 = vrot.slane %v1929_v16, 5 }
  0xed   : > { %2072 = vrot.lane.b32.xlu1 %v10358_v43, %s9115_s18  ;;  %2062 = vrot.lane.b32.xlu0 %v10366_v12, %s9111_s14  ;;  %v2238_v25 = vmax.f32 %v2218_v28, 0.0  ;;  %v10461_v39 = vpack.c.bf16 %v2256_v61, %v2256_v61  ;;  %v15523_v52 = vunpack.c.l.b16 %v10323_v18  ;;  %v15524_v14 = vunpack.c.l.b16 %v10343_v38 }
  0xee   : > { %v1448_v46 = vpop.permute.xlu2 %1447  ;;  %v1935_v61 = vshll.u32 %v10318_v53, 16  ;;  %v2449_v53 = vrot.slane %v10434_v22, 5 }
  0xef   : > { %v974_v13 = vpop.permute.xlu1 %973  ;;  %v964_v62 = vpop.permute.xlu0 %963  ;;  %v1540_v54 = vsel %vm979_vm8, %v9668_v40, %v1448_v46  ;;  %v2237_v46 = vmax.f32 %v2217_v2, 0.0  ;;  %v2354_v2 = vshrl.u32 %v10461_v39, 16 }
  0xf0   : > { %v1034_v3 = vsel %vm1028_vm13, %v1025_v55, %v964_v62  ;;  %v2342_v55 = vrot.slane %v2340_v59, 4  ;;  %v2345_v62 = vrot.slane %v2343_v58, 5  ;;  %v2200_v59 = vmul.f32 %v10410_v44, %v2180_v37 }
  0xf1   : > { %v1045_v7 = vsel %vm1037_vm14, %v1034_v3, %v974_v13  ;;  %v2338_v13 = vsel %vm9227_vm7, %v2333_v6, %v2337_v47  ;;  %v2349_v58 = vshll.u32 %v10434_v22, 16  ;;  %v2199_v6 = vmul.f32 %v10410_v44, %v2179_v42  ;;  %v8935_v22 = vld [vmem:[%s15275_s3 + $0xb8] sm:$0xff] }
  0xf2   : > { %6226 = vmatmul.bf16.gmra.mxu2 %v1045_v7  ;;  %v2057_v3 = vpack.c.b16 %v9895_v20, %v15523_v52  ;;  %v15525_v7 = vunpack.c.l.b16 %v10316_v33  ;;  %v2346_v40 = vor.u32 %v2345_v62, %v2342_v55  ;;  %v10472_v28 = vunpack.c.l.b16 %v2338_v13  ;;  %6334 = vmatpush.bf16.msrb.mxu1 %v8935_v22 }
  0xf3   : > { %v1932_v42 = vor.u32 %v1931_v29, %v1928_v24  ;;  %v2258_v52 = vsel %vm466_vm5, %v2238_v25, 0.0  ;;  %v2220_v38 = vadd.f32 %v10431_v51, %v2200_v59  ;;  %v2357_v55 = vshll.u32 %v10461_v39, 16  ;;  %6582 = vmatpush.bf16.msra.mxu0 %v8935_v22 }
  0xf4   : > { %2013 = vrot.lane.b32.xlu2 %v10400_v27, %s9113_s16  ;;  %v2046_v47 = vpack.c.b16 %v15525_v7, %v15524_v14  ;;  %v2351_v14 = vrot.slane %v2349_v58, 5  ;;  %v2219_v62 = vadd.f32 %v10431_v51, %v2199_v6  ;;  %v2347_v13 = vrot.slane %v2346_v40, 4 }
  0xf5   : > { %2028 = vrot.lane.b32.xlu1 %v2021_v49, %s9110_s13  ;;  %2015 = vrot.lane.b32.xlu0 %v10384_v9, %s9113_s16  ;;  %v10452_v49 = vsel %vm9191_vm2, %v8460_v63, %v2445_v31  ;;  %v8450_v63 = vld [vmem:[%s9200_s10 + $0x11c] sm:$0x1]  ;;  %v8461_v24 = vrot.slane %v10378_v5, 9  ;;  %v2257_v29 = vsel %vm473_vm6, %v2237_v46, 0.0  ;;  %v1933_v25 = vrot.slane %v1932_v42, 4 }
  0xf6   : > { %v1494_v19 = vpop.permute.xlu2 %1493  ;;  %v2544_v37 = vunpack.c.l.b16 %v10452_v49  ;;  %v2181_v33 = vunpack.c.l.bf16 %v8450_v63  ;;  %v1937_v59 = vrot.slane %v1935_v61, 5  ;;  %v2240_v6 = vmax.f32 %v2220_v38, 0.0 }
  0xf7   : > { %v1481_v16 = vpop.permute.xlu1 %1480  ;;  %v1468_v31 = vpop.permute.xlu0 %1467  ;;  %v2356_v7 = vrot.slane %v2354_v2, 4  ;;  %v2239_v40 = vmax.f32 %v2219_v62, 0.0  ;;  %v2531_v42 = vpack.c.b16 %v10472_v28, %v9287_v23  ;;  %v10507_v61 = vsel %vm9191_vm2, %v8461_v24, %v2449_v53 }
  0xf8   : > { %v1549_v18 = vsel %vm992_vm9, %v1540_v54, %v1468_v31  ;;  %v10490_v54 = vpack.c.bf16 %v2258_v52, %v2258_v52  ;;  %v2551_v58 = vpack.c.b16 %v2544_v37, %v9233_v34  ;;  %v2352_v52 = vsel %vm9227_vm7, %v2347_v13, %v2351_v14 }
  0xf9   : > { %v1557_v17 = vsel %vm1001_vm10, %v1549_v18, %v1481_v16  ;;  %v2201_v16 = vmul.f32 %v10410_v44, %v2181_v33  ;;  %v1938_v38 = vsel %vm9227_vm7, %v1933_v25, %v1937_v59  ;;  %v2259_v13 = vsel %vm473_vm6, %v2239_v40, 0.0 }
  0xfa   : > { %v2371_v2 = vshll.u32 %v10490_v54, 16  ;;  %v10531_v25 = vunpack.c.l.b16 %v1938_v38  ;;  %v15527_v22 = vunpack.c.l.b16 %v9851_v26 }
  0xfb   : > { %v2221_v62 = vadd.f32 %v10431_v51, %v2201_v16  ;;  %v10539_v16 = vpack.c.bf16 %v2259_v13, %v2259_v13 }
  0xfc   : > { %2052 = vrot.lane.b32.xlu2 %v2046_v47, %s9116_s19  ;;  %v2359_v47 = vrot.slane %v2357_v55, 5  ;;  %v2260_v55 = vsel %vm466_vm5, %v2240_v6, 0.0  ;;  %v978_v6 = vpack.c.b16 %v9233_v34, %v15527_v22  ;;  %v8452_v22 = vld [vmem:[%s9200_s10 + $0x124] sm:$0x1] }
  0xfd   : > { %2064 = vrot.lane.b32.xlu1 %v2057_v3, %s9111_s14  ;;  %2054 = vrot.lane.b32.xlu0 %v2047_v0, %s9116_s19  ;;  %v10500_v3 = vpack.c.bf16 %v2257_v29, %v2257_v29  ;;  %v1565_v0 = vsel %vm1010_vm11, %v1557_v17, %v1494_v19  ;;  %v2368_v19 = vshrl.u32 %v10490_v54, 16  ;;  %v2545_v29 = vunpack.c.l.b16 %v10507_v61 }
  0xfe   : > { %v1527_v31 = vpop.permute.xlu2 %1526  ;;  %v2360_v53 = vor.u32 %v2359_v47, %v2356_v7  ;;  %v2525_v17 = vunpack.c.l.b16 %v2352_v52  ;;  %v10533_v59 = vpack.c.bf16 %v2260_v55, %v2260_v55  ;;  %8724 = vmatmul.msk.bf16.gmra.mxu3 %vm979_vm8, %v978_v6  ;;  %v2034_v52 = vpack.c.b16 %v10531_v25, %v10327_v4 }
  0xff   : > { %v1517_v63 = vpop.permute.xlu1 %1516  ;;  %v1507_v46 = vpop.permute.xlu0 %1506  ;;  %v2363_v14 = vshll.u32 %v10500_v3, 16  ;;  %v2377_v49 = vshll.u32 %v10539_v16, 16  ;;  %v15528_v55 = vunpack.c.l.b16 %v10056_v32  ;;  %v15534_v61 = vunpack.c.l.b16 %v9927_v36  ;;  %v8988_v36 = vld [vmem:[%s15275_s3 + $0x40] sm:$0xff] }
 0x100   : > { %v1573_v18 = vsel %vm1019_vm12, %v1565_v0, %v1507_v46  ;;  %v2361_v40 = vrot.slane %v2360_v53, 4  ;;  %v2590_v46 = vpack.c.b16 %v2545_v29, %v2544_v37  ;;  %v2382_v38 = vshrl.u32 %v10533_v59, 16  ;;  %v8933_v53 = vld [vmem:[%s15275_s3 + $0xa8] sm:$0xff] }
 0x101   : > { %v1581_v33 = vsel %vm1028_vm13, %v1573_v18, %v1517_v63  ;;  %v2370_v63 = vrot.slane %v2368_v19, 4  ;;  %v2365_v0 = vrot.slane %v2363_v14, 5  ;;  %v2577_v18 = vpack.c.b16 %v2525_v17, %v10472_v28 }
 0x102   : > { %v10521_v24 = vsel %vm1037_vm14, %v1581_v33, %v1527_v31  ;;  %v2373_v31 = vrot.slane %v2371_v2, 5  ;;  %v2385_v19 = vshll.u32 %v10533_v59, 16  ;;  %v8451_v33 = vld [vmem:[%s9200_s10 + $0x120] sm:$0xf] }
 0x103   : > { %15526 = vst [vmem:[#allocation13_spill] sm:$0xff] %v10521_v24  ;;  %6102 = vmatmul.bf16.gmra.mxu0 %v10521_v24  ;;  %v2366_v4 = vsel %vm9227_vm7, %v2361_v40, %v2365_v0  ;;  %v2182_v13 = vunpack.c.l.bf16 %v8451_v33 }
 0x104   : > { %1995 = vrot.lane.b32.xlu2 %v10358_v43, %s9112_s15  ;;  %v8934_v43 = vld [vmem:[%s15275_s3 + $0xb0] sm:$0xff]  ;;  %v2374_v2 = vor.u32 %v2373_v31, %v2370_v63  ;;  %v2387_v6 = vrot.slane %v2385_v19, 5  ;;  %v10580_v31 = vunpack.c.l.b16 %v2366_v4  ;;  %v2067_v19 = vpack.c.b16 %v9287_v23, %v10531_v25 }
 0x105   : > { %2555 = vrot.lane.b32.xlu1 %v2551_v58, %s9113_s16  ;;  %2535 = vrot.lane.b32.xlu0 %v2531_v42, %s9112_s15  ;;  %v2241_v58 = vmax.f32 %v2221_v62, 0.0  ;;  %v8453_v42 = vld [vmem:[%s9200_s10 + $0x128] sm:$0xf]  ;;  %v10562_v62 = vpack.c.b16 %v9233_v34, %v15528_v55 }
 0x106   : > { %v930_v47 = vpop.permute.xlu2 %929  ;;  %6335 = vmatpush.bf16.msrb.mxu1 %v8934_v43  ;;  %6583 = vmatpush.bf16.msra.mxu0 %v8934_v43  ;;  %v2184_v14 = vunpack.c.l.bf16 %v8453_v42  ;;  %v2375_v43 = vrot.slane %v2374_v2, 4 }
 0x107   : > { %v917_v7 = vpop.permute.xlu1 %916  ;;  %v897_v26 = vpop.permute.xlu0 %896  ;;  %v2261_v37 = vsel %vm473_vm6, %v2241_v58, 0.0  ;;  %8684 = vmatmul.msk.bf16.gmra.mxu1 %vm979_vm8, %v10562_v62  ;;  %v2379_v58 = vrot.slane %v2377_v49, 5 }
 0x108   : > { %v991_v28 = vsel %vm979_vm8, %v9674_v50, %v897_v26  ;;  %v10576_v32 = vpack.c.bf16 %v2261_v37, %v2261_v37  ;;  %v2384_v50 = vrot.slane %v2382_v38, 4  ;;  %v2183_v26 = vunpack.c.l.bf16 %v8452_v22 }
 0x109   : > { %v1000_v63 = vsel %vm992_vm9, %v991_v28, %v917_v7  ;;  %v8932_v7 = vld [vmem:[%s15275_s3 + $0xa0] sm:$0xff]  ;;  %v2532_v37 = vpack.c.b16 %v10580_v31, %v2525_v17  ;;  %v2380_v55 = vsel %vm9227_vm7, %v2375_v43, %v2379_v58  ;;  %v2514_v28 = vunpack.c.l.b16 %v10461_v39 }
 0x10a   : > { %6336 = vmatpush.bf16.msrb.mxu1 %v8933_v53  ;;  %6584 = vmatpush.bf16.msra.mxu0 %v8933_v53  ;;  %v1009_v38 = vsel %vm1001_vm10, %v1000_v63, %v930_v47  ;;  %v2388_v33 = vor.u32 %v2387_v6, %v2384_v50  ;;  %v2391_v2 = vshll.u32 %v10576_v32, 16  ;;  %v8931_v47 = vld [vmem:[%s15275_s3 + $0x98] sm:$0xff]  ;;  %v2203_v4 = vmul.f32 %v10410_v44, %v2183_v26 }
 0x10b   : > { %v15297_v17 = vunpack.c.l.b16 %v10304_v45  ;;  %v2513_v22 = vunpack.c.l.b16 %v10378_v5  ;;  %v10610_v63 = vunpack.c.l.b16 %v2380_v55  ;;  %v2516_v55 = vunpack.c.l.b16 %v10533_v59 }
 0x10c   : > { %2041 = vrot.lane.b32.xlu2 %v2034_v52, %s9114_s17  ;;  %v2202_v52 = vmul.f32 %v10410_v44, %v2182_v13  ;;  %v2515_v13 = vunpack.c.l.b16 %v10490_v54  ;;  %v2389_v43 = vrot.slane %v2388_v33, 4  ;;  %v2393_v58 = vrot.slane %v2391_v2, 5  ;;  %v8930_v2 = vld [vmem:[%s15275_s3 + $0x90] sm:$0xff] }
 0x10d   : > { %2594 = vrot.lane.b32.xlu1 %v2590_v46, %s9116_s19  ;;  %2581 = vrot.lane.b32.xlu0 %v2577_v18, %s9114_s17  ;;  %v2204_v46 = vmul.f32 %v10410_v44, %v2184_v14  ;;  %v8454_v18 = vld [vmem:[%s9200_s10 + $0x12c] sm:$0x1]  ;;  %v8455_v14 = vld [vmem:[%s9200_s10 + $0x130] sm:$0xf]  ;;  %v2223_v5 = vadd.f32 %v10431_v51, %v2203_v4 }
 0x10e   : > { %v966_v0 = vpop.permute.xlu2 %965  ;;  %6337 = vmatpush.bf16.msrb.mxu1 %v8932_v7  ;;  %v2185_v53 = vunpack.c.l.bf16 %v8454_v18  ;;  %6585 = vmatpush.bf16.msra.mxu0 %v8932_v7  ;;  %v2222_v50 = vadd.f32 %v10431_v51, %v2202_v52  ;;  %v2186_v26 = vunpack.c.l.bf16 %v8455_v14  ;;  %v8456_v4 = vld [vmem:[%s9200_s10 + $0x134] sm:$0x1]  ;;  %v8464_v14 = vrot.slane %v10533_v59, 9 }
 0x10f   : > { %v956_v40 = vpop.permute.xlu1 %955  ;;  %v943_v42 = vpop.permute.xlu0 %942  ;;  %v2224_v25 = vadd.f32 %v10431_v51, %v2204_v46  ;;  %8761 = vmatmul.msk.bf16.vlgmr.msrb.gmra.mxu3 %vm979_vm8, %v10198_v11 }
 0x110   : > { %v1018_v49 = vsel %vm1010_vm11, %v1009_v38, %v943_v42  ;;  %v2205_v52 = vmul.f32 %v10410_v44, %v2185_v53  ;;  %v2565_v38 = vpack.c.b16 %v2515_v13, %v2514_v28  ;;  %v2242_v33 = vmax.f32 %v2222_v50, 0.0 }
 0x111   : > { %v1027_v6 = vsel %vm1019_vm12, %v1018_v49, %v956_v40  ;;  %v2244_v40 = vmax.f32 %v2224_v25, 0.0  ;;  %v10628_v49 = vld [vmem:[%s15275_s3 + $0x88] sm:$0xff]  ;;  %v8463_v25 = vrot.slane %v10490_v54, 9  ;;  %v2457_v53 = vrot.slane %v10539_v16, 5 }
 0x112   : > { %6338 = vmatpush.bf16.msrb.mxu1 %v8931_v47  ;;  %6586 = vmatpush.bf16.msra.mxu0 %v8931_v47  ;;  %v1036_v7 = vsel %vm1028_vm13, %v1027_v6, %v966_v0  ;;  %v2394_v47 = vsel %vm9227_vm7, %v2389_v43, %v2393_v58  ;;  %v2206_v50 = vmul.f32 %v10410_v44, %v2186_v26  ;;  %v2461_v6 = vrot.slane %v10576_v32, 5  ;;  %v10649_v43 = vld [vmem:[%s15275_s3 + $0x38] sm:$0xff] }
 0x113   : > { %6735 = vmatpush.bf16.msrb.mxu3 %v10628_v49  ;;  %v2262_v16 = vsel %vm466_vm5, %v2242_v33, 0.0  ;;  %v2187_v32 = vunpack.c.l.bf16 %v8456_v4  ;;  %v10659_v26 = vunpack.c.l.b16 %v2394_v47 }
 0x114   : > { %2074 = vrot.lane.b32.xlu2 %v2067_v19, %s9115_s18  ;;  %v2564_v19 = vpack.c.b16 %v2513_v22, %v15297_v17  ;;  %v2226_v58 = vadd.f32 %v10431_v51, %v2206_v50 }
 0x115   : > { %2537 = vrot.lane.b32.xlu1 %v2532_v37, %s9112_s15  ;;  %2614 = vrot.lane.b32.xlu0 %v2532_v37, %s9115_s18  ;;  %v2578_v37 = vpack.c.b16 %v10610_v63, %v10580_v31  ;;  %v2264_v31 = vsel %vm466_vm5, %v2244_v40, 0.0  ;;  %v2453_v40 = vrot.slane %v10500_v3, 5  ;;  %v10696_v47 = vpack.c.b16 %v10659_v26, %v10610_v63 }
 0x116   : > { %v1470_v42 = vpop.permute.xlu2 %1469  ;;  %6339 = vmatpush.bf16.msrb.mxu1 %v8930_v2  ;;  %6587 = vmatpush.bf16.msra.mxu0 %v8930_v2 }
 0x117   : > { %v1450_v46 = vpop.permute.xlu1 %1449  ;;  %v976_v18 = vpop.permute.xlu0 %975 }
 0x118   : > { %v1048_v0 = vsel %vm1037_vm14, %v1036_v7, %v976_v18  ;;  %v2243_v7 = vmax.f32 %v2223_v5, 0.0  ;;  %v2225_v18 = vadd.f32 %v10431_v51, %v2205_v52  ;;  %v1543_v54 = vsel %vm979_vm8, %v9793_v35, %v1450_v46 }
 0x119   : > { %6231 = vmatmul.bf16.gmra.mxu2 %v1048_v0  ;;  %v8462_v5 = vrot.slane %v10461_v39, 9  ;;  %v10666_v35 = vpack.c.b16 %v2516_v55, %v2515_v13  ;;  %v10670_v46 = vpack.c.b16 %v2514_v28, %v2513_v22  ;;  %v10672_v52 = vpack.c.bf16 %v2264_v31, %v2264_v31  ;;  %v10682_v13 = vld [vmem:[%s15275_s3 + $0x30] sm:$0xff] }
 0x11a   : > { %6510 = vmatpush.bf16.msra.mxu1 %v10649_v43  ;;  %v10675_v0 = vpack.c.bf16 %v2262_v16, %v2262_v16  ;;  %v2263_v3 = vsel %vm473_vm6, %v2243_v7, 0.0  ;;  %v10687_v28 = vsel %vm9191_vm2, %v8463_v25, %v2457_v53  ;;  %v10691_v22 = vsel %vm9191_vm2, %v8464_v14, %v2461_v6 }
 0x11b   : > { %15529 = vst [vmem:[#allocation14_spill] sm:$0xff] %v10666_v35  ;;  %v10700_v4 = vsel %vm9191_vm2, %v8462_v5, %v2453_v40  ;;  %v2304_v7 = vpack.c.bf16 %v2263_v3, %v2263_v3  ;;  %v2410_v14 = vshrl.u32 %v10672_v52, 16  ;;  %v2413_v6 = vshll.u32 %v10672_v52, 16 }
 0x11c   : > { %2568 = vrot.lane.b32.xlu2 %v2564_v19, %s9110_s13  ;;  %v1551_v19 = vsel %vm992_vm9, %v1543_v54, %v1470_v42  ;;  %v2207_v42 = vmul.f32 %v10410_v44, %v2187_v32  ;;  %v2396_v50 = vshrl.u32 %v10675_v0, 16  ;;  %v2399_v25 = vshll.u32 %v10675_v0, 16  ;;  %v10714_v54 = vld [vmem:[%s15275_s3 + $0x28] sm:$0xff] }
 0x11d   : > { %2583 = vrot.lane.b32.xlu1 %v2578_v37, %s9114_s17  ;;  %2570 = vrot.lane.b32.xlu0 %v2565_v38, %s9110_s13  ;;  %v2245_v38 = vmax.f32 %v2225_v18, 0.0  ;;  %v2246_v37 = vmax.f32 %v2226_v58, 0.0  ;;  %v15303_v31 = vunpack.c.l.b16 %v10687_v28  ;;  %v15302_v63 = vunpack.c.l.b16 %v10691_v22 }
 0x11e   : > { %v1509_v2 = vpop.permute.xlu2 %1508  ;;  %6511 = vmatpush.bf16.msra.mxu1 %v10682_v13  ;;  %v2517_v16 = vunpack.c.l.b16 %v10675_v0  ;;  %v2227_v58 = vadd.f32 %v10431_v51, %v2207_v42  ;;  %v2398_v3 = vrot.slane %v2396_v50, 4  ;;  %v2412_v17 = vrot.slane %v2410_v14, 4 }
 0x11f   : > { %v1496_v33 = vpop.permute.xlu1 %1495  ;;  %v1483_v39 = vpop.permute.xlu0 %1482  ;;  %v2265_v18 = vsel %vm473_vm6, %v2245_v38, 0.0  ;;  %v2266_v5 = vsel %vm466_vm5, %v2246_v37, 0.0  ;;  %v2401_v38 = vrot.slane %v2399_v25, 5  ;;  %v2415_v21 = vrot.slane %v2413_v6, 5  ;;  %8762 = vmatmul.msk.bf16.gmra.mxu3 %vm979_vm8, %v10400_v27 }
 0x120   : > { %v1559_v53 = vsel %vm1001_vm10, %v1551_v19, %v1483_v39  ;;  %v8465_v19 = vrot.slane %v10675_v0, 9  ;;  %v2465_v39 = vrot.slane %v2304_v7, 5  ;;  %v2306_v42 = vpack.c.bf16 %v2265_v18, %v2265_v18 }
 0x121   : > { %v1567_v40 = vsel %vm1010_vm11, %v1559_v53, %v1496_v33  ;;  %v10730_v33 = vpack.c.bf16 %v2266_v5, %v2266_v5  ;;  %v10737_v53 = vld [vmem:[%s15275_s3 + $0x20] sm:$0xff]  ;;  %v10745_v14 = vpack.c.b16 %v15302_v63, %v15303_v31  ;;  %v2566_v6 = vpack.c.b16 %v2517_v16, %v2516_v55 }
 0x122   : > { %6512 = vmatpush.bf16.msra.mxu1 %v10714_v54  ;;  %v1575_v50 = vsel %vm1019_vm12, %v1567_v40, %v1509_v2  ;;  %v2247_v18 = vmax.f32 %v2227_v58, 0.0  ;;  %v15531_v24 = vunpack.c.l.b16 %v10700_v4  ;;  %v2402_v40 = vor.u32 %v2401_v38, %v2398_v3 }
 0x123   : > { %15530 = vst [vmem:[#allocation15_spill] sm:$0xff] %v10745_v14  ;;  %v10763_v59 = vsel %vm9191_vm2, %v8465_v19, %v2465_v39  ;;  %v2416_v55 = vor.u32 %v2415_v21, %v2412_v17  ;;  %v2419_v58 = vshll.u32 %v2306_v42, 16  ;;  %v15304_v19 = vunpack.c.l.b16 %v10672_v52 }
 0x124   : > { %2604 = vrot.lane.b32.xlu2 %v10670_v46, %s9111_s14  ;;  %v10756_v2 = vpack.c.b16 %v15531_v24, %v2545_v29  ;;  %v2472_v24 = vshrl.u32 %v10730_v33, 16  ;;  %v2475_v29 = vshll.u32 %v10730_v33, 16  ;;  %v2267_v21 = vsel %vm473_vm6, %v2247_v18, 0.0 }
 0x125   : > { %2616 = vrot.lane.b32.xlu1 %v10696_v47, %s9115_s18  ;;  %2606 = vrot.lane.b32.xlu0 %v10666_v35, %s9111_s14  ;;  %v2405_v35 = vshll.u32 %v2304_v7, 16  ;;  %v10776_v7 = vld [vmem:[%s15275_s3 + $0x18] sm:$0xff]  ;;  %v2549_v17 = vunpack.c.l.b16 %v10763_v59  ;;  %v2403_v3 = vrot.slane %v2402_v40, 4  ;;  %v2417_v39 = vrot.slane %v2416_v55, 4  ;;  %v10796_v40 = vld [vmem:[%s15275_s3 + $0x10] sm:$0xff] }
 0x126   : > { %v1990_v32 = vpop.permute.xlu2 %1989  ;;  %6513 = vmatpush.bf16.msra.mxu1 %v10737_v53  ;;  %15532 = vst [vmem:[#allocation16_spill] sm:$0xff] %v10756_v2  ;;  %v2469_v18 = vrot.slane %v2306_v42, 5  ;;  %v2474_v63 = vrot.slane %v2472_v24, 4  ;;  %v2477_v31 = vrot.slane %v2475_v29, 5  ;;  %v10803_v42 = vpack.c.b16 %v15304_v19, %v2517_v16 }
 0x127   : > { %v1529_v37 = vpop.permute.xlu1 %1528  ;;  %v1519_v25 = vpop.permute.xlu0 %1518  ;;  %v2407_v38 = vrot.slane %v2405_v35, 5  ;;  %v15537_v59 = vunpack.c.l.b16 %v10687_v28  ;;  %v10821_v28 = vld [vmem:[%s15275_s3 + $0x8] sm:$0xff] }
 0x128   : > { %v1583_v5 = vsel %vm1028_vm13, %v1575_v50, %v1519_v25  ;;  %v1973_v50 = vpack.c.b16 %v15534_v61, %v9895_v20  ;;  %v8466_v25 = vrot.slane %v10672_v52, 9  ;;  %15535 = vst [vmem:[#allocation18_spill] sm:$0xff] %v10803_v42 }
 0x129   : > { %v10759_v57 = vsel %vm1037_vm14, %v1583_v5, %v1529_v37  ;;  %8765 = vmatmul.msk.bf16.vlgmr.msrb.gmra.mxu2 %vm979_vm8, %v10198_v11  ;;  %v2421_v37 = vrot.slane %v2419_v58, 5  ;;  %v2408_v0 = vsel %vm9227_vm7, %v2403_v3, %v2407_v38 }
 0x12a   : > { %15533 = vst [vmem:[#allocation17_spill] sm:$0xff] %v10759_v57  ;;  %6107 = vmatmul.bf16.gmra.mxu0 %v10759_v57  ;;  %6514 = vmatpush.bf16.msra.mxu1 %v10776_v7  ;;  %v2080_v5 = vsel %vm979_vm8, %v1973_v50, %v1990_v32  ;;  %v15536_v32 = vunpack.c.l.b16 %v10700_v4  ;;  %v15538_v50 = vunpack.c.l.b16 %v10691_v22  ;;  %v2470_v29 = vsel %vm9191_vm2, %v8466_v25, %v2469_v18 }
 0x12b   : > { %6793 = vmatpush.bf16.msrb.mxu2 %v8988_v36  ;;  %v2308_v36 = vpack.c.bf16 %v2267_v21, %v2267_v21  ;;  %v2422_v16 = vsel %vm9227_vm7, %v2417_v39, %v2421_v37  ;;  %v2478_v21 = vor.u32 %v2477_v31, %v2474_v63  ;;  %v2550_v4 = vunpack.c.l.b16 %v2470_v29 }
 0x12c   : > { %2557 = vrot.lane.b32.xlu2 %v10756_v2, %s9113_s16  ;;  %v2591_v55 = vpack.c.b16 %v15537_v59, %v15536_v32  ;;  %v2592_v24 = vpack.c.b16 %v2549_v17, %v15538_v50  ;;  %v2529_v3 = vunpack.c.l.b16 %v2408_v0  ;;  %v2530_v31 = vunpack.c.l.b16 %v2422_v16  ;;  %v8472_v16 = vld [vmem:[%s9200_s10 + $0x14c] sm:$0x1] }
 0x12d   : > { %2572 = vrot.lane.b32.xlu1 %v2566_v6, %s9110_s13  ;;  %2559 = vrot.lane.b32.xlu0 %v10745_v14, %s9113_s16  ;;  %v2481_v19 = vshll.u32 %v2308_v36, 16  ;;  %v8467_v63 = vrot.slane %v10730_v33, 9  ;;  %v2489_v38 = vrot.slane %v2308_v36, 5  ;;  %v2479_v25 = vrot.slane %v2478_v21, 4  ;;  %v10873_v21 = vld [vmem:[%s15275_s3 + $0x80] sm:$0xff] }
 0x12e   : > { %v2036_v61 = vpop.permute.xlu2 %2035  ;;  %6515 = vmatpush.bf16.msra.mxu1 %v10796_v40  ;;  %v10840_v32 = vpack.c.b16 %v2550_v4, %v2549_v17 }
 0x12f   : > { %v2023_v6 = vpop.permute.xlu1 %2022  ;;  %v2010_v35 = vpop.permute.xlu0 %2009  ;;  %v2483_v18 = vrot.slane %v2481_v19, 5  ;;  %8763 = vmatmul.msk.bf16.gmra.mxu3 %vm979_vm8, %v10384_v9  ;;  %v10843_v19 = vpack.c.b16 %v2530_v31, %v2529_v3 }
 0x130   : > { %v2091_v58 = vsel %vm992_vm9, %v2080_v5, %v2010_v35  ;;  %v10835_v5 = vld [vmem:[%s15275_s3] sm:$0xff]  ;;  %15539 = vst [vmem:[#allocation19_spill] sm:$0xff] %v10840_v32 }
 0x131   : > { %v2099_v22 = vsel %vm1001_vm10, %v2091_v58, %v2023_v6  ;;  %v8471_v58 = vld [vmem:[%s9200_s10 + $0x148] sm:$0xf]  ;;  %v2484_v17 = vsel %vm9227_vm7, %v2479_v25, %v2483_v18  ;;  %v2579_v25 = vpack.c.b16 %v2529_v3, %v10659_v26 }
 0x132   : > { %6516 = vmatpush.bf16.msra.mxu1 %v10821_v28  ;;  %v2107_v6 = vsel %vm1010_vm11, %v2099_v22, %v2036_v61  ;;  %v2718_v50 = vunpack.c.l.bf16 %v8471_v58  ;;  %v10867_v0 = vunpack.c.l.b16 %v2484_v17 }
 0x134   : > { %2596 = vrot.lane.b32.xlu2 %v2591_v55, %s9116_s19  ;;  %v10847_v55 = vsel %vm9191_vm2, %v8467_v63, %v2489_v38  ;;  %v2738_v29 = vmul.f32 %v10410_v44, %v2718_v50 }
 0x135   : > { %2608 = vrot.lane.b32.xlu1 %v10803_v42, %s9111_s14  ;;  %2598 = vrot.lane.b32.xlu0 %v2592_v24, %s9116_s19  ;;  %v15305_v24 = vunpack.c.l.b16 %v10847_v55 }
 0x136   : > { %v2069_v37 = vpop.permute.xlu2 %2068  ;;  %6517 = vmatpush.bf16.msra.mxu1 %v10835_v5  ;;  %v2758_v63 = vadd.f32 %v10431_v51, %v2738_v29 }
 0x137   : > { %v2059_v39 = vpop.permute.xlu1 %2058  ;;  %v2049_v35 = vpop.permute.xlu0 %2048 }
 0x138   : > { %v2115_v36 = vsel %vm1019_vm12, %v2107_v6, %v2049_v35  ;;  %v2778_v6 = vmax.f32 %v2758_v63, 0.0  ;;  %v2580_v35 = vpack.c.b16 %v10867_v0, %v2530_v31 }
 0x139   : > { %v2123_v59 = vsel %vm1028_vm13, %v2115_v36, %v2059_v39  ;;  %8766 = vmatmul.msk.bf16.gmra.mxu2 %vm979_vm8, %v10400_v27  ;;  %v8473_v36 = vld [vmem:[%s9200_s10 + $0x150] sm:$0xf] }
 0x13a   : > { %v10853_v61 = vsel %vm1037_vm14, %v2123_v59, %v2069_v37  ;;  %v2593_v37 = vpack.c.b16 %v15305_v24, %v2550_v4  ;;  %v10887_v59 = vld [vmem:[%s15275_s3 + $0x78] sm:$0xff]  ;;  %v2798_v26 = vsel %vm466_vm5, %v2778_v6, 0.0  ;;  %v2720_v3 = vunpack.c.l.bf16 %v8473_v36  ;;  %v10918_v36 = vpop.f32.mrf.mxu1 }
 0x13b   : > { %15540 = vst [vmem:[#allocation20_spill] sm:$0xff] %v10853_v61  ;;  %6340 = vmatmul.bf16.vlgmr.msrb.gmra.mxu1 %v10853_v61  ;;  %6460 = vmatmul.bf16.vlgmr.msrb.gmra.mxu0 %v10853_v61  ;;  %v10896_v31 = vpack.c.bf16 %v2798_v26, %v2798_v26 }
 0x13c   : > { %2539 = vrot.lane.b32.xlu2 %v10696_v47, %s9112_s15  ;;  %6699 = vmatpush.bf16.msrb.mxu1 %v10873_v21  ;;  %v2719_v47 = vunpack.c.l.bf16 %v8472_v16  ;;  %v2740_v17 = vmul.f32 %v10410_v44, %v2720_v3  ;;  %v8474_v16 = vld [vmem:[%s9200_s10 + $0x154] sm:$0x1] }
 0x13d   : > { %2561 = vrot.lane.b32.xlu1 %v10840_v32, %s9113_s16  ;;  %2541 = vrot.lane.b32.xlu0 %v10843_v19, %s9112_s15  ;;  %15541 = vst [vmem:[#allocation21_spill] sm:$0xff] %v10896_v31  ;;  %v2875_v29 = vshll.u32 %v10896_v31, 16 }
 0x13e   : > { %6757 = vmatpush.bf16.msrb.mxu0 %v10649_v43  ;;  %v2025_v39 = vpop.permute.xlu2 %2024  ;;  %v2739_v18 = vmul.f32 %v10410_v44, %v2719_v47 }
 0x13f   : > { %v2012_v22 = vpop.permute.xlu1 %2011  ;;  %v1992_v38 = vpop.permute.xlu0 %1991 }
 0x140   : > { %6700 = vmatpush.bf16.msrb.mxu1 %v10887_v59  ;;  %v2083_v43 = vsel %vm979_vm8, %v10102_v60, %v1992_v38  ;;  %v2759_v4 = vadd.f32 %v10431_v51, %v2739_v18  ;;  %v2872_v60 = vshrl.u32 %v10896_v31, 16  ;;  %v2721_v38 = vunpack.c.l.bf16 %v8474_v16  ;;  %v10922_v3 = vpop.f32.mrf.mxu2 }
 0x141   : > { %v2093_v50 = vsel %vm992_vm9, %v2083_v43, %v2012_v22  ;;  %v2760_v22 = vadd.f32 %v10431_v51, %v2740_v17 }
 0x142   : > { %6758 = vmatpush.bf16.msrb.mxu0 %v10682_v13  ;;  %v2779_v58 = vmax.f32 %v2759_v4, 0.0  ;;  %v10909_v13 = vld [vmem:[%s15275_s3 + $0x70] sm:$0xff]  ;;  %v2874_v6 = vrot.slane %v2872_v60, 4  ;;  %v2101_v43 = vsel %vm1001_vm10, %v2093_v50, %v2025_v39  ;;  %v2741_v26 = vmul.f32 %v10410_v44, %v2721_v38  ;;  %v10934_v39 = vld [vmem:[%s15275_s3 + $0x68] sm:$0xff] }
 0x143   : > { %v2780_v4 = vmax.f32 %v2760_v22, 0.0  ;;  %v15542_v22 = vunpack.c.l.b16 %v10373_v48 }
 0x144   : > { %2585 = vrot.lane.b32.xlu2 %v2579_v25, %s9114_s17  ;;  %6701 = vmatpush.bf16.msrb.mxu1 %v10909_v13  ;;  %v2799_v63 = vsel %vm473_vm6, %v2779_v58, 0.0  ;;  %v2761_v16 = vadd.f32 %v10431_v51, %v2741_v26 }
 0x145   : > { %2600 = vrot.lane.b32.xlu1 %v2593_v37, %s9116_s19  ;;  %2587 = vrot.lane.b32.xlu0 %v2580_v35, %s9114_s17  ;;  %v10916_v18 = vpack.c.bf16 %v2799_v63, %v2799_v63  ;;  %v2877_v35 = vrot.slane %v2875_v29, 5  ;;  %v8475_v29 = vld [vmem:[%s9200_s10 + $0x158] sm:$0xf]  ;;  %v2800_v50 = vsel %vm466_vm5, %v2780_v4, 0.0  ;;  %v10941_v63 = vpop.f32.mrf.mxu3  ;;  %v10946_v38 = vpack.c.b16 %v9233_v34, %v15542_v22 }
 0x146   : > { %6759 = vmatpush.bf16.msrb.mxu0 %v10714_v54  ;;  %v2061_v25 = vpop.permute.xlu2 %2060  ;;  %v2613_v54 = vpack.c.b16 %v9287_v23, %v10867_v0  ;;  %v2722_v0 = vunpack.c.l.bf16 %v8475_v29  ;;  %v2781_v26 = vmax.f32 %v2761_v16, 0.0 }
 0x147   : > { %v2051_v47 = vpop.permute.xlu1 %2050  ;;  %v2038_v37 = vpop.permute.xlu0 %2037  ;;  %v2878_v17 = vor.u32 %v2877_v35, %v2874_v6  ;;  %v2881_v60 = vshll.u32 %v10916_v18, 16  ;;  %15543 = vst [vmem:[#allocation22_spill] sm:$0xff] %v10946_v38  ;;  %v10948_v35 = vpack.c.bf16 %v2800_v50, %v2800_v50  ;;  %8764 = vmatmul.msk.bf16.gmra.mxu3 %vm979_vm8, %v10946_v38 }
 0x148   : > { %v2109_v58 = vsel %vm1010_vm11, %v2101_v43, %v2038_v37  ;;  %6702 = vmatpush.bf16.msrb.mxu1 %v10934_v39  ;;  %v10950_v43 = vpop.f32.mrf.mxu0  ;;  %v2742_v48 = vmul.f32 %v10410_v44, %v2722_v0 }
 0x149   : > { %8767 = vmatmul.msk.bf16.gmra.mxu2 %vm979_vm8, %v10384_v9  ;;  %v2879_v37 = vrot.slane %v2878_v17, 4  ;;  %v2883_v6 = vrot.slane %v2881_v60, 5  ;;  %v2117_v4 = vsel %vm1019_vm12, %v2109_v58, %v2051_v47  ;;  %v2886_v60 = vshrl.u32 %v10948_v35, 16  ;;  %v8476_v58 = vld [vmem:[%s9200_s10 + $0x15c] sm:$0x1] }
 0x14a   : > { %6760 = vmatpush.bf16.msrb.mxu0 %v10737_v53  ;;  %v2563_v53 = vunpack.c.l.b16 %v10730_v33  ;;  %v2889_v47 = vshll.u32 %v10948_v35, 16  ;;  %v2801_v33 = vsel %vm473_vm6, %v2781_v26, 0.0  ;;  %v2762_v50 = vadd.f32 %v10431_v51, %v2742_v48 }
 0x14b   : > { %v2884_v17 = vsel %vm9227_vm7, %v2879_v37, %v2883_v6  ;;  %v2723_v16 = vunpack.c.l.bf16 %v8476_v58  ;;  %v2125_v0 = vsel %vm1028_vm13, %v2117_v4, %v2061_v25  ;;  %v10976_v6 = vpack.c.bf16 %v2801_v33, %v2801_v33  ;;  %v10998_v33 = vld [vmem:[%s15275_s3 + $0x58] sm:$0xff] }
 0x14c   : > { %2618 = vrot.lane.b32.xlu2 %v10843_v19, %s9115_s18  ;;  %v3070_v19 = vunpack.c.l.b16 %v2884_v17  ;;  %v2888_v17 = vrot.slane %v2886_v60, 4  ;;  %v2891_v26 = vrot.slane %v2889_v47, 5  ;;  %v15545_v58 = vunpack.c.l.b16 %v10672_v52  ;;  %v10988_v60 = vpop.f32.mrf.mxu1 }
 0x14d   : > { %2620 = vrot.lane.b32.xlu0 %v2613_v54, %s9115_s18  ;;  %v10971_v54 = vld [vmem:[%s15275_s3 + $0x60] sm:$0xff]  ;;  %v2782_v9 = vmax.f32 %v2762_v50, 0.0  ;;  %v2895_v25 = vshll.u32 %v10976_v6, 16  ;;  %v2743_v4 = vmul.f32 %v10410_v44, %v2723_v16  ;;  %v11001_v50 = vpop.f32.mrf.mxu2 }
 0x14e   : > { %6703 = vmatpush.bf16.msrb.mxu1 %v10971_v54  ;;  %6761 = vmatpush.bf16.msrb.mxu0 %v10776_v7  ;;  %v2014_v37 = vpop.permute.xlu2 %2013  ;;  %v2567_v24 = vpack.c.b16 %v2563_v53, %v15545_v58  ;;  %v3077_v61 = vpack.c.b16 %v3070_v19, %v9287_v23  ;;  %v2892_v7 = vor.u32 %v2891_v26, %v2888_v17 }
 0x14f   : > { %v1994_v29 = vpop.permute.xlu1 %1993  ;;  %v2071_v22 = vpop.permute.xlu0 %2070  ;;  %v2802_v52 = vsel %vm466_vm5, %v2782_v9, 0.0  ;;  %15546 = vst [vmem:[#allocation24_spill] sm:$0xff] %v11001_v50  ;;  %v2897_v16 = vrot.slane %v2895_v25, 5 }
 0x150   : > { %v10979_v48 = vsel %vm1037_vm14, %v2125_v0, %v2071_v22  ;;  %v2086_v47 = vsel %vm979_vm8, %v10339_v15, %v1994_v29  ;;  %3081 = vrot.lane.b32.xlu1 %v3077_v61, %s9112_s15  ;;  %v2893_v44 = vrot.slane %v2892_v7, 4  ;;  %v11003_v0 = vpack.c.bf16 %v2802_v52, %v2802_v52  ;;  %v11008_v9 = vpop.f32.mrf.mxu3  ;;  %v11015_v26 = vpop.f32.mrf.mxu0 }
 0x151   : > { %15544 = vst [vmem:[#allocation23_spill] sm:$0xff] %v10979_v48  ;;  %6345 = vmatmul.bf16.gmra.mxu1 %v10979_v48  ;;  %6465 = vmatmul.bf16.gmra.mxu0 %v10979_v48  ;;  %v2763_v15 = vadd.f32 %v10431_v51, %v2743_v4  ;;  %v2095_v61 = vsel %vm992_vm9, %v2086_v47, %v2014_v37  ;;  %v15310_v29 = vunpack.c.l.b16 %v10896_v31  ;;  %v3059_v22 = vunpack.c.l.b16 %v10948_v35  ;;  %v11022_v37 = vld [vmem:[%s15275_s3 + $0x50] sm:$0xff] }
 0x152   : > { %6704 = vmatpush.bf16.msrb.mxu1 %v10998_v33  ;;  %6762 = vmatpush.bf16.msrb.mxu0 %v10796_v40  ;;  %15547 = vst [vmem:[#allocation25_spill] sm:$0xff] %v11008_v9  ;;  %v2898_v17 = vsel %vm9227_vm7, %v2893_v44, %v2897_v16  ;;  %v2900_v40 = vshrl.u32 %v11003_v0, 16  ;;  %v2603_v52 = vpack.c.b16 %v9895_v20, %v2563_v53 }
 0x153   : > { %v3071_v7 = vunpack.c.l.b16 %v2898_v17  ;;  %v2783_v25 = vmax.f32 %v2763_v15, 0.0  ;;  %v3110_v44 = vpack.c.b16 %v3059_v22, %v15310_v29  ;;  %v8477_v29 = vld [vmem:[%s9200_s10 + $0x160] sm:$0xf] }
 0x154   : > { %2574 = vrot.lane.b32.xlu2 %v2567_v24, %s9110_s13  ;;  %v2903_v24 = vshll.u32 %v11003_v0, 16  ;;  %v2902_v48 = vrot.slane %v2900_v40, 4  ;;  %v6127_v53 = vpop.f32.mrf.mxu1  ;;  %v2724_v40 = vunpack.c.l.bf16 %v8477_v29 }
 0x155   : > { %v3123_v15 = vpack.c.b16 %v3071_v7, %v3070_v19  ;;  %v2803_v17 = vsel %vm473_vm6, %v2783_v25, 0.0  ;;  %3114 = vrot.lane.b32.xlu0 %v3110_v44, %s9110_s13  ;;  %v15548_v44 = vld [vmem:[#allocation6_spill] sm:$0xff] }
 0x156   : > { %6705 = vmatpush.bf16.msrb.mxu1 %v11022_v37  ;;  %v2053_v47 = vpop.permute.xlu2 %2052  ;;  %6763 = vmatpush.bf16.msrb.mxu0 %v10821_v28  ;;  %v2844_v9 = vpack.c.bf16 %v2803_v17, %v2803_v17  ;;  %v2905_v27 = vrot.slane %v2903_v24, 5  ;;  %v11040_v28 = vld [vmem:[%s15275_s3 + $0x48] sm:$0xff]  ;;  %v6222_v24 = vpop.f32.mrf.mxu2 }
 0x157   : > { %v2040_v58 = vpop.permute.xlu1 %2039  ;;  %v2027_v4 = vpop.permute.xlu0 %2026  ;;  %8769 = vmatmul.msk.bf16.vlgmr.msra.gmra.mxu3 %vm979_vm8, %v15548_v44 }
 0x158   : > { %v2103_v16 = vsel %vm1001_vm10, %v2095_v61, %v2027_v4  ;;  %3127 = vrot.lane.b32.xlu1 %v3123_v15, %s9114_s17  ;;  %v2906_v61 = vor.u32 %v2905_v27, %v2902_v48  ;;  %v2909_v25 = vshll.u32 %v2844_v9, 16  ;;  %v6251_v4 = vpop.f32.mrf.mxu3  ;;  %v15316_v15 = vunpack.c.l.b16 %v11003_v0  ;;  %v11052_v27 = vld [vmem:[%s15276_s4] ss:$0 sm:$0xff] }
 0x159   : > { %8768 = vmatmul.msk.bf16.gmra.mxu2 %vm979_vm8, %v10946_v38  ;;  %v2111_v19 = vsel %vm1010_vm11, %v2103_v16, %v2040_v58  ;;  %v2744_v48 = vmul.f32 %v11052_v27, %v2724_v40  ;;  %v11060_v16 = vld [vmem:[%s15275_s3 + $0xd0] sm:$0xff] }
 0x15a   : > { %6706 = vmatpush.bf16.msrb.mxu1 %v11040_v28  ;;  %6764 = vmatpush.bf16.msrb.mxu0 %v10835_v5  ;;  %v2907_v17 = vrot.slane %v2906_v61, 4  ;;  %v2911_v38 = vrot.slane %v2909_v25, 5  ;;  %v2119_v5 = vsel %vm1019_vm12, %v2111_v19, %v2053_v47  ;;  %15549 = vst [vmem:[#allocation6_spill] sm:$0xff] %v11060_v16  ;;  %v11065_v50 = vpack.c.b16 %v15316_v15, %v3059_v22 }
 0x15b   : > { %6863 = vmatpush.bf16.msra.mxu3 %v11060_v16  ;;  %v2764_v19 = vadd.f32 %v10431_v51, %v2744_v48  ;;  %v8491_v51 = vrot.slane %v10948_v35, 9 }
 0x15c   : > { %2610 = vrot.lane.b32.xlu2 %v2603_v52, %s9111_s14  ;;  %v8478_v52 = vld [vmem:[%s9200_s10 + $0x164] sm:$0x1]  ;;  %15550 = vst [vmem:[#allocation26_spill] sm:$0xff] %v11065_v50  ;;  %v2912_v47 = vsel %vm9227_vm7, %v2907_v17, %v2911_v38  ;;  %v8492_v17 = vrot.slane %v11003_v0, 9 }
 0x15d   : > { %v11073_v42 = vunpack.c.l.b16 %v2912_v47  ;;  %v2725_v16 = vunpack.c.l.bf16 %v8478_v52  ;;  %3150 = vrot.lane.b32.xlu0 %v11065_v50, %s9111_s14  ;;  %v2784_v22 = vmax.f32 %v2764_v19, 0.0 }
 0x15e   : > { %v6098_v29 = vpop.f32.mrf.mxu0  ;;  %v1996_v44 = vpop.permute.xlu2 %1995 }
 0x15f   : > { %v2073_v58 = vpop.permute.xlu1 %2072  ;;  %v6128_v61 = vadd.f32 %v6127_v53, %v6098_v29  ;;  %v2063_v25 = vpop.permute.xlu0 %2062  ;;  %v2089_v57 = vsel %vm979_vm8, %v10366_v12, %v1996_v44  ;;  %v8479_v53 = vld [vmem:[%s9200_s10 + $0x168] sm:$0xf]  ;;  %v11084_v12 = vpack.c.b16 %v11073_v42, %v3071_v7  ;;  %v2745_v52 = vmul.f32 %v11052_v27, %v2725_v16  ;;  %v11113_v44 = vld [vmem:[%s15277_s5] ss:$0 sm:$0xff] }
 0x160   : > { %v2127_v40 = vsel %vm1028_vm13, %v2119_v5, %v2063_v25  ;;  %v2726_v38 = vunpack.c.l.bf16 %v8479_v53  ;;  %v2999_v5 = vrot.slane %v2844_v9, 5  ;;  %v8480_v9 = vld [vmem:[%s9200_s10 + $0x16c] sm:$0x1]  ;;  %v6224_v16 = vpop.f32.mrf.mxu2  ;;  %v6253_v50 = vpop.f32.mrf.mxu3 }
 0x161   : > { %v6223_v29 = vadd.f32 %v6222_v24, %v6128_v61  ;;  %v11077_v11 = vsel %vm1037_vm14, %v2127_v40, %v2073_v58  ;;  %v2995_v24 = vrot.slane %v10976_v6, 5  ;;  %v2804_v58 = vsel %vm466_vm5, %v2784_v22, 0.0  ;;  %v6129_v61 = vpop.f32.mrf.mxu1  ;;  %3160 = vrot.lane.b32.xlu1 %v11084_v12, %s9115_s18 }
 0x162   : > { %15551 = vst [vmem:[#allocation27_spill] sm:$0xff] %v11077_v11  ;;  %6350 = vmatmul.bf16.gmra.mxu1 %v11077_v11  ;;  %6470 = vmatmul.bf16.gmra.mxu0 %v11077_v11  ;;  %v11100_v35 = vpack.c.bf16 %v2804_v58, %v2804_v58  ;;  %v8490_v6 = vrot.slane %v10896_v31, 9  ;;  %v11107_v25 = vsel %vm9191_vm2, %v8492_v17, %v2999_v5  ;;  %v15555_v31 = vunpack.c.l.b16 %v11003_v0 }
 0x163   : > { %v11089_v48 = vadd.f32 %v6251_v4, %v6223_v29  ;;  %v11098_v7 = vsel %vm9191_vm2, %v8491_v51, %v2995_v24  ;;  %v2991_v4 = vrot.slane %v10916_v18, 5  ;;  %v2765_v47 = vadd.f32 %v11113_v44, %v2745_v52 }
 0x164   : > { %v2746_v19 = vmul.f32 %v11052_v27, %v2726_v38  ;;  %v3092_v18 = vunpack.c.l.b16 %v11107_v25  ;;  %v3061_v29 = vunpack.c.l.b16 %v11100_v35  ;;  %v2727_v51 = vunpack.c.l.bf16 %v8480_v9 }
 0x165   : > { %15552 = vst [vmem:[#allocation28_spill] sm:$0xff] %v11089_v48  ;;  %v2992_v22 = vsel %vm9191_vm2, %v8490_v6, %v2991_v4  ;;  %v2785_v15 = vmax.f32 %v2765_v47, 0.0  ;;  %v15553_v25 = vunpack.c.l.b16 %v11098_v7 }
 0x166   : > { %v6100_v40 = vpop.f32.mrf.mxu0  ;;  %v2042_v5 = vpop.permute.xlu2 %2041  ;;  %v3090_v58 = vunpack.c.l.b16 %v2992_v22  ;;  %v2766_v52 = vadd.f32 %v11113_v44, %v2746_v19  ;;  %v3111_v48 = vpack.c.b16 %v3061_v29, %v15555_v31  ;;  %v2747_v6 = vmul.f32 %v11052_v27, %v2727_v51 }
 0x167   : > { %v2029_v53 = vpop.permute.xlu1 %2028  ;;  %v6130_v24 = vadd.f32 %v6129_v61, %v6100_v40  ;;  %v2016_v17 = vpop.permute.xlu0 %2015  ;;  %v11125_v11 = vpack.c.b16 %v3092_v18, %v15553_v25  ;;  %v8481_v61 = vld [vmem:[%s9200_s10 + $0x170] sm:$0xf]  ;;  %v8493_v31 = vrot.slane %v11100_v35, 9  ;;  %v15557_v40 = vunpack.c.l.b16 %v10304_v45 }
 0x168   : > { %v2097_v38 = vsel %vm992_vm9, %v2089_v57, %v2016_v17  ;;  %v3097_v9 = vpack.c.b16 %v3090_v58, %v9233_v34  ;;  %v2805_v57 = vsel %vm473_vm6, %v2785_v15, 0.0  ;;  %v2786_v19 = vmax.f32 %v2766_v52, 0.0  ;;  %v8482_v17 = vld [vmem:[%s9200_s10 + $0x174] sm:$0x1]  ;;  %v15558_v52 = vld [vmem:[#allocation7_spill] sm:$0xff] }
 0x169   : > { %15554 = vst [vmem:[#allocation29_spill] sm:$0xff] %v11125_v11  ;;  %v6225_v4 = vadd.f32 %v6224_v16, %v6130_v24  ;;  %8773 = vmatmul.msk.bf16.vlgmr.msra.gmra.mxu2 %vm979_vm8, %v10756_v2  ;;  %v2105_v47 = vsel %vm1001_vm10, %v2097_v38, %v2029_v53  ;;  %3103 = vrot.lane.b32.xlu0 %v11125_v11, %s9113_s16  ;;  %v2728_v53 = vunpack.c.l.bf16 %v8481_v61  ;;  %v8483_v11 = vld [vmem:[%s9200_s10 + $0x178] sm:$0xf] }
 0x16a   : > { %v2846_v0 = vpack.c.bf16 %v2805_v57, %v2805_v57  ;;  %6982 = vmatpush.bf16.msra.mxu2 %v10628_v49  ;;  %v11146_v22 = vpack.c.b16 %v15557_v40, %v9895_v20  ;;  %3101 = vrot.lane.b32.xlu2 %v3097_v9, %s9113_s16  ;;  %v2767_v15 = vadd.f32 %v11113_v44, %v2747_v6  ;;  %v2806_v24 = vsel %vm466_vm5, %v2786_v19, 0.0 }
 0x16b   : > { %v11141_v16 = vadd.f32 %v6253_v50, %v6225_v4  ;;  %3116 = vrot.lane.b32.xlu1 %v3111_v48, %s9110_s13  ;;  %v2914_v49 = vshrl.u32 %v11100_v35, 16  ;;  %v2917_v50 = vshll.u32 %v11100_v35, 16  ;;  %v2113_v45 = vsel %vm1010_vm11, %v2105_v47, %v2042_v5  ;;  %8770 = vmatmul.msk.bf16.gmra.mxu3 %vm979_vm8, %v15558_v52 }
 0x16c   : > { %v3003_v51 = vrot.slane %v2846_v0, 5  ;;  %v11159_v38 = vpack.c.bf16 %v2806_v24, %v2806_v24  ;;  %v2787_v25 = vmax.f32 %v2767_v15, 0.0  ;;  %v2729_v6 = vunpack.c.l.bf16 %v8482_v17 }
 0x16d   : > { %15556 = vst [vmem:[#allocation30_spill] sm:$0xff] %v11141_v16  ;;  %v2916_v4 = vrot.slane %v2914_v49, 4  ;;  %v2919_v9 = vrot.slane %v2917_v50, 5  ;;  %v2748_v57 = vmul.f32 %v11052_v27, %v2728_v53  ;;  %v15560_v50 = vunpack.c.l.b16 %v11098_v7 }
 0x16e   : > { %v3004_v48 = vsel %vm9191_vm2, %v8493_v31, %v3003_v51  ;;  %v2075_v19 = vpop.permute.xlu2 %2074  ;;  %v15322_v5 = vunpack.c.l.b16 %v11159_v38  ;;  %v2807_v47 = vsel %vm473_vm6, %v2787_v25, 0.0  ;;  %v2928_v15 = vshrl.u32 %v11159_v38, 16 }
 0x16f   : > { %v2065_v61 = vpop.permute.xlu1 %2064  ;;  %v2055_v35 = vpop.permute.xlu0 %2054  ;;  %v3093_v40 = vunpack.c.l.b16 %v3004_v48  ;;  %v2848_v17 = vpack.c.bf16 %v2807_v47, %v2807_v47  ;;  %v2920_v52 = vor.u32 %v2919_v9, %v2916_v4  ;;  %v2923_v31 = vshll.u32 %v2846_v0, 16  ;;  %v8484_v9 = vld [vmem:[%s9200_s10 + $0x17c] sm:$0x1] }
 0x170   : > { %v2121_v24 = vsel %vm1019_vm12, %v2113_v45, %v2055_v35  ;;  %v11172_v53 = vpack.c.b16 %v15322_v5, %v3061_v29  ;;  %v3136_v48 = vpack.c.b16 %v15560_v50, %v3090_v58  ;;  %v2930_v35 = vrot.slane %v2928_v15, 4 }
 0x171   : > { %v2129_v51 = vsel %vm1028_vm13, %v2121_v24, %v2065_v61  ;;  %v3137_v49 = vpack.c.b16 %v3093_v40, %v3092_v18  ;;  %v2921_v16 = vrot.slane %v2920_v52, 4  ;;  %v2925_v45 = vrot.slane %v2923_v31, 5 }
 0x172   : > { %15559 = vst [vmem:[#allocation7_spill] sm:$0xff] %v11172_v53  ;;  %v11178_v25 = vsel %vm1037_vm14, %v2129_v51, %v2075_v19  ;;  %v2931_v18 = vshll.u32 %v11159_v38, 16  ;;  %v2937_v0 = vshll.u32 %v2848_v17, 16  ;;  %v8494_v29 = vrot.slane %v11159_v38, 9  ;;  %3140 = vrot.lane.b32.xlu2 %v3136_v48, %s9116_s19 }
 0x173   : > { %15561 = vst [vmem:[#allocation31_spill] sm:$0xff] %v11178_v25  ;;  %6355 = vmatmul.bf16.gmra.mxu1 %v11178_v25  ;;  %6475 = vmatmul.bf16.gmra.mxu0 %v11178_v25  ;;  %v3007_v61 = vrot.slane %v2848_v17, 5  ;;  %v2926_v7 = vsel %vm9227_vm7, %v2921_v16, %v2925_v45  ;;  %v2749_v58 = vmul.f32 %v11052_v27, %v2729_v6  ;;  %v2730_v19 = vunpack.c.l.bf16 %v8483_v11  ;;  %v11197_v17 = vpop.f32.mrf.mxu3 }
 0x174   : > { %3142 = vrot.lane.b32.xlu0 %v3137_v49, %s9116_s19  ;;  %3152 = vrot.lane.b32.xlu1 %v11172_v53, %s9111_s14  ;;  %v2768_v4 = vadd.f32 %v11113_v44, %v2748_v57  ;;  %v2933_v47 = vrot.slane %v2931_v18, 5  ;;  %v2731_v6 = vunpack.c.l.bf16 %v8484_v9  ;;  %v2939_v49 = vrot.slane %v2937_v0, 5 }
 0x175   : > { %v11195_v15 = vsel %vm9191_vm2, %v8494_v29, %v3007_v61  ;;  %v2769_v16 = vadd.f32 %v11113_v44, %v2749_v58  ;;  %v11201_v50 = vunpack.c.l.b16 %v2926_v7  ;;  %v2750_v48 = vmul.f32 %v11052_v27, %v2730_v19 }
 0x176   : > { %v3094_v52 = vunpack.c.l.b16 %v11195_v15  ;;  %v2788_v31 = vmax.f32 %v2768_v4, 0.0  ;;  %v2569_v51 = vpop.permute.xlu2 %2568  ;;  %v2934_v11 = vor.u32 %v2933_v47, %v2930_v35  ;;  %v2751_v7 = vmul.f32 %v11052_v27, %v2731_v6  ;;  %v8485_v4 = vld [vmem:[%s9200_s10 + $0x180] sm:$0xf] }
 0x177   : > { %v2556_v24 = vpop.permute.xlu1 %2555  ;;  %v2536_v57 = vpop.permute.xlu0 %2535  ;;  %v2789_v29 = vmax.f32 %v2769_v16, 0.0  ;;  %v2770_v9 = vadd.f32 %v11113_v44, %v2750_v48  ;;  %v2732_v19 = vunpack.c.l.bf16 %v8485_v4 }
 0x178   : > { %v2626_v45 = vsel %vm979_vm8, %v11146_v22, %v2536_v57  ;;  %v11208_v18 = vpack.c.b16 %v3094_v52, %v3093_v40  ;;  %v2808_v61 = vsel %vm466_vm5, %v2788_v31, 0.0  ;;  %v2935_v35 = vrot.slane %v2934_v11, 4  ;;  %v6132_v57 = vpop.f32.mrf.mxu1 }
 0x179   : > { %v2637_v58 = vsel %vm992_vm9, %v2626_v45, %v2556_v24  ;;  %8774 = vmatmul.msk.bf16.gmra.mxu2 %vm979_vm8, %v10745_v14  ;;  %v11215_v0 = vpack.c.bf16 %v2808_v61, %v2808_v61  ;;  %v2809_v40 = vsel %vm473_vm6, %v2789_v29, 0.0  ;;  %v2790_v48 = vmax.f32 %v2770_v9, 0.0 }
 0x17a   : > { %15562 = vst [vmem:[#allocation32_spill] sm:$0xff] %v11208_v18  ;;  %v2645_v22 = vsel %vm1001_vm10, %v2637_v58, %v2569_v51  ;;  %v2940_v47 = vsel %vm9227_vm7, %v2935_v35, %v2939_v49  ;;  %v2850_v24 = vpack.c.bf16 %v2809_v40, %v2809_v40  ;;  %v2771_v51 = vadd.f32 %v11113_v44, %v2751_v7 }
 0x17b   : > { %v2942_v16 = vshrl.u32 %v11215_v0, 16  ;;  %v2945_v31 = vshll.u32 %v11215_v0, 16  ;;  %v11227_v11 = vunpack.c.l.b16 %v2940_v47  ;;  %v8495_v6 = vrot.slane %v11215_v0, 9  ;;  %3083 = vrot.lane.b32.xlu2 %v11084_v12, %s9112_s15  ;;  %8771 = vmatmul.msk.bf16.gmra.mxu3 %vm979_vm8, %v10041_v56 }
 0x17c   : > { %3105 = vrot.lane.b32.xlu1 %v11208_v18, %s9113_s16  ;;  %v2951_v29 = vshll.u32 %v2850_v24, 16  ;;  %v3011_v61 = vrot.slane %v2850_v24, 5  ;;  %v2791_v4 = vmax.f32 %v2771_v51, 0.0  ;;  %v2810_v7 = vsel %vm466_vm5, %v2790_v48, 0.0 }
 0x17d   : > { %v2944_v49 = vrot.slane %v2942_v16, 4  ;;  %v2947_v45 = vrot.slane %v2945_v31, 5  ;;  %v11239_v35 = vpack.c.b16 %v11227_v11, %v11201_v50  ;;  %v2752_v40 = vmul.f32 %v11052_v27, %v2732_v19  ;;  %v6227_v31 = vpop.f32.mrf.mxu2 }
 0x17e   : > { %v2605_v12 = vpop.permute.xlu2 %2604  ;;  %v2953_v56 = vrot.slane %v2951_v29, 5  ;;  %v11246_v16 = vsel %vm9191_vm2, %v8495_v6, %v3011_v61  ;;  %v11248_v24 = vpack.c.bf16 %v2810_v7, %v2810_v7  ;;  %v2811_v48 = vsel %vm473_vm6, %v2791_v4, 0.0  ;;  %v6258_v29 = vpop.f32.mrf.mxu3  ;;  %v8486_v7 = vld [vmem:[%s9200_s10 + $0x184] sm:$0x1] }
 0x17f   : > { %v2595_v58 = vpop.permute.xlu1 %2594  ;;  %v2582_v9 = vpop.permute.xlu0 %2581  ;;  %v2948_v47 = vor.u32 %v2947_v45, %v2944_v49  ;;  %3085 = vrot.lane.b32.xlu0 %v11239_v35, %s9112_s15  ;;  %v15324_v19 = vunpack.c.l.b16 %v11246_v16  ;;  %v2772_v49 = vadd.f32 %v11113_v44, %v2752_v40  ;;  %v3124_v61 = vpack.c.b16 %v11201_v50, %v11073_v42 }
 0x180   : > { %v2653_v5 = vsel %vm1010_vm11, %v2645_v22, %v2582_v9  ;;  %v6103_v51 = vpop.f32.mrf.mxu0  ;;  %v11265_v53 = vpack.c.bf16 %v2811_v48, %v2811_v48  ;;  %v2956_v4 = vshrl.u32 %v11248_v24, 16  ;;  %v2959_v42 = vshll.u32 %v11248_v24, 16 }
 0x181   : > { %v6133_v45 = vadd.f32 %v6132_v57, %v6103_v51  ;;  %v2949_v6 = vrot.slane %v2948_v47, 4  ;;  %v2661_v22 = vsel %vm1019_vm12, %v2653_v5, %v2595_v58  ;;  %v3138_v9 = vpack.c.b16 %v15324_v19, %v3094_v52  ;;  %v11277_v58 = vld [vmem:[%s15275_s3 + $0xc8] sm:$0xff]  ;;  %v6134_v51 = vpop.f32.mrf.mxu1 }
 0x182   : > { %v2792_v50 = vmax.f32 %v2772_v49, 0.0  ;;  %v2958_v5 = vrot.slane %v2956_v4, 4  ;;  %v2965_v15 = vshll.u32 %v11265_v53, 16  ;;  %v2733_v52 = vunpack.c.l.bf16 %v8486_v7 }
 0x183   : > { %6518 = vmatmul.bf16.vlgmr.msra.gmra.mxu1 %v10075_v41  ;;  %v6228_v57 = vadd.f32 %v6227_v31, %v6133_v45  ;;  %v2954_v40 = vsel %vm9227_vm7, %v2949_v6, %v2953_v56  ;;  %3129 = vrot.lane.b32.xlu2 %v3124_v61, %s9114_s17  ;;  %v2961_v56 = vrot.slane %v2959_v42, 5  ;;  %v2669_v7 = vsel %vm1028_vm13, %v2661_v22, %v2605_v12 }
 0x184   : > { %v3075_v47 = vunpack.c.l.b16 %v2954_v40  ;;  %3144 = vrot.lane.b32.xlu1 %v3138_v9, %s9116_s19  ;;  %6827 = vmatpush.bf16.msra.mxu1 %v11277_v58  ;;  %v2812_v31 = vsel %vm466_vm5, %v2792_v50, 0.0  ;;  %v2753_v6 = vmul.f32 %v11052_v27, %v2733_v52  ;;  %v11300_v50 = vld [vmem:[%s15275_s3 + $0xc0] sm:$0xff] }
 0x185   : > { %v11281_v41 = vadd.f32 %v11197_v17, %v6228_v57  ;;  %v11287_v45 = vpack.c.bf16 %v2812_v31, %v2812_v31  ;;  %v2962_v17 = vor.u32 %v2961_v56, %v2958_v5  ;;  %v2967_v57 = vrot.slane %v2965_v15, 5  ;;  %v6229_v52 = vpop.f32.mrf.mxu2 }
 0x186   : > { %v3125_v49 = vpack.c.b16 %v3075_v47, %v11227_v11  ;;  %v2558_v4 = vpop.permute.xlu2 %2557  ;;  %v2773_v42 = vadd.f32 %v11113_v44, %v2753_v6  ;;  %v11306_v22 = vpop.f32.mrf.mxu3 }
 0x187   : > { %v2538_v48 = vpop.permute.xlu1 %2537  ;;  %v2615_v9 = vpop.permute.xlu0 %2614  ;;  %v3018_v11 = vshrl.u32 %v11287_v45, 16  ;;  %v2963_v5 = vrot.slane %v2962_v17, 4  ;;  %v3021_v15 = vshll.u32 %v11287_v45, 16 }
 0x188   : > { %v11292_v61 = vsel %vm1037_vm14, %v2669_v7, %v2615_v9  ;;  %v6105_v40 = vpop.f32.mrf.mxu0  ;;  %3131 = vrot.lane.b32.xlu0 %v3125_v49, %s9114_s17  ;;  %6828 = vmatpush.bf16.msra.mxu1 %v11300_v50  ;;  %v2793_v56 = vmax.f32 %v2773_v42, 0.0  ;;  %v2629_v49 = vsel %vm979_vm8, %v10670_v46, %v2538_v48 }
 0x189   : > { %15563 = vst [vmem:[#allocation33_spill] sm:$0xff] %v11292_v61  ;;  %v6135_v12 = vadd.f32 %v6134_v51, %v6105_v40  ;;  %6588 = vmatmul.bf16.vlgmr.msra.gmra.mxu0 %v11292_v61  ;;  %8775 = vmatmul.msk.bf16.gmra.mxu2 %vm979_vm8, %v10840_v32  ;;  %v3020_v31 = vrot.slane %v3018_v11, 4  ;;  %v2968_v51 = vsel %vm9227_vm7, %v2963_v5, %v2967_v57  ;;  %v3023_v7 = vrot.slane %v3021_v15, 5  ;;  %v11321_v40 = vld [vmem:[%s15275_s3 + $0xb8] sm:$0xff] }
 0x18a   : > { %6946 = vmatpush.bf16.msra.mxu0 %v10873_v21  ;;  %v11314_v9 = vunpack.c.l.b16 %v2968_v51  ;;  %v2813_v17 = vsel %vm473_vm6, %v2793_v56, 0.0  ;;  %v2639_v48 = vsel %vm992_vm9, %v2629_v49, %v2558_v4  ;;  %v3064_v11 = vunpack.c.l.b16 %v11248_v24  ;;  %v8501_v5 = vld [vmem:[%s9200_s10 + $0x198] sm:$0xf]  ;;  %v8502_v15 = vld [vmem:[%s9200_s10 + $0x19c] sm:$0x1] }
 0x18b   : > { %v6230_v6 = vadd.f32 %v6229_v52, %v6135_v12  ;;  %3162 = vrot.lane.b32.xlu2 %v11239_v35, %s9115_s18  ;;  %8772 = vmatmul.msk.bf16.gmra.mxu3 %vm979_vm8, %v10562_v62  ;;  %v11330_v21 = vpack.c.bf16 %v2813_v17, %v2813_v17  ;;  %v3024_v12 = vor.u32 %v3023_v7, %v3020_v31  ;;  %v3109_v35 = vunpack.c.l.b16 %v11287_v45  ;;  %v11349_v7 = vld [vmem:[%s15275_s3 + $0xb0] sm:$0xff] }
 0x18c   : > { %6829 = vmatpush.bf16.msra.mxu1 %v11321_v40  ;;  %v3080_v42 = vpack.c.b16 %v11314_v9, %v3075_v47  ;;  %v3063_v56 = vunpack.c.l.b16 %v11215_v0  ;;  %v3264_v4 = vunpack.c.l.bf16 %v8501_v5  ;;  %v3265_v31 = vunpack.c.l.bf16 %v8502_v15 }
 0x18d   : > { %v11324_v46 = vadd.f32 %v6258_v29, %v6230_v6  ;;  %v3027_v62 = vshll.u32 %v11330_v21, 16  ;;  %v3025_v47 = vrot.slane %v3024_v12, 4  ;;  %v8503_v12 = vld [vmem:[%s9200_s10 + $0x1a0] sm:$0xf] }
 0x18e   : > { %6947 = vmatpush.bf16.msra.mxu0 %v10887_v59  ;;  %v2597_v52 = vpop.permute.xlu2 %2596  ;;  %3087 = vrot.lane.b32.xlu1 %v3080_v42, %s9112_s15  ;;  %v15564_v59 = vunpack.c.l.b16 %v11159_v38  ;;  %v11352_v0 = vpop.f32.mrf.mxu3  ;;  %v3284_v17 = vmul.f32 %v11052_v27, %v3264_v4  ;;  %v3113_v38 = vpack.c.b16 %v3109_v35, %v3064_v11  ;;  %v3266_v15 = vunpack.c.l.bf16 %v8503_v12 }
 0x18f   : > { %v2584_v57 = vpop.permute.xlu1 %2583  ;;  %v2571_v29 = vpop.permute.xlu0 %2570  ;;  %v3029_v6 = vrot.slane %v3027_v62, 5 }
 0x190   : > { %3164 = vrot.lane.b32.xlu0 %v3080_v42, %s9115_s18  ;;  %v2647_v49 = vsel %vm1001_vm10, %v2639_v48, %v2571_v29  ;;  %v3112_v51 = vpack.c.b16 %v3063_v56, %v15564_v59  ;;  %6830 = vmatpush.bf16.msra.mxu1 %v11349_v7  ;;  %v3285_v42 = vmul.f32 %v11052_v27, %v3265_v31  ;;  %v15565_v48 = vld [vmem:[#allocation10_spill] sm:$0xff] }
 0x191   : > { %v3030_v5 = vsel %vm9227_vm7, %v3025_v47, %v3029_v6  ;;  %v2655_v29 = vsel %vm1010_vm11, %v2647_v49, %v2584_v57  ;;  %v3304_v4 = vadd.f32 %v11113_v44, %v3284_v17  ;;  %v11378_v47 = vld [vmem:[%s15275_s3 + $0xa8] sm:$0xff]  ;;  %v6123_v57 = vadd.f32 %v10918_v36, %v10950_v43  ;;  %v8504_v17 = vld [vmem:[%s9200_s10 + $0x1a4] sm:$0x1] }
 0x192   : > { %6948 = vmatpush.bf16.msra.mxu0 %v10909_v13  ;;  %v11364_v62 = vunpack.c.l.b16 %v3030_v5  ;;  %v3305_v31 = vadd.f32 %v11113_v44, %v3285_v42  ;;  %v15566_v13 = vunpack.c.l.b16 %v10847_v55  ;;  %v2663_v42 = vsel %vm1019_vm12, %v2655_v29, %v2597_v52  ;;  %v8505_v52 = vld [vmem:[%s9200_s10 + $0x1a8] sm:$0xf] }
 0x193   : > { %6523 = vmatmul.bf16.gmra.mxu1 %v15565_v48  ;;  %3118 = vrot.lane.b32.xlu2 %v3112_v51, %s9110_s13  ;;  %v3286_v48 = vmul.f32 %v11052_v27, %v3266_v15  ;;  %v3324_v55 = vmax.f32 %v3304_v4, 0.0  ;;  %v11391_v36 = vadd.f32 %v10988_v60, %v11015_v26  ;;  %v6218_v43 = vadd.f32 %v10922_v3, %v6123_v57 }
 0x194   : > { %v11372_v59 = vpack.c.b16 %v9233_v34, %v15566_v13  ;;  %6831 = vmatpush.bf16.msra.mxu1 %v11378_v47  ;;  %v3126_v6 = vpack.c.b16 %v11364_v62, %v11314_v9  ;;  %v3325_v51 = vmax.f32 %v3305_v31, 0.0  ;;  %v3267_v13 = vunpack.c.l.bf16 %v8504_v17 }
 0x195   : > { %v3306_v15 = vadd.f32 %v11113_v44, %v3286_v48  ;;  %v11405_v60 = vpack.c.b16 %v3064_v11, %v3063_v56  ;;  %v3268_v56 = vunpack.c.l.bf16 %v8505_v52  ;;  %v15571_v48 = vld [vmem:[#allocation14_spill] sm:$0xff]  ;;  %v11482_v19 = vadd.f32 %v10941_v63, %v6218_v43  ;;  %v11500_v43 = vld [vmem:[%s15275_s3 + $0x90] sm:$0xff] }
 0x196   : > { %15567 = vst [vmem:[#allocation10_spill] sm:$0xff] %v11372_v59  ;;  %6949 = vmatpush.bf16.msra.mxu0 %v10934_v39  ;;  %v2540_v5 = vpop.permute.xlu2 %2539  ;;  %3133 = vrot.lane.b32.xlu1 %v3126_v6, %s9114_s17  ;;  %v3344_v39 = vsel %vm466_vm5, %v3324_v55, 0.0  ;;  %v3345_v3 = vsel %vm473_vm6, %v3325_v51, 0.0  ;;  %v3287_v11 = vmul.f32 %v11052_v27, %v3267_v13  ;;  %v3159_v6 = vpack.c.b16 %v9287_v23, %v11364_v62  ;;  %v11432_v17 = vpop.f32.mrf.mxu3 }
 0x197   : > { %v2617_v49 = vpop.permute.xlu1 %2616  ;;  %v2607_v12 = vpop.permute.xlu0 %2606  ;;  %15569 = vst [vmem:[#allocation35_spill] sm:$0xff] %v11405_v60  ;;  %v11409_v26 = vpack.c.bf16 %v3344_v39, %v3344_v39  ;;  %v11418_v4 = vpack.c.bf16 %v3345_v3, %v3345_v3  ;;  %v3326_v31 = vmax.f32 %v3306_v15, 0.0  ;;  %v2632_v57 = vsel %vm979_vm8, %v15571_v48, %v2540_v5  ;;  %v8506_v15 = vld [vmem:[%s9200_s10 + $0x1ac] sm:$0x1]  ;;  %v11460_v3 = vld [vmem:[%s15275_s3 + $0x98] sm:$0xff] }
 0x198   : > { %v2671_v9 = vsel %vm1028_vm13, %v2663_v42, %v2607_v12  ;;  %3120 = vrot.lane.b32.xlu0 %v3113_v38, %s9110_s13  ;;  %v11414_v38 = vld [vmem:[%s15275_s3 + $0xa0] sm:$0xff]  ;;  %v8496_v5 = vrot.slane %v11248_v24, 9  ;;  %v3307_v62 = vadd.f32 %v11113_v44, %v3287_v11  ;;  %v3288_v13 = vmul.f32 %v11052_v27, %v3268_v56 }
 0x199   : > { %v11401_v29 = vsel %vm1037_vm14, %v2671_v9, %v2617_v49  ;;  %8776 = vmatmul.msk.bf16.gmra.mxu2 %vm979_vm8, %v11372_v59  ;;  %15570 = vst [vmem:[#allocation36_spill] sm:$0xff] %v11409_v26  ;;  %6832 = vmatpush.bf16.msra.mxu1 %v11414_v38  ;;  %v3149_v49 = vpack.c.b16 %v9895_v20, %v3109_v35  ;;  %v8520_v55 = vrot.slane %v11409_v26, 9  ;;  %v3537_v42 = vrot.slane %v11418_v4, 5 }
 0x19a   : > { %15568 = vst [vmem:[#allocation34_spill] sm:$0xff] %v11401_v29  ;;  %6593 = vmatmul.bf16.gmra.mxu0 %v11401_v29  ;;  %v3346_v12 = vsel %vm466_vm5, %v3326_v31, 0.0  ;;  %v3015_v35 = vrot.slane %v11265_v53, 5  ;;  %v3269_v52 = vunpack.c.l.bf16 %v8506_v15  ;;  %v11466_v31 = vld [vmem:[%s15275_s3 + $0x40] sm:$0xff]  ;;  %v11479_v53 = vld [vmem:[%s9200_s10 + $0x1b0] sm:$0xf] }
 0x19b   : > { %6950 = vmatpush.bf16.msra.mxu0 %v10971_v54  ;;  %3154 = vrot.lane.b32.xlu2 %v11405_v60, %s9111_s14  ;;  %v11444_v54 = vpack.c.bf16 %v3346_v12, %v3346_v12  ;;  %v11450_v39 = vsel %vm9191_vm2, %v8520_v55, %v3537_v42  ;;  %v3327_v12 = vmax.f32 %v3307_v62, 0.0  ;;  %v15574_v62 = vunpack.c.l.b16 %v11409_v26 }
 0x19c   : > { %v11430_v51 = vpop.f32.mrf.mxu2  ;;  %8785 = vmatmul.msk.bf16.vlgmr.msrb.gmra.mxu3 %vm979_vm8, %v10756_v2  ;;  %v11455_v24 = vsel %vm9191_vm2, %v8496_v5, %v3015_v35  ;;  %v15325_v48 = vunpack.c.l.b16 %v11450_v39  ;;  %v3308_v35 = vadd.f32 %v11113_v44, %v3288_v13  ;;  %v3289_v15 = vmul.f32 %v11052_v27, %v3269_v52 }
 0x19d   : > { %6833 = vmatpush.bf16.msra.mxu1 %v11460_v3  ;;  %7040 = vmatpush.bf16.msrb.mxu3 %v11466_v31  ;;  %v3605_v55 = vunpack.c.l.b16 %v11444_v54  ;;  %v3096_v42 = vunpack.c.l.b16 %v11455_v24  ;;  %v3347_v52 = vsel %vm473_vm6, %v3327_v12, 0.0  ;;  %v3421_v60 = vshll.u32 %v11409_v26, 16 }
 0x19e   : > { %v2586_v56 = vpop.permute.xlu2 %2585  ;;  %3166 = vrot.lane.b32.xlu1 %v3159_v6, %s9115_s18  ;;  %v3328_v63 = vmax.f32 %v3308_v35, 0.0  ;;  %v11520_v2 = vpop.f32.mrf.mxu3 }
 0x19f   : > { %v2573_v9 = vpop.permute.xlu1 %2572  ;;  %v2560_v11 = vpop.permute.xlu0 %2559  ;;  %6951 = vmatpush.bf16.msra.mxu0 %v10998_v33  ;;  %v3643_v33 = vpack.c.b16 %v15325_v48, %v9233_v34  ;;  %v3656_v13 = vpack.c.b16 %v3605_v55, %v15574_v62  ;;  %v3035_v62 = vrot.slane %v11330_v21, 5  ;;  %v3418_v21 = vshrl.u32 %v11409_v26, 16  ;;  %v15577_v26 = vld [vmem:[#allocation9_spill] sm:$0xff] }
 0x1a0   : > { %v2641_v5 = vsel %vm992_vm9, %v2632_v57, %v2560_v11  ;;  %3156 = vrot.lane.b32.xlu0 %v3149_v49, %s9111_s14  ;;  %v15572_v57 = vunpack.c.l.b16 %v11246_v16  ;;  %v6137_v16 = vpop.f32.mrf.mxu1  ;;  %v3388_v11 = vpack.c.bf16 %v3347_v52, %v3347_v52  ;;  %v3348_v35 = vsel %vm466_vm5, %v3328_v63, 0.0 }
 0x1a1   : > { %v2649_v24 = vsel %vm1001_vm10, %v2641_v5, %v2573_v9  ;;  %6834 = vmatpush.bf16.msra.mxu1 %v11500_v43  ;;  %v15575_v9 = vld [vmem:[#allocation13_spill] sm:$0xff]  ;;  %v3309_v5 = vadd.f32 %v11113_v44, %v3289_v15  ;;  %v11517_v15 = vpack.c.bf16 %v3348_v35, %v3348_v35 }
 0x1a2   : > { %v11490_v49 = vpack.c.b16 %v3096_v42, %v15572_v57  ;;  %v2657_v6 = vsel %vm1010_vm11, %v2649_v24, %v2586_v56  ;;  %v8521_v56 = vrot.slane %v11444_v54, 9  ;;  %v8497_v57 = vrot.slane %v11287_v45, 9 }
 0x1a3   : > { %6528 = vmatmul.bf16.gmra.mxu1 %v15575_v9  ;;  %6952 = vmatpush.bf16.msra.mxu0 %v11022_v37  ;;  %v3432_v9 = vshrl.u32 %v11444_v54, 16  ;;  %v3541_v52 = vrot.slane %v3388_v11, 5  ;;  %v3329_v24 = vmax.f32 %v3309_v5, 0.0  ;;  %v3435_v37 = vshll.u32 %v11444_v54, 16 }
 0x1a4   : > { %15573 = vst [vmem:[#allocation14_spill] sm:$0xff] %v11490_v49  ;;  %v11508_v12 = vpop.f32.mrf.mxu2  ;;  %3107 = vrot.lane.b32.xlu2 %v11490_v49, %s9113_s16  ;;  %v11524_v63 = vsel %vm9191_vm2, %v8497_v57, %v3035_v62 }
 0x1a5   : > { %15576 = vst [vmem:[#allocation13_spill] sm:$0xff] %v11524_v63  ;;  %v3434_v45 = vrot.slane %v3432_v9, 4  ;;  %v11530_v35 = vsel %vm9191_vm2, %v8521_v56, %v3541_v52  ;;  %v3349_v49 = vsel %vm473_vm6, %v3329_v24, 0.0  ;;  %v15578_v24 = vunpack.c.l.b16 %v11517_v15 }
 0x1a6   : > { %v2619_v9 = vpop.permute.xlu2 %2618  ;;  %3660 = vrot.lane.b32.xlu1 %v3656_v13, %s9110_s13  ;;  %v3637_v56 = vunpack.c.l.b16 %v11530_v35  ;;  %v3390_v52 = vpack.c.bf16 %v3349_v49, %v3349_v49  ;;  %v15582_v49 = vunpack.c.l.b16 %v11450_v39  ;;  %v3441_v13 = vshll.u32 %v3388_v11, 16  ;;  %v8508_v11 = vld [vmem:[%s9200_s10 + $0x1b4] sm:$0x1] }
 0x1a7   : > { %v2609_v48 = vpop.permute.xlu1 %2608  ;;  %v2599_v34 = vpop.permute.xlu0 %2598  ;;  %6953 = vmatpush.bf16.msra.mxu0 %v11040_v28  ;;  %v11546_v5 = vpack.c.b16 %v15578_v24, %v3605_v55  ;;  %v3446_v55 = vshrl.u32 %v11517_v15, 16  ;;  %v8522_v39 = vrot.slane %v11517_v15, 9 }
 0x1a8   : > { %v6108_v25 = vpop.f32.mrf.mxu0  ;;  %v2665_v57 = vsel %vm1019_vm12, %v2657_v6, %v2599_v34  ;;  %3647 = vrot.lane.b32.xlu0 %v3643_v33, %s9113_s16  ;;  %v15580_v34 = vunpack.c.l.b16 %v11524_v63 }
 0x1a9   : > { %v6138_v62 = vadd.f32 %v6137_v16, %v6108_v25  ;;  %v2673_v54 = vsel %vm1028_vm13, %v2665_v57, %v2609_v48  ;;  %8789 = vmatmul.msk.bf16.vlgmr.msrb.gmra.mxu2 %vm979_vm8, %v15577_v26  ;;  %15579 = vst [vmem:[#allocation9_spill] sm:$0xff] %v11546_v5  ;;  %v3437_v25 = vrot.slane %v3435_v37, 5  ;;  %v3682_v48 = vpack.c.b16 %v3637_v56, %v15582_v49  ;;  %v15583_v16 = vld [vmem:[#allocation6_spill] sm:$0xff] }
 0x1aa   : > { %v3139_v28 = vpack.c.b16 %v15580_v34, %v3096_v42  ;;  %v11552_v6 = vsel %vm1037_vm14, %v2673_v54, %v2619_v9  ;;  %7110 = vmatpush.bf16.msrb.mxu2 %v15583_v16  ;;  %v3449_v42 = vshll.u32 %v11517_v15, 16  ;;  %v3455_v37 = vshll.u32 %v3390_v52, 16 }
 0x1ab   : > { %v6233_v33 = vadd.f32 %v11430_v51, %v6138_v62  ;;  %15581 = vst [vmem:[#allocation37_spill] sm:$0xff] %v11552_v6  ;;  %6598 = vmatmul.bf16.gmra.mxu0 %v11552_v6  ;;  %v3438_v26 = vor.u32 %v3437_v25, %v3434_v45  ;;  %v3443_v54 = vrot.slane %v3441_v13, 5  ;;  %v3545_v57 = vrot.slane %v3390_v52, 5  ;;  %v6139_v62 = vpop.f32.mrf.mxu1 }
 0x1ac   : > { %v11563_v51 = vpop.f32.mrf.mxu2  ;;  %3146 = vrot.lane.b32.xlu2 %v3139_v28, %s9116_s19  ;;  %8786 = vmatmul.msk.bf16.gmra.mxu3 %vm979_vm8, %v10745_v14  ;;  %v3448_v9 = vrot.slane %v3446_v55, 4  ;;  %v3451_v24 = vrot.slane %v3449_v42, 5  ;;  %v3457_v34 = vrot.slane %v3455_v37, 5  ;;  %v3420_v49 = vrot.slane %v3418_v21, 4  ;;  %v15585_v14 = vld [vmem:[#allocation18_spill] sm:$0xff] }
 0x1ad   : > { %v11561_v35 = vadd.f32 %v11306_v22, %v6233_v33  ;;  %15584 = vst [vmem:[#allocation6_spill] sm:$0xff] %v11563_v51  ;;  %v3439_v45 = vrot.slane %v3438_v26, 4  ;;  %v11570_v22 = vpop.f32.mrf.mxu3  ;;  %v11574_v33 = vsel %vm9191_vm2, %v8522_v39, %v3545_v57  ;;  %v3423_v52 = vrot.slane %v3421_v60, 5  ;;  %v8509_v21 = vld [vmem:[%s9200_s10 + $0x1b8] sm:$0xf] }
 0x1ae   : > { %v3427_v28 = vshll.u32 %v11418_v4, 16  ;;  %v3452_v55 = vor.u32 %v3451_v24, %v3448_v9  ;;  %v15336_v42 = vunpack.c.l.b16 %v11574_v33  ;;  %v3271_v37 = vunpack.c.l.bf16 %v8508_v11  ;;  %v2575_v57 = vpop.permute.xlu2 %2574  ;;  %3696 = vrot.lane.b32.xlu1 %v11546_v5, %s9111_s14 }
 0x1af   : > { %v2562_v25 = vpop.permute.xlu1 %2561  ;;  %v2542_v13 = vpop.permute.xlu0 %2541  ;;  %v3444_v26 = vsel %vm9227_vm7, %v3439_v45, %v3443_v54  ;;  %v3424_v4 = vor.u32 %v3423_v52, %v3420_v49  ;;  %v8510_v54 = vld [vmem:[%s9200_s10 + $0x1bc] sm:$0x1] }
 0x1b0   : > { %v6110_v16 = vpop.f32.mrf.mxu0  ;;  %v2635_v63 = vsel %vm979_vm8, %v15585_v14, %v2542_v13  ;;  %3686 = vrot.lane.b32.xlu0 %v3682_v48, %s9116_s19  ;;  %v11585_v60 = vunpack.c.l.b16 %v3444_v26  ;;  %v3453_v9 = vrot.slane %v3452_v55, 4  ;;  %v11592_v11 = vpack.c.b16 %v15336_v42, %v3637_v56  ;;  %v15588_v52 = vld [vmem:[#allocation17_spill] sm:$0xff] }
 0x1b1   : > { %v6140_v39 = vadd.f32 %v6139_v62, %v6110_v16  ;;  %v2643_v45 = vsel %vm992_vm9, %v2635_v63, %v2562_v25  ;;  %v3429_v14 = vrot.slane %v3427_v28, 5  ;;  %v3425_v24 = vrot.slane %v3424_v4, 4  ;;  %v8511_v28 = vld [vmem:[%s9200_s10 + $0x1c0] sm:$0xf] }
 0x1b2   : > { %15586 = vst [vmem:[#allocation18_spill] sm:$0xff] %v11592_v11  ;;  %v2651_v48 = vsel %vm1001_vm10, %v2643_v45, %v2575_v57  ;;  %v15587_v13 = vunpack.c.l.bf16 %v11479_v53  ;;  %v3458_v63 = vsel %vm9227_vm7, %v3453_v9, %v3457_v34  ;;  %v3291_v25 = vmul.f32 %v11052_v27, %v3271_v37 }
 0x1b3   : > { %v6235_v62 = vadd.f32 %v11508_v12, %v6140_v39  ;;  %6533 = vmatmul.bf16.gmra.mxu1 %v15588_v52  ;;  %v3272_v56 = vunpack.c.l.bf16 %v8509_v21  ;;  %v3273_v16 = vunpack.c.l.bf16 %v8510_v54  ;;  %v11609_v55 = vunpack.c.l.b16 %v3458_v63  ;;  %v8512_v21 = vld [vmem:[%s9200_s10 + $0x1c4] sm:$0x1] }
 0x1b4   : > { %v3290_v49 = vmul.f32 %v11052_v27, %v15587_v13  ;;  %v11607_v26 = vpop.f32.mrf.mxu2  ;;  %v3430_v53 = vsel %vm9227_vm7, %v3425_v24, %v3429_v14  ;;  %v3311_v34 = vadd.f32 %v11113_v44, %v3291_v25  ;;  %v3274_v9 = vunpack.c.l.bf16 %v8511_v28  ;;  %v15590_v25 = vld [vmem:[#allocation24_spill] sm:$0xff] }
 0x1b5   : > { %v11605_v12 = vadd.f32 %v11352_v0, %v6235_v62  ;;  %15589 = vst [vmem:[#allocation17_spill] sm:$0xff] %v11607_v26  ;;  %v11614_v57 = vunpack.c.l.b16 %v3430_v53  ;;  %v3292_v37 = vmul.f32 %v11052_v27, %v3272_v56  ;;  %v3293_v4 = vmul.f32 %v11052_v27, %v3273_v16  ;;  %v11626_v13 = vpop.f32.mrf.mxu3 }
 0x1b6   : > { %v3310_v39 = vadd.f32 %v11113_v44, %v3290_v49  ;;  %v11622_v54 = vpack.c.b16 %v11609_v55, %v11585_v60  ;;  %v3275_v14 = vunpack.c.l.bf16 %v8512_v21  ;;  %v3331_v49 = vmax.f32 %v3311_v34, 0.0  ;;  %3649 = vrot.lane.b32.xlu1 %v11592_v11, %s9113_s16 }
 0x1b7   : > { %v2601_v0 = vpop.permute.xlu1 %2600  ;;  %v2588_v62 = vpop.permute.xlu0 %2587  ;;  %v3623_v24 = vpack.c.b16 %v11614_v57, %v9287_v23  ;;  %v3312_v52 = vadd.f32 %v11113_v44, %v3292_v37  ;;  %v3313_v63 = vadd.f32 %v11113_v44, %v3293_v4  ;;  %v6220_v56 = vadd.f32 %v15590_v25, %v11391_v36 }
 0x1b8   : > { %v3330_v45 = vmax.f32 %v3310_v39, 0.0  ;;  %v2659_v16 = vsel %vm1010_vm11, %v2651_v48, %v2588_v62  ;;  %v6341_v53 = vpop.f32.mrf.mxu1  ;;  %3629 = vrot.lane.b32.xlu0 %v11622_v54, %s9112_s15  ;;  %v3294_v39 = vmul.f32 %v11052_v27, %v3274_v9  ;;  %v2611_v36 = vpop.permute.xlu2 %2610  ;;  %v15591_v48 = vld [vmem:[#allocation12_spill] sm:$0xff]  ;;  %v3351_v4 = vsel %vm473_vm6, %v3331_v49, 0.0 }
 0x1b9   : > { %v2667_v34 = vsel %vm1019_vm12, %v2659_v16, %v2601_v0  ;;  %v6371_v37 = vadd.f32 %v11432_v17, %v6341_v53  ;;  %3627 = vrot.lane.b32.xlu2 %v3623_v24, %s9112_s15  ;;  %8790 = vmatmul.msk.bf16.gmra.mxu2 %vm979_vm8, %v15591_v48  ;;  %v3392_v9 = vpack.c.bf16 %v3351_v4, %v3351_v4  ;;  %v3332_v17 = vmax.f32 %v3312_v52, 0.0  ;;  %v11659_v24 = vpop.f32.mrf.mxu0 }
 0x1ba   : > { %v3350_v28 = vsel %vm466_vm5, %v3330_v45, 0.0  ;;  %v2675_v21 = vsel %vm1028_vm13, %v2667_v34, %v2611_v36  ;;  %v3295_v0 = vmul.f32 %v11052_v27, %v3275_v14  ;;  %v3333_v25 = vmax.f32 %v3313_v63, 0.0 }
 0x1bb   : > { %v11649_v45 = vpack.c.bf16 %v3350_v28, %v3350_v28  ;;  %v6390_v62 = vadd.f32 %v6371_v37, %v11482_v19  ;;  %v3314_v16 = vadd.f32 %v11113_v44, %v3294_v39  ;;  %v3469_v14 = vshll.u32 %v3392_v9, 16 }
 0x1bc   : > { %v11661_v49 = vpop.f32.mrf.mxu2  ;;  %v3549_v63 = vrot.slane %v3392_v9, 5  ;;  %v3669_v28 = vpack.c.b16 %v11585_v60, %v11614_v57  ;;  %8787 = vmatmul.msk.bf16.gmra.mxu3 %vm979_vm8, %v10840_v32  ;;  %v3352_v39 = vsel %vm466_vm5, %v3332_v17, 0.0  ;;  %v3353_v48 = vsel %vm473_vm6, %v3333_v25, 0.0  ;;  %v15594_v32 = vld [vmem:[#allocation25_spill] sm:$0xff] }
 0x1bd   : > { %15592 = vst [vmem:[#allocation24_spill] sm:$0xff] %v11661_v49  ;;  %v3460_v53 = vshrl.u32 %v11649_v45, 16  ;;  %v3463_v27 = vshll.u32 %v11649_v45, 16  ;;  %v8523_v19 = vrot.slane %v11649_v45, 9  ;;  %v6398_v52 = vpack.c.bf16 %v6390_v62, %v6390_v62  ;;  %v11680_v60 = vpop.f32.mrf.mxu3 }
 0x1be   : > { %v3471_v36 = vrot.slane %v3469_v14, 5  ;;  %v11682_v57 = vpack.c.bf16 %v3352_v39, %v3352_v39  ;;  %v11684_v42 = vpack.c.bf16 %v3353_v48, %v3353_v48  ;;  %v3334_v17 = vmax.f32 %v3314_v16, 0.0  ;;  %v8513_v48 = vld [vmem:[%s9200_s10 + $0x1c8] sm:$0xf] }
 0x1bf   : > { %v3462_v34 = vrot.slane %v3460_v53, 4  ;;  %v3465_v37 = vrot.slane %v3463_v27, 5  ;;  %6407 = vst.msk [vmem:[%s11657_s30] sm:$0xf] %vm6406_vm15, %v6398_v52  ;;  %v2621_v4 = vpop.permute.xlu0 %2620  ;;  %v11678_v9 = vsel %vm9191_vm2, %v8523_v19, %v3549_v63  ;;  %v3315_v52 = vadd.f32 %v11113_v44, %v3295_v0 }
 0x1c0   : > { %v6343_v53 = vpop.f32.mrf.mxu1  ;;  %v11687_v27 = vsel %vm1037_vm14, %v2675_v21, %v2621_v4  ;;  %v15338_v25 = vunpack.c.l.b16 %v11678_v9  ;;  %v6249_v19 = vadd.f32 %v15594_v32, %v6220_v56  ;;  %v3474_v16 = vshrl.u32 %v11682_v57, 16 }
 0x1c1   : > { %15593 = vst [vmem:[#allocation12_spill] sm:$0xff] %v11687_v27  ;;  %v3466_v14 = vor.u32 %v3465_v37, %v3462_v34  ;;  %v6373_v63 = vadd.f32 %v11520_v2, %v6343_v53  ;;  %6603 = vmatmul.bf16.gmra.mxu0 %v11687_v27  ;;  %3673 = vrot.lane.b32.xlu2 %v3669_v28, %s9114_s17  ;;  %v3477_v39 = vshll.u32 %v11682_v57, 16  ;;  %v15595_v34 = vunpack.c.l.b16 %v11574_v33 }
 0x1c2   : > { %v3483_v44 = vshll.u32 %v11684_v42, 16  ;;  %v3354_v32 = vsel %vm466_vm5, %v3334_v17, 0.0  ;;  %v3476_v56 = vrot.slane %v3474_v16, 4  ;;  %v6428_v4 = vmul.f32 %v6390_v62, %v6390_v62 }
 0x1c3   : > { %v3467_v21 = vrot.slane %v3466_v14, 4  ;;  %v3683_v37 = vpack.c.b16 %v15338_v25, %v15595_v34  ;;  %v6391_v2 = vadd.f32 %v6373_v63, %v6249_v19  ;;  %6707 = vmatmul.bf16.vlgmr.msrb.gmra.mxu1 %v11292_v61  ;;  %v3479_v0 = vrot.slane %v3477_v39, 5  ;;  %v11713_v14 = vpop.permute.xlu1 %3081  ;;  %v11718_v19 = vld [vmem:[%s15275_s3 + $0x38] sm:$0xff] }
 0x1c4   : > { %v11705_v28 = vpack.c.bf16 %v3354_v32, %v3354_v32  ;;  %v11708_v53 = vpop.f32.mrf.mxu2  ;;  %v3335_v17 = vmax.f32 %v3315_v52, 0.0  ;;  %15597 = vst [vmem:[#allocation38_spill] sm:$0xff] %v11718_v19  ;;  %7004 = vmatpush.bf16.msrb.mxu1 %v11718_v19  ;;  %v11723_v32 = vpop.permute.xlu2 %3101  ;;  %v3276_v52 = vunpack.c.l.bf16 %v8513_v48 }
 0x1c5   : > { %15596 = vst [vmem:[#allocation25_spill] sm:$0xff] %v11708_v53  ;;  %v3472_v33 = vsel %vm9227_vm7, %v3467_v21, %v3471_v36  ;;  %3688 = vrot.lane.b32.xlu1 %v3683_v37, %s9116_s19  ;;  %v6399_v63 = vpack.c.bf16 %v6391_v2, %v6391_v2  ;;  %v11721_v16 = vadd.f32 %v6391_v2, %v6390_v62  ;;  %v11725_v36 = vpop.f32.mrf.mxu0  ;;  %v3485_v37 = vrot.slane %v3483_v44, 5  ;;  %v11732_v5 = vpop.f32.mrf.mxu3  ;;  %v11743_v44 = vld [vmem:[%s15275_s3 + $0x30] sm:$0xff] }
 0x1c6   : > { %v6429_v39 = vmul.f32 %v6391_v2, %v6391_v2  ;;  %v3619_v34 = vunpack.c.l.b16 %v3472_v33  ;;  %15598 = vst [vmem:[#allocation39_spill] sm:$0xff] %v11725_v36  ;;  %v3480_v21 = vor.u32 %v3479_v0, %v3476_v56  ;;  %v3355_v62 = vsel %vm473_vm6, %v3335_v17, 0.0  ;;  %v8514_v33 = vld [vmem:[%s9200_s10 + $0x1cc] sm:$0x1] }
 0x1c7   : > { %6408 = vst.msk [vmem:[%s11657_s30 + $0x4] sm:$0xf] %vm6406_vm15, %v6399_v63  ;;  %v3488_v2 = vshrl.u32 %v11705_v28, 16  ;;  %v11738_v53 = vpack.c.bf16 %v3355_v62, %v3355_v62  ;;  %v3491_v56 = vshll.u32 %v11705_v28, 16  ;;  %v3277_v63 = vunpack.c.l.bf16 %v8514_v33 }
 0x1c8   : > { %v11729_v25 = vadd.f32 %v6429_v39, %v6428_v4  ;;  %v3670_v61 = vpack.c.b16 %v3619_v34, %v11609_v55  ;;  %v3481_v11 = vrot.slane %v3480_v21, 4  ;;  %15599 = vst [vmem:[#allocation40_spill] sm:$0xff] %v11743_v44  ;;  %7005 = vmatpush.bf16.msrb.mxu1 %v11743_v44  ;;  %v15600_v4 = vld [vmem:[#allocation11_spill] sm:$0xff]  ;;  %v8515_v39 = vld [vmem:[%s9200_s10 + $0x1d0] sm:$0xf] }
 0x1c9   : > { %3706 = vrot.lane.b32.xlu2 %v11622_v54, %s9115_s18  ;;  %v3490_v55 = vrot.slane %v3488_v2, 4  ;;  %8791 = vmatmul.msk.bf16.gmra.mxu2 %vm979_vm8, %v15600_v4  ;;  %v3497_v17 = vshll.u32 %v11738_v53, 16  ;;  %v3493_v62 = vrot.slane %v3491_v56, 5  ;;  %v11765_v2 = vpop.permute.xlu0 %3114  ;;  %v3278_v44 = vunpack.c.l.bf16 %v8515_v39 }
 0x1ca   : > { %3675 = vrot.lane.b32.xlu0 %v3670_v61, %s9114_s17  ;;  %v3486_v48 = vsel %vm9227_vm7, %v3481_v11, %v3485_v37  ;;  %v11759_v61 = vld [vmem:[%s15276_s4] ss:$0 sm:$0xff]  ;;  %v15605_v39 = vunpack.c.l.b16 %v11649_v45 }
 0x1cb   : > { %v3296_v54 = vmul.f32 %v11759_v61, %v3276_v52  ;;  %v11763_v21 = vunpack.c.l.b16 %v3486_v48  ;;  %v11772_v37 = vld [vmem:[%s15277_s5] ss:$0 sm:$0xff]  ;;  %v3297_v0 = vmul.f32 %v11759_v61, %v3277_v63  ;;  %v11779_v52 = vld [vmem:[%s15275_s3 + $0x28] sm:$0xff]  ;;  %v3494_v56 = vor.u32 %v3493_v62, %v3490_v55 }
 0x1cc   : > { %v11767_v11 = vpop.f32.mrf.mxu2  ;;  %15602 = vst [vmem:[#allocation41_spill] sm:$0xff] %v11779_v52  ;;  %7006 = vmatpush.bf16.msrb.mxu1 %v11779_v52  ;;  %v3499_v48 = vrot.slane %v3497_v17, 5  ;;  %8788 = vmatmul.msk.bf16.gmra.mxu3 %vm979_vm8, %v11372_v59  ;;  %v15604_v63 = vunpack.c.l.b16 %v11517_v15  ;;  %v11796_v17 = vpop.permute.xlu2 %3140  ;;  %v3608_v62 = vunpack.c.l.b16 %v11682_v57 }
 0x1cd   : > { %15601 = vst [vmem:[#allocation11_spill] sm:$0xff] %v11767_v11  ;;  %v3316_v4 = vadd.f32 %v11772_v37, %v3296_v54  ;;  %v3625_v33 = vpack.c.b16 %v11763_v21, %v3619_v34  ;;  %v11783_v11 = vpop.permute.xlu1 %3127  ;;  %v3317_v52 = vadd.f32 %v11772_v37, %v3297_v0  ;;  %v3495_v55 = vrot.slane %v3494_v56, 4  ;;  %v11799_v59 = vpop.f32.mrf.mxu3  ;;  %v11807_v0 = vld [vmem:[%s15275_s3 + $0x20] sm:$0xff]  ;;  %v15608_v56 = vld [vmem:[#allocation20_spill] sm:$0xff] }
 0x1ce   : > { %v6346_v54 = vpop.f32.mrf.mxu1  ;;  %v11787_v19 = vpop.f32.mrf.mxu0  ;;  %v3657_v49 = vpack.c.b16 %v15605_v39, %v15604_v63  ;;  %v3298_v63 = vmul.f32 %v11759_v61, %v3278_v44  ;;  %15606 = vst [vmem:[#allocation43_spill] sm:$0xff] %v11807_v0 }
 0x1cf   : > { %15603 = vst [vmem:[#allocation42_spill] sm:$0xff] %v11787_v19  ;;  %v3336_v26 = vmax.f32 %v3316_v4, 0.0  ;;  %v6376_v34 = vadd.f32 %v11570_v22, %v6346_v54  ;;  %3631 = vrot.lane.b32.xlu1 %v3625_v33, %s9112_s15  ;;  %v3337_v19 = vmax.f32 %v3317_v52, 0.0  ;;  %v15607_v22 = vld [vmem:[#allocation28_spill] sm:$0xff]  ;;  %v3609_v54 = vunpack.c.l.b16 %v11705_v28 }
 0x1d0   : > { %7007 = vmatpush.bf16.msrb.mxu1 %v11807_v0 }
 0x1d1   : > { %v3356_v15 = vsel %vm466_vm5, %v3336_v26, 0.0  ;;  %v6392_v4 = vadd.f32 %v6376_v34, %v15607_v22  ;;  %6765 = vmatmul.bf16.vlgmr.msrb.gmra.mxu0 %v15608_v56  ;;  %v3500_v26 = vsel %vm9227_vm7, %v3495_v55, %v3499_v48  ;;  %3662 = vrot.lane.b32.xlu2 %v3657_v49, %s9110_s13  ;;  %v3357_v39 = vsel %vm473_vm6, %v3337_v19, 0.0  ;;  %v11826_v48 = vpop.permute.xlu0 %3150 }
 0x1d2   : > { %3708 = vrot.lane.b32.xlu0 %v3625_v33, %s9115_s18  ;;  %v11816_v44 = vpack.c.bf16 %v3356_v15, %v3356_v15  ;;  %v11818_v52 = vunpack.c.l.b16 %v3500_v26  ;;  %7074 = vmatpush.bf16.msrb.mxu0 %v11277_v58  ;;  %15609 = vst [vmem:[#allocation28_spill] sm:$0xff] %v11826_v48  ;;  %v3398_v49 = vpack.c.bf16 %v3357_v39, %v3357_v39  ;;  %v8516_v26 = vld [vmem:[%s9200_s10 + $0x1d4] sm:$0x1]  ;;  %v11838_v58 = vld [vmem:[%s15275_s3 + $0x18] sm:$0xff]  ;;  %v15613_v48 = vunpack.c.l.b16 %v11649_v45 }
 0x1d3   : > { %v6400_v34 = vpack.c.bf16 %v6392_v4, %v6392_v4  ;;  %v6416_v33 = vadd.f32 %v11721_v16, %v6392_v4  ;;  %v6430_v22 = vmul.f32 %v6392_v4, %v6392_v4  ;;  %6712 = vmatmul.bf16.gmra.mxu1 %v11401_v29  ;;  %15611 = vst [vmem:[#allocation44_spill] sm:$0xff] %v11838_v58  ;;  %v8525_v45 = vrot.slane %v11705_v28, 9  ;;  %v15616_v28 = vld [vmem:[#allocation22_spill] sm:$0xff] }
 0x1d4   : > { %v11828_v55 = vpop.f32.mrf.mxu2  ;;  %v3671_v15 = vpack.c.b16 %v11818_v52, %v11763_v21  ;;  %v3502_v56 = vshrl.u32 %v11816_v44, 16  ;;  %v3505_v19 = vshll.u32 %v11816_v44, 16  ;;  %7008 = vmatpush.bf16.msrb.mxu1 %v11838_v58  ;;  %v3658_v4 = vpack.c.b16 %v3609_v54, %v3608_v62 }
 0x1d5   : > { %15610 = vst [vmem:[#allocation20_spill] sm:$0xff] %v11828_v55  ;;  %v6437_v16 = vadd.f32 %v11729_v25, %v6430_v22  ;;  %v3318_v21 = vadd.f32 %v11772_v37, %v3298_v63  ;;  %v3511_v36 = vshll.u32 %v3398_v49, 16  ;;  %v11849_v51 = vpack.c.b16 %v3608_v62, %v15613_v48  ;;  %v11854_v25 = vpop.permute.xlu1 %3160 }
 0x1d6   : > { %6409 = vst.msk [vmem:[%s11657_s30 + $0x8] sm:$0xf] %vm6406_vm15, %v6400_v34  ;;  %v6348_v39 = vpop.f32.mrf.mxu1  ;;  %v11845_v29 = vpop.f32.mrf.mxu0  ;;  %v3504_v55 = vrot.slane %v3502_v56, 4  ;;  %v3507_v0 = vrot.slane %v3505_v19, 5  ;;  %7075 = vmatpush.bf16.msrb.mxu0 %v11300_v50  ;;  %v3279_v63 = vunpack.c.l.bf16 %v8516_v26  ;;  %v15350_v22 = vunpack.c.l.b16 %v11816_v44  ;;  %v11865_v50 = vld [vmem:[%s15275_s3 + $0x10] sm:$0xff] }
 0x1d7   : > { %15612 = vst [vmem:[#allocation45_spill] sm:$0xff] %v11845_v29  ;;  %v6378_v58 = vadd.f32 %v11626_v13, %v6348_v39  ;;  %3677 = vrot.lane.b32.xlu1 %v3671_v15, %s9114_s17  ;;  %v11856_v34 = vpop.permute.xlu2 %3083  ;;  %v3513_v19 = vrot.slane %v3511_v36, 5  ;;  %v11859_v29 = vpop.f32.mrf.mxu3  ;;  %v15615_v13 = vld [vmem:[#allocation30_spill] sm:$0xff]  ;;  %v3557_v48 = vrot.slane %v11738_v53, 5  ;;  %v3338_v36 = vmax.f32 %v3318_v21, 0.0 }
 0x1d8   : > { %15614 = vst [vmem:[#allocation46_spill] sm:$0xff] %v11849_v51  ;;  %v3508_v56 = vor.u32 %v3507_v0, %v3504_v55  ;;  %7009 = vmatpush.bf16.msrb.mxu1 %v11865_v50  ;;  %v8526_v0 = vrot.slane %v11816_v44, 9  ;;  %v3561_v15 = vrot.slane %v3398_v49, 5  ;;  %v8524_v26 = vrot.slane %v11682_v57, 9 }
 0x1d9   : > { %v6393_v62 = vadd.f32 %v6378_v58, %v15615_v13  ;;  %3698 = vrot.lane.b32.xlu2 %v11849_v51, %s9111_s14  ;;  %8792 = vmatmul.msk.bf16.gmra.mxu2 %vm979_vm8, %v15616_v28  ;;  %v3553_v58 = vrot.slane %v11684_v42, 5  ;;  %v3358_v53 = vsel %vm466_vm5, %v3338_v36, 0.0  ;;  %v11883_v21 = vpack.c.b16 %v15350_v22, %v3609_v54  ;;  %v15618_v36 = vld [vmem:[#allocation29_spill] sm:$0xff] }
 0x1da   : > { %3664 = vrot.lane.b32.xlu0 %v3658_v4, %s9110_s13  ;;  %v3509_v55 = vrot.slane %v3508_v56, 4  ;;  %7076 = vmatpush.bf16.msrb.mxu0 %v11321_v40  ;;  %v11889_v57 = vpack.c.bf16 %v3358_v53, %v3358_v53  ;;  %v11898_v40 = vld [vmem:[%s15275_s3 + $0x8] sm:$0xff]  ;;  %v3558_v28 = vsel %vm9191_vm2, %v8525_v45, %v3557_v48  ;;  %v15620_v45 = vunpack.c.l.b16 %v11678_v9 }
 0x1db   : > { %v6401_v39 = vpack.c.bf16 %v6393_v62, %v6393_v62  ;;  %v6417_v4 = vadd.f32 %v6416_v33, %v6393_v62  ;;  %v6431_v13 = vmul.f32 %v6393_v62, %v6393_v62  ;;  %15617 = vst [vmem:[#allocation30_spill] sm:$0xff] %v11883_v21  ;;  %v3554_v42 = vsel %vm9191_vm2, %v8524_v26, %v3553_v58  ;;  %v11893_v33 = vpop.permute.xlu0 %3103  ;;  %v11917_v58 = vld [vmem:[%s15275_s3 + $0x88] sm:$0xff] }
 0x1dc   : > { %v11885_v56 = vpop.f32.mrf.mxu2  ;;  %v3514_v49 = vsel %vm9227_vm7, %v3509_v55, %v3513_v19  ;;  %7010 = vmatpush.bf16.msrb.mxu1 %v11898_v40  ;;  %v3640_v19 = vunpack.c.l.b16 %v3554_v42  ;;  %8793 = vmatmul.msk.bf16.vlgmr.msra.gmra.mxu3 %vm979_vm8, %v15618_v36  ;;  %v3299_v55 = vmul.f32 %v11759_v61, %v3279_v63  ;;  %v11912_v26 = vsel %vm9191_vm2, %v8526_v0, %v3561_v15  ;;  %v15623_v9 = vld [vmem:[#allocation23_spill] sm:$0xff] }
 0x1dd   : > { %6410 = vst.msk [vmem:[%s11657_s30 + $0xc] sm:$0xf] %vm6406_vm15, %v6401_v39  ;;  %v6438_v54 = vadd.f32 %v6437_v16, %v6431_v13  ;;  %v11903_v62 = vunpack.c.l.b16 %v3514_v49  ;;  %7229 = vmatpush.bf16.msra.mxu3 %v11917_v58  ;;  %v11933_v13 = vpop.permute.xlu1 %3116  ;;  %v11940_v49 = vld [vmem:[%s15275_s3] sm:$0xff] }
 0x1de   : > { %15619 = vst [vmem:[#allocation22_spill] sm:$0xff] %v11917_v58  ;;  %v11928_v48 = vpack.c.b16 %v3640_v19, %v15620_v45  ;;  %v3319_v0 = vadd.f32 %v11772_v37, %v3299_v55  ;;  %7077 = vmatpush.bf16.msrb.mxu0 %v11349_v7  ;;  %v3642_v7 = vunpack.c.l.b16 %v11912_v26  ;;  %v8527_v26 = vrot.slane %v11889_v57, 9 }
 0x1df   : > { %v6351_v16 = vpop.f32.mrf.mxu1  ;;  %v11920_v39 = vpop.f32.mrf.mxu0  ;;  %v11924_v63 = vpack.c.b16 %v11903_v62, %v11818_v52  ;;  %15622 = vst [vmem:[#allocation48_spill] sm:$0xff] %v11940_v49  ;;  %v3641_v52 = vunpack.c.l.b16 %v3558_v28 }
 0x1e0   : > { %15621 = vst [vmem:[#allocation47_spill] sm:$0xff] %v11928_v48  ;;  %v6381_v15 = vadd.f32 %v11680_v60, %v6351_v16  ;;  %v11935_v53 = vpop.permute.xlu2 %3129  ;;  %7011 = vmatpush.bf16.msrb.mxu1 %v11940_v49  ;;  %v3655_v60 = vunpack.c.l.b16 %v11889_v57  ;;  %v11948_v42 = vpop.f32.mrf.mxu3  ;;  %v3339_v55 = vmax.f32 %v3319_v0, 0.0 }
 0x1e1   : > { %6770 = vmatmul.bf16.gmra.mxu0 %v15623_v9  ;;  %3710 = vrot.lane.b32.xlu1 %v11924_v63, %s9115_s18 }
 0x1e2   : > { %3700 = vrot.lane.b32.xlu0 %v11883_v21, %s9111_s14  ;;  %v6394_v16 = vadd.f32 %v6381_v15, %v11281_v41  ;;  %3651 = vrot.lane.b32.xlu2 %v11928_v48, %s9113_s16  ;;  %v3359_v28 = vsel %vm473_vm6, %v3339_v55, 0.0  ;;  %v11962_v15 = vpack.c.b16 %v3642_v7, %v3641_v52  ;;  %v15625_v21 = vunpack.c.l.b16 %v11816_v44 }
 0x1e3   : > { %6717 = vmatmul.bf16.gmra.mxu1 %v11552_v6  ;;  %7078 = vmatpush.bf16.msrb.mxu0 %v11378_v47  ;;  %v3400_v41 = vpack.c.bf16 %v3359_v28, %v3359_v28  ;;  %v3684_v48 = vpack.c.b16 %v3641_v52, %v3640_v19  ;;  %v3564_v47 = vshrl.u32 %v11889_v57, 16 }
 0x1e4   : > { %v6402_v45 = vpack.c.bf16 %v6394_v16, %v6394_v16  ;;  %v6418_v0 = vadd.f32 %v6417_v4, %v6394_v16  ;;  %v6432_v9 = vmul.f32 %v6394_v16, %v6394_v16  ;;  %v11960_v22 = vpop.f32.mrf.mxu2  ;;  %15624 = vst [vmem:[#allocation23_spill] sm:$0xff] %v11962_v15  ;;  %v3659_v51 = vpack.c.b16 %v3655_v60, %v15625_v21 }
 0x1e5   : > { %v3581_v55 = vrot.slane %v3400_v41, 5  ;;  %v3567_v4 = vshll.u32 %v11889_v57, 16  ;;  %v3566_v19 = vrot.slane %v3564_v47, 4 }
 0x1e6   : > { %6411 = vst.msk [vmem:[%s11657_s30 + $0x10] sm:$0xf] %vm6406_vm15, %v6402_v45  ;;  %v6439_v6 = vadd.f32 %v6438_v54, %v6432_v9  ;;  %v11968_v49 = vpop.permute.xlu0 %3142  ;;  %v11980_v21 = vpop.permute.xlu1 %3152 }
 0x1e7   : > { %v6353_v16 = vpop.f32.mrf.mxu1  ;;  %v11972_v58 = vpop.f32.mrf.mxu0  ;;  %7079 = vmatpush.bf16.msrb.mxu0 %v11414_v38  ;;  %v11978_v44 = vsel %vm9191_vm2, %v8527_v26, %v3581_v55  ;;  %v3569_v45 = vrot.slane %v3567_v4, 5  ;;  %v15627_v26 = vld [vmem:[#allocation21_spill] sm:$0xff] }
 0x1e8   : > { %v6383_v28 = vadd.f32 %v11732_v5, %v6353_v16  ;;  %15626 = vst [vmem:[#allocation49_spill] sm:$0xff] %v11978_v44  ;;  %v11982_v54 = vpop.permute.xlu2 %3162  ;;  %v11987_v52 = vpop.f32.mrf.mxu3  ;;  %v3573_v5 = vshll.u32 %v3400_v41, 16  ;;  %v15628_v9 = vunpack.c.l.b16 %v15627_v26  ;;  %v15630_v26 = vld [vmem:[#allocation27_spill] sm:$0xff] }
 0x1e9   : > { %3666 = vrot.lane.b32.xlu1 %v3659_v51, %s9110_s13  ;;  %8805 = vmatmul.msk.bf16.vlgmr.msra.gmra.mxu2 %vm979_vm8, %v15618_v36  ;;  %v3570_v47 = vor.u32 %v3569_v45, %v3566_v19 }
 0x1ea   : > { %3653 = vrot.lane.b32.xlu0 %v11962_v15, %s9113_s16  ;;  %v6395_v38 = vadd.f32 %v6383_v28, %v11324_v46  ;;  %3690 = vrot.lane.b32.xlu2 %v3684_v48, %s9116_s19  ;;  %v3065_v55 = vpack.c.b16 %v15628_v9, %v9895_v20  ;;  %v3575_v51 = vrot.slane %v3573_v5, 5  ;;  %v15629_v48 = vunpack.c.l.b16 %v11978_v44  ;;  %v15631_v9 = vld [vmem:[#allocation26_spill] sm:$0xff]  ;;  %v15647_v44 = vld [vmem:[#allocation4_spill] sm:$0xff] }
 0x1eb   : > { %7080 = vmatpush.bf16.msrb.mxu0 %v11460_v3  ;;  %7287 = vmatpush.bf16.msra.mxu2 %v11466_v31  ;;  %v3571_v28 = vrot.slane %v3570_v47, 4  ;;  %v3695_v3 = vpack.c.b16 %v9895_v20, %v3655_v60 }
 0x1ec   : > { %v6403_v16 = vpack.c.bf16 %v6395_v38, %v6395_v38  ;;  %v6419_v4 = vadd.f32 %v6418_v0, %v6395_v38  ;;  %v6433_v57 = vmul.f32 %v6395_v38, %v6395_v38  ;;  %v11998_v46 = vpop.f32.mrf.mxu2  ;;  %v3685_v41 = vpack.c.b16 %v15629_v48, %v3642_v7  ;;  %8794 = vmatmul.msk.bf16.gmra.mxu3 %vm979_vm8, %v11208_v18 }
 0x1ed   : > { %v3576_v0 = vsel %vm9227_vm7, %v3571_v28, %v3575_v51  ;;  %v3172_v31 = vsel %vm979_vm8, %v3065_v55, %v11713_v14  ;;  %v3175_v55 = vsel %vm979_vm8, %v15631_v9, %v11856_v34  ;;  %v15632_v9 = vld [vmem:[#allocation14_spill] sm:$0xff] }
 0x1ee   : > { %6412 = vst.msk [vmem:[%s11657_s30 + $0x14] sm:$0xf] %vm6406_vm15, %v6403_v16  ;;  %v6440_v19 = vadd.f32 %v6439_v6, %v6433_v57  ;;  %v12019_v6 = vpop.permute.xlu1 %3105 }
 0x1ef   : > { %7081 = vmatpush.bf16.msrb.mxu0 %v11500_v43 }
 0x1f0   : > { %v6356_v45 = vpop.f32.mrf.mxu1  ;;  %v6476_v38 = vpop.f32.mrf.mxu0 }
 0x1f1   : > { %v6386_v7 = vadd.f32 %v11799_v59, %v6356_v45  ;;  %v12015_v5 = vadd.f32 %v11885_v56, %v6476_v38  ;;  %6775 = vmatmul.bf16.gmra.mxu0 %v15630_v26  ;;  %v12021_v60 = vpop.permute.xlu2 %3118  ;;  %3702 = vrot.lane.b32.xlu1 %v3695_v3, %s9111_s14  ;;  %v3086_v43 = vpop.permute.xlu0 %3085  ;;  %v3668_v59 = vunpack.c.l.b16 %v3576_v0  ;;  %v3183_v56 = vsel %vm992_vm9, %v3172_v31, %v11723_v32 }
 0x1f2   : > { %3692 = vrot.lane.b32.xlu0 %v3685_v41, %s9116_s19  ;;  %3633 = vrot.lane.b32.xlu2 %v11924_v63, %s9112_s15  ;;  %v12026_v14 = vpop.f32.mrf.mxu3  ;;  %v3191_v48 = vsel %vm1001_vm10, %v3183_v56, %v11765_v2  ;;  %v3185_v32 = vsel %vm992_vm9, %v3175_v55, %v11893_v33 }
 0x1f3   : > { %v6396_v57 = vadd.f32 %v6386_v7, %v11561_v35  ;;  %6722 = vmatmul.bf16.gmra.mxu1 %v11687_v27  ;;  %v3672_v41 = vpack.c.b16 %v3668_v59, %v11903_v62  ;;  %v3199_v34 = vsel %vm1010_vm11, %v3191_v48, %v11783_v11  ;;  %v8531_v62 = vld [vmem:[%s9200_s10 + $0x1e8] sm:$0xf]  ;;  %v3705_v55 = vpack.c.b16 %v9287_v23, %v3668_v59 }
 0x1f4   : > { %v12035_v47 = vpop.f32.mrf.mxu2  ;;  %v3810_v11 = vunpack.c.l.bf16 %v8531_v62 }
 0x1f5   : > { %v6404_v16 = vpack.c.bf16 %v6396_v57, %v6396_v57  ;;  %v6420_v63 = vadd.f32 %v6419_v4, %v6396_v57  ;;  %v6434_v51 = vmul.f32 %v6396_v57, %v6396_v57 }
 0x1f6   : > { %v12050_v31 = vpop.permute.xlu1 %3144 }
 0x1f7   : > { %6413 = vst.msk [vmem:[%s11657_s30 + $0x18] sm:$0xf] %vm6406_vm15, %v6404_v16  ;;  %v6441_v35 = vadd.f32 %v6440_v19, %v6434_v51  ;;  %v3193_v19 = vsel %vm1001_vm10, %v3185_v32, %v11933_v13  ;;  %v3830_v13 = vmul.f32 %v11759_v61, %v3810_v11  ;;  %v15633_v51 = vld [vmem:[#allocation6_spill] sm:$0xff]  ;;  %v15635_v11 = vld [vmem:[#allocation31_spill] sm:$0xff] }
 0x1f8   : > { %v6358_v28 = vpop.f32.mrf.mxu1  ;;  %v6478_v3 = vpop.f32.mrf.mxu0  ;;  %v3201_v57 = vsel %vm1010_vm11, %v3193_v19, %v11935_v53  ;;  %v6491_v48 = vadd.f32 %v15633_v51, %v11659_v24  ;;  %v15636_v24 = vld [vmem:[#allocation7_spill] sm:$0xff] }
 0x1f9   : > { %v6388_v0 = vadd.f32 %v11859_v29, %v6358_v28  ;;  %v12048_v4 = vadd.f32 %v11960_v22, %v6478_v3  ;;  %v12052_v2 = vpop.permute.xlu2 %3154  ;;  %8806 = vmatmul.msk.bf16.gmra.mxu2 %vm979_vm8, %v11208_v18  ;;  %v3207_v22 = vsel %vm1019_vm12, %v3199_v34, %v11796_v17  ;;  %v3850_v17 = vadd.f32 %v11772_v37, %v3830_v13 }
 0x1fa   : > { %3679 = vrot.lane.b32.xlu2 %v3672_v41, %s9114_s17  ;;  %v12058_v33 = vpop.permute.xlu0 %3131  ;;  %v12060_v45 = vpop.f32.mrf.mxu3  ;;  %v15634_v41 = vld [vmem:[#allocation28_spill] sm:$0xff]  ;;  %v3209_v3 = vsel %vm1019_vm12, %v3201_v57, %v11968_v49  ;;  %v15638_v57 = vld [vmem:[#allocation39_spill] sm:$0xff] }
 0x1fb   : > { %v6397_v29 = vadd.f32 %v6388_v0, %v11605_v12  ;;  %v8532_v12 = vld [vmem:[%s9200_s10 + $0x1ec] sm:$0x1]  ;;  %v3870_v34 = vmax.f32 %v3850_v17, 0.0  ;;  %v3217_v51 = vsel %vm1028_vm13, %v3209_v3, %v11980_v21  ;;  %v8534_v21 = vld [vmem:[%s9200_s10 + $0x1f4] sm:$0x1] }
 0x1fc   : > { %v12067_v38 = vpop.f32.mrf.mxu2  ;;  %8795 = vmatmul.msk.bf16.gmra.mxu3 %vm979_vm8, %v15632_v9  ;;  %v3811_v16 = vunpack.c.l.bf16 %v8532_v12  ;;  %v15639_v12 = vld [vmem:[#allocation17_spill] sm:$0xff] }
 0x1fd   : > { %v6405_v7 = vpack.c.bf16 %v6397_v29, %v6397_v29  ;;  %v6421_v26 = vadd.f32 %v6420_v63, %v6397_v29  ;;  %v6435_v56 = vmul.f32 %v6397_v29, %v6397_v29  ;;  %v3215_v63 = vsel %vm1028_vm13, %v3207_v22, %v15634_v41  ;;  %v8533_v22 = vld [vmem:[%s9200_s10 + $0x1f0] sm:$0xf] }
 0x1fe   : > { %v3831_v59 = vmul.f32 %v11759_v61, %v3811_v16  ;;  %v3178_v29 = vsel %vm979_vm8, %v15636_v24, %v3086_v43  ;;  %v12092_v13 = vsel %vm1037_vm14, %v3215_v63, %v11854_v25  ;;  %v6493_v43 = vadd.f32 %v15639_v12, %v15638_v57 }
 0x1ff   : > { %6414 = vst.msk [vmem:[%s11657_s30 + $0x1c] sm:$0xf] %vm6406_vm15, %v6405_v7  ;;  %v6422_v32 = vrot.slane %v6421_v26, 4  ;;  %v6442_v53 = vadd.f32 %v6441_v35, %v6435_v56  ;;  %v3812_v56 = vunpack.c.l.bf16 %v8533_v22 }
 0x200   : > { %v6519_v28 = vpop.f32.mrf.mxu1  ;;  %15637 = vst [vmem:[#allocation21_spill] sm:$0xff] %v12092_v13  ;;  %v12097_v49 = vpop.permute.xlu1 %3087  ;;  %v3851_v7 = vadd.f32 %v11772_v37, %v3831_v59 }
 0x201   : > { %v6423_v0 = vadd.f32 %v6422_v32, %v6421_v26  ;;  %v6443_v62 = vrot.slane %v6442_v53, 4  ;;  %v6520_v19 = vadd.f32 %v6519_v28, %v6491_v48  ;;  %6780 = vmatmul.bf16.gmra.mxu0 %v15635_v11  ;;  %v3890_v26 = vsel %vm466_vm5, %v3870_v34, 0.0  ;;  %v12105_v25 = vpop.permute.xlu2 %3107 }
 0x202   : > { %3712 = vrot.lane.b32.xlu2 %v3705_v55, %s9115_s18  ;;  %v12095_v35 = vpop.permute.xlu0 %3164  ;;  %v12107_v55 = vpop.f32.mrf.mxu3  ;;  %v3187_v48 = vsel %vm992_vm9, %v3178_v29, %v12019_v6  ;;  %v3871_v63 = vmax.f32 %v3851_v7, 0.0  ;;  %v12115_v32 = vpack.c.bf16 %v3890_v26, %v3890_v26  ;;  %v3832_v3 = vmul.f32 %v11759_v61, %v3812_v56 }
 0x203   : > { %v6424_v16 = vrot.slane %v6423_v0, 2  ;;  %v6444_v17 = vadd.f32 %v6443_v62, %v6442_v53  ;;  %6835 = vmatmul.bf16.vlgmr.msra.gmra.mxu1 %v12092_v13  ;;  %v12120_v53 = vld [vmem:[%s15275_s3 + $0x80] sm:$0xff]  ;;  %v6549_v34 = vadd.f32 %v11948_v42, %v6520_v19  ;;  %v3813_v29 = vunpack.c.l.bf16 %v8534_v21 }
 0x204   : > { %v12113_v41 = vpop.f32.mrf.mxu2  ;;  %15640 = vst [vmem:[#allocation27_spill] sm:$0xff] %v12115_v32  ;;  %7193 = vmatpush.bf16.msra.mxu1 %v12120_v53  ;;  %v3891_v62 = vsel %vm473_vm6, %v3871_v63, 0.0  ;;  %v3964_v11 = vshrl.u32 %v12115_v32, 16  ;;  %v3967_v24 = vshll.u32 %v12115_v32, 16  ;;  %v3852_v56 = vadd.f32 %v11772_v37, %v3832_v3 }
 0x205   : > { %15641 = vst [vmem:[#allocation26_spill] sm:$0xff] %v12120_v53  ;;  %v6425_v28 = vadd.f32 %v6424_v16, %v6423_v0  ;;  %v6445_v59 = vrot.slane %v6444_v17, 2  ;;  %v3932_v0 = vpack.c.bf16 %v3891_v62, %v3891_v62  ;;  %v3833_v19 = vmul.f32 %v11759_v61, %v3813_v29  ;;  %v12136_v16 = vld [vmem:[%s15275_s3 + $0x78] sm:$0xff] }
 0x206   : > { %v6589_v6 = vpop.f32.mrf.mxu0  ;;  %v3966_v12 = vrot.slane %v3964_v11, 4  ;;  %v3969_v42 = vrot.slane %v3967_v24, 5  ;;  %15642 = vst [vmem:[#allocation6_spill] sm:$0xff] %v12136_v16  ;;  %v3872_v11 = vmax.f32 %v3852_v56, 0.0 }
 0x207   : > { %v6426_v22 = vrot.slane %v6425_v28, 1  ;;  %v6446_v7 = vadd.f32 %v6445_v59, %v6444_v17  ;;  %v6619_v26 = vadd.f32 %v11998_v46, %v6589_v6  ;;  %v3195_v46 = vsel %vm1001_vm10, %v3187_v48, %v12021_v60  ;;  %v15643_v60 = vld [vmem:[#allocation42_spill] sm:$0xff]  ;;  %v15644_v48 = vld [vmem:[#allocation24_spill] sm:$0xff] }
 0x208   : > { %v6521_v57 = vpop.f32.mrf.mxu1  ;;  %7194 = vmatpush.bf16.msra.mxu1 %v12136_v16  ;;  %v12143_v21 = vpop.permute.xlu1 %3133  ;;  %v3970_v6 = vor.u32 %v3969_v42, %v3966_v12  ;;  %v3973_v62 = vshll.u32 %v3932_v0, 16  ;;  %v3853_v3 = vadd.f32 %v11772_v37, %v3833_v19  ;;  %v15645_v12 = vld [vmem:[#allocation13_spill] sm:$0xff] }
 0x209   : > { %v6447_v63 = vrot.slane %v6446_v7, 1  ;;  %v6638_v17 = vadd.f32 %v6619_v26, %v6549_v34  ;;  %v6427_v24 = vadd.f32 %v6426_v22, %v6425_v28  ;;  %v6522_v27 = vadd.f32 %v6521_v57, %v6493_v43  ;;  %8807 = vmatmul.msk.bf16.gmra.mxu2 %vm979_vm8, %v15632_v9  ;;  %v12162_v43 = vld [vmem:[%s15275_s3 + $0x70] sm:$0xff]  ;;  %v12174_v57 = vpop.permute.xlu2 %3146  ;;  %v15653_v9 = vld [vmem:[#allocation38_spill] sm:$0xff] }
 0x20a   : > { %v12141_v59 = vpop.permute.xlu0 %3120  ;;  %v12148_v34 = vpop.f32.mrf.mxu3  ;;  %v6496_v26 = vadd.f32 %v15644_v48, %v15643_v60  ;;  %v15646_v42 = vunpack.c.l.b16 %v15645_v12  ;;  %v3971_v56 = vrot.slane %v3970_v6, 4  ;;  %v3975_v28 = vrot.slane %v3973_v62, 5  ;;  %15649 = vst [vmem:[#allocation31_spill] sm:$0xff] %v12162_v43 }
 0x20b   : > { %v6448_v29 = vadd.f32 %v6447_v63, %v6446_v7  ;;  %v6646_v18 = vpack.c.bf16 %v6638_v17, %v6638_v17  ;;  %v12172_v7 = vsel %vm1037_vm14, %v3217_v51, %v11982_v54  ;;  %v8550_v63 = vrot.slane %v12115_v32, 9  ;;  %v8535_v51 = vld [vmem:[%s9200_s10 + $0x1f8] sm:$0xf] }
 0x20c   : > { %v12152_v36 = vpop.f32.mrf.mxu2  ;;  %v12157_v19 = vpack.c.b16 %v15647_v44, %v15646_v42  ;;  %7195 = vmatpush.bf16.msra.mxu1 %v12162_v43  ;;  %15651 = vst [vmem:[#allocation39_spill] sm:$0xff] %v12172_v7  ;;  %v4083_v6 = vrot.slane %v3932_v0, 5  ;;  %v3203_v60 = vsel %vm1010_vm11, %v3195_v46, %v12058_v33  ;;  %v3892_v54 = vsel %vm466_vm5, %v3872_v11, 0.0  ;;  %v8536_v46 = vld [vmem:[%s9200_s10 + $0x1fc] sm:$0x1] }
 0x20d   : > { %v12166_v22 = vsel %vm6449_vm0, %v6427_v24, %v6448_v29  ;;  %8777 = vst.msk [vmem:[%s11657_s30 + $0x20] sm:$0xf] %vm6406_vm15, %v6646_v18  ;;  %v3976_v18 = vsel %vm9227_vm7, %v3971_v56, %v3975_v28  ;;  %v3873_v24 = vmax.f32 %v3853_v3, 0.0  ;;  %v6551_v29 = vadd.f32 %v11987_v52, %v6522_v27  ;;  %v12203_v27 = vld [vmem:[%s15275_s3 + $0x68] sm:$0xff] }
 0x20e   : > { %15648 = vst [vmem:[#allocation28_spill] sm:$0xff] %v12157_v19  ;;  %v6591_v62 = vpop.f32.mrf.mxu0  ;;  %8796 = vmatmul.msk.bf16.gmra.mxu3 %vm979_vm8, %v12157_v19  ;;  %v12188_v0 = vunpack.c.l.b16 %v3976_v18  ;;  %v12192_v33 = vsel %vm9191_vm2, %v8550_v63, %v4083_v6  ;;  %v6676_v12 = vmul.f32 %v6638_v17, %v6638_v17  ;;  %v12198_v11 = vpack.c.bf16 %v3892_v54, %v3892_v54 }
 0x20f   : > { %15650 = vst [vmem:[#allocation7_spill] sm:$0xff] %v12166_v22  ;;  %v6621_v48 = vadd.f32 %v12035_v47, %v6591_v62  ;;  %v15366_v56 = vunpack.c.l.b16 %v12192_v33  ;;  %v3893_v3 = vsel %vm473_vm6, %v3873_v24, 0.0  ;;  %v3814_v63 = vunpack.c.l.bf16 %v8535_v51 }
 0x210   : > { %v6524_v42 = vpop.f32.mrf.mxu1  ;;  %15652 = vst [vmem:[#allocation17_spill] sm:$0xff] %v12203_v27  ;;  %7196 = vmatpush.bf16.msra.mxu1 %v12203_v27  ;;  %v4169_v47 = vpack.c.b16 %v12188_v0, %v9287_v23  ;;  %v3934_v28 = vpack.c.bf16 %v3893_v3, %v3893_v3  ;;  %v3978_v18 = vshrl.u32 %v12198_v11, 16  ;;  %v3981_v24 = vshll.u32 %v12198_v11, 16  ;;  %v12218_v51 = vpop.permute.xlu1 %3166  ;;  %v15655_v27 = vld [vmem:[#allocation25_spill] sm:$0xff] }
 0x211   : > { %v6639_v52 = vadd.f32 %v6621_v48, %v6551_v29  ;;  %6954 = vmatmul.bf16.vlgmr.msra.gmra.mxu0 %v12092_v13  ;;  %v4189_v62 = vpack.c.b16 %v15366_v56, %v15647_v44  ;;  %v3815_v54 = vunpack.c.l.bf16 %v8536_v46  ;;  %v6525_v3 = vadd.f32 %v6524_v42, %v6496_v26  ;;  %v15654_v56 = vld [vmem:[#allocation45_spill] sm:$0xff]  ;;  %v8537_v26 = vld [vmem:[%s9200_s10 + $0x200] sm:$0xf] }
 0x212   : > { %v12209_v6 = vpop.permute.xlu0 %3156  ;;  %7251 = vmatpush.bf16.msra.mxu0 %v15653_v9  ;;  %v12220_v23 = vpop.f32.mrf.mxu3  ;;  %v6498_v22 = vadd.f32 %v15655_v27, %v15654_v56  ;;  %v3211_v46 = vsel %vm1019_vm12, %v3203_v60, %v12050_v31  ;;  %4173 = vrot.lane.b32.xlu0 %v4169_v47, %s9112_s15  ;;  %v3980_v9 = vrot.slane %v3978_v18, 4  ;;  %v3987_v27 = vshll.u32 %v3934_v28, 16  ;;  %v12240_v60 = vld [vmem:[%s15275_s3 + $0x60] sm:$0xff] }
 0x213   : > { %v6647_v29 = vpack.c.bf16 %v6639_v52, %v6639_v52  ;;  %v6663_v48 = vadd.f32 %v6639_v52, %v6638_v17  ;;  %v6677_v13 = vmul.f32 %v6639_v52, %v6639_v52  ;;  %6840 = vmatmul.bf16.gmra.mxu1 %v12172_v7  ;;  %4193 = vrot.lane.b32.xlu1 %v4189_v62, %s9113_s16  ;;  %v3983_v17 = vrot.slane %v3981_v24, 5  ;;  %v15656_v52 = vld [vmem:[#allocation35_spill] sm:$0xff]  ;;  %v15658_v24 = vld [vmem:[#allocation40_spill] sm:$0xff] }
 0x214   : > { %v12226_v43 = vpop.f32.mrf.mxu2  ;;  %v3181_v56 = vsel %vm979_vm8, %v15656_v52, %v12097_v49  ;;  %v8551_v31 = vrot.slane %v12198_v11, 9  ;;  %15657 = vst [vmem:[#allocation42_spill] sm:$0xff] %v12240_v60  ;;  %7197 = vmatpush.bf16.msra.mxu1 %v12240_v60  ;;  %v4087_v62 = vrot.slane %v3934_v28, 5  ;;  %v3834_v18 = vmul.f32 %v11759_v61, %v3814_v63  ;;  %v12248_v52 = vpop.permute.xlu2 %3627 }
 0x215   : > { %8778 = vst.msk [vmem:[%s11657_s30 + $0x24] sm:$0xf] %vm6406_vm15, %v6647_v29  ;;  %v6684_v42 = vadd.f32 %v6677_v13, %v6676_v12  ;;  %v3984_v47 = vor.u32 %v3983_v17, %v3980_v9  ;;  %v3835_v13 = vmul.f32 %v11759_v61, %v3815_v54  ;;  %v8538_v12 = vld [vmem:[%s9200_s10 + $0x204] sm:$0x1]  ;;  %v6554_v49 = vadd.f32 %v12026_v14, %v6525_v3 }
 0x216   : > { %7252 = vmatpush.bf16.msra.mxu0 %v15658_v24  ;;  %v3989_v44 = vrot.slane %v3987_v27, 5  ;;  %v3816_v16 = vunpack.c.l.bf16 %v8537_v26  ;;  %v3817_v53 = vunpack.c.l.bf16 %v8538_v12  ;;  %v12253_v28 = vsel %vm9191_vm2, %v8551_v31, %v4087_v62 }
 0x217   : > { %v6594_v29 = vpop.f32.mrf.mxu0  ;;  %v3985_v9 = vrot.slane %v3984_v47, 4  ;;  %v3854_v63 = vadd.f32 %v11772_v37, %v3834_v18  ;;  %v3219_v54 = vsel %vm1028_vm13, %v3211_v46, %v12052_v2  ;;  %v3189_v14 = vsel %vm992_vm9, %v3181_v56, %v12105_v25  ;;  %v15659_v25 = vld [vmem:[#allocation41_spill] sm:$0xff]  ;;  %v8539_v18 = vld [vmem:[%s9200_s10 + $0x208] sm:$0xf] }
 0x218   : > { %v6624_v15 = vadd.f32 %v12067_v38, %v6594_v29  ;;  %v6526_v60 = vpop.f32.mrf.mxu1  ;;  %v15375_v3 = vunpack.c.l.b16 %v12253_v28  ;;  %v3855_v17 = vadd.f32 %v11772_v37, %v3835_v13  ;;  %v12265_v38 = vld [vmem:[%s15275_s3 + $0x58] sm:$0xff]  ;;  %v3836_v46 = vmul.f32 %v11759_v61, %v3816_v16 }
 0x219   : > { %7198 = vmatpush.bf16.msra.mxu1 %v12265_v38  ;;  %v3990_v27 = vsel %vm9227_vm7, %v3985_v9, %v3989_v44  ;;  %v3874_v2 = vmax.f32 %v3854_v63, 0.0  ;;  %v6527_v56 = vadd.f32 %v6526_v60, %v6498_v22  ;;  %8808 = vmatmul.msk.bf16.gmra.mxu2 %vm979_vm8, %v12157_v19  ;;  %v15660_v62 = vunpack.c.l.b16 %v12192_v33  ;;  %v15662_v9 = vld [vmem:[#allocation16_spill] sm:$0xff] }
 0x21a   : > { %v6640_v26 = vadd.f32 %v6624_v15, %v6554_v49  ;;  %7253 = vmatpush.bf16.msra.mxu0 %v15659_v25  ;;  %v12274_v31 = vpop.f32.mrf.mxu3  ;;  %v12276_v47 = vunpack.c.l.b16 %v3990_v27  ;;  %v3837_v44 = vmul.f32 %v11759_v61, %v3817_v53  ;;  %v3197_v22 = vsel %vm1001_vm10, %v3189_v14, %v12141_v59  ;;  %v12292_v33 = vpop.permute.xlu0 %3647  ;;  %v12304_v59 = vld [vmem:[%s15275_s3 + $0x50] sm:$0xff] }
 0x21b   : > { %v4228_v15 = vpack.c.b16 %v15375_v3, %v15660_v62  ;;  %v12290_v24 = vsel %vm1037_vm14, %v3219_v54, %v12095_v35  ;;  %v12294_v49 = vpop.permute.xlu1 %3660  ;;  %v3894_v29 = vsel %vm466_vm5, %v3874_v2, 0.0  ;;  %v3856_v63 = vadd.f32 %v11772_v37, %v3836_v46  ;;  %v15663_v2 = vld [vmem:[#allocation43_spill] sm:$0xff] }
 0x21c   : > { %v6648_v16 = vpack.c.bf16 %v6640_v26, %v6640_v26  ;;  %v6664_v13 = vadd.f32 %v6663_v48, %v6640_v26  ;;  %v6678_v12 = vmul.f32 %v6640_v26, %v6640_v26  ;;  %v12286_v60 = vpop.f32.mrf.mxu2  ;;  %15661 = vst [vmem:[#allocation24_spill] sm:$0xff] %v12290_v24  ;;  %v4215_v53 = vpack.c.b16 %v12276_v47, %v12188_v0 }
 0x21d   : > { %4232 = vrot.lane.b32.xlu1 %v4228_v15, %s9116_s19  ;;  %v3875_v48 = vmax.f32 %v3855_v17, 0.0  ;;  %7199 = vmatpush.bf16.msra.mxu1 %v12304_v59  ;;  %v12311_v0 = vpack.c.bf16 %v3894_v29, %v3894_v29  ;;  %v3818_v54 = vunpack.c.l.bf16 %v8539_v18  ;;  %v6556_v14 = vadd.f32 %v12060_v45, %v6527_v56  ;;  %v15664_v15 = vld [vmem:[#allocation36_spill] sm:$0xff]  ;;  %v12337_v18 = vpop.permute.xlu2 %3673 }
 0x21e   : > { %8779 = vst.msk [vmem:[%s11657_s30 + $0x28] sm:$0xf] %vm6406_vm15, %v6648_v16  ;;  %v6685_v35 = vadd.f32 %v6684_v42, %v6678_v12  ;;  %8809 = vmatmul.msk.bf16.vlgmr.msrb.gmra.mxu3 %vm979_vm8, %v15662_v9  ;;  %v3205_v26 = vsel %vm1010_vm11, %v3197_v22, %v12143_v21  ;;  %4219 = vrot.lane.b32.xlu0 %v4215_v53, %s9114_s17  ;;  %v12330_v21 = vld [vmem:[%s15275_s3 + $0xd0] sm:$0xff]  ;;  %v3876_v16 = vmax.f32 %v3856_v63, 0.0  ;;  %v12343_v53 = vld [vmem:[%s15275_s3 + $0x48] sm:$0xff] }
 0x21f   : > { %v6596_v17 = vpop.f32.mrf.mxu0  ;;  %v3895_v27 = vsel %vm473_vm6, %v3875_v48, 0.0  ;;  %v3857_v42 = vadd.f32 %v11772_v37, %v3837_v44  ;;  %7254 = vmatpush.bf16.msra.mxu0 %v15663_v2  ;;  %v3992_v45 = vshrl.u32 %v12311_v0, 16  ;;  %v3995_v56 = vshll.u32 %v12311_v0, 16  ;;  %7357 = vmatpush.bf16.msrb.mxu3 %v12330_v21 }
 0x220   : > { %v6626_v25 = vadd.f32 %v12113_v41, %v6596_v17  ;;  %v6529_v62 = vpop.f32.mrf.mxu1  ;;  %v12323_v46 = vpack.c.bf16 %v3895_v27, %v3895_v27  ;;  %v15665_v44 = vunpack.c.l.b16 %v15664_v15  ;;  %v3838_v22 = vmul.f32 %v11759_v61, %v3818_v54  ;;  %v15666_v27 = vld [vmem:[#allocation11_spill] sm:$0xff]  ;;  %v15667_v15 = vld [vmem:[#allocation44_spill] sm:$0xff] }
 0x221   : > { %6959 = vmatmul.bf16.gmra.mxu0 %v12172_v7  ;;  %v3877_v12 = vmax.f32 %v3857_v42, 0.0  ;;  %7200 = vmatpush.bf16.msra.mxu1 %v12343_v53  ;;  %v3994_v29 = vrot.slane %v3992_v45, 4  ;;  %v3997_v9 = vrot.slane %v3995_v56, 5  ;;  %v6501_v2 = vadd.f32 %v15666_v27, %v11920_v39 }
 0x222   : > { %v3611_v41 = vpack.c.b16 %v15665_v44, %v9895_v20  ;;  %v6641_v48 = vadd.f32 %v6626_v25, %v6556_v14  ;;  %v4001_v17 = vshll.u32 %v12323_v46, 16  ;;  %v12350_v63 = vpop.f32.mrf.mxu3  ;;  %v3896_v54 = vsel %vm466_vm5, %v3876_v16, 0.0  ;;  %v8540_v44 = vld [vmem:[%s9200_s10 + $0x20c] sm:$0x1] }
 0x223   : > { %6845 = vmatmul.bf16.gmra.mxu1 %v12290_v24  ;;  %v3897_v42 = vsel %vm473_vm6, %v3877_v12, 0.0  ;;  %7255 = vmatpush.bf16.msra.mxu0 %v15667_v15  ;;  %v3213_v56 = vsel %vm1019_vm12, %v3205_v26, %v12174_v57  ;;  %v6530_v27 = vadd.f32 %v6529_v62, %v6501_v2  ;;  %v3998_v3 = vor.u32 %v3997_v9, %v3994_v29  ;;  %v12373_v57 = vpop.permute.xlu1 %3696 }
 0x224   : > { %v6649_v14 = vpack.c.bf16 %v6641_v48, %v6641_v48  ;;  %v6665_v25 = vadd.f32 %v6664_v13, %v6641_v48  ;;  %v6679_v45 = vmul.f32 %v6641_v48, %v6641_v48  ;;  %v12359_v39 = vpop.f32.mrf.mxu2  ;;  %v4003_v7 = vrot.slane %v4001_v17, 5  ;;  %v12371_v48 = vpop.permute.xlu0 %3686 }
 0x225   : > { %v12362_v19 = vpack.c.bf16 %v3896_v54, %v3896_v54  ;;  %v3718_v12 = vsel %vm979_vm8, %v3611_v41, %v12248_v52  ;;  %v12368_v15 = vpack.c.bf16 %v3897_v42, %v3897_v42  ;;  %v3858_v13 = vadd.f32 %v11772_v37, %v3838_v22  ;;  %v12391_v20 = vpop.permute.xlu2 %3706 }
 0x226   : > { %8780 = vst.msk [vmem:[%s11657_s30 + $0x2c] sm:$0xf] %vm6406_vm15, %v6649_v14  ;;  %v6686_v16 = vadd.f32 %v6685_v35, %v6679_v45  ;;  %v3999_v26 = vrot.slane %v3998_v3, 4  ;;  %v3819_v9 = vunpack.c.l.bf16 %v8540_v44  ;;  %v15668_v35 = vld [vmem:[#allocation20_spill] sm:$0xff]  ;;  %v6559_v54 = vadd.f32 %v12107_v55, %v6530_v27 }
 0x227   : > { %v4006_v62 = vshrl.u32 %v12362_v19, 16  ;;  %v4009_v29 = vshll.u32 %v12362_v19, 16  ;;  %7256 = vmatpush.bf16.msra.mxu0 %v11865_v50  ;;  %v6503_v17 = vadd.f32 %v15668_v35, %v11972_v58  ;;  %v4015_v2 = vshll.u32 %v12368_v15, 16 }
 0x228   : > { %v6531_v52 = vpop.f32.mrf.mxu1  ;;  %v6599_v41 = vpop.f32.mrf.mxu0  ;;  %v3878_v22 = vmax.f32 %v3858_v13, 0.0  ;;  %v3221_v3 = vsel %vm1028_vm13, %v3213_v56, %v12209_v6  ;;  %v4004_v14 = vsel %vm9227_vm7, %v3999_v26, %v4003_v7  ;;  %v3729_v50 = vsel %vm992_vm9, %v3718_v12, %v12292_v33  ;;  %v15669_v13 = vld [vmem:[#allocation18_spill] sm:$0xff] }
 0x229   : > { %v6629_v42 = vadd.f32 %v12152_v36, %v6599_v41  ;;  %v12389_v45 = vunpack.c.l.b16 %v4004_v14  ;;  %v4008_v58 = vrot.slane %v4006_v62, 4  ;;  %v4011_v44 = vrot.slane %v4009_v29, 5  ;;  %8813 = vmatmul.msk.bf16.vlgmr.msrb.gmra.mxu2 %vm979_vm8, %v15669_v13  ;;  %v15670_v62 = vld [vmem:[#allocation22_spill] sm:$0xff]  ;;  %v15671_v14 = vld [vmem:[#allocation15_spill] sm:$0xff] }
 0x22a   : > { %v12395_v36 = vpop.f32.mrf.mxu3  ;;  %v4152_v55 = vunpack.c.l.b16 %v12311_v0  ;;  %v3898_v7 = vsel %vm466_vm5, %v3878_v22, 0.0  ;;  %v3839_v6 = vmul.f32 %v11759_v61, %v3819_v9  ;;  %v4017_v12 = vrot.slane %v4015_v2, 5  ;;  %7476 = vmatpush.bf16.msrb.mxu2 %v15670_v62 }
 0x22b   : > { %v6642_v35 = vadd.f32 %v6629_v42, %v6559_v54  ;;  %7257 = vmatpush.bf16.msra.mxu0 %v11898_v40  ;;  %v4170_v33 = vpack.c.b16 %v12389_v45, %v12276_v47  ;;  %v4012_v27 = vor.u32 %v4011_v44, %v4008_v58  ;;  %v12406_v26 = vpack.c.bf16 %v3898_v7, %v3898_v7  ;;  %v8541_v42 = vld [vmem:[%s9200_s10 + $0x210] sm:$0xf] }
 0x22c   : > { %v12404_v56 = vpop.f32.mrf.mxu2  ;;  %v6532_v29 = vadd.f32 %v6531_v52, %v6503_v17  ;;  %v4153_v61 = vunpack.c.l.b16 %v12362_v19  ;;  %v15380_v47 = vunpack.c.l.b16 %v12115_v32  ;;  %v4151_v9 = vunpack.c.l.b16 %v12198_v11  ;;  %v15672_v58 = vld [vmem:[#allocation48_spill] sm:$0xff] }
 0x22d   : > { %v6650_v41 = vpack.c.bf16 %v6642_v35, %v6642_v35  ;;  %v6666_v54 = vadd.f32 %v6665_v25, %v6642_v35  ;;  %v6680_v22 = vmul.f32 %v6642_v35, %v6642_v35  ;;  %4252 = vrot.lane.b32.xlu0 %v4170_v33, %s9115_s18  ;;  %4175 = vrot.lane.b32.xlu1 %v4170_v33, %s9112_s15  ;;  %v4013_v40 = vrot.slane %v4012_v27, 4  ;;  %v3630_v27 = vpop.permute.xlu0 %3629 }
 0x22e   : > { %8810 = vmatmul.msk.bf16.gmra.mxu3 %vm979_vm8, %v15671_v14  ;;  %v3859_v25 = vadd.f32 %v11772_v37, %v3839_v6  ;;  %v4020_v17 = vshrl.u32 %v12406_v26, 16  ;;  %v4023_v52 = vshll.u32 %v12406_v26, 16  ;;  %v12425_v11 = vsel %vm1037_vm14, %v3221_v3, %v12218_v51  ;;  %v12439_v3 = vpop.permute.xlu1 %3649 }
 0x22f   : > { %8781 = vst.msk [vmem:[%s11657_s30 + $0x30] sm:$0xf] %vm6406_vm15, %v6650_v41  ;;  %v6687_v2 = vadd.f32 %v6686_v16, %v6680_v22  ;;  %7258 = vmatpush.bf16.msra.mxu0 %v15672_v58  ;;  %v4018_v16 = vsel %vm9227_vm7, %v4013_v40, %v4017_v12  ;;  %v4202_v7 = vpack.c.b16 %v4151_v9, %v15380_v47  ;;  %v3820_v37 = vunpack.c.l.bf16 %v8541_v42  ;;  %v8542_v22 = vld [vmem:[%s9200_s10 + $0x214] sm:$0x1] }
 0x230   : > { %v6534_v44 = vpop.f32.mrf.mxu1  ;;  %v6601_v35 = vpop.f32.mrf.mxu0  ;;  %15673 = vst [vmem:[#allocation13_spill] sm:$0xff] %v12425_v11  ;;  %v6561_v6 = vadd.f32 %v12148_v34, %v6532_v29  ;;  %v12434_v62 = vunpack.c.l.b16 %v4018_v16  ;;  %v3879_v41 = vmax.f32 %v3859_v25, 0.0  ;;  %v3737_v51 = vsel %vm1001_vm10, %v3729_v50, %v12294_v49  ;;  %v12456_v50 = vld [vmem:[%s15276_s4] ss:$0 sm:$0xff] }
 0x231   : > { %v6631_v33 = vadd.f32 %v12226_v43, %v6601_v35  ;;  %6964 = vmatmul.bf16.gmra.mxu0 %v12290_v24  ;;  %v4203_v12 = vpack.c.b16 %v4153_v61, %v4152_v55  ;;  %4206 = vrot.lane.b32.xlu2 %v4202_v7, %s9110_s13  ;;  %v4022_v34 = vrot.slane %v4020_v17, 4  ;;  %v4025_v43 = vrot.slane %v4023_v52, 5 }
 0x232   : > { %v4216_v42 = vpack.c.b16 %v12434_v62, %v12389_v45  ;;  %v12449_v40 = vpop.f32.mrf.mxu3  ;;  %v3899_v49 = vsel %vm473_vm6, %v3879_v41, 0.0  ;;  %v3840_v14 = vmul.f32 %v12456_v50, %v3820_v37  ;;  %v15381_v17 = vunpack.c.l.b16 %v12406_v26 }
 0x233   : > { %v6643_v29 = vadd.f32 %v6631_v33, %v6561_v6  ;;  %6850 = vmatmul.bf16.gmra.mxu1 %v12425_v11  ;;  %v3940_v52 = vpack.c.bf16 %v3899_v49, %v3899_v49  ;;  %v4026_v45 = vor.u32 %v4025_v43, %v4022_v34  ;;  %v3821_v58 = vunpack.c.l.bf16 %v8542_v22  ;;  %v12464_v6 = vpop.permute.xlu2 %3662  ;;  %v8543_v34 = vld [vmem:[%s9200_s10 + $0x218] sm:$0xf] }
 0x234   : > { %v12459_v25 = vpop.f32.mrf.mxu2  ;;  %v8553_v33 = vrot.slane %v12362_v19, 9  ;;  %v4095_v47 = vrot.slane %v12368_v15, 5  ;;  %v8554_v49 = vrot.slane %v12406_v26, 9  ;;  %v12478_v22 = vpack.c.b16 %v4152_v55, %v4151_v9 }
 0x235   : > { %v6651_v35 = vpack.c.bf16 %v6643_v29, %v6643_v29  ;;  %v12462_v16 = vadd.f32 %v6666_v54, %v6643_v29  ;;  %v6681_v7 = vmul.f32 %v6643_v29, %v6643_v29  ;;  %4208 = vrot.lane.b32.xlu0 %v4203_v12, %s9110_s13  ;;  %4221 = vrot.lane.b32.xlu1 %v4216_v42, %s9114_s17  ;;  %v4027_v37 = vrot.slane %v4026_v45, 4  ;;  %v12483_v12 = vld [vmem:[%s15277_s5] ss:$0 sm:$0xff]  ;;  %v15675_v45 = vld [vmem:[#allocation9_spill] sm:$0xff] }
 0x236   : > { %v4029_v41 = vshll.u32 %v3940_v52, 16  ;;  %15674 = vst [vmem:[#allocation38_spill] sm:$0xff] %v12478_v22  ;;  %v4099_v43 = vrot.slane %v3940_v52, 5  ;;  %v3860_v15 = vadd.f32 %v12483_v12, %v3840_v14  ;;  %v12488_v29 = vsel %vm1010_vm11, %v3737_v51, %v12337_v18  ;;  %v8544_v18 = vld [vmem:[%s9200_s10 + $0x21c] sm:$0x1] }
 0x237   : > { %8782 = vst.msk [vmem:[%s11657_s30 + $0x34] sm:$0xf] %vm6406_vm15, %v6651_v35  ;;  %v12474_v54 = vadd.f32 %v6687_v2, %v6681_v7  ;;  %v12492_v2 = vsel %vm979_vm8, %v15675_v45, %v3630_v27  ;;  %v3841_v55 = vmul.f32 %v12456_v50, %v3821_v58  ;;  %v6535_v9 = vadd.f32 %v6534_v44, %v12015_v5 }
 0x238   : > { %v6536_v42 = vpop.f32.mrf.mxu1  ;;  %v4031_v35 = vrot.slane %v4029_v41, 5  ;;  %v12500_v52 = vpack.c.b16 %v15381_v17, %v4153_v61  ;;  %v3880_v14 = vmax.f32 %v3860_v15, 0.0  ;;  %v3822_v7 = vunpack.c.l.bf16 %v8543_v34  ;;  %v15677_v61 = vld [vmem:[#allocation47_spill] sm:$0xff]  ;;  %v12528_v34 = vpop.permute.xlu1 %3688 }
 0x239   : > { %4242 = vrot.lane.b32.xlu2 %v12478_v22, %s9111_s14  ;;  %v8552_v27 = vrot.slane %v12311_v0, 9  ;;  %v4091_v58 = vrot.slane %v12323_v46, 5  ;;  %v3861_v5 = vadd.f32 %v12483_v12, %v3841_v55  ;;  %8814 = vmatmul.msk.bf16.gmra.mxu2 %vm979_vm8, %v15677_v61  ;;  %v12524_v0 = vsel %vm9191_vm2, %v8554_v49, %v4099_v43 }
 0x23a   : > { %15676 = vst [vmem:[#allocation45_spill] sm:$0xff] %v12500_v52  ;;  %v4032_v51 = vsel %vm9227_vm7, %v4027_v37, %v4031_v35  ;;  %v12516_v41 = vpop.f32.mrf.mxu3  ;;  %v12520_v37 = vsel %vm9191_vm2, %v8553_v33, %v4095_v47  ;;  %v3900_v46 = vsel %vm466_vm5, %v3880_v14, 0.0  ;;  %v3823_v47 = vunpack.c.l.bf16 %v8544_v18 }
 0x23b   : > { %v12512_v44 = vunpack.c.l.b16 %v4032_v51  ;;  %15678 = vst [vmem:[#allocation25_spill] sm:$0xff] %v12516_v41  ;;  %v12532_v45 = vpack.c.bf16 %v3900_v46, %v3900_v46  ;;  %v12536_v35 = vsel %vm9191_vm2, %v8552_v27, %v4091_v58  ;;  %v3881_v55 = vmax.f32 %v3861_v5, 0.0  ;;  %v15715_v41 = vld [vmem:[#allocation31_spill] sm:$0xff] }
 0x23c   : > { %v12510_v19 = vpop.permute.xlu0 %3675  ;;  %v12530_v15 = vpop.f32.mrf.mxu2  ;;  %v6564_v33 = vadd.f32 %v12220_v23, %v6535_v9  ;;  %v4184_v43 = vunpack.c.l.b16 %v12536_v35  ;;  %v3842_v14 = vmul.f32 %v12456_v50, %v3822_v7  ;;  %v4185_v46 = vunpack.c.l.b16 %v12520_v37  ;;  %v15680_v7 = vld [vmem:[#allocation19_spill] sm:$0xff] }
 0x23d   : > { %15679 = vst [vmem:[#allocation35_spill] sm:$0xff] %v12530_v15  ;;  %v12541_v49 = vpack.c.b16 %v12512_v44, %v12434_v62  ;;  %4244 = vrot.lane.b32.xlu0 %v12500_v52, %s9111_s14  ;;  %v4186_v27 = vunpack.c.l.b16 %v12524_v0  ;;  %v3901_v23 = vsel %vm473_vm6, %v3881_v55, 0.0  ;;  %v12553_v9 = vpop.permute.xlu2 %3698  ;;  %v15681_v58 = vunpack.c.l.b16 %v12253_v28 }
 0x23e   : > { %v6604_v51 = vpop.f32.mrf.mxu0  ;;  %8811 = vmatmul.msk.bf16.gmra.mxu3 %vm979_vm8, %v15680_v7  ;;  %v3942_v37 = vpack.c.bf16 %v3901_v23, %v3901_v23  ;;  %v4034_v0 = vshrl.u32 %v12532_v45, 16  ;;  %v8555_v55 = vrot.slane %v12532_v45, 9  ;;  %v4037_v18 = vshll.u32 %v12532_v45, 16 }
 0x23f   : > { %v6634_v62 = vadd.f32 %v12286_v60, %v6604_v51  ;;  %4254 = vrot.lane.b32.xlu1 %v12541_v49, %s9115_s18  ;;  %v12561_v5 = vpack.c.b16 %v4184_v43, %v15681_v58  ;;  %v3862_v60 = vadd.f32 %v12483_v12, %v3842_v14  ;;  %v3843_v51 = vmul.f32 %v12456_v50, %v3823_v47 }
 0x240   : > { %v12564_v35 = vpop.f32.mrf.mxu1  ;;  %v6537_v17 = vadd.f32 %v6536_v42, %v12048_v4  ;;  %v4103_v28 = vrot.slane %v3942_v37, 5  ;;  %v4036_v58 = vrot.slane %v4034_v0, 4  ;;  %v12572_v23 = vpack.c.b16 %v4186_v27, %v4185_v46  ;;  %v15684_v4 = vld [vmem:[#allocation33_spill] sm:$0xff] }
 0x241   : > { %15682 = vst [vmem:[#allocation40_spill] sm:$0xff] %v12561_v5  ;;  %v6644_v7 = vadd.f32 %v6634_v62, %v6564_v33  ;;  %6969 = vmatmul.bf16.gmra.mxu0 %v12425_v11  ;;  %4195 = vrot.lane.b32.xlu2 %v12561_v5, %s9113_s16  ;;  %v3882_v52 = vmax.f32 %v3862_v60, 0.0  ;;  %v3863_v14 = vadd.f32 %v12483_v12, %v3843_v51  ;;  %v4039_v22 = vrot.slane %v4037_v18, 5  ;;  %v12614_v5 = vpop.permute.xlu1 %3631 }
 0x242   : > { %15683 = vst [vmem:[#allocation41_spill] sm:$0xff] %v12572_v23  ;;  %v15685_v33 = vunpack.c.l.b16 %v12406_v26  ;;  %v15686_v62 = vunpack.c.l.b16 %v12532_v45  ;;  %v12585_v11 = vpop.f32.mrf.mxu3  ;;  %v12591_v18 = vsel %vm9191_vm2, %v8555_v55, %v4103_v28  ;;  %v8545_v28 = vld [vmem:[%s9200_s10 + $0x220] sm:$0xf] }
 0x243   : > { %v6652_v47 = vpack.c.bf16 %v6644_v7, %v6644_v7  ;;  %v6668_v24 = vadd.f32 %v12462_v16, %v6644_v7  ;;  %v6682_v32 = vmul.f32 %v6644_v7, %v6644_v7  ;;  %7012 = vmatmul.bf16.vlgmr.msrb.gmra.mxu1 %v15684_v4  ;;  %15687 = vst [vmem:[#allocation16_spill] sm:$0xff] %v12585_v11  ;;  %v3902_v16 = vsel %vm466_vm5, %v3882_v52, 0.0  ;;  %v12598_v7 = vld [vmem:[%s15275_s3 + $0xc8] sm:$0xff] }
 0x244   : > { %v12579_v42 = vpop.permute.xlu0 %3708  ;;  %v4204_v0 = vpack.c.b16 %v15686_v62, %v15685_v33  ;;  %v12587_v60 = vpop.f32.mrf.mxu2  ;;  %v3883_v51 = vmax.f32 %v3863_v14, 0.0  ;;  %15689 = vst [vmem:[#allocation36_spill] sm:$0xff] %v12598_v7  ;;  %7321 = vmatpush.bf16.msrb.mxu1 %v12598_v7  ;;  %v15389_v4 = vunpack.c.l.b16 %v12591_v18  ;;  %v12605_v33 = vpack.c.bf16 %v3902_v16, %v3902_v16 }
 0x245   : > { %15688 = vst [vmem:[#allocation43_spill] sm:$0xff] %v12587_v60  ;;  %v6689_v26 = vadd.f32 %v12474_v54, %v6682_v32  ;;  %v4040_v55 = vor.u32 %v4039_v22, %v4036_v58  ;;  %v3753_v52 = vsel %vm1019_vm12, %v12488_v29, %v12371_v48  ;;  %v3731_v14 = vsel %vm992_vm9, %v12492_v2, %v12439_v3  ;;  %v12658_v60 = vld [vmem:[%s15275_s3 + $0xb8] sm:$0xff] }
 0x246   : > { %8783 = vst.msk [vmem:[%s11657_s30 + $0x38] sm:$0xf] %vm6406_vm15, %v6652_v47  ;;  %v6606_v62 = vpop.f32.mrf.mxu0  ;;  %4197 = vrot.lane.b32.xlu0 %v12572_v23, %s9113_s16  ;;  %v3903_v32 = vsel %vm473_vm6, %v3883_v51, 0.0  ;;  %v4043_v54 = vshll.u32 %v3942_v37, 16  ;;  %v6566_v22 = vadd.f32 %v12274_v31, %v6537_v17  ;;  %v15392_v48 = vunpack.c.l.b16 %v12605_v33  ;;  %v12632_v31 = vld [vmem:[%s15275_s3 + $0xc0] sm:$0xff]  ;;  %v12635_v17 = vpop.permute.xlu2 %3651 }
 0x247   : > { %v6636_v58 = vadd.f32 %v12359_v39, %v6606_v62  ;;  %4210 = vrot.lane.b32.xlu1 %v4204_v0, %s9110_s13  ;;  %v4229_v3 = vpack.c.b16 %v4185_v46, %v4184_v43  ;;  %v4230_v2 = vpack.c.b16 %v15389_v4, %v4186_v27  ;;  %v3944_v47 = vpack.c.bf16 %v3903_v32, %v3903_v32  ;;  %v8546_v0 = vld [vmem:[%s9200_s10 + $0x224] sm:$0x1] }
 0x248   : > { %v12624_v29 = vpop.f32.mrf.mxu1  ;;  %v4048_v16 = vshrl.u32 %v12605_v33, 16  ;;  %v3824_v51 = vunpack.c.l.bf16 %v8545_v28  ;;  %15690 = vst [vmem:[#allocation11_spill] sm:$0xff] %v12632_v31  ;;  %7322 = vmatpush.bf16.msrb.mxu1 %v12632_v31  ;;  %v4041_v43 = vrot.slane %v4040_v55, 4  ;;  %v4045_v46 = vrot.slane %v4043_v54, 5  ;;  %v15693_v54 = vld [vmem:[#allocation23_spill] sm:$0xff] }
 0x249   : > { %v6645_v39 = vadd.f32 %v6636_v58, %v6566_v22  ;;  %v4051_v37 = vshll.u32 %v12605_v33, 16  ;;  %v15691_v27 = vunpack.c.l.b16 %v12532_v45  ;;  %4234 = vrot.lane.b32.xlu2 %v4229_v3, %s9116_s19  ;;  %v4057_v32 = vshll.u32 %v3944_v47, 16  ;;  %8815 = vmatmul.msk.bf16.gmra.mxu2 %vm979_vm8, %v15693_v54  ;;  %15695 = vst [vmem:[#allocation22_spill] sm:$0xff] %v12658_v60  ;;  %v8563_v31 = vld [vmem:[%s9200_s10 + $0x240] sm:$0xf] }
 0x24a   : > { %v4050_v62 = vrot.slane %v4048_v16, 4  ;;  %v8556_v22 = vrot.slane %v12605_v33, 9  ;;  %v12649_v23 = vpop.f32.mrf.mxu3  ;;  %v4107_v3 = vrot.slane %v3944_v47, 5  ;;  %v3825_v16 = vunpack.c.l.bf16 %v8546_v0 }
 0x24b   : > { %v12643_v28 = vpack.c.b16 %v15392_v48, %v15691_v27  ;;  %v6653_v58 = vpack.c.bf16 %v6645_v39, %v6645_v39  ;;  %v6669_v4 = vadd.f32 %v6668_v24, %v6645_v39  ;;  %v6683_v55 = vmul.f32 %v6645_v39, %v6645_v39  ;;  %15694 = vst [vmem:[#allocation20_spill] sm:$0xff] %v12649_v23 }
 0x24c   : > { %v4053_v45 = vrot.slane %v4051_v37, 5  ;;  %v3761_v27 = vsel %vm1028_vm13, %v3753_v52, %v12373_v57  ;;  %v12653_v48 = vpop.permute.xlu0 %3664  ;;  %7323 = vmatpush.bf16.msrb.mxu1 %v12658_v60  ;;  %v3739_v24 = vsel %vm1001_vm10, %v3731_v14, %v12464_v6  ;;  %v12665_v57 = vpop.f32.mrf.mxu2  ;;  %v4046_v52 = vsel %vm9227_vm7, %v4041_v43, %v4045_v46  ;;  %v15697_v43 = vld [vmem:[#allocation10_spill] sm:$0xff] }
 0x24d   : > { %15692 = vst [vmem:[#allocation44_spill] sm:$0xff] %v12643_v28  ;;  %v6670_v39 = vrot.slane %v6669_v4, 4  ;;  %v6690_v37 = vadd.f32 %v6689_v26, %v6683_v55  ;;  %v4059_v23 = vrot.slane %v4057_v32, 5  ;;  %v12674_v60 = vsel %vm9191_vm2, %v8556_v22, %v4107_v3  ;;  %v12689_v32 = vpop.permute.xlu1 %3677  ;;  %v12696_v55 = vld [vmem:[%s15275_s3 + $0xb0] sm:$0xff]  ;;  %v15700_v26 = vld [vmem:[#allocation26_spill] sm:$0xff] }
 0x24e   : > { %8784 = vst.msk [vmem:[%s11657_s30 + $0x3c] sm:$0xf] %vm6406_vm15, %v6653_v58  ;;  %v12669_v47 = vpop.f32.mrf.mxu0  ;;  %4236 = vrot.lane.b32.xlu0 %v4230_v2, %s9116_s19  ;;  %v4054_v0 = vor.u32 %v4053_v45, %v4050_v62  ;;  %v3844_v6 = vmul.f32 %v12456_v50, %v3824_v51  ;;  %8812 = vmatmul.msk.bf16.gmra.mxu3 %vm979_vm8, %v15697_v43  ;;  %v8561_v2 = vld [vmem:[%s9200_s10 + $0x238] sm:$0xf] }
 0x24f   : > { %15696 = vst [vmem:[#allocation15_spill] sm:$0xff] %v12665_v57  ;;  %v6671_v14 = vadd.f32 %v6670_v39, %v6669_v4  ;;  %v6691_v58 = vrot.slane %v6690_v37, 4  ;;  %4246 = vrot.lane.b32.xlu1 %v12643_v28, %s9111_s14  ;;  %v12685_v46 = vsel %vm1037_vm14, %v3761_v27, %v12391_v20  ;;  %v3845_v51 = vmul.f32 %v12456_v50, %v3825_v16  ;;  %v8562_v39 = vld [vmem:[%s9200_s10 + $0x23c] sm:$0x1]  ;;  %v15701_v28 = vld [vmem:[#allocation34_spill] sm:$0xff] }
 0x250   : > { %15698 = vst [vmem:[#allocation48_spill] sm:$0xff] %v12685_v46  ;;  %v12687_v62 = vpop.f32.mrf.mxu1  ;;  %v4055_v4 = vrot.slane %v4054_v0, 4  ;;  %v3864_v22 = vadd.f32 %v12483_v12, %v3844_v6  ;;  %7324 = vmatpush.bf16.msrb.mxu1 %v12696_v55  ;;  %v3747_v20 = vsel %vm1010_vm11, %v3739_v24, %v12510_v19  ;;  %v4167_v27 = vunpack.c.l.b16 %v4046_v52  ;;  %v12710_v19 = vpop.permute.xlu2 %3690 }
 0x251   : > { %15699 = vst [vmem:[#allocation9_spill] sm:$0xff] %v12696_v55  ;;  %v6672_v45 = vrot.slane %v6671_v14, 2  ;;  %v6692_v3 = vadd.f32 %v6691_v58, %v6690_v37  ;;  %7082 = vmatmul.bf16.vlgmr.msrb.gmra.mxu0 %v12685_v46  ;;  %4177 = vrot.lane.b32.xlu2 %v12541_v49, %s9112_s15  ;;  %v3865_v0 = vadd.f32 %v12483_v12, %v3845_v51  ;;  %v4356_v43 = vunpack.c.l.bf16 %v8561_v2 }
 0x252   : > { %v4060_v16 = vsel %vm9227_vm7, %v4055_v4, %v4059_v23  ;;  %v3884_v6 = vmax.f32 %v3864_v22, 0.0  ;;  %7440 = vmatpush.bf16.msrb.mxu0 %v15700_v26  ;;  %v15702_v52 = vunpack.c.l.b16 %v12591_v18  ;;  %v15703_v23 = vunpack.c.l.b16 %v12674_v60  ;;  %v12720_v49 = vpop.f32.mrf.mxu3 }
 0x253   : > { %v6673_v37 = vadd.f32 %v6672_v45, %v6671_v14  ;;  %v6693_v58 = vrot.slane %v6692_v3, 2  ;;  %7017 = vmatmul.bf16.gmra.mxu1 %v15701_v28  ;;  %v12712_v24 = vunpack.c.l.b16 %v4060_v16  ;;  %15705 = vst [vmem:[#allocation33_spill] sm:$0xff] %v12720_v49  ;;  %v3885_v51 = vmax.f32 %v3865_v0, 0.0  ;;  %v12727_v28 = vld [vmem:[%s15275_s3 + $0xa8] sm:$0xff]  ;;  %v15708_v0 = vld [vmem:[#allocation46_spill] sm:$0xff]  ;;  %v15712_v49 = vld [vmem:[#allocation4_spill] sm:$0xff] }
 0x254   : > { %v12718_v4 = vpack.c.b16 %v15703_v23, %v15702_v52  ;;  %v3904_v26 = vsel %vm466_vm5, %v3884_v6, 0.0  ;;  %v4357_v14 = vunpack.c.l.bf16 %v8562_v39  ;;  %15706 = vst [vmem:[#allocation10_spill] sm:$0xff] %v12727_v28  ;;  %7325 = vmatpush.bf16.msrb.mxu1 %v12727_v28  ;;  %v3755_v22 = vsel %vm1019_vm12, %v3747_v20, %v12528_v34  ;;  %v12735_v16 = vpop.f32.mrf.mxu2  ;;  %v12742_v52 = vpop.permute.xlu0 %3700  ;;  %v15709_v20 = vld [vmem:[#allocation6_spill] sm:$0xff] }
 0x255   : > { %v6674_v2 = vrot.slane %v6673_v37, 1  ;;  %v6694_v18 = vadd.f32 %v6693_v58, %v6692_v3  ;;  %v12733_v45 = vpack.c.b16 %v12712_v24, %v4167_v27  ;;  %15707 = vst [vmem:[#allocation26_spill] sm:$0xff] %v12735_v16  ;;  %v3724_v39 = vsel %vm979_vm8, %v15708_v0, %v12614_v5  ;;  %v15710_v0 = vld [vmem:[#allocation49_spill] sm:$0xff]  ;;  %v12775_v11 = vpop.permute.xlu1 %3710 }
 0x256   : > { %15704 = vst [vmem:[#allocation19_spill] sm:$0xff] %v12718_v4  ;;  %v12740_v6 = vpop.f32.mrf.mxu0  ;;  %v3905_v3 = vsel %vm473_vm6, %v3885_v51, 0.0  ;;  %v12746_v58 = vpack.c.bf16 %v3904_v26, %v3904_v26  ;;  %v4376_v34 = vmul.f32 %v12456_v50, %v4356_v43  ;;  %7441 = vmatpush.bf16.msrb.mxu0 %v15709_v20  ;;  %v15711_v16 = vunpack.c.l.b16 %v15710_v0 }
 0x257   : > { %v6695_v23 = vrot.slane %v6694_v18, 1  ;;  %4179 = vrot.lane.b32.xlu0 %v12733_v45, %s9112_s15  ;;  %4199 = vrot.lane.b32.xlu1 %v12718_v4, %s9113_s16  ;;  %v3946_v5 = vpack.c.bf16 %v3905_v3, %v3905_v3  ;;  %v4377_v51 = vmul.f32 %v12456_v50, %v4357_v14  ;;  %v4217_v55 = vpack.c.b16 %v4167_v27, %v12512_v44  ;;  %v12770_v3 = vld [vmem:[%s15275_s3 + $0xa0] sm:$0xff] }
 0x258   : > { %v12757_v28 = vpack.c.b16 %v15712_v49, %v15711_v16  ;;  %v12760_v26 = vpop.f32.mrf.mxu1  ;;  %v4110_v43 = vshrl.u32 %v12746_v58, 16  ;;  %v4113_v20 = vshll.u32 %v12746_v58, 16  ;;  %v8557_v57 = vrot.slane %v12746_v58, 9  ;;  %15714 = vst [vmem:[#allocation46_spill] sm:$0xff] %v12770_v3  ;;  %7326 = vmatpush.bf16.msrb.mxu1 %v12770_v3 }
 0x259   : > { %v6675_v16 = vadd.f32 %v6674_v2, %v6673_v37  ;;  %v6696_v14 = vadd.f32 %v6695_v23, %v6694_v18  ;;  %v3733_v0 = vsel %vm992_vm9, %v3724_v39, %v12635_v17  ;;  %v4119_v4 = vshll.u32 %v3946_v5, 16  ;;  %4223 = vrot.lane.b32.xlu2 %v4217_v55, %s9114_s17  ;;  %v8564_v39 = vld [vmem:[%s9200_s10 + $0x244] sm:$0x1]  ;;  %v15717_v23 = vld [vmem:[#allocation7_spill] sm:$0xff] }
 0x25a   : > { %15713 = vst [vmem:[#allocation34_spill] sm:$0xff] %v12757_v28  ;;  %v4112_v7 = vrot.slane %v4110_v43, 4  ;;  %v4115_v15 = vrot.slane %v4113_v20, 5  ;;  %v4127_v44 = vrot.slane %v3946_v5, 5  ;;  %v4396_v27 = vadd.f32 %v12483_v12, %v4376_v34  ;;  %7442 = vmatpush.bf16.msrb.mxu0 %v15715_v41  ;;  %8816 = vmatmul.msk.bf16.gmra.mxu2 %vm979_vm8, %v12757_v28  ;;  %v12785_v17 = vpop.f32.mrf.mxu3 }
 0x25b   : > { %v6697_v3 = vsel %vm6449_vm0, %v6675_v16, %v6696_v14  ;;  %v3763_v37 = vsel %vm1028_vm13, %v3755_v22, %v12553_v9  ;;  %15716 = vst [vmem:[#allocation6_spill] sm:$0xff] %v12785_v17  ;;  %v4397_v2 = vadd.f32 %v12483_v12, %v4377_v51  ;;  %v4358_v18 = vunpack.c.l.bf16 %v8563_v31  ;;  %v12799_v9 = vld [vmem:[%s15275_s3 + $0x98] sm:$0xff]  ;;  %v3634_v22 = vpop.permute.xlu2 %3633 }
 0x25c   : > { %v12790_v55 = vadd.f32 %v6697_v3, %v15717_v23  ;;  %v4116_v34 = vor.u32 %v4115_v15, %v4112_v7  ;;  %v4121_v5 = vrot.slane %v4119_v4, 5  ;;  %v12794_v41 = vsel %vm9191_vm2, %v8557_v57, %v4127_v44  ;;  %7327 = vmatpush.bf16.msrb.mxu1 %v12799_v9  ;;  %v12805_v43 = vpop.f32.mrf.mxu2  ;;  %v15721_v57 = vld [vmem:[#allocation30_spill] sm:$0xff]  ;;  %v15722_v44 = vld [vmem:[#allocation17_spill] sm:$0xff] }
 0x25d   : > { %15719 = vst [vmem:[#allocation31_spill] sm:$0xff] %v12794_v41  ;;  %v3741_v31 = vsel %vm1001_vm10, %v3733_v0, %v12653_v48  ;;  %v15402_v51 = vunpack.c.l.b16 %v12794_v41  ;;  %v4416_v15 = vmax.f32 %v4396_v27, 0.0  ;;  %v4417_v7 = vmax.f32 %v4397_v2, 0.0 }
 0x25e   : > { %15718 = vst [vmem:[#allocation49_spill] sm:$0xff] %v12790_v55  ;;  %v12807_v4 = vpop.f32.mrf.mxu0  ;;  %v3727_v20 = vsel %vm979_vm8, %v15721_v57, %v3634_v22  ;;  %v4117_v3 = vrot.slane %v4116_v34, 4  ;;  %v4378_v16 = vmul.f32 %v12456_v50, %v4358_v18  ;;  %v4359_v14 = vunpack.c.l.bf16 %v8564_v39  ;;  %7443 = vmatpush.bf16.msrb.mxu0 %v15722_v44  ;;  %8825 = vmatmul.msk.bf16.vlgmr.msra.gmra.mxu3 %vm979_vm8, %v15669_v13  ;;  %v3654_v39 = vpop.permute.xlu0 %3653  ;;  %v12839_v22 = vld [vmem:[%s15275_s3 + $0x90] sm:$0xff] }
 0x25f   : > { %15720 = vst [vmem:[#allocation7_spill] sm:$0xff] %v12805_v43  ;;  %v12815_v48 = vsel %vm1037_vm14, %v3763_v37, %v12579_v42  ;;  %v15724_v0 = vunpack.c.l.b16 %v12674_v60  ;;  %v4436_v2 = vsel %vm466_vm5, %v4416_v15, 0.0  ;;  %v4437_v23 = vsel %vm473_vm6, %v4417_v7, 0.0 }
 0x260   : > { %15723 = vst [vmem:[#allocation30_spill] sm:$0xff] %v12815_v48  ;;  %v12827_v18 = vpop.f32.mrf.mxu1  ;;  %v4122_v42 = vsel %vm9227_vm7, %v4117_v3, %v4121_v5  ;;  %v12831_v37 = vpack.c.bf16 %v4436_v2, %v4436_v2  ;;  %v12833_v60 = vpack.c.bf16 %v4437_v23, %v4437_v23  ;;  %v4398_v34 = vadd.f32 %v12483_v12, %v4378_v16  ;;  %v8565_v2 = vld [vmem:[%s9200_s10 + $0x248] sm:$0xf]  ;;  %v12866_v23 = vld [vmem:[%s15275_s3 + $0x40] sm:$0xff] }
 0x261   : > { %v4231_v27 = vpack.c.b16 %v15402_v51, %v15724_v0  ;;  %7328 = vmatpush.bf16.msrb.mxu1 %v12839_v22  ;;  %v3749_v15 = vsel %vm1010_vm11, %v3741_v31, %v12689_v32  ;;  %7087 = vmatmul.bf16.gmra.mxu0 %v12815_v48  ;;  %v3735_v5 = vsel %vm992_vm9, %v3727_v20, %v3654_v39  ;;  %v12846_v7 = vunpack.c.l.b16 %v4122_v42  ;;  %v15726_v31 = vld [vmem:[#allocation42_spill] sm:$0xff]  ;;  %v15727_v20 = vld [vmem:[#allocation37_spill] sm:$0xff]  ;;  %v3667_v39 = vpop.permute.xlu1 %3666 }
 0x262   : > { %15725 = vst [vmem:[#allocation17_spill] sm:$0xff] %v12831_v37  ;;  %v4379_v57 = vmul.f32 %v12456_v50, %v4359_v14  ;;  %v4510_v3 = vshrl.u32 %v12831_v37, 16  ;;  %v4513_v16 = vshll.u32 %v12831_v37, 16  ;;  %v4519_v44 = vshll.u32 %v12833_v60, 16  ;;  %4256 = vrot.lane.b32.xlu2 %v12733_v45, %s9115_s18  ;;  %7444 = vmatpush.bf16.msrb.mxu0 %v15726_v31  ;;  %v8566_v31 = vld [vmem:[%s9200_s10 + $0x24c] sm:$0x1] }
 0x263   : > { %4238 = vrot.lane.b32.xlu1 %v4231_v27, %s9116_s19  ;;  %v4418_v32 = vmax.f32 %v4398_v34, 0.0  ;;  %7022 = vmatmul.bf16.gmra.mxu1 %v15727_v20  ;;  %v4218_v0 = vpack.c.b16 %v12846_v7, %v12712_v24  ;;  %v12859_v27 = vpop.f32.mrf.mxu3  ;;  %v3757_v45 = vsel %vm1019_vm12, %v3749_v15, %v12710_v19  ;;  %v3743_v24 = vsel %vm1001_vm10, %v3735_v5, %v3667_v39 }
 0x264   : > { %v4399_v14 = vadd.f32 %v12483_v12, %v4379_v57  ;;  %7534 = vmatpush.bf16.msra.mxu3 %v12866_v23  ;;  %v4512_v42 = vrot.slane %v4510_v3, 4  ;;  %v4515_v34 = vrot.slane %v4513_v16, 5  ;;  %v12874_v57 = vpop.f32.mrf.mxu2  ;;  %v4201_v13 = vunpack.c.l.b16 %v12746_v58  ;;  %v3680_v16 = vpop.permute.xlu2 %3679 }
 0x265   : > { %4225 = vrot.lane.b32.xlu0 %v4218_v0, %s9114_s17  ;;  %15728 = vst [vmem:[#allocation42_spill] sm:$0xff] %v12874_v57  ;;  %v4438_v20 = vsel %vm466_vm5, %v4418_v32, 0.0  ;;  %v4521_v19 = vrot.slane %v4519_v44, 5  ;;  %v4360_v3 = vunpack.c.l.bf16 %v8565_v2  ;;  %v3765_v5 = vsel %vm1028_vm13, %v3757_v45, %v12742_v52  ;;  %v15731_v45 = vld [vmem:[#allocation29_spill] sm:$0xff] }
 0x266   : > { %v4419_v51 = vmax.f32 %v4399_v14, 0.0  ;;  %v12879_v55 = vpop.f32.mrf.mxu0  ;;  %v4516_v41 = vor.u32 %v4515_v34, %v4512_v42  ;;  %v12881_v15 = vpack.c.bf16 %v4438_v20, %v4438_v20  ;;  %7445 = vmatpush.bf16.msrb.mxu0 %v12265_v38  ;;  %v15729_v0 = vunpack.c.l.b16 %v12605_v33  ;;  %v15730_v34 = vld [vmem:[#allocation5_spill] sm:$0xff]  ;;  %v8567_v20 = vld [vmem:[%s9200_s10 + $0x250] sm:$0xf] }
 0x267   : > { %v4361_v14 = vunpack.c.l.bf16 %v8566_v31  ;;  %v3751_v44 = vsel %vm1010_vm11, %v3743_v24, %v3680_v16  ;;  %v4251_v52 = vpack.c.b16 %v15730_v34, %v12846_v7  ;;  %v4380_v33 = vmul.f32 %v12456_v50, %v4360_v3  ;;  %v3693_v7 = vpop.permute.xlu0 %3692 }
 0x268   : > { %v4439_v32 = vsel %vm473_vm6, %v4419_v51, 0.0  ;;  %v4205_v58 = vpack.c.b16 %v4201_v13, %v15729_v0  ;;  %v12890_v39 = vpop.f32.mrf.mxu1  ;;  %v4517_v42 = vrot.slane %v4516_v41, 4  ;;  %v4524_v38 = vshrl.u32 %v12881_v15, 16 }
 0x269   : > { %v12893_v2 = vpack.c.bf16 %v4439_v32, %v4439_v32  ;;  %v4527_v51 = vshll.u32 %v12881_v15, 16  ;;  %v15405_v24 = vunpack.c.l.b16 %v12881_v15  ;;  %v4629_v17 = vrot.slane %v12833_v60, 5 }
 0x26a   : > { %v4522_v31 = vsel %vm9227_vm7, %v4517_v42, %v4521_v19  ;;  %v4526_v41 = vrot.slane %v4524_v38, 4  ;;  %4212 = vrot.lane.b32.xlu2 %v4205_v58, %s9110_s13  ;;  %7446 = vmatpush.bf16.msrb.mxu0 %v12304_v59  ;;  %v4400_v19 = vadd.f32 %v12483_v12, %v4380_v33  ;;  %v4381_v42 = vmul.f32 %v12456_v50, %v4361_v14 }
 0x26b   : > { %v4533_v16 = vshll.u32 %v12893_v2, 16  ;;  %v12908_v32 = vunpack.c.l.b16 %v4522_v31  ;;  %v4529_v0 = vrot.slane %v4527_v51, 5  ;;  %8829 = vmatmul.msk.bf16.vlgmr.msra.gmra.mxu2 %vm979_vm8, %v15731_v45  ;;  %v12912_v3 = vpop.f32.mrf.mxu3  ;;  %v12918_v38 = vadd.f32 %v12350_v63, %v12564_v35 }
 0x26c   : > { %v4362_v59 = vunpack.c.l.bf16 %v8567_v20  ;;  %7604 = vmatpush.bf16.msra.mxu2 %v12330_v21  ;;  %v4420_v31 = vmax.f32 %v4400_v19, 0.0  ;;  %v4401_v33 = vadd.f32 %v12483_v12, %v4381_v42  ;;  %v12927_v14 = vadd.f32 %v12395_v36, %v12624_v29 }
 0x26d   : > { %v4535_v58 = vrot.slane %v4533_v16, 5  ;;  %4258 = vrot.lane.b32.xlu0 %v4251_v52, %s9115_s18  ;;  %v4715_v45 = vpack.c.b16 %v12908_v32, %v15730_v34  ;;  %v4530_v51 = vor.u32 %v4529_v0, %v4526_v41  ;;  %v12933_v35 = vsel %vm1037_vm14, %v3765_v5, %v12775_v11  ;;  %v12936_v52 = vpop.f32.mrf.mxu2  ;;  %v8568_v41 = vld [vmem:[%s9200_s10 + $0x254] sm:$0x1] }
 0x26e   : > { %v12929_v63 = vpop.f32.mrf.mxu0  ;;  %15732 = vst [vmem:[#allocation37_spill] sm:$0xff] %v12933_v35  ;;  %v3759_v21 = vsel %vm1019_vm12, %v3751_v44, %v3693_v7  ;;  %v4382_v20 = vmul.f32 %v12456_v50, %v4362_v59  ;;  %7447 = vmatpush.bf16.msrb.mxu0 %v12343_v53  ;;  %v15734_v36 = vunpack.c.l.b16 %v12831_v37  ;;  %v4440_v11 = vsel %vm466_vm5, %v4420_v31, 0.0  ;;  %8826 = vmatmul.msk.bf16.gmra.mxu3 %vm979_vm8, %v15677_v61  ;;  %v8569_v44 = vld [vmem:[%s9200_s10 + $0x258] sm:$0xf]  ;;  %v15735_v53 = vld [vmem:[#allocation8_spill] sm:$0xff] }
 0x26f   : > { %15733 = vst [vmem:[#allocation29_spill] sm:$0xff] %v12936_v52  ;;  %4719 = vrot.lane.b32.xlu1 %v4715_v45, %s9112_s15  ;;  %v4531_v16 = vrot.slane %v4530_v51, 4  ;;  %v4421_v5 = vmax.f32 %v4401_v33, 0.0  ;;  %v12953_v0 = vpack.c.bf16 %v4440_v11, %v4440_v11  ;;  %v4241_v19 = vpack.c.b16 %v15735_v53, %v4201_v13  ;;  %v15736_v61 = vld [vmem:[#allocation12_spill] sm:$0xff] }
 0x270   : > { %v4748_v29 = vpack.c.b16 %v15405_v24, %v15734_v36  ;;  %v12951_v7 = vpop.f32.mrf.mxu1  ;;  %v8581_v42 = vrot.slane %v12881_v15, 9  ;;  %v4402_v59 = vadd.f32 %v12483_v12, %v4382_v20  ;;  %v4633_v31 = vrot.slane %v12893_v2, 5  ;;  %v3703_v20 = vpop.permute.xlu1 %3702 }
 0x271   : > { %7092 = vmatmul.bf16.gmra.mxu0 %v12933_v35  ;;  %v4536_v45 = vsel %vm9227_vm7, %v4531_v16, %v4535_v58  ;;  %v4441_v51 = vsel %vm473_vm6, %v4421_v5, 0.0  ;;  %v4363_v33 = vunpack.c.l.bf16 %v8568_v41  ;;  %v4538_v13 = vshrl.u32 %v12953_v0, 16 }
 0x272   : > { %v12964_v36 = vunpack.c.l.b16 %v4536_v45  ;;  %v4482_v11 = vpack.c.bf16 %v4441_v51, %v4441_v51  ;;  %4248 = vrot.lane.b32.xlu2 %v4241_v19, %s9111_s14  ;;  %v4364_v24 = vunpack.c.l.bf16 %v8569_v44  ;;  %v4541_v52 = vshll.u32 %v12953_v0, 16  ;;  %v3713_v44 = vpop.permute.xlu2 %3712 }
 0x273   : > { %7027 = vmatmul.bf16.gmra.mxu1 %v15736_v61  ;;  %v12970_v58 = vpop.f32.mrf.mxu3  ;;  %v8582_v16 = vrot.slane %v12953_v0, 9  ;;  %v4422_v5 = vmax.f32 %v4402_v59, 0.0  ;;  %v8580_v2 = vrot.slane %v12831_v37, 9  ;;  %v15409_v45 = vunpack.c.l.b16 %v12953_v0 }
 0x274   : > { %v4761_v41 = vpack.c.b16 %v12964_v36, %v12908_v32  ;;  %v4540_v51 = vrot.slane %v4538_v13, 4  ;;  %v4547_v19 = vshll.u32 %v4482_v11, 16  ;;  %v4543_v61 = vrot.slane %v4541_v52, 5 }
 0x275   : > { %4752 = vrot.lane.b32.xlu0 %v4748_v29, %s9110_s13  ;;  %v4637_v57 = vrot.slane %v4482_v11, 5  ;;  %v4442_v34 = vsel %vm466_vm5, %v4422_v5, 0.0  ;;  %v3767_v59 = vsel %vm1028_vm13, %v3759_v21, %v3703_v20  ;;  %v12984_v43 = vpop.f32.mrf.mxu2  ;;  %v4634_v13 = vsel %vm9191_vm2, %v8581_v42, %v4633_v31 }
 0x276   : > { %v12982_v37 = vpop.f32.mrf.mxu0  ;;  %v4549_v32 = vrot.slane %v4547_v19, 5  ;;  %v4383_v29 = vmul.f32 %v12456_v50, %v4363_v33  ;;  %v4544_v52 = vor.u32 %v4543_v61, %v4540_v51  ;;  %v4630_v60 = vsel %vm9191_vm2, %v8580_v2, %v4629_v17 }
 0x277   : > { %4765 = vrot.lane.b32.xlu1 %v4761_v41, %s9114_s17  ;;  %v12992_v11 = vsel %vm9191_vm2, %v8582_v16, %v4637_v57  ;;  %v4384_v21 = vmul.f32 %v12456_v50, %v4364_v24  ;;  %v6767_v20 = vadd.f32 %v12669_v47, %v12918_v38  ;;  %v13001_v42 = vpack.c.bf16 %v4442_v34, %v4442_v34  ;;  %v8570_v41 = vld [vmem:[%s9200_s10 + $0x25c] sm:$0x1] }
 0x278   : > { %v12999_v5 = vpop.f32.mrf.mxu1  ;;  %v4728_v31 = vunpack.c.l.b16 %v4630_v60  ;;  %v4403_v33 = vadd.f32 %v12483_v12, %v4383_v29  ;;  %v6769_v57 = vadd.f32 %v12740_v6, %v12927_v14  ;;  %v13008_v16 = vsel %vm1037_vm14, %v3767_v59, %v3713_v44  ;;  %v15740_v14 = vld [vmem:[#allocation32_spill] sm:$0xff]  ;;  %v8571_v59 = vld [vmem:[%s9200_s10 + $0x260] sm:$0xf]  ;;  %v8572_v60 = vld [vmem:[%s9200_s10 + $0x264] sm:$0x1] }
 0x279   : > { %15737 = vst [vmem:[#allocation12_spill] sm:$0xff] %v13008_v16  ;;  %v15738_v17 = vunpack.c.l.b16 %v12881_v15  ;;  %v4545_v24 = vrot.slane %v4544_v52, 4  ;;  %v4729_v34 = vunpack.c.l.b16 %v4634_v13  ;;  %v4404_v15 = vadd.f32 %v12483_v12, %v4384_v21 }
 0x27a   : > { %v4735_v2 = vpack.c.b16 %v4728_v31, %v15712_v49  ;;  %v4423_v51 = vmax.f32 %v4403_v33, 0.0  ;;  %v4365_v44 = vunpack.c.l.bf16 %v8570_v41  ;;  %v4552_v61 = vshrl.u32 %v13001_v42, 16 }
 0x27b   : > { %v13014_v47 = vpack.c.b16 %v15409_v45, %v15738_v17  ;;  %v4550_v6 = vsel %vm9227_vm7, %v4545_v24, %v4549_v32  ;;  %8830 = vmatmul.msk.bf16.gmra.mxu2 %vm979_vm8, %v15740_v14  ;;  %v13022_v19 = vpop.f32.mrf.mxu3  ;;  %v4555_v52 = vshll.u32 %v13001_v42, 16  ;;  %v4424_v33 = vmax.f32 %v4404_v15, 0.0 }
 0x27c   : > { %v13027_v13 = vunpack.c.l.b16 %v4550_v6  ;;  %4739 = vrot.lane.b32.xlu2 %v4735_v2, %s9113_s16  ;;  %v4443_v32 = vsel %vm473_vm6, %v4423_v51, 0.0  ;;  %v4385_v41 = vmul.f32 %v12456_v50, %v4365_v44  ;;  %v4554_v17 = vrot.slane %v4552_v61, 4 }
 0x27d   : > { %15739 = vst [vmem:[#allocation50_spill] sm:$0xff] %v13014_v47  ;;  %4788 = vrot.lane.b32.xlu0 %v13014_v47, %s9111_s14  ;;  %v4484_v21 = vpack.c.bf16 %v4443_v32, %v4443_v32  ;;  %v13044_v2 = vpop.f32.mrf.mxu2  ;;  %v8583_v51 = vrot.slane %v13001_v42, 9  ;;  %v4557_v14 = vrot.slane %v4555_v52, 5  ;;  %v4366_v29 = vunpack.c.l.bf16 %v8571_v59 }
 0x27e   : > { %v13038_v24 = vpop.f32.mrf.mxu0  ;;  %v13042_v6 = vpack.c.b16 %v13027_v13, %v12964_v36  ;;  %v4444_v32 = vsel %vm466_vm5, %v4424_v33, 0.0  ;;  %8827 = vmatmul.msk.bf16.gmra.mxu3 %vm979_vm8, %v15693_v54  ;;  %v4774_v15 = vpack.c.b16 %v4729_v34, %v4728_v31  ;;  %v4367_v44 = vunpack.c.l.bf16 %v8572_v60 }
 0x27f   : > { %v4641_v45 = vrot.slane %v4484_v21, 5  ;;  %v13053_v36 = vpack.c.bf16 %v4444_v32, %v4444_v32  ;;  %v4405_v38 = vadd.f32 %v12483_v12, %v4385_v41  ;;  %v4558_v47 = vor.u32 %v4557_v14, %v4554_v17 }
 0x280   : > { %v6836_v61 = vpop.f32.mrf.mxu1  ;;  %4798 = vrot.lane.b32.xlu1 %v13042_v6, %s9115_s18  ;;  %v4561_v52 = vshll.u32 %v4484_v21, 16  ;;  %v6796_v59 = vadd.f32 %v12404_v56, %v6767_v20  ;;  %v6743_v33 = vadd.f32 %v12449_v40, %v12687_v62  ;;  %v15741_v31 = vunpack.c.l.b16 %v12992_v11 }
 0x281   : > { %v6866_v49 = vadd.f32 %v12859_v27, %v6836_v61  ;;  %7097 = vmatmul.bf16.gmra.mxu0 %v13008_v16  ;;  %v13067_v32 = vsel %vm9191_vm2, %v8583_v51, %v4641_v45  ;;  %v4425_v41 = vmax.f32 %v4405_v38, 0.0  ;;  %v4559_v17 = vrot.slane %v4558_v47, 4  ;;  %v13089_v51 = vld [vmem:[%s15275_s3 + $0x38] sm:$0xff] }
 0x282   : > { %v13063_v60 = vpack.c.b16 %v15741_v31, %v4729_v34  ;;  %v4386_v21 = vmul.f32 %v12456_v50, %v4366_v29  ;;  %v4563_v62 = vrot.slane %v4561_v52, 5  ;;  %v4566_v27 = vshrl.u32 %v13053_v36, 16  ;;  %15745 = vst [vmem:[#allocation51_spill] sm:$0xff] %v13089_v51 }
 0x283   : > { %v13070_v56 = vadd.f32 %v6866_v49, %v6796_v59  ;;  %7201 = vmatmul.bf16.vlgmr.msra.gmra.mxu1 %v12685_v46  ;;  %v13073_v40 = vpop.f32.mrf.mxu3  ;;  %v4569_v20 = vshll.u32 %v13053_v36, 16  ;;  %v6798_v34 = vadd.f32 %v12459_v25, %v6769_v57  ;;  %v15743_v45 = vunpack.c.l.b16 %v12953_v0 }
 0x284   : > { %15742 = vst [vmem:[#allocation32_spill] sm:$0xff] %v13063_v60  ;;  %v15744_v38 = vunpack.c.l.b16 %v13001_v42  ;;  %4778 = vrot.lane.b32.xlu2 %v4774_v15, %s9116_s19  ;;  %v4445_v49 = vsel %vm473_vm6, %v4425_v41, 0.0  ;;  %v4387_v29 = vmul.f32 %v12456_v50, %v4367_v44  ;;  %7498 = vmatpush.bf16.msra.mxu1 %v13089_v51  ;;  %v15413_v0 = vunpack.c.l.b16 %v13067_v32  ;;  %v15746_v50 = vld [vmem:[#allocation25_spill] sm:$0xff] }
 0x285   : > { %v6893_v25 = vpack.c.bf16 %v13070_v56, %v13070_v56  ;;  %4741 = vrot.lane.b32.xlu0 %v13063_v60, %s9113_s16  ;;  %v4486_v14 = vpack.c.bf16 %v4445_v49, %v4445_v49  ;;  %v13100_v15 = vadd.f32 %v15746_v50, %v12760_v26  ;;  %v13104_v61 = vpop.f32.mrf.mxu2  ;;  %v4568_v52 = vrot.slane %v4566_v27, 4 }
 0x286   : > { %v4749_v47 = vpack.c.b16 %v15744_v38, %v15743_v45  ;;  %v13102_v44 = vpop.f32.mrf.mxu0  ;;  %v4571_v59 = vrot.slane %v4569_v20, 5  ;;  %v4406_v31 = vadd.f32 %v12483_v12, %v4386_v21  ;;  %v4564_v41 = vsel %vm9227_vm7, %v4559_v17, %v4563_v62  ;;  %v8573_v21 = vld [vmem:[%s9200_s10 + $0x268] sm:$0xf] }
 0x287   : > { %8797 = vst.msk [vmem:[%s11657_s30 + $0x40] sm:$0xf] %vm6406_vm15, %v6893_v25  ;;  %v4575_v45 = vshll.u32 %v4486_v14, 16  ;;  %v8584_v38 = vrot.slane %v13053_v36, 9  ;;  %v4645_v26 = vrot.slane %v4486_v14, 5  ;;  %v6772_v49 = vadd.f32 %v12807_v4, %v6743_v33  ;;  %v13119_v25 = vld [vmem:[%s15275_s3 + $0x30] sm:$0xff] }
 0x288   : > { %v6838_v50 = vpop.f32.mrf.mxu1  ;;  %4754 = vrot.lane.b32.xlu1 %v4749_v47, %s9110_s13  ;;  %v4572_v57 = vor.u32 %v4571_v59, %v4568_v52  ;;  %v4407_v27 = vadd.f32 %v12483_v12, %v4387_v29  ;;  %v4426_v20 = vmax.f32 %v4406_v31, 0.0  ;;  %15747 = vst [vmem:[#allocation25_spill] sm:$0xff] %v13119_v25  ;;  %7499 = vmatpush.bf16.msra.mxu1 %v13119_v25  ;;  %v15748_v62 = vunpack.c.l.b16 %v12992_v11  ;;  %v8574_v14 = vld [vmem:[%s9200_s10 + $0x26c] sm:$0x1] }
 0x289   : > { %v6868_v17 = vadd.f32 %v12912_v3, %v6838_v50  ;;  %v15749_v33 = vunpack.c.l.b16 %v13001_v42  ;;  %v15750_v12 = vunpack.c.l.b16 %v13053_v36  ;;  %v4577_v29 = vrot.slane %v4575_v45, 5  ;;  %v15752_v50 = vld [vmem:[#allocation14_spill] sm:$0xff]  ;;  %v13142_v42 = vpop.permute.xlu0 %4173 }
 0x28a   : > { %v4775_v4 = vpack.c.b16 %v15413_v0, %v15748_v62  ;;  %v6923_v52 = vmul.f32 %v13070_v56, %v13070_v56  ;;  %v4573_v59 = vrot.slane %v4572_v57, 4  ;;  %v4711_v31 = vunpack.c.l.b16 %v4564_v41 }
 0x28b   : > { %v13131_v47 = vpack.c.b16 %v15750_v12, %v15749_v33  ;;  %v4427_v46 = vmax.f32 %v4407_v27, 0.0  ;;  %v6886_v3 = vadd.f32 %v6868_v17, %v6798_v34  ;;  %v13138_v11 = vsel %vm9191_vm2, %v8584_v38, %v4645_v26  ;;  %8831 = vmatmul.msk.bf16.gmra.mxu2 %vm979_vm8, %v15752_v50  ;;  %v13144_v62 = vpop.f32.mrf.mxu3  ;;  %v13156_v38 = vpop.permute.xlu2 %4206  ;;  %v13161_v27 = vld [vmem:[%s15275_s3 + $0x28] sm:$0xff] }
 0x28c   : > { %v4446_v45 = vsel %vm466_vm5, %v4426_v20, 0.0  ;;  %v4368_v33 = vunpack.c.l.bf16 %v8573_v21  ;;  %v4578_v57 = vsel %vm9227_vm7, %v4573_v59, %v4577_v29  ;;  %4721 = vrot.lane.b32.xlu2 %v13042_v6, %s9112_s15  ;;  %v4369_v26 = vunpack.c.l.bf16 %v8574_v14  ;;  %15753 = vst [vmem:[#allocation14_spill] sm:$0xff] %v13161_v27  ;;  %7500 = vmatpush.bf16.msra.mxu1 %v13161_v27  ;;  %v13168_v17 = vpop.permute.xlu1 %4193  ;;  %v15754_v12 = vld [vmem:[#allocation35_spill] sm:$0xff] }
 0x28d   : > { %15751 = vst [vmem:[#allocation52_spill] sm:$0xff] %v13131_v47  ;;  %v4447_v34 = vsel %vm473_vm6, %v4427_v46, 0.0  ;;  %v13154_v41 = vpack.c.bf16 %v4446_v45, %v4446_v45  ;;  %v6894_v20 = vpack.c.bf16 %v6886_v3, %v6886_v3  ;;  %v6910_v21 = vadd.f32 %v6886_v3, %v13070_v56  ;;  %4780 = vrot.lane.b32.xlu0 %v4775_v4, %s9116_s19  ;;  %v13173_v59 = vpop.f32.mrf.mxu2 }
 0x28e   : > { %v6924_v6 = vmul.f32 %v6886_v3, %v6886_v3  ;;  %v13166_v46 = vunpack.c.l.b16 %v4578_v57  ;;  %v6801_v29 = vadd.f32 %v15754_v12, %v6772_v49  ;;  %v13171_v14 = vpop.f32.mrf.mxu0  ;;  %15755 = vst [vmem:[#allocation35_spill] sm:$0xff] %v13173_v59  ;;  %v4488_v50 = vpack.c.bf16 %v4447_v34, %v4447_v34  ;;  %8828 = vmatmul.msk.bf16.gmra.mxu3 %vm979_vm8, %v12757_v28  ;;  %v13194_v3 = vld [vmem:[%s15276_s4] ss:$0 sm:$0xff]  ;;  %v15757_v28 = vld [vmem:[#allocation36_spill] sm:$0xff] }
 0x28f   : > { %v4580_v45 = vshrl.u32 %v13154_v41, 16  ;;  %v4583_v0 = vshll.u32 %v13154_v41, 16  ;;  %8798 = vst.msk [vmem:[%s11657_s30 + $0x44] sm:$0xf] %vm6406_vm15, %v6894_v20  ;;  %v8585_v49 = vrot.slane %v13154_v41, 9  ;;  %v15756_v20 = vld [vmem:[#allocation21_spill] sm:$0xff] }
 0x290   : > { %v6931_v56 = vadd.f32 %v6924_v6, %v6923_v52  ;;  %v13180_v4 = vpack.c.b16 %v13166_v46, %v4711_v31  ;;  %v6841_v57 = vpop.f32.mrf.mxu1  ;;  %4790 = vrot.lane.b32.xlu1 %v13131_v47, %s9111_s14  ;;  %v4589_v54 = vshll.u32 %v4488_v50, 16  ;;  %v4649_v60 = vrot.slane %v4488_v50, 5  ;;  %v8576_v50 = vld [vmem:[%s9200_s10 + $0x274] sm:$0x1] }
 0x291   : > { %v4582_v34 = vrot.slane %v4580_v45, 4  ;;  %v4585_v12 = vrot.slane %v4583_v0, 5  ;;  %v6871_v52 = vadd.f32 %v12970_v58, %v6841_v57  ;;  %7259 = vmatmul.bf16.vlgmr.msra.gmra.mxu0 %v15756_v20  ;;  %v4762_v6 = vpack.c.b16 %v4711_v31, %v13027_v13  ;;  %v8575_v45 = vld [vmem:[%s9200_s10 + $0x270] sm:$0xf]  ;;  %v13204_v58 = vld [vmem:[%s15275_s3 + $0x20] sm:$0xff] }
 0x292   : > { %v4388_v47 = vmul.f32 %v13194_v3, %v4368_v33  ;;  %v4389_v0 = vmul.f32 %v13194_v3, %v4369_v26  ;;  %v4591_v25 = vrot.slane %v4589_v54, 5  ;;  %7568 = vmatpush.bf16.msra.mxu0 %v15757_v28  ;;  %15758 = vst [vmem:[#allocation21_spill] sm:$0xff] %v13204_v58  ;;  %7501 = vmatpush.bf16.msra.mxu1 %v13204_v58  ;;  %v15759_v33 = vunpack.c.l.b16 %v13067_v32  ;;  %v13221_v57 = vld [vmem:[%s15277_s5] ss:$0 sm:$0xff] }
 0x293   : > { %v4586_v27 = vor.u32 %v4585_v12, %v4582_v34  ;;  %v6774_v13 = vadd.f32 %v12879_v55, %v13100_v15  ;;  %v6887_v31 = vadd.f32 %v6871_v52, %v6801_v29  ;;  %7206 = vmatmul.bf16.gmra.mxu1 %v12815_v48  ;;  %v15760_v26 = vunpack.c.l.b16 %v13138_v11  ;;  %v13216_v28 = vpop.f32.mrf.mxu3  ;;  %v13226_v15 = vpop.permute.xlu2 %4242  ;;  %v15764_v48 = vld [vmem:[#allocation11_spill] sm:$0xff] }
 0x294   : > { %v4408_v34 = vadd.f32 %v13221_v57, %v4388_v47  ;;  %4767 = vrot.lane.b32.xlu2 %v4762_v6, %s9114_s17  ;;  %v4409_v55 = vadd.f32 %v13221_v57, %v4389_v0  ;;  %v4370_v32 = vunpack.c.l.bf16 %v8575_v45  ;;  %v4371_v29 = vunpack.c.l.bf16 %v8576_v50  ;;  %v13234_v47 = vpop.permute.xlu0 %4219 }
 0x295   : > { %v13214_v54 = vpack.c.b16 %v15760_v26, %v15759_v33  ;;  %v4587_v12 = vrot.slane %v4586_v27, 4  ;;  %v6895_v52 = vpack.c.bf16 %v6887_v31, %v6887_v31  ;;  %v6911_v20 = vadd.f32 %v6910_v21, %v6887_v31  ;;  %4723 = vrot.lane.b32.xlu0 %v13180_v4, %s9112_s15  ;;  %v15762_v27 = vld [vmem:[#allocation16_spill] sm:$0xff]  ;;  %v13242_v50 = vpop.f32.mrf.mxu2 }
 0x296   : > { %v6925_v33 = vmul.f32 %v6887_v31, %v6887_v31  ;;  %v13232_v26 = vsel %vm9191_vm2, %v8585_v49, %v4649_v60  ;;  %v6748_v6 = vadd.f32 %v15762_v27, %v12827_v18  ;;  %v13238_v0 = vpop.f32.mrf.mxu0  ;;  %15763 = vst [vmem:[#allocation16_spill] sm:$0xff] %v13242_v50  ;;  %v4428_v21 = vmax.f32 %v4408_v34, 0.0  ;;  %7569 = vmatpush.bf16.msra.mxu0 %v15764_v48  ;;  %v13248_v60 = vld [vmem:[%s15275_s3 + $0x18] sm:$0xff]  ;;  %v15766_v49 = vld [vmem:[#allocation43_spill] sm:$0xff] }
 0x297   : > { %15761 = vst [vmem:[#allocation36_spill] sm:$0xff] %v13214_v54  ;;  %v4592_v45 = vsel %vm9227_vm7, %v4587_v12, %v4591_v25  ;;  %v4429_v31 = vmax.f32 %v4409_v55, 0.0  ;;  %7502 = vmatpush.bf16.msra.mxu1 %v13248_v60  ;;  %v6803_v18 = vadd.f32 %v15766_v49, %v6774_v13  ;;  %v13256_v25 = vpop.permute.xlu1 %4232  ;;  %v4390_v34 = vmul.f32 %v13194_v3, %v4370_v32 }
 0x298   : > { %15765 = vst [vmem:[#allocation11_spill] sm:$0xff] %v13248_v60  ;;  %v6932_v27 = vadd.f32 %v6931_v56, %v6925_v33  ;;  %v13254_v58 = vunpack.c.l.b16 %v4592_v45  ;;  %v6843_v12 = vpop.f32.mrf.mxu1  ;;  %4743 = vrot.lane.b32.xlu1 %v13214_v54, %s9113_s16  ;;  %v4448_v55 = vsel %vm466_vm5, %v4428_v21, 0.0  ;;  %v4391_v56 = vmul.f32 %v13194_v3, %v4371_v29  ;;  %v15767_v54 = vld [vmem:[#allocation22_spill] sm:$0xff]  ;;  %v13280_v21 = vld [vmem:[%s15275_s3 + $0x10] sm:$0xff] }
 0x299   : > { %8799 = vst.msk [vmem:[%s11657_s30 + $0x48] sm:$0xf] %vm6406_vm15, %v6895_v52  ;;  %v4449_v13 = vsel %vm473_vm6, %v4429_v31, 0.0  ;;  %v6873_v52 = vadd.f32 %v13022_v19, %v6843_v12  ;;  %v13270_v32 = vpack.c.bf16 %v4448_v55, %v4448_v55  ;;  %v4410_v49 = vadd.f32 %v13221_v57, %v4390_v34  ;;  %v15769_v12 = vld [vmem:[#allocation28_spill] sm:$0xff] }
 0x29a   : > { %v4763_v33 = vpack.c.b16 %v13254_v58, %v13166_v46  ;;  %v13272_v45 = vpack.c.bf16 %v4449_v13, %v4449_v13  ;;  %v4411_v48 = vadd.f32 %v13221_v57, %v4391_v56  ;;  %7570 = vmatpush.bf16.msra.mxu0 %v15767_v54  ;;  %15768 = vst [vmem:[#allocation43_spill] sm:$0xff] %v13280_v21  ;;  %v15770_v54 = vunpack.c.l.b16 %v13138_v11 }
 0x29b   : > { %7503 = vmatpush.bf16.msra.mxu1 %v13280_v21  ;;  %v6777_v19 = vadd.f32 %v12929_v63, %v6748_v6  ;;  %v6888_v46 = vadd.f32 %v6873_v52, %v6803_v18  ;;  %v4594_v29 = vshrl.u32 %v13270_v32, 16  ;;  %v4597_v31 = vshll.u32 %v13270_v32, 16  ;;  %8832 = vmatmul.msk.bf16.gmra.mxu2 %vm979_vm8, %v15769_v12  ;;  %v13288_v34 = vpop.f32.mrf.mxu3  ;;  %v13297_v6 = vpop.permute.xlu2 %4195 }
 0x29c   : > { %v15771_v55 = vunpack.c.l.b16 %v13232_v26  ;;  %v4603_v56 = vshll.u32 %v13272_v45, 16  ;;  %4800 = vrot.lane.b32.xlu2 %v13180_v4, %s9115_s18  ;;  %v4430_v63 = vmax.f32 %v4410_v49, 0.0  ;;  %v4431_v18 = vmax.f32 %v4411_v48, 0.0  ;;  %v15773_v49 = vld [vmem:[#allocation9_spill] sm:$0xff] }
 0x29d   : > { %v6896_v52 = vpack.c.bf16 %v6888_v46, %v6888_v46  ;;  %v6912_v50 = vadd.f32 %v6911_v20, %v6888_v46  ;;  %v6926_v12 = vmul.f32 %v6888_v46, %v6888_v46  ;;  %4769 = vrot.lane.b32.xlu0 %v4763_v33, %s9114_s17  ;;  %v4596_v21 = vrot.slane %v4594_v29, 4  ;;  %v13312_v20 = vld [vmem:[%s15275_s3 + $0x8] sm:$0xff] }
 0x29e   : > { %v4776_v13 = vpack.c.b16 %v15771_v55, %v15770_v54  ;;  %v13300_v11 = vpop.f32.mrf.mxu0  ;;  %v4599_v60 = vrot.slane %v4597_v31, 5  ;;  %v13302_v54 = vpop.f32.mrf.mxu2  ;;  %v4450_v55 = vsel %vm466_vm5, %v4430_v63, 0.0  ;;  %v4451_v4 = vsel %vm473_vm6, %v4431_v18, 0.0  ;;  %7571 = vmatpush.bf16.msra.mxu0 %v15773_v49  ;;  %15774 = vst [vmem:[#allocation28_spill] sm:$0xff] %v13312_v20  ;;  %v15775_v49 = vld [vmem:[#allocation40_spill] sm:$0xff] }
 0x29f   : > { %15772 = vst [vmem:[#allocation22_spill] sm:$0xff] %v13302_v54  ;;  %7504 = vmatpush.bf16.msra.mxu1 %v13312_v20  ;;  %v6933_v48 = vadd.f32 %v6932_v27, %v6926_v12  ;;  %v13317_v33 = vpack.c.bf16 %v4450_v55, %v4450_v55  ;;  %v13319_v46 = vpack.c.bf16 %v4451_v4, %v4451_v4  ;;  %v4605_v63 = vrot.slane %v4603_v56, 5  ;;  %v13322_v18 = vpop.permute.xlu0 %4252  ;;  %v15776_v20 = vld [vmem:[#allocation15_spill] sm:$0xff]  ;;  %v13330_v12 = vpop.permute.xlu1 %4175  ;;  %v15780_v56 = vld [vmem:[#allocation10_spill] sm:$0xff] }
 0x2a0   : > { %8800 = vst.msk [vmem:[%s11657_s30 + $0x4c] sm:$0xf] %vm6406_vm15, %v6896_v52  ;;  %v6846_v29 = vpop.f32.mrf.mxu1  ;;  %4782 = vrot.lane.b32.xlu1 %v4776_v13, %s9116_s19  ;;  %v4600_v31 = vor.u32 %v4599_v60, %v4596_v21  ;;  %8833 = vmatmul.msk.bf16.vlgmr.msrb.gmra.mxu3 %vm979_vm8, %v15775_v49  ;;  %v4701_v54 = vunpack.c.l.b16 %v13154_v41  ;;  %v6806_v59 = vadd.f32 %v15776_v20, %v6777_v19  ;;  %v15777_v52 = vld [vmem:[#allocation39_spill] sm:$0xff]  ;;  %v15779_v21 = vld [vmem:[#allocation20_spill] sm:$0xff]  ;;  %v13347_v4 = vld [vmem:[%s15275_s3] sm:$0xff] }
 0x2a1   : > { %v6876_v27 = vadd.f32 %v13073_v40, %v6846_v29  ;;  %7264 = vmatmul.bf16.gmra.mxu0 %v15777_v52  ;;  %v4656_v55 = vshrl.u32 %v13317_v33, 16  ;;  %v13336_v60 = vld [vmem:[%s15275_s3 + $0x88] sm:$0xff]  ;;  %v6750_v41 = vadd.f32 %v15779_v21, %v12890_v39  ;;  %v4659_v19 = vshll.u32 %v13317_v33, 16  ;;  %15781 = vst [vmem:[#allocation15_spill] sm:$0xff] %v13347_v4 }
 0x2a2   : > { %15778 = vst [vmem:[#allocation9_spill] sm:$0xff] %v13336_v60  ;;  %7723 = vmatpush.bf16.msrb.mxu3 %v13336_v60  ;;  %v4601_v13 = vrot.slane %v4600_v31, 4  ;;  %v4665_v40 = vshll.u32 %v13319_v46, 16  ;;  %7572 = vmatpush.bf16.msra.mxu0 %v15780_v56  ;;  %v15783_v56 = vunpack.c.l.b16 %v13053_v36 }
 0x2a3   : > { %7505 = vmatpush.bf16.msra.mxu1 %v13347_v4  ;;  %v6889_v20 = vadd.f32 %v6876_v27, %v6806_v59  ;;  %v4658_v29 = vrot.slane %v4656_v55, 4  ;;  %v13351_v52 = vpop.f32.mrf.mxu3  ;;  %v6779_v39 = vadd.f32 %v12982_v37, %v6750_v41  ;;  %v4661_v21 = vrot.slane %v4659_v19, 5  ;;  %v13358_v51 = vpop.permute.xlu2 %4234  ;;  %v15784_v37 = vld [vmem:[#allocation46_spill] sm:$0xff] }
 0x2a4   : > { %7211 = vmatmul.bf16.gmra.mxu1 %v12933_v35  ;;  %15782 = vst [vmem:[#allocation39_spill] sm:$0xff] %v13351_v52  ;;  %v4606_v31 = vsel %vm9227_vm7, %v4601_v13, %v4605_v63  ;;  %v4750_v60 = vpack.c.b16 %v4701_v54, %v15783_v56  ;;  %v4667_v52 = vrot.slane %v4665_v40, 5  ;;  %v8586_v56 = vrot.slane %v13270_v32, 9 }
 0x2a5   : > { %v6897_v10 = vpack.c.bf16 %v6889_v20, %v6889_v20  ;;  %v6913_v4 = vadd.f32 %v6912_v50, %v6889_v20  ;;  %v6927_v59 = vmul.f32 %v6889_v20, %v6889_v20  ;;  %v4714_v27 = vunpack.c.l.b16 %v4606_v31  ;;  %v15785_v20 = vld [vmem:[#allocation33_spill] sm:$0xff] }
 0x2a6   : > { %v13360_v35 = vpop.f32.mrf.mxu0  ;;  %v4662_v55 = vor.u32 %v4661_v21, %v4658_v29  ;;  %v13362_v1 = vpop.f32.mrf.mxu2  ;;  %4756 = vrot.lane.b32.xlu2 %v4750_v60, %s9110_s13  ;;  %7573 = vmatpush.bf16.msra.mxu0 %v15784_v37  ;;  %v4702_v50 = vunpack.c.l.b16 %v13270_v32  ;;  %v6753_v40 = vadd.f32 %v15785_v20, %v12951_v7  ;;  %v15786_v29 = vld [vmem:[#allocation26_spill] sm:$0xff]  ;;  %v4653_v7 = vrot.slane %v13272_v45, 5 }
 0x2a7   : > { %8801 = vst.msk [vmem:[%s11657_s30 + $0x50] sm:$0xf] %vm6406_vm15, %v6897_v10  ;;  %v6934_v36 = vadd.f32 %v6933_v48, %v6927_v59  ;;  %v4718_v63 = vpack.c.b16 %v4714_v27, %v13254_v58  ;;  %v13370_v19 = vpop.permute.xlu0 %4208  ;;  %v6808_v31 = vadd.f32 %v15786_v29, %v6779_v39  ;;  %v4747_v10 = vunpack.c.l.b16 %v13317_v33  ;;  %v13379_v58 = vpop.permute.xlu1 %4221 }
 0x2a8   : > { %v6848_v41 = vpop.f32.mrf.mxu1  ;;  %v4663_v13 = vrot.slane %v4662_v55, 4  ;;  %v13383_v21 = vpack.c.b16 %v4702_v50, %v4701_v54  ;;  %v6782_v55 = vadd.f32 %v13038_v24, %v6753_v40  ;;  %v4654_v32 = vsel %vm9191_vm2, %v8586_v56, %v4653_v7  ;;  %v15792_v7 = vld [vmem:[#allocation24_spill] sm:$0xff] }
 0x2a9   : > { %v6878_v60 = vadd.f32 %v13144_v62, %v6848_v41  ;;  %4802 = vrot.lane.b32.xlu0 %v4718_v63, %s9115_s18  ;;  %4725 = vrot.lane.b32.xlu1 %v4718_v63, %s9112_s15  ;;  %v4734_v24 = vunpack.c.l.b16 %v4654_v32 }
 0x2aa   : > { %v4668_v48 = vsel %vm9227_vm7, %v4663_v13, %v4667_v52  ;;  %15787 = vst [vmem:[#allocation20_spill] sm:$0xff] %v13383_v21  ;;  %7574 = vmatpush.bf16.msra.mxu0 %v12799_v9  ;;  %v15788_v52 = vld [vmem:[#allocation27_spill] sm:$0xff]  ;;  %v4751_v13 = vpack.c.b16 %v4747_v10, %v4702_v50  ;;  %v15790_v50 = vld [vmem:[#allocation41_spill] sm:$0xff] }
 0x2ab   : > { %v6890_v62 = vadd.f32 %v6878_v60, %v6808_v31  ;;  %v4760_v39 = vunpack.c.l.b16 %v4668_v48  ;;  %8845 = vmatmul.msk.bf16.vlgmr.msrb.gmra.mxu2 %vm979_vm8, %v15775_v49  ;;  %v13390_v59 = vpop.f32.mrf.mxu3  ;;  %v15789_v54 = vunpack.c.l.b16 %v15788_v52  ;;  %v13396_v63 = vpop.permute.xlu2 %4177  ;;  %v15811_v49 = vld [vmem:[#allocation4_spill] sm:$0xff] }
 0x2ac   : > { %7781 = vmatpush.bf16.msrb.mxu2 %v12866_v23 }
 0x2ad   : > { %v4157_v37 = vpack.c.b16 %v15789_v54, %v15735_v53  ;;  %v6898_v9 = vpack.c.bf16 %v6890_v62, %v6890_v62  ;;  %v6914_v45 = vadd.f32 %v6913_v4, %v6890_v62  ;;  %v6928_v41 = vmul.f32 %v6890_v62, %v6890_v62 }
 0x2ae   : > { %v13401_v20 = vpop.f32.mrf.mxu0  ;;  %v4764_v29 = vpack.c.b16 %v4760_v39, %v4714_v27  ;;  %v13403_v31 = vpop.f32.mrf.mxu2  ;;  %4792 = vrot.lane.b32.xlu2 %v13383_v21, %s9111_s14  ;;  %7575 = vmatpush.bf16.msra.mxu0 %v12839_v22  ;;  %v15791_v27 = vld [vmem:[#allocation7_spill] sm:$0xff]  ;;  %v8587_v54 = vrot.slane %v13317_v33, 9 }
 0x2af   : > { %8802 = vst.msk [vmem:[%s11657_s30 + $0x54] sm:$0xf] %vm6406_vm15, %v6898_v9  ;;  %v6935_v40 = vadd.f32 %v6934_v36, %v6928_v41  ;;  %v4264_v23 = vsel %vm979_vm8, %v4157_v37, %v13142_v42  ;;  %v13412_v60 = vpop.permute.xlu0 %4244  ;;  %v6811_v48 = vadd.f32 %v15791_v27, %v6782_v55  ;;  %v15793_v36 = vld [vmem:[#allocation6_spill] sm:$0xff]  ;;  %v15794_v42 = vunpack.c.l.b16 %v13232_v26 }
 0x2b0   : > { %v6851_v4 = vpop.f32.mrf.mxu1  ;;  %8834 = vmatmul.msk.bf16.gmra.mxu3 %vm979_vm8, %v15790_v50  ;;  %v6755_v62 = vadd.f32 %v15793_v36, %v12999_v5  ;;  %v4673_v55 = vrot.slane %v13319_v46, 5  ;;  %v4787_v46 = vpack.c.b16 %v15735_v53, %v4747_v10 }
 0x2b1   : > { %v6881_v56 = vadd.f32 %v13216_v28, %v6851_v4  ;;  %7269 = vmatmul.bf16.gmra.mxu0 %v15792_v7  ;;  %4758 = vrot.lane.b32.xlu0 %v4751_v13, %s9110_s13  ;;  %v13420_v22 = vpop.permute.xlu1 %4254  ;;  %v13427_v52 = vpack.c.b16 %v4734_v24, %v15794_v42  ;;  %v4275_v28 = vsel %vm992_vm9, %v4264_v23, %v13168_v17  ;;  %v15797_v23 = vld [vmem:[#allocation5_spill] sm:$0xff] }
 0x2b2   : > { %4771 = vrot.lane.b32.xlu1 %v4764_v29, %s9114_s17  ;;  %v6784_v5 = vadd.f32 %v13102_v44, %v6755_v62  ;;  %v13439_v26 = vsel %vm9191_vm2, %v8587_v54, %v4673_v55  ;;  %v4283_v17 = vsel %vm1001_vm10, %v4275_v28, %v13156_v38  ;;  %v4797_v4 = vpack.c.b16 %v15797_v23, %v4760_v39 }
 0x2b3   : > { %15795 = vst [vmem:[#allocation10_spill] sm:$0xff] %v13427_v52  ;;  %v6891_v37 = vadd.f32 %v6881_v56, %v6811_v48  ;;  %v13434_v32 = vpop.f32.mrf.mxu3  ;;  %v13442_v13 = vpop.permute.xlu2 %4223  ;;  %v15798_v56 = vld [vmem:[#allocation42_spill] sm:$0xff]  ;;  %v4291_v7 = vsel %vm1010_vm11, %v4283_v17, %v13234_v47  ;;  %v15800_v17 = vld [vmem:[#allocation19_spill] sm:$0xff] }
 0x2b4   : > { %7216 = vmatmul.bf16.gmra.mxu1 %v13008_v16  ;;  %15796 = vst [vmem:[#allocation46_spill] sm:$0xff] %v13439_v26  ;;  %v6813_v38 = vadd.f32 %v15798_v56, %v6784_v5  ;;  %v4299_v47 = vsel %vm1019_vm12, %v4291_v7, %v13256_v25  ;;  %v15801_v7 = vld [vmem:[#allocation13_spill] sm:$0xff] }
 0x2b5   : > { %v6899_v9 = vpack.c.bf16 %v6891_v37, %v6891_v37  ;;  %v6915_v41 = vadd.f32 %v6914_v45, %v6891_v37  ;;  %v6929_v33 = vmul.f32 %v6891_v37, %v6891_v37  ;;  %v15436_v45 = vunpack.c.l.b16 %v13439_v26 }
 0x2b6   : > { %v13446_v29 = vpop.f32.mrf.mxu0  ;;  %v13449_v44 = vpop.f32.mrf.mxu2  ;;  %4745 = vrot.lane.b32.xlu2 %v13427_v52, %s9113_s16  ;;  %v4307_v25 = vsel %vm1028_vm13, %v4299_v47, %v13226_v15 }
 0x2b7   : > { %8803 = vst.msk [vmem:[%s11657_s30 + $0x58] sm:$0xf] %vm6406_vm15, %v6899_v9  ;;  %v6936_v10 = vadd.f32 %v6935_v40, %v6929_v33  ;;  %v4777_v40 = vpack.c.b16 %v15436_v45, %v4734_v24  ;;  %v13503_v15 = vsel %vm1037_vm14, %v4307_v25, %v13322_v18 }
 0x2b8   : > { %v6853_v27 = vpop.f32.mrf.mxu1  ;;  %v13456_v48 = vpop.permute.xlu0 %4197  ;;  %15802 = vst [vmem:[#allocation33_spill] sm:$0xff] %v13503_v15 }
 0x2b9   : > { %v6883_v39 = vadd.f32 %v13288_v34, %v6853_v27  ;;  %4794 = vrot.lane.b32.xlu0 %v4787_v46, %s9111_s14  ;;  %v13463_v36 = vpop.permute.xlu1 %4210  ;;  %v15799_v34 = vld [vmem:[#allocation38_spill] sm:$0xff]  ;;  %v4875_v27 = vld [vmem:[%s13481_s20 + $0xc] sm:$0x1] }
 0x2ba   : > { %4804 = vrot.lane.b32.xlu1 %v4797_v4, %s9115_s18  ;;  %v4267_v54 = vsel %vm979_vm8, %v15799_v34, %v13330_v12  ;;  %v4874_v4 = vld [vmem:[%s13481_s20 + $0x8] sm:$0xf] }
 0x2bb   : > { %v6892_v62 = vadd.f32 %v6883_v39, %v6813_v38  ;;  %8846 = vmatmul.msk.bf16.gmra.mxu2 %vm979_vm8, %v15790_v50  ;;  %v13471_v42 = vpop.f32.mrf.mxu3  ;;  %v4277_v33 = vsel %vm992_vm9, %v4267_v54, %v13297_v6  ;;  %v4901_v39 = vunpack.c.l.bf16 %v4874_v4  ;;  %v4877_v50 = vld [vmem:[%s13481_s20 + $0x14] sm:$0x1] }
 0x2bc   : > { %v4285_v47 = vsel %vm1001_vm10, %v4277_v33, %v13370_v19 }
 0x2bd   : > { %v6900_v55 = vpack.c.bf16 %v6892_v62, %v6892_v62  ;;  %v6916_v28 = vadd.f32 %v6915_v41, %v6892_v62  ;;  %v6930_v37 = vmul.f32 %v6892_v62, %v6892_v62  ;;  %v13492_v41 = vpop.permute.xlu2 %4256  ;;  %v4293_v25 = vsel %vm1010_vm11, %v4285_v47, %v13379_v58 }
 0x2be   : > { %v13483_v24 = vpop.f32.mrf.mxu0  ;;  %v13485_v5 = vpop.f32.mrf.mxu2  ;;  %4784 = vrot.lane.b32.xlu2 %v4777_v40, %s9116_s19  ;;  %v4902_v40 = vunpack.c.l.bf16 %v4875_v27  ;;  %v15803_v27 = vld [vmem:[#allocation29_spill] sm:$0xff]  ;;  %v6987_v58 = vadd.f32 %v12984_v43, %v13238_v0  ;;  %v13551_v43 = vadd.f32 %v13104_v61, %v13360_v35 }
 0x2bf   : > { %8804 = vst.msk [vmem:[%s11657_s30 + $0x5c] sm:$0xf] %vm6406_vm15, %v6900_v55  ;;  %v6917_v12 = vrot.slane %v6916_v28, 4  ;;  %v6937_v9 = vadd.f32 %v6936_v10, %v6930_v37  ;;  %v4921_v55 = vmul.f32 %v13194_v3, %v4901_v39 }
 0x2c0   : > { %v7013_v46 = vpop.f32.mrf.mxu1  ;;  %8835 = vmatmul.msk.bf16.gmra.mxu3 %vm979_vm8, %v15800_v17  ;;  %v13505_v10 = vpop.permute.xlu0 %4236  ;;  %v4922_v18 = vmul.f32 %v13194_v3, %v4902_v40 }
 0x2c1   : > { %v6918_v56 = vadd.f32 %v6917_v12, %v6916_v28  ;;  %v6938_v38 = vrot.slane %v6937_v9, 4  ;;  %7274 = vmatmul.bf16.gmra.mxu0 %v15801_v7  ;;  %v13510_v34 = vpop.permute.xlu1 %4246  ;;  %v13519_v28 = vld [vmem:[%s15275_s3 + $0x80] sm:$0xff]  ;;  %v4941_v33 = vadd.f32 %v13221_v57, %v4921_v55 }
 0x2c2   : > { %v4942_v4 = vadd.f32 %v13221_v57, %v4922_v18  ;;  %v4876_v18 = vld [vmem:[%s13481_s20 + $0x10] sm:$0xf] }
 0x2c3   : > { %v6919_v62 = vrot.slane %v6918_v56, 2  ;;  %v6939_v6 = vadd.f32 %v6938_v38, %v6937_v9  ;;  %v13512_v54 = vpop.f32.mrf.mxu3  ;;  %v6985_v38 = vadd.f32 %v15803_v27, %v13171_v14  ;;  %v4961_v55 = vmax.f32 %v4941_v33, 0.0  ;;  %v13546_v14 = vld [vmem:[%s15275_s3 + $0x78] sm:$0xff] }
 0x2c4   : > { %7329 = vmatmul.bf16.vlgmr.msrb.gmra.mxu1 %v13503_v15  ;;  %v4962_v45 = vmax.f32 %v4942_v4, 0.0  ;;  %15805 = vst [vmem:[#allocation26_spill] sm:$0xff] %v13546_v14 }
 0x2c5   : > { %7687 = vmatpush.bf16.msrb.mxu1 %v13519_v28  ;;  %v6920_v37 = vadd.f32 %v6919_v62, %v6918_v56  ;;  %v6940_v19 = vrot.slane %v6939_v6, 2  ;;  %v15804_v56 = vld [vmem:[#allocation45_spill] sm:$0xff]  ;;  %v13539_v62 = vadd.f32 %v13044_v2, %v13300_v11  ;;  %v4301_v2 = vsel %vm1019_vm12, %v4293_v25, %v13358_v51  ;;  %v13555_v11 = vpop.permute.xlu2 %4212 }
 0x2c6   : > { %v13524_v12 = vpop.f32.mrf.mxu0  ;;  %v13526_v9 = vpop.f32.mrf.mxu2  ;;  %v4270_v40 = vsel %vm979_vm8, %v15804_v56, %v13396_v63  ;;  %v4903_v63 = vunpack.c.l.bf16 %v4876_v18  ;;  %v4981_v33 = vsel %vm466_vm5, %v4961_v55, 0.0  ;;  %v4982_v27 = vsel %vm473_vm6, %v4962_v45, 0.0  ;;  %v4878_v18 = vld [vmem:[%s13481_s20 + $0x18] sm:$0xf] }
 0x2c7   : > { %v6921_v7 = vrot.slane %v6920_v37, 1  ;;  %v6941_v39 = vadd.f32 %v6940_v19, %v6939_v6  ;;  %v4279_v6 = vsel %vm992_vm9, %v4270_v40, %v13456_v48  ;;  %v4904_v56 = vunpack.c.l.bf16 %v4877_v50  ;;  %v15809_v40 = vld [vmem:[#allocation31_spill] sm:$0xff] }
 0x2c8   : > { %v7015_v47 = vpop.f32.mrf.mxu1  ;;  %v7014_v61 = vadd.f32 %v7013_v46, %v6985_v38  ;;  %v13567_v25 = vpack.c.bf16 %v4981_v33, %v4981_v33  ;;  %v4309_v48 = vsel %vm1028_vm13, %v4301_v2, %v13412_v60  ;;  %v15810_v55 = vunpack.c.l.b16 %v15809_v40  ;;  %v13583_v46 = vld [vmem:[%s15275_s3 + $0x70] sm:$0xff]  ;;  %v15814_v2 = vld [vmem:[#allocation49_spill] sm:$0xff] }
 0x2c9   : > { %7688 = vmatpush.bf16.msrb.mxu1 %v13546_v14  ;;  %v6942_v0 = vrot.slane %v6941_v39, 1  ;;  %v6922_v16 = vadd.f32 %v6921_v7, %v6920_v37  ;;  %v13577_v50 = vpack.c.bf16 %v4982_v27, %v4982_v27  ;;  %v4923_v45 = vmul.f32 %v13194_v3, %v4903_v63  ;;  %15813 = vst [vmem:[#allocation24_spill] sm:$0xff] %v13583_v46  ;;  %v4180_v38 = vpop.permute.xlu0 %4179  ;;  %v4200_v7 = vpop.permute.xlu1 %4199 }
 0x2ca   : > { %15808 = vst [vmem:[#allocation27_spill] sm:$0xff] %v13567_v25  ;;  %v13575_v21 = vpack.c.b16 %v15811_v49, %v15810_v55  ;;  %v4287_v60 = vsel %vm1001_vm10, %v4279_v6, %v13463_v36 }
 0x2cb   : > { %v6943_v35 = vadd.f32 %v6942_v0, %v6941_v39  ;;  %8847 = vmatmul.msk.bf16.gmra.mxu2 %vm979_vm8, %v15800_v17  ;;  %v13565_v51 = vpop.f32.mrf.mxu3  ;;  %v8590_v39 = vrot.slane %v13567_v25, 9  ;;  %v4924_v0 = vmul.f32 %v13194_v3, %v4904_v56  ;;  %v5174_v40 = vrot.slane %v13577_v50, 5  ;;  %v15816_v17 = vld [vmem:[#allocation39_spill] sm:$0xff] }
 0x2cc   : > { %15812 = vst [vmem:[#allocation7_spill] sm:$0xff] %v13575_v21  ;;  %v4943_v55 = vadd.f32 %v13221_v57, %v4923_v45  ;;  %v7043_v36 = vadd.f32 %v15816_v17, %v7014_v61  ;;  %v7016_v61 = vadd.f32 %v7015_v47, %v6987_v58  ;;  %v15820_v58 = vld [vmem:[#allocation35_spill] sm:$0xff] }
 0x2cd   : > { %7689 = vmatpush.bf16.msrb.mxu1 %v13583_v46  ;;  %v6944_v37 = vsel %vm6449_vm0, %v6922_v16, %v6943_v35  ;;  %v4905_v16 = vunpack.c.l.bf16 %v4878_v18  ;;  %v4879_v35 = vld [vmem:[%s13481_s20 + $0x1c] sm:$0x1]  ;;  %v4944_v46 = vadd.f32 %v13221_v57, %v4924_v0  ;;  %v13610_v45 = vsel %vm9191_vm2, %v8590_v39, %v5174_v40 }
 0x2ce   : > { %v13592_v63 = vadd.f32 %v6944_v37, %v15814_v2  ;;  %v7083_v33 = vpop.f32.mrf.mxu0  ;;  %v13594_v27 = vpop.f32.mrf.mxu2  ;;  %v4906_v26 = vunpack.c.l.bf16 %v4879_v35  ;;  %v13604_v37 = vsel %vm1037_vm14, %v4309_v48, %v13420_v22  ;;  %v4963_v18 = vmax.f32 %v4943_v55, 0.0  ;;  %v15819_v55 = vld [vmem:[#allocation51_spill] sm:$0xff] }
 0x2cf   : > { %v7113_v6 = vadd.f32 %v13403_v31, %v7083_v33  ;;  %15817 = vst [vmem:[#allocation5_spill] sm:$0xff] %v13604_v37  ;;  %v4925_v17 = vmul.f32 %v13194_v3, %v4905_v16  ;;  %v13616_v31 = vld [vmem:[%s15275_s3 + $0x68] sm:$0xff]  ;;  %v5273_v48 = vunpack.c.l.b16 %v13610_v45  ;;  %v4964_v0 = vmax.f32 %v4944_v46, 0.0  ;;  %v15821_v46 = vld [vmem:[#allocation44_spill] sm:$0xff] }
 0x2d0   : > { %15815 = vst [vmem:[#allocation6_spill] sm:$0xff] %v13592_v63  ;;  %v7018_v56 = vpop.f32.mrf.mxu1  ;;  %8836 = vmatmul.msk.bf16.gmra.mxu3 %vm979_vm8, %v13575_v21  ;;  %v4295_v39 = vsel %vm1010_vm11, %v4287_v60, %v13442_v13  ;;  %v4983_v2 = vsel %vm466_vm5, %v4963_v18, 0.0  ;;  %v4926_v40 = vmul.f32 %v13194_v3, %v4906_v26  ;;  %v13630_v47 = vadd.f32 %v15820_v58, %v13401_v20  ;;  %v13635_v60 = vpop.permute.xlu2 %4248  ;;  %v13648_v18 = vld [vmem:[%s15275_s3 + $0x60] sm:$0xff] }
 0x2d1   : > { %15818 = vst [vmem:[#allocation42_spill] sm:$0xff] %v13616_v31  ;;  %7690 = vmatpush.bf16.msrb.mxu1 %v13616_v31  ;;  %v7132_v22 = vadd.f32 %v7113_v6, %v7043_v36  ;;  %7448 = vmatmul.bf16.vlgmr.msrb.gmra.mxu0 %v13503_v15  ;;  %v4945_v33 = vadd.f32 %v13221_v57, %v4925_v17  ;;  %v4984_v6 = vsel %vm473_vm6, %v4964_v0, 0.0 }
 0x2d2   : > { %7745 = vmatpush.bf16.msrb.mxu0 %v15819_v55  ;;  %v4273_v13 = vsel %vm979_vm8, %v15821_v46, %v4180_v38  ;;  %v5280_v36 = vpack.c.b16 %v5273_v48, %v15811_v49  ;;  %v13640_v26 = vpack.c.bf16 %v4983_v2, %v4983_v2  ;;  %v4946_v20 = vadd.f32 %v13221_v57, %v4926_v40 }
 0x2d3   : > { %v7140_v16 = vpack.c.bf16 %v7132_v22, %v7132_v22  ;;  %v13637_v35 = vpop.f32.mrf.mxu3  ;;  %v4965_v45 = vmax.f32 %v4945_v33, 0.0  ;;  %15822 = vst [vmem:[#allocation38_spill] sm:$0xff] %v13648_v18  ;;  %v7045_v38 = vadd.f32 %v13390_v59, %v7016_v61  ;;  %v4303_v17 = vsel %vm1019_vm12, %v4295_v39, %v13505_v10 }
 0x2d4   : > { %7334 = vmatmul.bf16.gmra.mxu1 %v13604_v37  ;;  %5284 = vrot.lane.b32.xlu0 %v5280_v36, %s9113_s16  ;;  %v5025_v2 = vpack.c.bf16 %v4984_v6, %v4984_v6  ;;  %v5242_v55 = vunpack.c.l.b16 %v13640_v26  ;;  %v8591_v58 = vrot.slane %v13640_v26, 9  ;;  %v4966_v61 = vmax.f32 %v4946_v20, 0.0 }
 0x2d5   : > { %7691 = vmatpush.bf16.msrb.mxu1 %v13648_v18  ;;  %8817 = vst.msk [vmem:[%s11657_s30 + $0x60] sm:$0xf] %vm6406_vm15, %v7140_v16  ;;  %v4985_v59 = vsel %vm466_vm5, %v4965_v45, 0.0  ;;  %v15823_v16 = vld [vmem:[#allocation25_spill] sm:$0xff]  ;;  %v4281_v39 = vsel %vm992_vm9, %v4273_v13, %v4200_v7  ;;  %v13667_v36 = vpop.permute.xlu1 %4238  ;;  %v5069_v0 = vshrl.u32 %v13640_v26, 16  ;;  %v15824_v18 = vunpack.c.l.b16 %v13567_v25 }
 0x2d6   : > { %v7085_v33 = vpop.f32.mrf.mxu0  ;;  %v13658_v40 = vpop.f32.mrf.mxu2  ;;  %7746 = vmatpush.bf16.msrb.mxu0 %v15823_v16  ;;  %v5178_v6 = vrot.slane %v5025_v2, 5  ;;  %v13672_v63 = vpack.c.bf16 %v4985_v59, %v4985_v59  ;;  %v4986_v45 = vsel %vm473_vm6, %v4966_v61, 0.0  ;;  %v5072_v20 = vshll.u32 %v13640_v26, 16 }
 0x2d7   : > { %v7115_v10 = vadd.f32 %v13449_v44, %v7085_v33  ;;  %v4226_v46 = vpop.permute.xlu0 %4225  ;;  %v5293_v31 = vpack.c.b16 %v5242_v55, %v15824_v18  ;;  %v13680_v44 = vld [vmem:[%s15275_s3 + $0x58] sm:$0xff]  ;;  %v7019_v7 = vadd.f32 %v7018_v56, %v13539_v62  ;;  %v4311_v13 = vsel %vm1028_vm13, %v4303_v17, %v13510_v34  ;;  %v15826_v62 = vld [vmem:[#allocation14_spill] sm:$0xff] }
 0x2d8   : > { %v7020_v15 = vpop.f32.mrf.mxu1  ;;  %15825 = vst [vmem:[#allocation13_spill] sm:$0xff] %v13680_v44  ;;  %v13688_v33 = vsel %vm9191_vm2, %v8591_v58, %v5178_v6  ;;  %v4289_v26 = vsel %vm1001_vm10, %v4281_v39, %v13555_v11  ;;  %v13694_v61 = vpack.c.bf16 %v4986_v45, %v4986_v45  ;;  %v5071_v16 = vrot.slane %v5069_v0, 4  ;;  %v13707_v0 = vld [vmem:[%s15275_s3 + $0x50] sm:$0xff]  ;;  %v13713_v45 = vpop.permute.xlu2 %4739 }
 0x2d9   : > { %7692 = vmatpush.bf16.msrb.mxu1 %v13680_v44  ;;  %v7133_v18 = vadd.f32 %v7115_v10, %v7045_v38  ;;  %5297 = vrot.lane.b32.xlu1 %v5293_v31, %s9110_s13  ;;  %v15447_v59 = vunpack.c.l.b16 %v13688_v33  ;;  %v7170_v56 = vmul.f32 %v7132_v22, %v7132_v22  ;;  %v5074_v31 = vrot.slane %v5072_v20, 5  ;;  %15827 = vst [vmem:[#allocation29_spill] sm:$0xff] %v13707_v0  ;;  %v4880_v20 = vld [vmem:[%s13481_s20 + $0x20] sm:$0xf] }
 0x2da   : > { %7747 = vmatpush.bf16.msrb.mxu0 %v15826_v62  ;;  %v5078_v10 = vshll.u32 %v5025_v2, 16  ;;  %v5083_v39 = vshrl.u32 %v13672_v63, 16  ;;  %v5086_v2 = vshll.u32 %v13672_v63, 16  ;;  %v5055_v49 = vshrl.u32 %v13567_v25, 16 }
 0x2db   : > { %v7141_v34 = vpack.c.bf16 %v7133_v18, %v7133_v18  ;;  %v7157_v38 = vadd.f32 %v7133_v18, %v7132_v22  ;;  %v7171_v17 = vmul.f32 %v7133_v18, %v7133_v18  ;;  %8848 = vmatmul.msk.bf16.gmra.mxu2 %vm979_vm8, %v13575_v21  ;;  %v13699_v58 = vpop.f32.mrf.mxu3  ;;  %v5319_v11 = vpack.c.b16 %v15447_v59, %v5273_v48 }
 0x2dc   : > { %v7048_v22 = vadd.f32 %v13434_v32, %v7019_v7  ;;  %v15453_v48 = vunpack.c.l.b16 %v13672_v63  ;;  %v5075_v59 = vor.u32 %v5074_v31, %v5071_v16  ;;  %v5080_v21 = vrot.slane %v5078_v10, 5  ;;  %v15828_v7 = vld [vmem:[#allocation21_spill] sm:$0xff]  ;;  %v15831_v31 = vld [vmem:[#allocation18_spill] sm:$0xff] }
 0x2dd   : > { %7693 = vmatpush.bf16.msrb.mxu1 %v13707_v0  ;;  %8818 = vst.msk [vmem:[%s11657_s30 + $0x64] sm:$0xf] %vm6406_vm15, %v7141_v34  ;;  %v7178_v6 = vadd.f32 %v7171_v17, %v7170_v56  ;;  %5323 = vrot.lane.b32.xlu0 %v5319_v11, %s9116_s19  ;;  %v5085_v0 = vrot.slane %v5083_v39, 4  ;;  %v5092_v32 = vshll.u32 %v13694_v61, 16  ;;  %v5088_v44 = vrot.slane %v5086_v2, 5 }
 0x2de   : > { %v7088_v18 = vpop.f32.mrf.mxu0  ;;  %v13718_v62 = vpop.f32.mrf.mxu2  ;;  %7748 = vmatpush.bf16.msrb.mxu0 %v15828_v7  ;;  %v13728_v17 = vpack.c.b16 %v15453_v48, %v5242_v55  ;;  %v13733_v16 = vsel %vm1037_vm14, %v4311_v13, %v13492_v41  ;;  %v4297_v11 = vsel %vm1010_vm11, %v4289_v26, %v4226_v46  ;;  %v4907_v10 = vunpack.c.l.bf16 %v4880_v20  ;;  %v13741_v55 = vld [vmem:[%s15275_s3 + $0x48] sm:$0xff]  ;;  %v13752_v26 = vld [vmem:[%s15275_s3 + $0xd0] sm:$0xff] }
 0x2df   : > { %v7118_v56 = vadd.f32 %v13485_v5, %v7088_v18  ;;  %v13724_v34 = vpop.permute.xlu0 %4258  ;;  %15830 = vst [vmem:[#allocation2_spill] sm:$0xff] %v13733_v16  ;;  %v5076_v5 = vrot.slane %v5075_v59, 4  ;;  %v7021_v39 = vadd.f32 %v7020_v15, %v13551_v43  ;;  %v5089_v46 = vor.u32 %v5088_v44, %v5085_v0  ;;  %v15832_v0 = vld [vmem:[#allocation11_spill] sm:$0xff] }
 0x2e0   : > { %15829 = vst [vmem:[#allocation45_spill] sm:$0xff] %v13728_v17  ;;  %v7023_v14 = vpop.f32.mrf.mxu1  ;;  %8849 = vmatmul.msk.bf16.vlgmr.msra.gmra.mxu3 %vm979_vm8, %v15831_v31  ;;  %v5058_v13 = vshll.u32 %v13567_v25, 16  ;;  %v5094_v43 = vrot.slane %v5092_v32, 5  ;;  %v8592_v44 = vrot.slane %v13672_v63, 9  ;;  %v5182_v59 = vrot.slane %v13694_v61, 5  ;;  %v15839_v25 = vld [vmem:[#allocation17_spill] sm:$0xff] }
 0x2e1   : > { %7694 = vmatpush.bf16.msrb.mxu1 %v13741_v55  ;;  %v7134_v2 = vadd.f32 %v7118_v56, %v7048_v22  ;;  %7453 = vmatmul.bf16.gmra.mxu0 %v13604_v37  ;;  %v13746_v41 = vpop.permute.xlu1 %4719  ;;  %v5081_v15 = vsel %vm9227_vm7, %v5076_v5, %v5080_v21  ;;  %v5057_v56 = vrot.slane %v5055_v49, 4  ;;  %v4881_v31 = vld [vmem:[%s13481_s20 + $0x24] sm:$0x1]  ;;  %v4305_v21 = vsel %vm1019_vm12, %v4297_v11, %v13667_v36 }
 0x2e2   : > { %7851 = vmatpush.bf16.msra.mxu3 %v13752_v26  ;;  %5333 = vrot.lane.b32.xlu1 %v13728_v17, %s9111_s14  ;;  %v5090_v5 = vrot.slane %v5089_v46, 4  ;;  %v13770_v32 = vsel %vm9191_vm2, %v8592_v44, %v5182_v59  ;;  %v5064_v61 = vshll.u32 %v13577_v50, 16  ;;  %v5060_v49 = vrot.slane %v5058_v13, 5  ;;  %v15833_v59 = vld [vmem:[#allocation43_spill] sm:$0xff] }
 0x2e3   : > { %7749 = vmatpush.bf16.msrb.mxu0 %v15832_v0  ;;  %v7142_v22 = vpack.c.bf16 %v7134_v2, %v7134_v2  ;;  %v7158_v20 = vadd.f32 %v7157_v38, %v7134_v2  ;;  %v7172_v18 = vmul.f32 %v7134_v2, %v7134_v2  ;;  %v13763_v7 = vpop.f32.mrf.mxu3  ;;  %v13775_v2 = vunpack.c.l.b16 %v5081_v15 }
 0x2e4   : > { %7339 = vmatmul.bf16.gmra.mxu1 %v13733_v16  ;;  %v15455_v0 = vunpack.c.l.b16 %v13770_v32  ;;  %v7050_v48 = vadd.f32 %v13471_v42, %v7021_v39  ;;  %v5095_v46 = vsel %vm9227_vm7, %v5090_v5, %v5094_v43  ;;  %v4908_v44 = vunpack.c.l.bf16 %v4881_v31  ;;  %v4883_v31 = vld [vmem:[%s13481_s20 + $0x2c] sm:$0x1] }
 0x2e5   : > { %8819 = vst.msk [vmem:[%s11657_s30 + $0x68] sm:$0xf] %vm6406_vm15, %v7142_v22  ;;  %v7179_v38 = vadd.f32 %v7178_v6, %v7172_v18  ;;  %v4927_v50 = vmul.f32 %v13194_v3, %v4907_v10  ;;  %v13788_v22 = vpop.permute.xlu2 %4778  ;;  %v13790_v13 = vunpack.c.l.b16 %v5095_v46  ;;  %v15834_v42 = vunpack.c.l.b16 %v13688_v33  ;;  %v4882_v18 = vld [vmem:[%s13481_s20 + $0x28] sm:$0xf] }
 0x2e6   : > { %v7090_v36 = vpop.f32.mrf.mxu0  ;;  %v13779_v11 = vpop.f32.mrf.mxu2  ;;  %v5061_v43 = vor.u32 %v5060_v49, %v5057_v56  ;;  %v4313_v5 = vsel %vm1028_vm13, %v4305_v21, %v13635_v60  ;;  %v7024_v46 = vadd.f32 %v7023_v14, %v13630_v47  ;;  %v4910_v49 = vunpack.c.l.bf16 %v4883_v31  ;;  %v15837_v14 = vld [vmem:[#allocation16_spill] sm:$0xff] }
 0x2e7   : > { %7750 = vmatpush.bf16.msrb.mxu0 %v15833_v59  ;;  %v7120_v6 = vadd.f32 %v13526_v9, %v7090_v36  ;;  %v13786_v15 = vpop.permute.xlu0 %4752  ;;  %v13796_v39 = vpack.c.b16 %v15455_v0, %v15834_v42  ;;  %v5066_v9 = vrot.slane %v5064_v61, 5  ;;  %v4928_v36 = vmul.f32 %v13194_v3, %v4908_v44  ;;  %v15836_v44 = vld [vmem:[#allocation28_spill] sm:$0xff] }
 0x2e8   : > { %v7025_v10 = vpop.f32.mrf.mxu1  ;;  %v4947_v59 = vadd.f32 %v13221_v57, %v4927_v50  ;;  %v13809_v42 = vpack.c.b16 %v13790_v13, %v13775_v2  ;;  %v5062_v56 = vrot.slane %v5061_v43, 4  ;;  %v4909_v61 = vunpack.c.l.bf16 %v4882_v18  ;;  %v15838_v0 = vld [vmem:[#allocation32_spill] sm:$0xff] }
 0x2e9   : > { %15835 = vst [vmem:[#allocation3_spill] sm:$0xff] %v13796_v39  ;;  %v7135_v17 = vadd.f32 %v7120_v6, %v7050_v48  ;;  %v13805_v33 = vpop.permute.xlu1 %4765  ;;  %v4948_v60 = vadd.f32 %v13221_v57, %v4928_v36  ;;  %v6997_v47 = vadd.f32 %v15837_v14, %v13446_v29  ;;  %v15840_v36 = vunpack.c.l.b16 %v15839_v25 }
 0x2ea   : > { %5286 = vrot.lane.b32.xlu1 %v13796_v39, %s9113_s16  ;;  %v4967_v21 = vmax.f32 %v4947_v59, 0.0  ;;  %5266 = vrot.lane.b32.xlu0 %v13809_v42, %s9112_s15  ;;  %v5067_v18 = vsel %vm9227_vm7, %v5062_v56, %v5066_v9  ;;  %v13835_v25 = vsel %vm1037_vm14, %v4313_v5, %v13724_v34 }
 0x2eb   : > { %7751 = vmatpush.bf16.msrb.mxu0 %v15836_v44  ;;  %v7143_v48 = vpack.c.bf16 %v7135_v17, %v7135_v17  ;;  %v7159_v50 = vadd.f32 %v7158_v20, %v7135_v17  ;;  %v7173_v6 = vmul.f32 %v7135_v17, %v7135_v17  ;;  %8853 = vmatmul.msk.bf16.vlgmr.msra.gmra.mxu2 %vm979_vm8, %v15838_v0  ;;  %v13819_v43 = vpop.f32.mrf.mxu3  ;;  %v4968_v29 = vmax.f32 %v4948_v60, 0.0  ;;  %v15841_v20 = vld [vmem:[#allocation9_spill] sm:$0xff] }
 0x2ec   : > { %v4703_v59 = vpack.c.b16 %v15840_v36, %v15735_v53  ;;  %v4987_v17 = vsel %vm466_vm5, %v4967_v21, 0.0  ;;  %7970 = vmatpush.bf16.msra.mxu2 %v15841_v20  ;;  %15842 = vst [vmem:[#allocation31_spill] sm:$0xff] %v13835_v25  ;;  %v13837_v44 = vunpack.c.l.b16 %v5067_v18  ;;  %v7053_v36 = vadd.f32 %v13512_v54, %v7024_v46 }
 0x2ed   : > { %8820 = vst.msk [vmem:[%s11657_s30 + $0x6c] sm:$0xf] %vm6406_vm15, %v7143_v48  ;;  %v7180_v31 = vadd.f32 %v7179_v38, %v7173_v6  ;;  %v13839_v14 = vpack.c.bf16 %v4987_v17, %v4987_v17  ;;  %v4988_v60 = vsel %vm473_vm6, %v4968_v29, 0.0  ;;  %v4929_v21 = vmul.f32 %v13194_v3, %v4909_v61  ;;  %v4884_v48 = vld [vmem:[%s13481_s20 + $0x30] sm:$0xf]  ;;  %v15844_v6 = vld [vmem:[#allocation15_spill] sm:$0xff] }
 0x2ee   : > { %v7093_v9 = vpop.f32.mrf.mxu0  ;;  %v13842_v56 = vpop.f32.mrf.mxu2  ;;  %v4930_v38 = vmul.f32 %v13194_v3, %v4910_v49  ;;  %v5260_v54 = vpack.c.b16 %v13837_v44, %v15797_v23  ;;  %v5029_v46 = vpack.c.bf16 %v4988_v60, %v4988_v60  ;;  %v7026_v17 = vadd.f32 %v7025_v10, %v6997_v47  ;;  %v15845_v49 = vld [vmem:[#allocation47_spill] sm:$0xff] }
 0x2ef   : > { %15843 = vst [vmem:[#allocation49_spill] sm:$0xff] %v13842_v56  ;;  %7752 = vmatpush.bf16.msrb.mxu0 %v15844_v6  ;;  %v7123_v34 = vadd.f32 %v13594_v27, %v7093_v9  ;;  %v13851_v5 = vpop.permute.xlu0 %4788  ;;  %v5097_v18 = vshrl.u32 %v13839_v14, 16  ;;  %v4810_v29 = vsel %vm979_vm8, %v4703_v59, %v13746_v41  ;;  %v5100_v3 = vshll.u32 %v13839_v14, 16  ;;  %v13863_v9 = vpop.permute.xlu2 %4721 }
 0x2f0   : > { %v7028_v61 = vpop.f32.mrf.mxu1  ;;  %8850 = vmatmul.msk.bf16.gmra.mxu3 %vm979_vm8, %v15845_v49  ;;  %v8593_v27 = vrot.slane %v13839_v14, 9  ;;  %5264 = vrot.lane.b32.xlu2 %v5260_v54, %s9112_s15  ;;  %v5106_v47 = vshll.u32 %v5029_v46, 16  ;;  %v4911_v60 = vunpack.c.l.bf16 %v4884_v48  ;;  %v5186_v6 = vrot.slane %v5029_v46, 5  ;;  %v4885_v48 = vld [vmem:[%s13481_s20 + $0x34] sm:$0x1] }
 0x2f1   : > { %v7136_v20 = vadd.f32 %v7123_v34, %v7053_v36  ;;  %7458 = vmatmul.bf16.gmra.mxu0 %v13733_v16  ;;  %v5099_v10 = vrot.slane %v5097_v18, 4  ;;  %v5102_v59 = vrot.slane %v5100_v3, 5  ;;  %v4949_v49 = vadd.f32 %v13221_v57, %v4929_v21 }
 0x2f2   : > { %v13866_v41 = vpop.permute.xlu1 %4798  ;;  %v4950_v37 = vadd.f32 %v13221_v57, %v4930_v38  ;;  %v4821_v39 = vsel %vm992_vm9, %v4810_v29, %v13713_v45  ;;  %v5108_v56 = vrot.slane %v5106_v47, 5  ;;  %v13878_v46 = vsel %vm9191_vm2, %v8593_v27, %v5186_v6  ;;  %v13891_v27 = vld [vmem:[%s15276_s4] ss:$0 sm:$0xff] }
 0x2f3   : > { %v7144_v36 = vpack.c.bf16 %v7136_v20, %v7136_v20  ;;  %v7160_v34 = vadd.f32 %v7159_v50, %v7136_v20  ;;  %v7174_v16 = vmul.f32 %v7136_v20, %v7136_v20  ;;  %v13873_v54 = vpop.f32.mrf.mxu3  ;;  %v5103_v18 = vor.u32 %v5102_v59, %v5099_v10  ;;  %v15848_v59 = vld [vmem:[#allocation22_spill] sm:$0xff] }
 0x2f4   : > { %7344 = vmatmul.bf16.gmra.mxu1 %v13835_v25  ;;  %v5306_v57 = vpack.c.b16 %v13775_v2, %v13837_v44  ;;  %v15461_v21 = vunpack.c.l.b16 %v13878_v46  ;;  %v4969_v45 = vmax.f32 %v4949_v49, 0.0  ;;  %v4970_v38 = vmax.f32 %v4950_v37, 0.0 }
 0x2f5   : > { %8821 = vst.msk [vmem:[%s11657_s30 + $0x70] sm:$0xf] %vm6406_vm15, %v7144_v36  ;;  %v7181_v50 = vadd.f32 %v7180_v31, %v7174_v16  ;;  %v7055_v29 = vadd.f32 %v13565_v51, %v7026_v17  ;;  %v5104_v20 = vrot.slane %v5103_v18, 4  ;;  %v4931_v2 = vmul.f32 %v13891_v27, %v4911_v60 }
 0x2f6   : > { %v7095_v3 = vpop.f32.mrf.mxu0  ;;  %v13886_v10 = vpop.f32.mrf.mxu2  ;;  %v4912_v44 = vunpack.c.l.bf16 %v4885_v48  ;;  %v15847_v37 = vunpack.c.l.b16 %v13770_v32  ;;  %v4989_v17 = vsel %vm466_vm5, %v4969_v45, 0.0  ;;  %v4990_v47 = vsel %vm473_vm6, %v4970_v38, 0.0 }
 0x2f7   : > { %15846 = vst [vmem:[#allocation39_spill] sm:$0xff] %v13886_v10  ;;  %v7125_v16 = vadd.f32 %v13658_v40, %v7095_v3  ;;  %v13895_v31 = vpop.permute.xlu0 %4741  ;;  %v7000_v6 = vadd.f32 %v15848_v59, %v13483_v24  ;;  %v5109_v40 = vsel %vm9227_vm7, %v5104_v20, %v5108_v56  ;;  %v13909_v49 = vpack.c.bf16 %v4989_v17, %v4989_v17  ;;  %v13922_v24 = vld [vmem:[%s15277_s5] ss:$0 sm:$0xff]  ;;  %v4886_v3 = vld [vmem:[%s13481_s20 + $0x38] sm:$0xf]  ;;  %v15849_v17 = vld [vmem:[#allocation36_spill] sm:$0xff] }
 0x2f8   : > { %v5320_v51 = vpack.c.b16 %v15461_v21, %v15847_v37  ;;  %v7030_v60 = vpop.f32.mrf.mxu1  ;;  %v13911_v32 = vpack.c.bf16 %v4990_v47, %v4990_v47  ;;  %v4829_v36 = vsel %vm1001_vm10, %v4821_v39, %v13786_v15  ;;  %v13915_v18 = vunpack.c.l.b16 %v5109_v40  ;;  %5310 = vrot.lane.b32.xlu2 %v5306_v57, %s9114_s17 }
 0x2f9   : > { %v7137_v48 = vadd.f32 %v7125_v16, %v7055_v29  ;;  %v4951_v56 = vadd.f32 %v13922_v24, %v4931_v2  ;;  %v5111_v38 = vshrl.u32 %v13909_v49, 16  ;;  %v5114_v15 = vshll.u32 %v13909_v49, 16 }
 0x2fa   : > { %5325 = vrot.lane.b32.xlu1 %v5320_v51, %s9116_s19  ;;  %v13925_v45 = vpop.permute.xlu1 %4754  ;;  %v5120_v39 = vshll.u32 %v13911_v32, 16  ;;  %v4932_v29 = vmul.f32 %v13891_v27, %v4912_v44  ;;  %v7029_v57 = vadd.f32 %v7028_v61, %v7000_v6  ;;  %v13932_v51 = vpop.permute.xlu2 %4767  ;;  %v4837_v47 = vsel %vm1010_vm11, %v4829_v36, %v13805_v33 }
 0x2fb   : > { %v7145_v20 = vpack.c.bf16 %v7137_v48, %v7137_v48  ;;  %v7161_v16 = vadd.f32 %v7160_v34, %v7137_v48  ;;  %v7175_v37 = vmul.f32 %v7137_v48, %v7137_v48  ;;  %8854 = vmatmul.msk.bf16.gmra.mxu2 %vm979_vm8, %v15849_v17  ;;  %v13936_v2 = vpop.f32.mrf.mxu3  ;;  %v5307_v59 = vpack.c.b16 %v13915_v18, %v13790_v13 }
 0x2fc   : > { %15850 = vst [vmem:[#allocation51_spill] sm:$0xff] %v13936_v2  ;;  %v5113_v40 = vrot.slane %v5111_v38, 4  ;;  %v5116_v44 = vrot.slane %v5114_v15, 5  ;;  %v7002_v61 = vadd.f32 %v13362_v1, %v13524_v12  ;;  %v4971_v6 = vmax.f32 %v4951_v56, 0.0  ;;  %v15851_v2 = vld [vmem:[#allocation50_spill] sm:$0xff] }
 0x2fd   : > { %8822 = vst.msk [vmem:[%s11657_s30 + $0x74] sm:$0xf] %vm6406_vm15, %v7145_v20  ;;  %v7182_v34 = vadd.f32 %v7181_v50, %v7175_v37  ;;  %v4913_v48 = vunpack.c.l.bf16 %v4886_v3  ;;  %v4813_v10 = vsel %vm979_vm8, %v15851_v2, %v13863_v9  ;;  %5312 = vrot.lane.b32.xlu0 %v5307_v59, %s9114_s17  ;;  %v5122_v13 = vrot.slane %v5120_v39, 5  ;;  %v4887_v15 = vld [vmem:[%s13481_s20 + $0x3c] sm:$0x1]  ;;  %v15852_v37 = vld [vmem:[#allocation23_spill] sm:$0xff] }
 0x2fe   : > { %v7098_v21 = vpop.f32.mrf.mxu0  ;;  %v5117_v33 = vor.u32 %v5116_v44, %v5113_v40  ;;  %v13950_v36 = vpop.f32.mrf.mxu2  ;;  %v4952_v38 = vadd.f32 %v13922_v24, %v4932_v29  ;;  %v7058_v1 = vadd.f32 %v13637_v35, %v7029_v57  ;;  %v4845_v12 = vsel %vm1019_vm12, %v4837_v47, %v13788_v22 }
 0x2ff   : > { %v7128_v50 = vadd.f32 %v13718_v62, %v7098_v21  ;;  %v13957_v56 = vpop.permute.xlu0 %4780  ;;  %v4991_v9 = vsel %vm466_vm5, %v4971_v6, 0.0  ;;  %v5244_v29 = vunpack.c.l.b16 %v13839_v14  ;;  %v7031_v22 = vadd.f32 %v7030_v60, %v7002_v61  ;;  %v15853_v6 = vld [vmem:[#allocation48_spill] sm:$0xff] }
 0x300   : > { %v13962_v3 = vpop.f32.mrf.mxu1  ;;  %v5118_v39 = vrot.slane %v5117_v33, 4  ;;  %v13964_v20 = vpack.c.bf16 %v4991_v9, %v4991_v9  ;;  %8851 = vmatmul.msk.bf16.gmra.mxu3 %vm979_vm8, %v15852_v37  ;;  %v4972_v35 = vmax.f32 %v4952_v38, 0.0  ;;  %5343 = vrot.lane.b32.xlu2 %v13809_v42, %s9115_s18  ;;  %v4933_v62 = vmul.f32 %v13891_v27, %v4913_v48 }
 0x301   : > { %v7138_v57 = vadd.f32 %v7128_v50, %v7058_v1  ;;  %7463 = vmatmul.bf16.gmra.mxu0 %v13835_v25  ;;  %v4914_v60 = vunpack.c.l.bf16 %v4887_v15  ;;  %v4853_v40 = vsel %vm1028_vm13, %v4845_v12, %v13851_v5  ;;  %v4823_v33 = vsel %vm992_vm9, %v4813_v10, %v13895_v31  ;;  %v13998_v5 = vld [vmem:[%s15275_s3 + $0xc8] sm:$0xff] }
 0x302   : > { %v13973_v21 = vpop.permute.xlu1 %4790  ;;  %v5123_v2 = vsel %vm9227_vm7, %v5118_v39, %v5122_v13  ;;  %v4992_v47 = vsel %vm473_vm6, %v4972_v35, 0.0  ;;  %v5125_v59 = vshrl.u32 %v13964_v20, 16  ;;  %v15854_v1 = vunpack.c.l.b16 %v13672_v63  ;;  %v14003_v10 = vpop.permute.xlu2 %4800 }
 0x303   : > { %v7146_v44 = vpack.c.bf16 %v7138_v57, %v7138_v57  ;;  %v7162_v61 = vadd.f32 %v7161_v16, %v7138_v57  ;;  %v7176_v42 = vmul.f32 %v7138_v57, %v7138_v57  ;;  %v13983_v48 = vpop.f32.mrf.mxu3  ;;  %v13987_v13 = vunpack.c.l.b16 %v5123_v2 }
 0x304   : > { %7506 = vmatmul.bf16.vlgmr.msra.gmra.mxu1 %v15853_v6  ;;  %v13989_v38 = vpack.c.bf16 %v4992_v47, %v4992_v47  ;;  %v5294_v50 = vpack.c.b16 %v5244_v29, %v15854_v1  ;;  %v5127_v31 = vrot.slane %v5125_v59, 4  ;;  %v5128_v12 = vshll.u32 %v13964_v20, 16 }
 0x305   : > { %7815 = vmatpush.bf16.msra.mxu1 %v13998_v5  ;;  %8823 = vst.msk [vmem:[%s11657_s30 + $0x78] sm:$0xf] %vm6406_vm15, %v7146_v44  ;;  %v7183_v16 = vadd.f32 %v7182_v34, %v7176_v42  ;;  %v4953_v63 = vadd.f32 %v13922_v24, %v4933_v62  ;;  %v7060_v9 = vadd.f32 %v13699_v58, %v7031_v22  ;;  %v15462_v22 = vunpack.c.l.b16 %v13964_v20  ;;  %v4888_v44 = vld [vmem:[%s13481_s20 + $0x40] sm:$0xf] }
 0x306   : > { %v7100_v15 = vpop.f32.mrf.mxu0  ;;  %v5262_v39 = vpack.c.b16 %v13987_v13, %v13915_v18  ;;  %v14010_v37 = vpop.f32.mrf.mxu2  ;;  %v5134_v35 = vshll.u32 %v13989_v38, 16  ;;  %v4934_v34 = vmul.f32 %v13891_v27, %v4914_v60  ;;  %v4831_v57 = vsel %vm1001_vm10, %v4823_v33, %v13925_v45  ;;  %v14037_v33 = vld [vmem:[%s15275_s3 + $0xc0] sm:$0xff] }
 0x307   : > { %v7130_v2 = vadd.f32 %v13779_v11, %v7100_v15  ;;  %v5130_v47 = vrot.slane %v5128_v12, 5  ;;  %v4973_v62 = vmax.f32 %v4953_v63, 0.0  ;;  %v14020_v58 = vpop.permute.xlu0 %4723  ;;  %v5245_v18 = vunpack.c.l.b16 %v13909_v49 }
 0x308   : > { %v14017_v59 = vpop.f32.mrf.mxu1  ;;  %5345 = vrot.lane.b32.xlu0 %v5262_v39, %s9115_s18  ;;  %5268 = vrot.lane.b32.xlu1 %v5262_v39, %s9112_s15  ;;  %v4954_v60 = vadd.f32 %v13922_v24, %v4934_v34  ;;  %v14029_v11 = vsel %vm1037_vm14, %v4853_v40, %v13866_v41  ;;  %v4839_v1 = vsel %vm1010_vm11, %v4831_v57, %v13932_v51  ;;  %v5136_v40 = vrot.slane %v5134_v35, 5 }
 0x309   : > { %15855 = vst [vmem:[#allocation35_spill] sm:$0xff] %v14029_v11  ;;  %v7139_v45 = vadd.f32 %v7130_v2, %v7060_v9  ;;  %v5131_v42 = vor.u32 %v5130_v47, %v5127_v31  ;;  %5299 = vrot.lane.b32.xlu2 %v5294_v50, %s9110_s13  ;;  %v4993_v6 = vsel %vm466_vm5, %v4973_v62, 0.0  ;;  %7816 = vmatpush.bf16.msra.mxu1 %v14037_v33  ;;  %v4915_v39 = vunpack.c.l.bf16 %v4888_v44 }
 0x30a   : > { %v14042_v41 = vpop.permute.xlu1 %4743  ;;  %v14044_v31 = vpack.c.bf16 %v4993_v6, %v4993_v6  ;;  %v4974_v50 = vmax.f32 %v4954_v60, 0.0  ;;  %v5295_v34 = vpack.c.b16 %v15462_v22, %v5245_v18  ;;  %v14056_v35 = vpack.c.b16 %v5245_v18, %v5244_v29  ;;  %v14064_v60 = vld [vmem:[%s15275_s3 + $0xb8] sm:$0xff] }
 0x30b   : > { %v7147_v12 = vpack.c.bf16 %v7139_v45, %v7139_v45  ;;  %v7163_v63 = vadd.f32 %v7162_v61, %v7139_v45  ;;  %v7177_v9 = vmul.f32 %v7139_v45, %v7139_v45  ;;  %8855 = vmatmul.msk.bf16.gmra.mxu2 %vm979_vm8, %v13427_v52  ;;  %v14048_v15 = vpop.f32.mrf.mxu3  ;;  %v5132_v2 = vrot.slane %v5131_v42, 4  ;;  %15858 = vst [vmem:[#allocation14_spill] sm:$0xff] %v14064_v60 }
 0x30c   : > { %15856 = vst [vmem:[#allocation44_spill] sm:$0xff] %v14048_v15  ;;  %v4994_v51 = vsel %vm473_vm6, %v4974_v50, 0.0  ;;  %v5139_v62 = vshrl.u32 %v14044_v31, 16  ;;  %v5142_v18 = vshll.u32 %v14044_v31, 16  ;;  %v5194_v45 = vrot.slane %v13989_v38, 5  ;;  %v14076_v50 = vpop.permute.xlu2 %4756  ;;  %v15860_v15 = vld [vmem:[#allocation34_spill] sm:$0xff] }
 0x30d   : > { %15857 = vst [vmem:[#allocation25_spill] sm:$0xff] %v14056_v35  ;;  %v7164_v61 = vrot.slane %v7163_v63, 4  ;;  %v7184_v57 = vadd.f32 %v7183_v16, %v7177_v9  ;;  %v5035_v47 = vpack.c.bf16 %v4994_v51, %v4994_v51  ;;  %7817 = vmatpush.bf16.msra.mxu1 %v14064_v60  ;;  %v5137_v14 = vsel %vm9227_vm7, %v5132_v2, %v5136_v40  ;;  %v15875_v60 = vld [vmem:[#allocation24_spill] sm:$0xff] }
 0x30e   : > { %8824 = vst.msk [vmem:[%s11657_s30 + $0x7c] sm:$0xf] %vm6406_vm15, %v7147_v12  ;;  %v14067_v44 = vpop.f32.mrf.mxu0  ;;  %v14071_v29 = vpop.f32.mrf.mxu2  ;;  %v8595_v16 = vrot.slane %v13964_v20, 9  ;;  %v14078_v12 = vunpack.c.l.b16 %v5137_v14  ;;  %v4935_v9 = vmul.f32 %v13891_v27, %v4915_v39  ;;  %v5141_v2 = vrot.slane %v5139_v62, 4 }
 0x30f   : > { %15859 = vst [vmem:[#allocation21_spill] sm:$0xff] %v14071_v29  ;;  %v7165_v42 = vadd.f32 %v7164_v61, %v7163_v63  ;;  %v7185_v6 = vrot.slane %v7184_v57, 4  ;;  %v5144_v22 = vrot.slane %v5142_v18, 5  ;;  %v5148_v25 = vshll.u32 %v5035_v47, 16  ;;  %v14092_v61 = vpop.permute.xlu0 %4769 }
 0x310   : > { %v14081_v51 = vpop.f32.mrf.mxu1  ;;  %5301 = vrot.lane.b32.xlu0 %v5295_v34, %s9110_s13  ;;  %8852 = vmatmul.msk.bf16.gmra.mxu3 %vm979_vm8, %v15860_v15  ;;  %v8596_v39 = vrot.slane %v14044_v31, 9  ;;  %v5308_v34 = vpack.c.b16 %v14078_v12, %v13987_v13  ;;  %v5198_v18 = vrot.slane %v5035_v47, 5  ;;  %v14100_v15 = vld [vmem:[%s15275_s3 + $0xb0] sm:$0xff]  ;;  %v4847_v40 = vsel %vm1019_vm12, %v4839_v1, %v13957_v56 }
 0x311   : > { %v7166_v38 = vrot.slane %v7165_v42, 2  ;;  %v7186_v63 = vadd.f32 %v7185_v6, %v7184_v57  ;;  %7576 = vmatmul.bf16.vlgmr.msra.gmra.mxu0 %v14029_v11  ;;  %5335 = vrot.lane.b32.xlu2 %v14056_v35, %s9111_s14  ;;  %v5145_v62 = vor.u32 %v5144_v22, %v5141_v2  ;;  %v5150_v14 = vrot.slane %v5148_v25, 5  ;;  %15861 = vst [vmem:[#allocation18_spill] sm:$0xff] %v14100_v15  ;;  %v15862_v35 = vld [vmem:[#allocation30_spill] sm:$0xff]  ;;  %v15863_v25 = vld [vmem:[#allocation52_spill] sm:$0xff] }
 0x312   : > { %7934 = vmatpush.bf16.msra.mxu0 %v13519_v28  ;;  %7818 = vmatpush.bf16.msra.mxu1 %v14100_v15  ;;  %v4816_v13 = vsel %vm979_vm8, %v15863_v25, %v14020_v58  ;;  %v14109_v28 = vpop.permute.xlu1 %4782  ;;  %v15865_v47 = vunpack.c.l.b16 %v13964_v20  ;;  %v14122_v56 = vsel %vm9191_vm2, %v8595_v16, %v5194_v45  ;;  %v4955_v1 = vadd.f32 %v13922_v24, %v4935_v9 }
 0x313   : > { %v7167_v57 = vadd.f32 %v7166_v38, %v7165_v42  ;;  %v7187_v6 = vrot.slane %v7186_v63, 2  ;;  %v14111_v22 = vpop.f32.mrf.mxu3  ;;  %5314 = vrot.lane.b32.xlu1 %v5308_v34, %s9114_s17  ;;  %v15866_v42 = vunpack.c.l.b16 %v14044_v31  ;;  %v5146_v38 = vrot.slane %v5145_v62, 4  ;;  %v4889_v62 = vld [vmem:[%s13481_s20 + $0x44] sm:$0x1] }
 0x314   : > { %7511 = vmatmul.bf16.gmra.mxu1 %v15862_v35  ;;  %15864 = vst [vmem:[#allocation11_spill] sm:$0xff] %v14111_v22  ;;  %v14132_v20 = vsel %vm9191_vm2, %v8596_v39, %v5198_v18  ;;  %v8594_v34 = vrot.slane %v13909_v49, 9  ;;  %v4825_v16 = vsel %vm992_vm9, %v4816_v13, %v14042_v41  ;;  %v15869_v39 = vld [vmem:[#allocation26_spill] sm:$0xff]  ;;  %v14149_v49 = vld [vmem:[%s15275_s3 + $0xa8] sm:$0xff]  ;;  %v5421_v22 = vld [vmem:[%s14128_s8 + $0x10] sm:$0xf]  ;;  %v4855_v15 = vsel %vm1028_vm13, %v4847_v40, %v13973_v21  ;;  %v14176_v29 = vpop.permute.xlu2 %4792 }
 0x315   : > { %v14118_v2 = vpack.c.b16 %v15866_v42, %v15865_v47  ;;  %v7168_v58 = vrot.slane %v7167_v57, 1  ;;  %v7188_v35 = vadd.f32 %v7187_v6, %v7186_v63  ;;  %v5151_v9 = vsel %vm9227_vm7, %v5146_v38, %v5150_v14  ;;  %15870 = vst [vmem:[#allocation16_spill] sm:$0xff] %v14149_v49  ;;  %v15871_v6 = vld [vmem:[#allocation46_spill] sm:$0xff]  ;;  %v15873_v42 = vld [vmem:[#allocation4_spill] sm:$0xff]  ;;  %v5419_v38 = vld [vmem:[%s14128_s8 + $0x8] sm:$0xf] }
 0x316   : > { %v14138_v45 = vpop.f32.mrf.mxu0  ;;  %v14142_v25 = vpop.f32.mrf.mxu2  ;;  %v4975_v47 = vmax.f32 %v4955_v1, 0.0  ;;  %v5190_v63 = vrot.slane %v13911_v32, 5  ;;  %7935 = vmatpush.bf16.msra.mxu0 %v15869_v39  ;;  %7819 = vmatpush.bf16.msra.mxu1 %v14149_v49  ;;  %v14152_v18 = vunpack.c.l.b16 %v5151_v9  ;;  %v15872_v13 = vunpack.c.l.b16 %v15871_v6  ;;  %v14191_v21 = vld [vmem:[%s15275_s3 + $0xa0] sm:$0xff] }
 0x317   : > { %15867 = vst [vmem:[#allocation43_spill] sm:$0xff] %v14118_v2  ;;  %v7189_v41 = vrot.slane %v7188_v35, 1  ;;  %v4916_v6 = vunpack.c.l.bf16 %v4889_v62  ;;  %v4833_v40 = vsel %vm1001_vm10, %v4825_v16, %v14076_v50 }
 0x318   : > { %15868 = vst [vmem:[#allocation28_spill] sm:$0xff] %v14142_v25  ;;  %v14158_v32 = vpack.c.b16 %v15873_v42, %v15872_v13  ;;  %v14161_v1 = vpop.f32.mrf.mxu1  ;;  %5337 = vrot.lane.b32.xlu0 %v14118_v2, %s9111_s14  ;;  %v4995_v9 = vsel %vm466_vm5, %v4975_v47, 0.0  ;;  %v14170_v14 = vsel %vm9191_vm2, %v8594_v34, %v5190_v63  ;;  %v5420_v25 = vld [vmem:[%s14128_s8 + $0xc] sm:$0x1]  ;;  %v7169_v13 = vadd.f32 %v7168_v58, %v7167_v57  ;;  %v5422_v2 = vld [vmem:[%s14128_s8 + $0x14] sm:$0x1] }
 0x319   : > { %v7190_v49 = vadd.f32 %v7189_v41, %v7188_v35  ;;  %v14180_v39 = vpack.c.b16 %v14152_v18, %v14078_v12  ;;  %v14183_v47 = vpack.c.bf16 %v4995_v9, %v4995_v9  ;;  %v5277_v34 = vunpack.c.l.b16 %v14170_v14  ;;  %15876 = vst [vmem:[#allocation9_spill] sm:$0xff] %v14191_v21  ;;  %v15877_v35 = vld [vmem:[#allocation6_spill] sm:$0xff] }
 0x31a   : > { %15874 = vst [vmem:[#allocation17_spill] sm:$0xff] %v14158_v32  ;;  %v4936_v62 = vmul.f32 %v13891_v27, %v4916_v6  ;;  %v5446_v63 = vunpack.c.l.bf16 %v5419_v38  ;;  %7936 = vmatpush.bf16.msra.mxu0 %v15875_v60  ;;  %7820 = vmatpush.bf16.msra.mxu1 %v14191_v21  ;;  %v5447_v57 = vunpack.c.l.bf16 %v5420_v25  ;;  %v5448_v58 = vunpack.c.l.bf16 %v5421_v22  ;;  %v5423_v21 = vld [vmem:[%s14128_s8 + $0x18] sm:$0xf] }
 0x31b   : > { %v7191_v12 = vsel %vm6449_vm0, %v7169_v13, %v7190_v49  ;;  %8856 = vmatmul.msk.bf16.gmra.mxu2 %vm979_vm8, %v14158_v32  ;;  %5347 = vrot.lane.b32.xlu1 %v14180_v39, %s9115_s18  ;;  %v15879_v60 = vunpack.c.l.b16 %v14122_v56  ;;  %v15880_v14 = vunpack.c.l.b16 %v14132_v20  ;;  %v14211_v50 = vpop.f32.mrf.mxu3  ;;  %v5449_v16 = vunpack.c.l.bf16 %v5422_v2  ;;  %v14213_v9 = vpop.permute.xlu0 %4802  ;;  %v15887_v49 = vld [vmem:[#allocation42_spill] sm:$0xff] }
 0x31c   : > { %v14200_v41 = vadd.f32 %v7191_v12, %v15877_v35  ;;  %15882 = vst [vmem:[#allocation22_spill] sm:$0xff] %v14211_v50  ;;  %v4726_v22 = vpop.permute.xlu1 %4725  ;;  %v15883_v25 = vunpack.c.l.b16 %v13878_v46  ;;  %v4956_v13 = vadd.f32 %v13922_v24, %v4936_v62  ;;  %v4841_v12 = vsel %vm1010_vm11, %v4833_v40, %v14092_v61  ;;  %v15888_v46 = vld [vmem:[#allocation20_spill] sm:$0xff]  ;;  %v4746_v50 = vpop.permute.xlu2 %4745 }
 0x31d   : > { %v14208_v38 = vpack.c.b16 %v15880_v14, %v15879_v60  ;;  %v14226_v60 = vsel %vm1037_vm14, %v4855_v15, %v14003_v10  ;;  %v5466_v2 = vmul.f32 %v13891_v27, %v5446_v63  ;;  %v5467_v61 = vmul.f32 %v13891_v27, %v5447_v57  ;;  %v14241_v10 = vld [vmem:[%s15275_s3 + $0x98] sm:$0xff] }
 0x31e   : > { %15878 = vst [vmem:[#allocation15_spill] sm:$0xff] %v14200_v41  ;;  %v14217_v6 = vpack.c.b16 %v5277_v34, %v15883_v25  ;;  %v14222_v35 = vpop.f32.mrf.mxu0  ;;  %v14228_v14 = vpop.f32.mrf.mxu2  ;;  %7937 = vmatpush.bf16.msra.mxu0 %v15887_v49  ;;  %v4819_v25 = vsel %vm979_vm8, %v15888_v46, %v4726_v22  ;;  %v4976_v62 = vmax.f32 %v4956_v13, 0.0  ;;  %v5468_v40 = vmul.f32 %v13891_v27, %v5448_v58 }
 0x31f   : > { %15881 = vst [vmem:[#allocation47_spill] sm:$0xff] %v14208_v38  ;;  %7821 = vmatpush.bf16.msra.mxu1 %v14241_v10  ;;  %v15890_v63 = vunpack.c.l.b16 %v14044_v31  ;;  %v15891_v49 = vunpack.c.l.b16 %v14183_v47  ;;  %v5486_v57 = vadd.f32 %v13922_v24, %v5466_v2  ;;  %v5469_v58 = vmul.f32 %v13891_v27, %v5449_v16  ;;  %v9072_v2 = vld [vmem:[%s15275_s3 + $0x40] sm:$0xff] }
 0x320   : > { %15884 = vst [vmem:[#allocation50_spill] sm:$0xff] %v14217_v6  ;;  %5288 = vrot.lane.b32.xlu2 %v14217_v6, %s9113_s16  ;;  %5290 = vrot.lane.b32.xlu0 %v14208_v38, %s9113_s16  ;;  %v4996_v13 = vsel %vm473_vm6, %v4976_v62, 0.0  ;;  %v8597_v46 = vrot.slane %v14183_v47, 9  ;;  %v5487_v41 = vadd.f32 %v13922_v24, %v5467_v61  ;;  %v5201_v31 = vshrl.u32 %v14183_v47, 16  ;;  %v15892_v38 = vld [vmem:[#allocation38_spill] sm:$0xff]  ;;  %v15893_v62 = vld [vmem:[#allocation37_spill] sm:$0xff] }
 0x321   : > { %15885 = vst [vmem:[#allocation23_spill] sm:$0xff] %v14226_v60  ;;  %v14244_v15 = vpop.f32.mrf.mxu1  ;;  %v5296_v22 = vpack.c.b16 %v15891_v49, %v15890_v63  ;;  %8865 = vmatmul.msk.bf16.vlgmr.msrb.gmra.mxu3 %vm979_vm8, %v15838_v0  ;;  %7581 = vmatmul.bf16.gmra.mxu0 %v14226_v60  ;;  %v14265_v63 = vpack.c.bf16 %v4996_v13, %v4996_v13  ;;  %v5506_v49 = vmax.f32 %v5486_v57, 0.0  ;;  %v15894_v61 = vunpack.c.l.b16 %v14122_v56  ;;  %v14285_v56 = vld [vmem:[%s15275_s3 + $0x90] sm:$0xff] }
 0x322   : > { %15886 = vst [vmem:[#allocation48_spill] sm:$0xff] %v14228_v14  ;;  %8028 = vmatpush.bf16.msrb.mxu3 %v9072_v2  ;;  %v5488_v16 = vadd.f32 %v13922_v24, %v5468_v40  ;;  %v5489_v0 = vadd.f32 %v13922_v24, %v5469_v58  ;;  %7938 = vmatpush.bf16.msra.mxu0 %v15892_v38  ;;  %v5507_v6 = vmax.f32 %v5487_v41, 0.0 }
 0x323   : > { %15889 = vst [vmem:[#allocation34_spill] sm:$0xff] %v14241_v10  ;;  %v5321_v14 = vpack.c.b16 %v15894_v61, %v5277_v34  ;;  %v5204_v10 = vshll.u32 %v14183_v47, 16  ;;  %v4849_v13 = vsel %vm1019_vm12, %v4841_v12, %v14109_v28  ;;  %5303 = vrot.lane.b32.xlu1 %v5296_v22, %s9110_s13  ;;  %v5218_v40 = vrot.slane %v14265_v63, 5  ;;  %v14280_v38 = vpop.f32.mrf.mxu3  ;;  %7822 = vmatpush.bf16.msra.mxu1 %v14285_v56  ;;  %v15949_v4 = vld [vmem:[#allocation22_spill] sm:$0xff] }
 0x324   : > { %7516 = vmatmul.bf16.gmra.mxu1 %v15893_v62  ;;  %v5526_v57 = vsel %vm466_vm5, %v5506_v49, 0.0  ;;  %v5508_v58 = vmax.f32 %v5488_v16, 0.0  ;;  %15895 = vst [vmem:[#allocation30_spill] sm:$0xff] %v14285_v56  ;;  %v4827_v34 = vsel %vm992_vm9, %v4819_v25, %v4746_v50  ;;  %v5527_v28 = vsel %vm473_vm6, %v5507_v6, 0.0  ;;  %v15898_v56 = vld [vmem:[#allocation13_spill] sm:$0xff] }
 0x325   : > { %v5547_v41 = vmul.f32 0.0, %v5526_v57  ;;  %v5509_v12 = vmax.f32 %v5489_v0, 0.0  ;;  %v14295_v2 = vsel %vm9191_vm2, %v8597_v46, %v5218_v40  ;;  %v5548_v49 = vmul.f32 0.0, %v5527_v28  ;;  %v4759_v40 = vpop.permute.xlu0 %4758 }
 0x326   : > { %v14291_v22 = vpop.f32.mrf.mxu0  ;;  %15896 = vst [vmem:[#allocation52_spill] sm:$0xff] %v14295_v2  ;;  %v14297_v16 = vpop.f32.mrf.mxu2  ;;  %v5528_v62 = vsel %vm466_vm5, %v5508_v58, 0.0  ;;  %v5203_v61 = vrot.slane %v5201_v31, 4  ;;  %7939 = vmatpush.bf16.msra.mxu0 %v15898_v56  ;;  %v5206_v25 = vrot.slane %v5204_v10, 5  ;;  %v15901_v57 = vunpack.c.l.b16 %v14183_v47 }
 0x327   : > { %15897 = vst [vmem:[#allocation26_spill] sm:$0xff] %v14297_v16  ;;  %v14304_v0 = vpack.c.bf16 %v5547_v41, %v5547_v41  ;;  %v5529_v6 = vsel %vm473_vm6, %v5509_v12, 0.0  ;;  %v5568_v58 = vpack.c.bf16 %v5548_v49, %v5548_v49  ;;  %v5549_v56 = vmul.f32 0.0, %v5528_v62 }
 0x328   : > { %5327 = vrot.lane.b32.xlu2 %v5321_v14, %s9116_s19  ;;  %v5332_v31 = vpack.c.b16 %v15735_v53, %v15901_v57  ;;  %v5550_v28 = vmul.f32 0.0, %v5529_v6  ;;  %v4857_v50 = vsel %vm1028_vm13, %v4849_v13, %v14176_v29  ;;  %v4835_v14 = vsel %vm1001_vm10, %v4827_v34, %v4759_v40  ;;  %v15904_v6 = vld [vmem:[#allocation29_spill] sm:$0xff]  ;;  %v4772_v57 = vpop.permute.xlu1 %4771  ;;  %v15905_v13 = vld [vmem:[#allocation40_spill] sm:$0xff] }
 0x329   : > { %15899 = vst [vmem:[#allocation46_spill] sm:$0xff] %v14304_v0  ;;  %v14308_v46 = vpop.f32.mrf.mxu1  ;;  %v15902_v41 = vunpack.c.l.b16 %v14132_v20  ;;  %v15903_v12 = vunpack.c.l.b16 %v14295_v2  ;;  %v5600_v16 = vshrl.u32 %v14304_v0, 16  ;;  %v5603_v47 = vshll.u32 %v14304_v0, 16 }
 0x32a   : > { %15900 = vst [vmem:[#allocation24_spill] sm:$0xff] %v14308_v46  ;;  %v5609_v46 = vshll.u32 %v5568_v58, 16  ;;  %v8600_v49 = vrot.slane %v14304_v0, 9  ;;  %v5719_v62 = vrot.slane %v5568_v58, 5  ;;  %7940 = vmatpush.bf16.msra.mxu0 %v15904_v6  ;;  %v14328_v20 = vpack.c.bf16 %v5549_v56, %v5549_v56 }
 0x32b   : > { %v5322_v10 = vpack.c.b16 %v15903_v12, %v15902_v41  ;;  %v5602_v29 = vrot.slane %v5600_v16, 4  ;;  %8869 = vmatmul.msk.bf16.vlgmr.msrb.gmra.mxu2 %vm979_vm8, %v15905_v13  ;;  %v5570_v34 = vpack.c.bf16 %v5550_v28, %v5550_v28  ;;  %v5207_v40 = vor.u32 %v5206_v25, %v5203_v61  ;;  %5339 = vrot.lane.b32.xlu1 %v5332_v31, %s9111_s14  ;;  %v14336_v6 = vpop.f32.mrf.mxu3  ;;  %v4785_v16 = vpop.permute.xlu2 %4784 }
 0x32c   : > { %v4843_v41 = vsel %vm1010_vm11, %v4835_v14, %v4772_v57  ;;  %v5605_v12 = vrot.slane %v5603_v47, 5  ;;  %v14334_v58 = vsel %vm9191_vm2, %v8600_v49, %v5719_v62  ;;  %8098 = vmatpush.bf16.msrb.mxu2 %v13752_v26  ;;  %v5611_v13 = vrot.slane %v5609_v46, 5 }
 0x32d   : > { %5329 = vrot.lane.b32.xlu0 %v5322_v10, %s9116_s19  ;;  %v5450_v10 = vunpack.c.l.bf16 %v5423_v21  ;;  %v5818_v56 = vunpack.c.l.b16 %v14334_v58  ;;  %v5614_v61 = vshrl.u32 %v14328_v20, 16  ;;  %v5617_v25 = vshll.u32 %v14328_v20, 16 }
 0x32e   : > { %v14342_v31 = vpop.f32.mrf.mxu0  ;;  %v5606_v28 = vor.u32 %v5605_v12, %v5602_v29  ;;  %v5623_v14 = vshll.u32 %v5570_v34, 16  ;;  %v14344_v47 = vpop.f32.mrf.mxu2  ;;  %v8601_v21 = vrot.slane %v14328_v20, 9  ;;  %v5723_v49 = vrot.slane %v5570_v34, 5  ;;  %7941 = vmatpush.bf16.msra.mxu0 %v13741_v55  ;;  %v5424_v29 = vld [vmem:[%s14128_s8 + $0x1c] sm:$0x1] }
 0x32f   : > { %15906 = vst [vmem:[#allocation6_spill] sm:$0xff] %v14344_v47  ;;  %v14350_v26 = vsel %vm1037_vm14, %v4857_v50, %v14213_v9  ;;  %v5616_v46 = vrot.slane %v5614_v61, 4  ;;  %v5619_v62 = vrot.slane %v5617_v25, 5  ;;  %v5208_v57 = vrot.slane %v5207_v40, 4  ;;  %v5426_v61 = vld [vmem:[%s14128_s8 + $0x24] sm:$0x1] }
 0x330   : > { %15907 = vst [vmem:[#allocation42_spill] sm:$0xff] %v14350_v26  ;;  %5270 = vrot.lane.b32.xlu2 %v14180_v39, %s9112_s15  ;;  %v5607_v58 = vrot.slane %v5606_v28, 4  ;;  %v5825_v2 = vpack.c.b16 %v5818_v56, %v15873_v42  ;;  %v14360_v55 = vsel %vm9191_vm2, %v8601_v21, %v5723_v49  ;;  %v5210_v9 = vshll.u32 %v14265_v63, 16  ;;  %v5425_v39 = vld [vmem:[%s14128_s8 + $0x20] sm:$0xf]  ;;  %v15908_v49 = vld [vmem:[#allocation12_spill] sm:$0xff] }
 0x331   : > { %v14355_v12 = vpop.f32.mrf.mxu1  ;;  %8866 = vmatmul.msk.bf16.gmra.mxu3 %vm979_vm8, %v15849_v17  ;;  %7586 = vmatmul.bf16.gmra.mxu0 %v14350_v26  ;;  %v4851_v50 = vsel %vm1019_vm12, %v4843_v41, %v4785_v16  ;;  %v5620_v34 = vor.u32 %v5619_v62, %v5616_v46  ;;  %v5625_v40 = vrot.slane %v5623_v14, 5  ;;  %v5451_v42 = vunpack.c.l.bf16 %v5424_v29  ;;  %v4795_v46 = vpop.permute.xlu0 %4794 }
 0x332   : > { %v5612_v25 = vsel %vm9227_vm7, %v5607_v58, %v5611_v13  ;;  %v5212_v28 = vrot.slane %v5210_v9, 5  ;;  %v5470_v21 = vmul.f32 %v13891_v27, %v5450_v10  ;;  %v15481_v47 = vunpack.c.l.b16 %v14360_v55 }
 0x333   : > { %v14373_v63 = vunpack.c.l.b16 %v5612_v25  ;;  %v5621_v17 = vrot.slane %v5620_v34, 4  ;;  %v5452_v53 = vunpack.c.l.bf16 %v5425_v39  ;;  %5829 = vrot.lane.b32.xlu1 %v5825_v2, %s9113_s16  ;;  %v5471_v16 = vmul.f32 %v13891_v27, %v5451_v42  ;;  %v14381_v14 = vpop.f32.mrf.mxu3 }
 0x334   : > { %7521 = vmatmul.bf16.gmra.mxu1 %v15908_v49  ;;  %v5213_v41 = vsel %vm9227_vm7, %v5208_v57, %v5212_v28  ;;  %v5490_v13 = vadd.f32 %v13922_v24, %v5470_v21  ;;  %v5453_v10 = vunpack.c.l.bf16 %v5426_v61  ;;  %v7232_v25 = vadd.f32 %v13763_v7, %v13962_v3 }
 0x335   : > { %v5805_v62 = vpack.c.b16 %v14373_v63, %v15797_v23  ;;  %v5626_v29 = vsel %vm9227_vm7, %v5621_v17, %v5625_v40  ;;  %v14387_v58 = vunpack.c.l.b16 %v5213_v41  ;;  %v5472_v2 = vmul.f32 %v13891_v27, %v5452_v53 }
 0x336   : > { %v14390_v9 = vpop.f32.mrf.mxu0  ;;  %v14392_v42 = vunpack.c.l.b16 %v5626_v29  ;;  %v5491_v57 = vadd.f32 %v13922_v24, %v5471_v16  ;;  %v5510_v39 = vmax.f32 %v5490_v13, 0.0  ;;  %v14395_v34 = vpop.f32.mrf.mxu2  ;;  %v5473_v61 = vmul.f32 %v13891_v27, %v5453_v10  ;;  %v5428_v10 = vld [vmem:[%s14128_s8 + $0x2c] sm:$0x1] }
 0x337   : > { %v7234_v17 = vadd.f32 %v13819_v43, %v14017_v59  ;;  %5809 = vrot.lane.b32.xlu0 %v5805_v62, %s9112_s15  ;;  %v5309_v53 = vpack.c.b16 %v14387_v58, %v14152_v18  ;;  %v5492_v40 = vadd.f32 %v13922_v24, %v5472_v2  ;;  %v5864_v21 = vpack.c.b16 %v15481_v47, %v5818_v56  ;;  %v5427_v43 = vld [vmem:[%s14128_s8 + $0x28] sm:$0xf]  ;;  %v4805_v16 = vpop.permute.xlu1 %4804 }
 0x338   : > { %v5511_v49 = vmax.f32 %v5491_v57, 0.0  ;;  %v5530_v7 = vsel %vm466_vm5, %v5510_v39, 0.0  ;;  %v5493_v3 = vadd.f32 %v13922_v24, %v5473_v61  ;;  %v7261_v59 = vadd.f32 %v14067_v44, %v7232_v25  ;;  %v15909_v44 = vld [vmem:[#allocation41_spill] sm:$0xff] }
 0x339   : > { %v14406_v28 = vpop.f32.mrf.mxu1  ;;  %v4859_v41 = vsel %vm1028_vm13, %v4851_v50, %v4795_v46  ;;  %5316 = vrot.lane.b32.xlu2 %v5309_v53, %s9114_s17  ;;  %v5551_v18 = vmul.f32 0.0, %v5530_v7  ;;  %v5512_v13 = vmax.f32 %v5492_v40, 0.0  ;;  %v7263_v62 = vadd.f32 %v14138_v45, %v7234_v17 }
 0x33a   : > { %v5851_v56 = vpack.c.b16 %v14392_v42, %v14373_v63  ;;  %v5531_v29 = vsel %vm473_vm6, %v5511_v49, 0.0  ;;  %v5513_v2 = vmax.f32 %v5493_v3, 0.0  ;;  %v5454_v46 = vunpack.c.l.bf16 %v5427_v43 }
 0x33b   : > { %v5552_v57 = vmul.f32 0.0, %v5531_v29  ;;  %v14423_v39 = vpack.c.bf16 %v5551_v18, %v5551_v18  ;;  %8870 = vmatmul.msk.bf16.gmra.mxu2 %vm979_vm8, %v15909_v44  ;;  %v5532_v50 = vsel %vm466_vm5, %v5512_v13, 0.0  ;;  %v14430_v61 = vsel %vm1037_vm14, %v4859_v41, %v4805_v16  ;;  %5868 = vrot.lane.b32.xlu1 %v5864_v21, %s9116_s19  ;;  %v14433_v63 = vpop.f32.mrf.mxu3 }
 0x33c   : > { %v5553_v45 = vmul.f32 0.0, %v5532_v50  ;;  %v5533_v25 = vsel %vm473_vm6, %v5513_v2, 0.0  ;;  %v5455_v17 = vunpack.c.l.bf16 %v5428_v10  ;;  %v5342_v7 = vpack.c.b16 %v15797_v23, %v14387_v58 }
 0x33d   : > { %v14437_v53 = vpack.c.bf16 %v5552_v57, %v5552_v57  ;;  %v5628_v40 = vshrl.u32 %v14423_v39, 16  ;;  %v5631_v49 = vshll.u32 %v14423_v39, 16  ;;  %v5554_v41 = vmul.f32 0.0, %v5533_v25 }
 0x33e   : > { %v14443_v3 = vpop.f32.mrf.mxu0  ;;  %v14445_v43 = vpack.c.bf16 %v5553_v45, %v5553_v45  ;;  %v14447_v21 = vpop.f32.mrf.mxu2  ;;  %v5474_v18 = vmul.f32 %v13891_v27, %v5454_v46  ;;  %v5475_v2 = vmul.f32 %v13891_v27, %v5455_v17  ;;  %v5787_v45 = vunpack.c.l.b16 %v14328_v20  ;;  %v15911_v46 = vld [vmem:[#allocation49_spill] sm:$0xff] }
 0x33f   : > { %15910 = vst [vmem:[#allocation20_spill] sm:$0xff] %v14447_v21  ;;  %5855 = vrot.lane.b32.xlu0 %v5851_v56, %s9114_s17  ;;  %v5630_v13 = vrot.slane %v5628_v40, 4  ;;  %v5633_v10 = vrot.slane %v5631_v49, 5  ;;  %v5637_v29 = vshll.u32 %v14437_v53, 16  ;;  %v14454_v57 = vpack.c.bf16 %v5554_v41, %v5554_v41 }
 0x340   : > { %v5642_v44 = vshrl.u32 %v14445_v43, 16  ;;  %v5645_v50 = vshll.u32 %v14445_v43, 16  ;;  %v7290_v56 = vadd.f32 %v15911_v46, %v7261_v59  ;;  %v7237_v49 = vadd.f32 %v13873_v54, %v14081_v51 }
 0x341   : > { %v7330_v58 = vpop.f32.mrf.mxu1  ;;  %8867 = vmatmul.msk.bf16.gmra.mxu3 %vm979_vm8, %v13427_v52  ;;  %7591 = vmatmul.bf16.gmra.mxu0 %v14430_v61  ;;  %v5634_v40 = vor.u32 %v5633_v10, %v5630_v13  ;;  %v5639_v17 = vrot.slane %v5637_v29, 5  ;;  %v5651_v20 = vshll.u32 %v14454_v57, 16  ;;  %v15912_v13 = vld [vmem:[#allocation39_spill] sm:$0xff] }
 0x342   : > { %v7360_v25 = vadd.f32 %v14280_v38, %v7330_v58  ;;  %5349 = vrot.lane.b32.xlu2 %v5342_v7, %s9115_s18  ;;  %v5644_v41 = vrot.slane %v5642_v44, 4  ;;  %v5647_v47 = vrot.slane %v5645_v50, 5  ;;  %v5494_v38 = vadd.f32 %v13922_v24, %v5474_v18  ;;  %v5429_v44 = vld [vmem:[%s14128_s8 + $0x30] sm:$0xf]  ;;  %v9074_v50 = vld [vmem:[%s15275_s3 + $0x38] sm:$0xff] }
 0x343   : > { %v5635_v59 = vrot.slane %v5634_v40, 4  ;;  %v5495_v58 = vadd.f32 %v13922_v24, %v5475_v2  ;;  %v7292_v10 = vadd.f32 %v15912_v13, %v7263_v62  ;;  %v5653_v46 = vrot.slane %v5651_v20, 5  ;;  %v14474_v51 = vpop.f32.mrf.mxu3 }
 0x344   : > { %v7379_v16 = vadd.f32 %v7360_v25, %v7290_v56  ;;  %7695 = vmatmul.bf16.vlgmr.msrb.gmra.mxu1 %v14029_v11  ;;  %v5648_v29 = vor.u32 %v5647_v47, %v5644_v41  ;;  %v15913_v7 = vunpack.c.l.b16 %v14304_v0  ;;  %v5788_v62 = vunpack.c.l.b16 %v14423_v39  ;;  %v5430_v0 = vld [vmem:[%s14128_s8 + $0x34] sm:$0x1] }
 0x345   : > { %7992 = vmatpush.bf16.msrb.mxu1 %v9074_v50  ;;  %v5640_v18 = vsel %vm9227_vm7, %v5635_v59, %v5639_v17  ;;  %v5514_v47 = vmax.f32 %v5494_v38, 0.0  ;;  %v5515_v13 = vmax.f32 %v5495_v58, 0.0  ;;  %v8603_v17 = vrot.slane %v14445_v43, 9 }
 0x346   : > { %v5838_v54 = vpack.c.b16 %v5787_v45, %v15913_v7  ;;  %v7387_v56 = vpack.c.bf16 %v7379_v16, %v7379_v16  ;;  %v14483_v2 = vpop.f32.mrf.mxu0  ;;  %v14485_v25 = vunpack.c.l.b16 %v5640_v18  ;;  %v5649_v41 = vrot.slane %v5648_v29, 4  ;;  %v14488_v20 = vpop.f32.mrf.mxu2 }
 0x347   : > { %15914 = vst [vmem:[#allocation38_spill] sm:$0xff] %v14488_v20  ;;  %v5534_v7 = vsel %vm466_vm5, %v5514_v47, 0.0  ;;  %v5731_v59 = vrot.slane %v14454_v57, 5  ;;  %v5456_v38 = vunpack.c.l.bf16 %v5429_v44  ;;  %v5535_v58 = vsel %vm473_vm6, %v5515_v13, 0.0  ;;  %v15915_v47 = vld [vmem:[#allocation51_spill] sm:$0xff] }
 0x348   : > { %8837 = vst.msk [vmem:[%s11657_s30 + $0x80] sm:$0xf] %vm6406_vm15, %v7387_v56  ;;  %v5806_v18 = vpack.c.b16 %v14485_v25, %v14392_v42  ;;  %v5654_v29 = vsel %vm9227_vm7, %v5649_v41, %v5653_v46  ;;  %v5555_v40 = vmul.f32 0.0, %v5534_v7  ;;  %v9075_v56 = vld [vmem:[%s15275_s3 + $0x30] sm:$0xff]  ;;  %v7239_v57 = vadd.f32 %v15915_v47, %v14161_v1 }
 0x349   : > { %v7332_v50 = vpop.f32.mrf.mxu1  ;;  %7993 = vmatpush.bf16.msrb.mxu1 %v9075_v56  ;;  %v7266_v44 = vadd.f32 %v14222_v35, %v7237_v49  ;;  %v5556_v42 = vmul.f32 0.0, %v5535_v58  ;;  %v15916_v46 = vunpack.c.l.b16 %v14445_v43  ;;  %v14514_v13 = vunpack.c.l.b16 %v5654_v29 }
 0x34a   : > { %v7362_v52 = vadd.f32 %v14336_v6, %v7332_v50  ;;  %5842 = vrot.lane.b32.xlu2 %v5838_v54, %s9110_s13  ;;  %5888 = vrot.lane.b32.xlu0 %v5806_v18, %s9115_s18  ;;  %v14516_v7 = vpack.c.bf16 %v5555_v40, %v5555_v40  ;;  %v14518_v56 = vpack.c.b16 %v5788_v62, %v5787_v45  ;;  %v15918_v6 = vld [vmem:[#allocation19_spill] sm:$0xff]  ;;  %v14526_v50 = vpop.permute.xlu2 %5264 }
 0x34b   : > { %5811 = vrot.lane.b32.xlu1 %v5806_v18, %s9112_s15  ;;  %v5839_v41 = vpack.c.b16 %v15916_v46, %v5788_v62  ;;  %v7417_v1 = vmul.f32 %v7379_v16, %v7379_v16  ;;  %v5576_v49 = vpack.c.bf16 %v5556_v42, %v5556_v42  ;;  %8871 = vmatmul.msk.bf16.gmra.mxu2 %vm979_vm8, %v15918_v6  ;;  %v14531_v45 = vpop.f32.mrf.mxu3 }
 0x34c   : > { %15917 = vst [vmem:[#allocation37_spill] sm:$0xff] %v14518_v56  ;;  %v7380_v35 = vadd.f32 %v7362_v52, %v7292_v10  ;;  %v14524_v54 = vsel %vm9191_vm2, %v8603_v17, %v5731_v59  ;;  %v5656_v18 = vshrl.u32 %v14516_v7, 16  ;;  %v5659_v29 = vshll.u32 %v14516_v7, 16  ;;  %v9076_v10 = vld [vmem:[%s15275_s3 + $0x28] sm:$0xff] }
 0x34d   : > { %v8604_v40 = vrot.slane %v14516_v7, 9  ;;  %v5476_v52 = vmul.f32 %v13891_v27, %v5456_v38  ;;  %7994 = vmatpush.bf16.msrb.mxu1 %v9076_v10  ;;  %v5665_v58 = vshll.u32 %v5576_v49, 16  ;;  %v5852_v42 = vpack.c.b16 %v14514_v13, %v14485_v25 }
 0x34e   : > { %v7388_v62 = vpack.c.bf16 %v7380_v35, %v7380_v35  ;;  %v7404_v17 = vadd.f32 %v7380_v35, %v7379_v16  ;;  %v7418_v59 = vmul.f32 %v7380_v35, %v7380_v35  ;;  %v14537_v47 = vpop.f32.mrf.mxu0  ;;  %v5658_v46 = vrot.slane %v5656_v18, 4  ;;  %v14541_v38 = vpop.f32.mrf.mxu2 }
 0x34f   : > { %v5661_v6 = vrot.slane %v5659_v29, 5  ;;  %v5735_v27 = vrot.slane %v5576_v49, 5  ;;  %v7295_v11 = vadd.f32 %v13950_v36, %v7266_v44  ;;  %v7268_v10 = vadd.f32 %v14291_v22, %v7239_v57  ;;  %v5431_v36 = vld [vmem:[%s14128_s8 + $0x38] sm:$0xf]  ;;  %v5432_v22 = vld [vmem:[%s14128_s8 + $0x3c] sm:$0x1] }
 0x350   : > { %8838 = vst.msk [vmem:[%s11657_s30 + $0x84] sm:$0xf] %vm6406_vm15, %v7388_v62  ;;  %v7425_v16 = vadd.f32 %v7418_v59, %v7417_v1  ;;  %v8602_v35 = vrot.slane %v14423_v39, 9  ;;  %v5667_v25 = vrot.slane %v5665_v58, 5  ;;  %v5496_v49 = vadd.f32 %v13922_v24, %v5476_v52  ;;  %v15919_v44 = vld [vmem:[#allocation33_spill] sm:$0xff]  ;;  %v14568_v52 = vpop.permute.xlu0 %5284 }
 0x351   : > { %v7335_v20 = vpop.f32.mrf.mxu1  ;;  %v5662_v21 = vor.u32 %v5661_v6, %v5658_v46  ;;  %v14551_v18 = vsel %vm9191_vm2, %v8604_v40, %v5735_v27  ;;  %8868 = vmatmul.msk.bf16.gmra.mxu3 %vm979_vm8, %v14158_v32  ;;  %7753 = vmatmul.bf16.vlgmr.msrb.gmra.mxu0 %v15919_v44  ;;  %v5790_v39 = vunpack.c.l.b16 %v14516_v7  ;;  %v5821_v1 = vunpack.c.l.b16 %v14524_v54 }
 0x352   : > { %v7365_v57 = vadd.f32 %v14381_v14, %v7335_v20  ;;  %5878 = vrot.lane.b32.xlu2 %v14518_v56, %s9111_s14  ;;  %v5727_v29 = vrot.slane %v14437_v53, 5  ;;  %5844 = vrot.lane.b32.xlu0 %v5839_v41, %s9110_s13  ;;  %v15486_v40 = vunpack.c.l.b16 %v14551_v18  ;;  %v5516_v14 = vmax.f32 %v5496_v49, 0.0  ;;  %v14573_v54 = vpop.permute.xlu2 %5310  ;;  %v15929_v56 = vld [vmem:[#allocation3_spill] sm:$0xff] }
 0x353   : > { %5857 = vrot.lane.b32.xlu1 %v5852_v42, %s9114_s17  ;;  %v5663_v24 = vrot.slane %v5662_v21, 4  ;;  %v5457_v20 = vunpack.c.l.bf16 %v5430_v0  ;;  %v5458_v53 = vunpack.c.l.bf16 %v5431_v36  ;;  %v5459_v58 = vunpack.c.l.bf16 %v5432_v22  ;;  %8062 = vmatpush.bf16.msrb.mxu0 %v13998_v5  ;;  %v14580_v0 = vpop.permute.xlu1 %5297  ;;  %v14588_v6 = vpop.f32.mrf.mxu3  ;;  %v9078_v5 = vld [vmem:[%s15275_s3 + $0x20] sm:$0xff] }
 0x354   : > { %v7381_v62 = vadd.f32 %v7365_v57, %v7295_v11  ;;  %7700 = vmatmul.bf16.gmra.mxu1 %v14226_v60  ;;  %v5728_v59 = vsel %vm9191_vm2, %v8602_v35, %v5727_v29  ;;  %v5536_v41 = vsel %vm466_vm5, %v5516_v14, 0.0  ;;  %v14585_v11 = vld [vmem:[%s15276_s4] ss:$0 sm:$0xff]  ;;  %v15920_v22 = vunpack.c.l.b16 %v14445_v43 }
 0x355   : > { %v5668_v21 = vsel %vm9227_vm7, %v5663_v24, %v5667_v25  ;;  %v5820_v42 = vunpack.c.l.b16 %v5728_v59  ;;  %v5477_v46 = vmul.f32 %v14585_v11, %v5457_v20  ;;  %7995 = vmatpush.bf16.msrb.mxu1 %v9078_v5  ;;  %v5557_v44 = vmul.f32 0.0, %v5536_v41 }
 0x356   : > { %v7389_v27 = vpack.c.bf16 %v7381_v62, %v7381_v62  ;;  %v7405_v35 = vadd.f32 %v7404_v17, %v7381_v62  ;;  %v7419_v25 = vmul.f32 %v7381_v62, %v7381_v62  ;;  %v14593_v49 = vunpack.c.l.b16 %v5668_v21  ;;  %v14595_v36 = vpop.f32.mrf.mxu0  ;;  %v14610_v17 = vld [vmem:[%s15277_s5] ss:$0 sm:$0xff]  ;;  %v14613_v20 = vpop.f32.mrf.mxu2 }
 0x357   : > { %v14601_v57 = vpack.c.b16 %v5790_v39, %v15920_v22  ;;  %v15922_v29 = vunpack.c.l.b16 %v14360_v55  ;;  %v5497_v14 = vadd.f32 %v14610_v17, %v5477_v46  ;;  %15923 = vst [vmem:[#allocation29_spill] sm:$0xff] %v14613_v20  ;;  %v7242_v43 = vadd.f32 %v13983_v48, %v14244_v15  ;;  %8063 = vmatpush.bf16.msrb.mxu0 %v14037_v33  ;;  %v9080_v48 = vld [vmem:[%s15275_s3 + $0x18] sm:$0xff] }
 0x358   : > { %8839 = vst.msk [vmem:[%s11657_s30 + $0x88] sm:$0xf] %vm6406_vm15, %v7389_v27  ;;  %v7426_v62 = vadd.f32 %v7425_v16, %v7419_v25  ;;  %v14621_v55 = vpack.c.b16 %v14593_v49, %v14514_v13  ;;  %v7297_v59 = vadd.f32 %v14010_v37, %v7268_v10  ;;  %v14624_v41 = vpack.c.bf16 %v5557_v44, %v5557_v44  ;;  %v15925_v25 = vld [vmem:[#allocation7_spill] sm:$0xff] }
 0x359   : > { %15921 = vst [vmem:[#allocation13_spill] sm:$0xff] %v14601_v57  ;;  %v14605_v24 = vpack.c.b16 %v5820_v42, %v15922_v29  ;;  %v7337_v21 = vpop.f32.mrf.mxu1  ;;  %v5517_v5 = vmax.f32 %v5497_v14, 0.0  ;;  %v5478_v46 = vmul.f32 %v14585_v11, %v5458_v53  ;;  %7996 = vmatpush.bf16.msrb.mxu1 %v9080_v48  ;;  %v7271_v15 = vadd.f32 %v14342_v31, %v7242_v43  ;;  %v14659_v43 = vpop.permute.xlu0 %5323 }
 0x35a   : > { %v7367_v13 = vadd.f32 %v14433_v63, %v7337_v21  ;;  %v14635_v37 = vpack.c.b16 %v15486_v40, %v5821_v1  ;;  %v5479_v10 = vmul.f32 %v14585_v11, %v5459_v58  ;;  %5880 = vrot.lane.b32.xlu0 %v14601_v57, %s9111_s14  ;;  %v15485_v33 = vunpack.c.l.b16 %v14624_v41  ;;  %v14652_v44 = vpop.permute.xlu2 %5343  ;;  %v9081_v21 = vld [vmem:[%s15275_s3 + $0x10] sm:$0xff] }
 0x35b   : > { %5831 = vrot.lane.b32.xlu2 %v14605_v24, %s9113_s16  ;;  %5890 = vrot.lane.b32.xlu1 %v14621_v55, %s9115_s18  ;;  %v5537_v31 = vsel %vm473_vm6, %v5517_v5, 0.0  ;;  %v5498_v63 = vadd.f32 %v14610_v17, %v5478_v46  ;;  %v5865_v16 = vpack.c.b16 %v5821_v1, %v5820_v42  ;;  %v5670_v22 = vshrl.u32 %v14624_v41, 16 }
 0x35c   : > { %15924 = vst [vmem:[#allocation40_spill] sm:$0xff] %v14635_v37  ;;  %v7382_v53 = vadd.f32 %v7367_v13, %v7297_v59  ;;  %v5558_v27 = vmul.f32 0.0, %v5537_v31  ;;  %8872 = vmatmul.msk.bf16.gmra.mxu2 %vm979_vm8, %v15925_v25  ;;  %v5499_v58 = vadd.f32 %v14610_v17, %v5479_v10  ;;  %v5840_v29 = vpack.c.b16 %v15485_v33, %v5790_v39  ;;  %v15926_v59 = vld [vmem:[#allocation14_spill] sm:$0xff]  ;;  %v14666_v39 = vpop.f32.mrf.mxu3  ;;  %v14672_v31 = vpop.permute.xlu1 %5333 }
 0x35d   : > { %v8605_v14 = vrot.slane %v14624_v41, 9  ;;  %v5518_v1 = vmax.f32 %v5498_v63, 0.0  ;;  %v5673_v42 = vshll.u32 %v14624_v41, 16  ;;  %8064 = vmatpush.bf16.msrb.mxu0 %v15926_v59  ;;  %7997 = vmatpush.bf16.msrb.mxu1 %v9081_v21  ;;  %v5672_v25 = vrot.slane %v5670_v22, 4  ;;  %v15931_v22 = vld [vmem:[#allocation5_spill] sm:$0xff] }
 0x35e   : > { %v7390_v5 = vpack.c.bf16 %v7382_v53, %v7382_v53  ;;  %v7406_v7 = vadd.f32 %v7405_v35, %v7382_v53  ;;  %v7420_v46 = vmul.f32 %v7382_v53, %v7382_v53  ;;  %v5578_v48 = vpack.c.bf16 %v5558_v27, %v5558_v27  ;;  %v14668_v13 = vpop.f32.mrf.mxu0  ;;  %v14676_v53 = vpop.f32.mrf.mxu2  ;;  %v15928_v27 = vld [vmem:[#allocation21_spill] sm:$0xff] }
 0x35f   : > { %v5538_v10 = vsel %vm466_vm5, %v5518_v1, 0.0  ;;  %v5519_v63 = vmax.f32 %v5499_v58, 0.0  ;;  %v5675_v59 = vrot.slane %v5673_v42, 5  ;;  %15927 = vst [vmem:[#allocation12_spill] sm:$0xff] %v14676_v53  ;;  %v7300_v40 = vadd.f32 %v15928_v27, %v7271_v15  ;;  %v15930_v58 = vld [vmem:[#allocation18_spill] sm:$0xff] }
 0x360   : > { %8840 = vst.msk [vmem:[%s11657_s30 + $0x8c] sm:$0xf] %vm6406_vm15, %v7390_v5  ;;  %v7427_v33 = vadd.f32 %v7426_v62, %v7420_v46  ;;  %v5739_v21 = vrot.slane %v5578_v48, 5  ;;  %v5559_v35 = vmul.f32 0.0, %v5538_v10  ;;  %v5679_v60 = vshll.u32 %v5578_v48, 16  ;;  %v15932_v48 = vld [vmem:[#allocation24_spill] sm:$0xff] }
 0x361   : > { %v7340_v57 = vpop.f32.mrf.mxu1  ;;  %v5539_v32 = vsel %vm473_vm6, %v5519_v63, 0.0  ;;  %v5676_v1 = vor.u32 %v5675_v59, %v5672_v25  ;;  %8873 = vmatmul.msk.bf16.vlgmr.msra.gmra.mxu3 %vm979_vm8, %v15929_v56  ;;  %8065 = vmatpush.bf16.msrb.mxu0 %v15930_v58  ;;  %v5433_v46 = vld [vmem:[%s14128_s8 + $0x40] sm:$0xf]  ;;  %v15933_v10 = vld [vmem:[#allocation44_spill] sm:$0xff]  ;;  %v5434_v58 = vld [vmem:[%s14128_s8 + $0x44] sm:$0x1] }
 0x362   : > { %v7370_v62 = vadd.f32 %v14474_v51, %v7340_v57  ;;  %7758 = vmatmul.bf16.gmra.mxu0 %v15931_v22  ;;  %v14688_v42 = vsel %vm9191_vm2, %v8605_v14, %v5739_v21  ;;  %v14690_v15 = vpack.c.bf16 %v5559_v35, %v5559_v35  ;;  %v5560_v5 = vmul.f32 0.0, %v5539_v32  ;;  %5833 = vrot.lane.b32.xlu0 %v14635_v37, %s9113_s16 }
 0x363   : > { %5870 = vrot.lane.b32.xlu2 %v5865_v16, %s9116_s19  ;;  %v7244_v63 = vadd.f32 %v15933_v10, %v15932_v48  ;;  %5846 = vrot.lane.b32.xlu1 %v5840_v29, %s9110_s13  ;;  %v15491_v51 = vunpack.c.l.b16 %v14688_v42  ;;  %v5677_v57 = vrot.slane %v5676_v1, 4  ;;  %v5681_v14 = vrot.slane %v5679_v60, 5  ;;  %v15935_v1 = vld [vmem:[#allocation16_spill] sm:$0xff] }
 0x364   : > { %v7383_v25 = vadd.f32 %v7370_v62, %v7300_v40  ;;  %7705 = vmatmul.bf16.gmra.mxu1 %v14350_v26  ;;  %v15494_v16 = vunpack.c.l.b16 %v14690_v15  ;;  %v5580_v32 = vpack.c.bf16 %v5560_v5, %v5560_v5  ;;  %v5684_v59 = vshrl.u32 %v14690_v15, 16  ;;  %v14710_v40 = vpop.permute.xlu2 %5299  ;;  %v9082_v62 = vld [vmem:[%s15275_s3 + $0x8] sm:$0xff]  ;;  %v14737_v20 = vpop.permute.xlu1 %5286 }
 0x365   : > { %v7273_v21 = vadd.f32 %v14390_v9, %v7244_v63  ;;  %v15934_v35 = vunpack.c.l.b16 %v14551_v18  ;;  %v5687_v29 = vshll.u32 %v14690_v15, 16  ;;  %v5460_v60 = vunpack.c.l.bf16 %v5433_v46  ;;  %8066 = vmatpush.bf16.msrb.mxu0 %v15935_v1  ;;  %7998 = vmatpush.bf16.msrb.mxu1 %v9082_v62 }
 0x366   : > { %v7391_v9 = vpack.c.bf16 %v7383_v25, %v7383_v25  ;;  %v7407_v22 = vadd.f32 %v7406_v7, %v7383_v25  ;;  %v7421_v18 = vmul.f32 %v7383_v25, %v7383_v25  ;;  %v8606_v5 = vrot.slane %v14690_v15, 9  ;;  %v14717_v48 = vpop.f32.mrf.mxu0  ;;  %v14731_v37 = vpop.f32.mrf.mxu2 }
 0x367   : > { %v5866_v27 = vpack.c.b16 %v15491_v51, %v15934_v35  ;;  %v15936_v10 = vunpack.c.l.b16 %v14624_v41  ;;  %v5686_v63 = vrot.slane %v5684_v59, 4  ;;  %v5689_v35 = vrot.slane %v5687_v29, 5  ;;  %v14725_v51 = vpop.permute.xlu0 %5266  ;;  %v14733_v41 = vpop.f32.mrf.mxu3 }
 0x368   : > { %v5693_v1 = vshll.u32 %v5580_v32, 16  ;;  %8841 = vst.msk [vmem:[%s11657_s30 + $0x90] sm:$0xf] %vm6406_vm15, %v7391_v9  ;;  %v7428_v62 = vadd.f32 %v7427_v33, %v7421_v18  ;;  %v5682_v7 = vsel %vm9227_vm7, %v5677_v57, %v5681_v14  ;;  %v5743_v25 = vrot.slane %v5580_v32, 5  ;;  %v15938_v33 = vld [vmem:[#allocation9_spill] sm:$0xff]  ;;  %v9083_v57 = vld [vmem:[%s15275_s3] sm:$0xff] }
 0x369   : > { %v14723_v46 = vpack.c.b16 %v15494_v16, %v15936_v10  ;;  %v5461_v26 = vunpack.c.l.bf16 %v5434_v58  ;;  %v15937_v10 = vld [vmem:[#allocation11_spill] sm:$0xff]  ;;  %v7342_v59 = vpop.f32.mrf.mxu1  ;;  %v5690_v29 = vor.u32 %v5689_v35, %v5686_v63  ;;  %v5480_v9 = vmul.f32 %v14585_v11, %v5460_v60  ;;  %8067 = vmatpush.bf16.msrb.mxu0 %v15938_v33  ;;  %7999 = vmatpush.bf16.msrb.mxu1 %v9083_v57  ;;  %v15939_v14 = vld [vmem:[#allocation28_spill] sm:$0xff] }
 0x36a   : > { %v7247_v16 = vadd.f32 %v15937_v10, %v14355_v12  ;;  %v5695_v53 = vrot.slane %v5693_v1, 5  ;;  %v7302_v32 = vadd.f32 %v15939_v14, %v7273_v21  ;;  %v7372_v58 = vadd.f32 %v14531_v45, %v7342_v59  ;;  %5872 = vrot.lane.b32.xlu0 %v5866_v27, %s9116_s19  ;;  %v15940_v35 = vld [vmem:[#allocation8_spill] sm:$0xff]  ;;  %v15941_v1 = vld [vmem:[#allocation27_spill] sm:$0xff]  ;;  %v15943_v59 = vld [vmem:[#allocation34_spill] sm:$0xff] }
 0x36b   : > { %v14748_v12 = vsel %vm9191_vm2, %v8606_v5, %v5743_v25  ;;  %5813 = vrot.lane.b32.xlu2 %v14621_v55, %s9112_s15  ;;  %v5481_v60 = vmul.f32 %v14585_v11, %v5461_v26  ;;  %5882 = vrot.lane.b32.xlu1 %v14723_v46, %s9111_s14  ;;  %v5691_v18 = vrot.slane %v5690_v29, 4  ;;  %v5803_v63 = vunpack.c.l.b16 %v5682_v7 }
 0x36c   : > { %v5824_v21 = vunpack.c.l.b16 %v14748_v12  ;;  %v5500_v45 = vadd.f32 %v14610_v17, %v5480_v9  ;;  %v15942_v5 = vunpack.c.l.b16 %v15941_v1  ;;  %v7384_v10 = vadd.f32 %v7372_v58, %v7302_v32  ;;  %8885 = vmatmul.msk.bf16.vlgmr.msra.gmra.mxu2 %vm979_vm8, %v15929_v56  ;;  %v15945_v1 = vld [vmem:[#allocation50_spill] sm:$0xff] }
 0x36d   : > { %v5501_v55 = vadd.f32 %v14610_v17, %v5481_v60  ;;  %v7276_v26 = vadd.f32 %v14443_v3, %v7247_v16  ;;  %v5696_v11 = vsel %vm9227_vm7, %v5691_v18, %v5695_v53  ;;  %v5853_v7 = vpack.c.b16 %v5803_v63, %v14593_v49  ;;  %8068 = vmatpush.bf16.msrb.mxu0 %v15943_v59  ;;  %v14781_v49 = vpop.permute.xlu2 %5335 }
 0x36e   : > { %v5248_v25 = vpack.c.b16 %v15942_v5, %v15940_v35  ;;  %v5520_v27 = vmax.f32 %v5500_v45, 0.0  ;;  %v7392_v29 = vpack.c.bf16 %v7384_v10, %v7384_v10  ;;  %v7408_v9 = vadd.f32 %v7407_v22, %v7384_v10  ;;  %v14771_v17 = vpop.f32.mrf.mxu0  ;;  %v15947_v5 = vld [vmem:[#allocation48_spill] sm:$0xff] }
 0x36f   : > { %v7422_v33 = vmul.f32 %v7384_v10, %v7384_v10  ;;  %v14769_v57 = vunpack.c.l.b16 %v5696_v11  ;;  %v15944_v56 = vunpack.c.l.b16 %v14688_v42  ;;  %v5521_v16 = vmax.f32 %v5501_v55, 0.0  ;;  %v14788_v42 = vpop.f32.mrf.mxu2  ;;  %v14790_v60 = vpop.f32.mrf.mxu3 }
 0x370   : > { %v5540_v53 = vsel %vm466_vm5, %v5520_v27, 0.0  ;;  %v5355_v22 = vsel %vm979_vm8, %v5248_v25, %v14526_v50  ;;  %8842 = vst.msk [vmem:[%s11657_s30 + $0x94] sm:$0xf] %vm6406_vm15, %v7392_v29  ;;  %v14794_v45 = vpop.permute.xlu0 %5312  ;;  %v15946_v50 = vld [vmem:[#allocation30_spill] sm:$0xff]  ;;  %v7249_v11 = vadd.f32 %v15949_v4, %v14406_v28 }
 0x371   : > { %v14777_v3 = vpack.c.b16 %v5824_v21, %v15944_v56  ;;  %v7429_v14 = vadd.f32 %v7428_v62, %v7422_v33  ;;  %v5808_v32 = vpack.c.b16 %v14769_v57, %v5803_v63  ;;  %v5561_v58 = vmul.f32 0.0, %v5540_v53  ;;  %v7345_v18 = vpop.f32.mrf.mxu1  ;;  %8874 = vmatmul.msk.bf16.gmra.mxu3 %vm979_vm8, %v15945_v1  ;;  %8069 = vmatpush.bf16.msrb.mxu0 %v15946_v50  ;;  %v15948_v25 = vld [vmem:[#allocation2_spill] sm:$0xff] }
 0x372   : > { %v5541_v19 = vsel %vm473_vm6, %v5521_v16, 0.0  ;;  %v7305_v62 = vadd.f32 %v15947_v5, %v7276_v26  ;;  %v7375_v63 = vadd.f32 %v14588_v6, %v7345_v18  ;;  %7763 = vmatmul.bf16.gmra.mxu0 %v15948_v25  ;;  %v5366_v27 = vsel %vm992_vm9, %v5355_v22, %v14568_v52  ;;  %v14812_v26 = vpop.permute.xlu1 %5325 }
 0x373   : > { %v5562_v10 = vmul.f32 0.0, %v5541_v19  ;;  %v14802_v55 = vpack.c.bf16 %v5561_v58, %v5561_v58  ;;  %5859 = vrot.lane.b32.xlu2 %v5853_v7, %s9114_s17  ;;  %5815 = vrot.lane.b32.xlu0 %v5808_v32, %s9112_s15  ;;  %v7278_v28 = vadd.f32 %v14483_v2, %v7249_v11  ;;  %v5374_v22 = vsel %vm1001_vm10, %v5366_v27, %v14580_v0  ;;  %v15950_v0 = vld [vmem:[#allocation26_spill] sm:$0xff] }
 0x374   : > { %5835 = vrot.lane.b32.xlu1 %v14777_v3, %s9113_s16  ;;  %v7385_v6 = vadd.f32 %v7375_v63, %v7305_v62  ;;  %7710 = vmatmul.bf16.gmra.mxu1 %v14430_v61  ;;  %v5382_v11 = vsel %vm1010_vm11, %v5374_v22, %v14573_v54 }
 0x375   : > { %v5582_v59 = vpack.c.bf16 %v5562_v10, %v5562_v10  ;;  %v5746_v7 = vshrl.u32 %v14802_v55, 16  ;;  %v5749_v29 = vshll.u32 %v14802_v55, 16  ;;  %v8607_v52 = vrot.slane %v14802_v55, 9 }
 0x376   : > { %v7393_v33 = vpack.c.bf16 %v7385_v6, %v7385_v6  ;;  %v7409_v56 = vadd.f32 %v7408_v9, %v7385_v6  ;;  %v7423_v16 = vmul.f32 %v7385_v6, %v7385_v6  ;;  %v14821_v58 = vpop.f32.mrf.mxu0  ;;  %v7307_v4 = vadd.f32 %v15950_v0, %v7278_v28 }
 0x377   : > { %v5748_v53 = vrot.slane %v5746_v7, 4  ;;  %v5751_v18 = vrot.slane %v5749_v29, 5  ;;  %v5755_v19 = vshll.u32 %v5582_v59, 16  ;;  %v5763_v50 = vrot.slane %v5582_v59, 5  ;;  %v14825_v62 = vpop.f32.mrf.mxu2  ;;  %v14827_v2 = vpop.f32.mrf.mxu3 }
 0x378   : > { %8843 = vst.msk [vmem:[%s11657_s30 + $0x98] sm:$0xf] %vm6406_vm15, %v7393_v33  ;;  %v7430_v5 = vadd.f32 %v7429_v14, %v7423_v16  ;;  %v5837_v8 = vunpack.c.l.b16 %v14802_v55 }
 0x379   : > { %v7347_v63 = vpop.f32.mrf.mxu1  ;;  %v5752_v25 = vor.u32 %v5751_v18, %v5748_v53  ;;  %v5757_v9 = vrot.slane %v5755_v19, 5  ;;  %v14831_v10 = vsel %vm9191_vm2, %v8607_v52, %v5763_v50  ;;  %v15952_v19 = vld [vmem:[#allocation45_spill] sm:$0xff] }
 0x37a   : > { %v7377_v27 = vadd.f32 %v14666_v39, %v7347_v63  ;;  %v5863_v14 = vunpack.c.l.b16 %v14831_v10  ;;  %v14839_v6 = vpop.permute.xlu2 %5288  ;;  %v14841_v7 = vpop.permute.xlu0 %5345  ;;  %v5390_v39 = vsel %vm1019_vm12, %v5382_v11, %v14659_v43  ;;  %v5358_v50 = vsel %vm979_vm8, %v15952_v19, %v14725_v51 }
 0x37b   : > { %5892 = vrot.lane.b32.xlu2 %v5808_v32, %s9115_s18  ;;  %v5753_v59 = vrot.slane %v5752_v25, 4  ;;  %v14854_v28 = vpop.permute.xlu1 %5268  ;;  %v5368_v11 = vsel %vm992_vm9, %v5358_v50, %v14737_v20  ;;  %v15956_v50 = vld [vmem:[#allocation15_spill] sm:$0xff] }
 0x37c   : > { %v7386_v29 = vadd.f32 %v7377_v27, %v7307_v4  ;;  %v5867_v54 = vpack.c.b16 %v5863_v14, %v5824_v21  ;;  %8886 = vmatmul.msk.bf16.gmra.mxu2 %vm979_vm8, %v15945_v1  ;;  %v15951_v21 = vunpack.c.l.b16 %v14690_v15  ;;  %v5398_v1 = vsel %vm1028_vm13, %v5390_v39, %v14672_v31  ;;  %v15953_v15 = vld [vmem:[#allocation47_spill] sm:$0xff] }
 0x37d   : > { %v5758_v32 = vsel %vm9227_vm7, %v5753_v59, %v5757_v9  ;;  %v15954_v9 = vld [vmem:[#allocation31_spill] sm:$0xff] }
 0x37e   : > { %v7394_v52 = vpack.c.bf16 %v7386_v29, %v7386_v29  ;;  %v7410_v33 = vadd.f32 %v7409_v56, %v7386_v29  ;;  %v7424_v55 = vmul.f32 %v7386_v29, %v7386_v29  ;;  %v5850_v16 = vunpack.c.l.b16 %v5758_v32  ;;  %5874 = vrot.lane.b32.xlu1 %v5867_v54, %s9116_s19  ;;  %v14857_v12 = vpop.f32.mrf.mxu0 }
 0x37f   : > { %v5841_v53 = vpack.c.b16 %v5837_v8, %v15951_v21  ;;  %v14866_v18 = vpop.f32.mrf.mxu2  ;;  %v14868_v56 = vpop.f32.mrf.mxu3  ;;  %v5376_v54 = vsel %vm1001_vm10, %v5368_v11, %v14710_v40 }
 0x380   : > { %8844 = vst.msk [vmem:[%s11657_s30 + $0x9c] sm:$0xf] %vm6406_vm15, %v7394_v52  ;;  %v7411_v30 = vrot.slane %v7410_v33, 4  ;;  %v7431_v43 = vadd.f32 %v7430_v5, %v7424_v55  ;;  %v5854_v22 = vpack.c.b16 %v5850_v16, %v14769_v57  ;;  %v5406_v57 = vsel %vm1037_vm14, %v5398_v1, %v14652_v44 }
 0x381   : > { %v7507_v63 = vpop.f32.mrf.mxu1  ;;  %8875 = vmatmul.msk.bf16.gmra.mxu3 %vm979_vm8, %v15953_v15  ;;  %v5887_v29 = vpack.c.b16 %v15797_v23, %v5850_v16  ;;  %v5877_v44 = vpack.c.b16 %v15940_v35, %v5837_v8  ;;  %v5384_v23 = vsel %vm1010_vm11, %v5376_v54, %v14794_v45  ;;  %v15960_v54 = vld [vmem:[#allocation4_spill] sm:$0xff] }
 0x382   : > { %v7412_v25 = vadd.f32 %v7411_v30, %v7410_v33  ;;  %v7432_v31 = vrot.slane %v7431_v43, 4  ;;  %5861 = vrot.lane.b32.xlu0 %v5854_v22, %s9114_s17  ;;  %7768 = vmatmul.bf16.gmra.mxu0 %v15954_v9  ;;  %v14877_v5 = vpop.permute.xlu2 %5327  ;;  %v5302_v0 = vpop.permute.xlu0 %5301  ;;  %v5392_v19 = vsel %vm1019_vm12, %v5384_v23, %v14812_v26  ;;  %v15957_v26 = vld [vmem:[#allocation25_spill] sm:$0xff]  ;;  %v15961_v23 = vld [vmem:[#allocation20_spill] sm:$0xff] }
 0x383   : > { %5848 = vrot.lane.b32.xlu2 %v5841_v53, %s9110_s13  ;;  %v15955_v53 = vld [vmem:[#allocation6_spill] sm:$0xff]  ;;  %v5361_v11 = vsel %vm979_vm8, %v15957_v26, %v14854_v28  ;;  %s8368_s13 = sshll.u32 %s15983_s24, 1 }
 0x384   : > { %v7413_v4 = vrot.slane %v7412_v25, 2  ;;  %v7433_v51 = vadd.f32 %v7432_v31, %v7431_v43  ;;  %7823 = vmatmul.bf16.vlgmr.msra.gmra.mxu1 %v5406_v57  ;;  %v7479_v1 = vadd.f32 %v15955_v53, %v14537_v47  ;;  %s15245_s16 = scalar_lea.vmem %s15279_s7, %s8368_s13 }
 0x385   : > { %v5315_v32 = vpop.permute.xlu1 %5314 }
 0x386   : > { %v7414_v27 = vadd.f32 %v7413_v4, %v7412_v25  ;;  %v7434_v59 = vrot.slane %v7433_v51, 2  ;;  %v14887_v39 = vpop.f32.mrf.mxu0  ;;  %v7508_v22 = vadd.f32 %v7507_v63, %v7479_v1  ;;  %v5400_v4 = vsel %vm1028_vm13, %v5392_v19, %v14781_v49  ;;  %v15958_v49 = vld [vmem:[#allocation52_spill] sm:$0xff] }
 0x387   : > { %v14890_v55 = vpop.f32.mrf.mxu2  ;;  %v14892_v21 = vpop.f32.mrf.mxu3 }
 0x388   : > { %v7415_v52 = vrot.slane %v7414_v27, 1  ;;  %v7435_v33 = vadd.f32 %v7434_v59, %v7433_v51  ;;  %v7537_v9 = vadd.f32 %v14733_v41, %v7508_v22  ;;  %v7481_v59 = vadd.f32 %v14395_v34, %v14595_v36 }
 0x389   : > { %v7509_v20 = vpop.f32.mrf.mxu1  ;;  %v5409_v41 = vsel %vm1037_vm14, %v5400_v4, %v14841_v7 }
 0x38a   : > { %v7436_v30 = vrot.slane %v7435_v33, 1  ;;  %5894 = vrot.lane.b32.xlu0 %v5887_v29, %s9115_s18  ;;  %v5271_v40 = vpop.permute.xlu2 %5270  ;;  %v5338_v16 = vpop.permute.xlu0 %5337  ;;  %v7416_v8 = vadd.f32 %v7415_v52, %v7414_v27  ;;  %v7510_v52 = vadd.f32 %v7509_v20, %v7481_v59 }
 0x38b   : > { %5884 = vrot.lane.b32.xlu2 %v5877_v44, %s9111_s14 }
 0x38c   : > { %v7437_v43 = vadd.f32 %v7436_v30, %v7435_v33  ;;  %8887 = vmatmul.msk.bf16.gmra.mxu2 %vm979_vm8, %v15953_v15  ;;  %v5370_v33 = vsel %vm992_vm9, %v5361_v11, %v14839_v6 }
 0x38d   : > { %v5348_v31 = vpop.permute.xlu1 %5347  ;;  %v5378_v34 = vsel %vm1001_vm10, %v5370_v33, %v5302_v0 }
 0x38e   : > { %v7438_v47 = vsel %vm6449_vm0, %v7416_v8, %v7437_v43  ;;  %v7577_v45 = vpop.f32.mrf.mxu0  ;;  %v7484_v8 = vadd.f32 %v15961_v23, %v14668_v13  ;;  %v5386_v22 = vsel %vm1010_vm11, %v5378_v34, %v5315_v32 }
 0x38f   : > { %v14906_v25 = vadd.f32 %v7438_v47, %v15956_v50  ;;  %v7607_v63 = vadd.f32 %v14788_v42, %v7577_v45  ;;  %v14912_v51 = vpop.f32.mrf.mxu2  ;;  %v14914_v15 = vpop.f32.mrf.mxu3  ;;  %v15959_v42 = vunpack.c.l.b16 %v15958_v49 }
 0x391   : > { %v7512_v27 = vpop.f32.mrf.mxu1  ;;  %v7626_v29 = vadd.f32 %v7607_v63, %v7537_v9  ;;  %v5352_v44 = vpack.c.b16 %v15960_v54, %v15959_v42 }
 0x392   : > { %7942 = vmatmul.bf16.vlgmr.msra.gmra.mxu0 %v5406_v57  ;;  %v5291_v28 = vpop.permute.xlu0 %5290  ;;  %v7539_v57 = vadd.f32 %v14790_v60, %v7510_v52  ;;  %v7513_v47 = vadd.f32 %v7512_v27, %v7484_v8  ;;  %v5394_v60 = vsel %vm1019_vm12, %v5386_v22, %v14877_v5  ;;  %v15962_v27 = vld [vmem:[#allocation43_spill] sm:$0xff] }
 0x393   : > { %v7634_v53 = vpack.c.bf16 %v7626_v29, %v7626_v29  ;;  %v5317_v1 = vpop.permute.xlu2 %5316  ;;  %8876 = vmatmul.msk.bf16.gmra.mxu3 %vm979_vm8, %v5352_v44  ;;  %v7664_v0 = vmul.f32 %v7626_v29, %v7626_v29  ;;  %v5402_v11 = vsel %vm1028_vm13, %v5394_v60, %v5338_v16  ;;  %v5364_v59 = vsel %vm979_vm8, %v15962_v27, %v5271_v40 }
 0x394   : > { %7828 = vmatmul.bf16.gmra.mxu1 %v5409_v41  ;;  %v7542_v32 = vadd.f32 %v14827_v2, %v7513_v47  ;;  %v5372_v2 = vsel %vm992_vm9, %v5364_v59, %v5291_v28  ;;  %v5412_v16 = vsel %vm1037_vm14, %v5402_v11, %v5348_v31 }
 0x395   : > { %8857 = vst.msk [vmem:[%s11657_s30 + $0xa0] sm:$0xf] %vm6406_vm15, %v7634_v53  ;;  %v5304_v7 = vpop.permute.xlu1 %5303 }
 0x396   : > { %v7579_v36 = vpop.f32.mrf.mxu0 }
 0x397   : > { %v7609_v20 = vadd.f32 %v14825_v62, %v7579_v36  ;;  %v14934_v30 = vpop.f32.mrf.mxu2  ;;  %v14936_v6 = vpop.f32.mrf.mxu3 }
 0x399   : > { %v7514_v43 = vpop.f32.mrf.mxu1  ;;  %v7627_v19 = vadd.f32 %v7609_v20, %v7539_v57  ;;  %v5380_v20 = vsel %vm1001_vm10, %v5372_v2, %v5304_v7 }
 0x39a   : > { %v5388_v7 = vsel %vm1010_vm11, %v5380_v20, %v5317_v1  ;;  %v15968_v20 = vld [vmem:[#allocation46_spill] sm:$0xff] }
 0x39b   : > { %v7635_v50 = vpack.c.bf16 %v7627_v19, %v7627_v19  ;;  %v7651_v45 = vadd.f32 %v7627_v19, %v7626_v29  ;;  %v7665_v9 = vmul.f32 %v7627_v19, %v7627_v19  ;;  %v7489_v19 = vadd.f32 %v14541_v38, %v14771_v17 }
 0x39c   : > { %8888 = vmatmul.msk.bf16.gmra.mxu2 %vm979_vm8, %v5352_v44  ;;  %v5350_v62 = vpop.permute.xlu2 %5349  ;;  %v15963_v44 = vld [vmem:[#allocation38_spill] sm:$0xff] }
 0x39d   : > { %8858 = vst.msk [vmem:[%s11657_s30 + $0xa4] sm:$0xf] %vm6406_vm15, %v7635_v50  ;;  %v7672_v4 = vadd.f32 %v7665_v9, %v7664_v0  ;;  %v5340_v26 = vpop.permute.xlu1 %5339  ;;  %v7486_v52 = vadd.f32 %v15963_v44, %v14717_v48 }
 0x39e   : > { %v7582_v13 = vpop.f32.mrf.mxu0 }
 0x39f   : > { %v5330_v63 = vpop.permute.xlu0 %5329  ;;  %v7612_v29 = vadd.f32 %v14866_v18, %v7582_v13  ;;  %v14951_v49 = vpop.f32.mrf.mxu2  ;;  %v7515_v53 = vadd.f32 %v7514_v43, %v7486_v52  ;;  %v15964_v18 = vld [vmem:[#allocation32_spill] sm:$0xff] }
 0x3a0   : > { %v14953_v5 = vpop.f32.mrf.mxu3 }
 0x3a1   : > { %v7517_v42 = vpop.f32.mrf.mxu1  ;;  %v7628_v33 = vadd.f32 %v7612_v29, %v7542_v32 }
 0x3a2   : > { %7947 = vmatmul.bf16.gmra.mxu0 %v5409_v41  ;;  %v7544_v41 = vadd.f32 %v14868_v56, %v7515_v53  ;;  %v7518_v50 = vadd.f32 %v7517_v42, %v7489_v19 }
 0x3a3   : > { %v7636_v34 = vpack.c.bf16 %v7628_v33, %v7628_v33  ;;  %v7652_v40 = vadd.f32 %v7651_v45, %v7628_v33  ;;  %v7666_v36 = vmul.f32 %v7628_v33, %v7628_v33  ;;  %8889 = vmatmul.msk.bf16.vlgmr.msrb.gmra.mxu3 %vm979_vm8, %v15964_v18  ;;  %v15966_v33 = vld [vmem:[#allocation36_spill] sm:$0xff] }
 0x3a4   : > { %7833 = vmatmul.bf16.gmra.mxu1 %v5412_v16  ;;  %v14964_v23 = vpop.permute.xlu2 %5842  ;;  %v7547_v13 = vadd.f32 %v14892_v21, %v7518_v50 }
 0x3a5   : > { %8859 = vst.msk [vmem:[%s11657_s30 + $0xa8] sm:$0xf] %vm6406_vm15, %v7636_v34  ;;  %v7673_v57 = vadd.f32 %v7672_v4, %v7666_v36  ;;  %v14972_v22 = vpop.permute.xlu1 %5829  ;;  %v15967_v36 = vld [vmem:[#allocation12_spill] sm:$0xff] }
 0x3a6   : > { %v7584_v48 = vpop.f32.mrf.mxu0  ;;  %v7494_v18 = vadd.f32 %v15967_v36, %v14857_v12 }
 0x3a7   : > { %v7614_v31 = vadd.f32 %v14890_v55, %v7584_v48  ;;  %v14968_v28 = vpop.f32.mrf.mxu2  ;;  %v5396_v55 = vsel %vm1019_vm12, %v5388_v7, %v5330_v63  ;;  %v15969_v48 = vunpack.c.l.b16 %v15968_v20 }
 0x3a8   : > { %v14970_v8 = vpop.f32.mrf.mxu3  ;;  %v5404_v38 = vsel %vm1028_vm13, %v5396_v55, %v5340_v26 }
 0x3a9   : > { %v7519_v43 = vpop.f32.mrf.mxu1  ;;  %v7629_v47 = vadd.f32 %v7614_v31, %v7544_v41  ;;  %v5810_v0 = vpop.permute.xlu0 %5809  ;;  %v5415_v29 = vsel %vm1037_vm14, %v5404_v38, %v5350_v62  ;;  %v5793_v41 = vpack.c.b16 %v15969_v48, %v15940_v35 }
 0x3ab   : > { %v7637_v45 = vpack.c.bf16 %v7629_v47, %v7629_v47  ;;  %v7653_v56 = vadd.f32 %v7652_v40, %v7629_v47  ;;  %v7667_v9 = vmul.f32 %v7629_v47, %v7629_v47  ;;  %v15970_v47 = vld [vmem:[#allocation40_spill] sm:$0xff]  ;;  %v5900_v12 = vsel %vm979_vm8, %v5793_v41, %v5810_v0 }
 0x3ac   : > { %8893 = vmatmul.msk.bf16.vlgmr.msrb.gmra.mxu2 %vm979_vm8, %v14605_v24  ;;  %v15965_v24 = vld [vmem:[#allocation29_spill] sm:$0xff]  ;;  %v14991_v59 = vpop.permute.xlu2 %5878  ;;  %v5911_v38 = vsel %vm992_vm9, %v5900_v12, %v14972_v22 }
 0x3ad   : > { %8860 = vst.msk [vmem:[%s11657_s30 + $0xac] sm:$0xf] %vm6406_vm15, %v7637_v45  ;;  %v7674_v60 = vadd.f32 %v7673_v57, %v7667_v9  ;;  %v7491_v27 = vadd.f32 %v15965_v24, %v14821_v58  ;;  %v5869_v42 = vpop.permute.xlu1 %5868 }
 0x3ae   : > { %v7587_v4 = vpop.f32.mrf.mxu0 }
 0x3af   : > { %v7617_v17 = vadd.f32 %v14912_v51, %v7587_v4  ;;  %v14985_v1 = vpop.f32.mrf.mxu2  ;;  %v7520_v26 = vadd.f32 %v7519_v43, %v7491_v27  ;;  %v5919_v27 = vsel %vm1001_vm10, %v5911_v38, %v14964_v23 }
 0x3b0   : > { %v14987_v32 = vpop.f32.mrf.mxu3 }
 0x3b1   : > { %v7522_v11 = vpop.f32.mrf.mxu1  ;;  %v7630_v63 = vadd.f32 %v7617_v17, %v7547_v13  ;;  %v5856_v21 = vpop.permute.xlu0 %5855  ;;  %v7496_v13 = vadd.f32 %v14731_v37, %v14887_v39 }
 0x3b2   : > { %7952 = vmatmul.bf16.gmra.mxu0 %v5412_v16  ;;  %v7549_v16 = vadd.f32 %v14914_v15, %v7520_v26  ;;  %v7523_v31 = vadd.f32 %v7522_v11, %v7494_v18  ;;  %v15972_v26 = vld [vmem:[#allocation10_spill] sm:$0xff] }
 0x3b3   : > { %v7638_v44 = vpack.c.bf16 %v7630_v63, %v7630_v63  ;;  %v7654_v51 = vadd.f32 %v7653_v56, %v7630_v63  ;;  %v7668_v52 = vmul.f32 %v7630_v63, %v7630_v63  ;;  %8890 = vmatmul.msk.bf16.gmra.mxu3 %vm979_vm8, %v15966_v33 }
 0x3b4   : > { %7838 = vmatmul.bf16.gmra.mxu1 %v5415_v29  ;;  %v7552_v9 = vadd.f32 %v14936_v6, %v7523_v31 }
 0x3b5   : > { %8861 = vst.msk [vmem:[%s11657_s30 + $0xb0] sm:$0xf] %vm6406_vm15, %v7638_v44  ;;  %v7675_v2 = vadd.f32 %v7674_v60, %v7668_v52  ;;  %v5832_v7 = vpop.permute.xlu2 %5831  ;;  %v5927_v44 = vsel %vm1010_vm11, %v5919_v27, %v5856_v21 }
 0x3b6   : > { %v7589_v58 = vpop.f32.mrf.mxu0 }
 0x3b7   : > { %v7619_v53 = vadd.f32 %v14934_v30, %v7589_v58  ;;  %v15000_v62 = vpop.f32.mrf.mxu2 }
 0x3b8   : > { %v15002_v34 = vpop.f32.mrf.mxu3 }
 0x3b9   : > { %v7524_v40 = vpop.f32.mrf.mxu1  ;;  %v7631_v57 = vadd.f32 %v7619_v53, %v7549_v16  ;;  %v5935_v16 = vsel %vm1019_vm12, %v5927_v44, %v5869_v42 }
 0x3ba   : > { %v7525_v0 = vadd.f32 %v7524_v40, %v7496_v13  ;;  %v15975_v13 = vld [vmem:[#allocation17_spill] sm:$0xff] }
 0x3bb   : > { %v7639_v43 = vpack.c.bf16 %v7631_v57, %v7631_v57  ;;  %v7655_v19 = vadd.f32 %v7654_v51, %v7631_v57  ;;  %v7669_v15 = vmul.f32 %v7631_v57, %v7631_v57  ;;  %v15973_v57 = vld [vmem:[#allocation37_spill] sm:$0xff] }
 0x3bc   : > { %8894 = vmatmul.msk.bf16.gmra.mxu2 %vm979_vm8, %v15970_v47  ;;  %v5889_v30 = vpop.permute.xlu0 %5888  ;;  %v7554_v51 = vadd.f32 %v14953_v5, %v7525_v0  ;;  %v5943_v5 = vsel %vm1028_vm13, %v5935_v16, %v14991_v59 }
 0x3bd   : > { %v5812_v50 = vpop.permute.xlu1 %5811  ;;  %8862 = vst.msk [vmem:[%s11657_s30 + $0xb4] sm:$0xf] %vm6406_vm15, %v7639_v43  ;;  %v7676_v45 = vadd.f32 %v7675_v2, %v7669_v15 }
 0x3be   : > { %v7592_v56 = vpop.f32.mrf.mxu0  ;;  %v5903_v20 = vsel %vm979_vm8, %v15973_v57, %v5812_v50 }
 0x3bf   : > { %v7622_v35 = vadd.f32 %v14951_v49, %v7592_v56  ;;  %v15016_v55 = vpop.f32.mrf.mxu2  ;;  %v15971_v49 = vld [vmem:[#allocation35_spill] sm:$0xff]  ;;  %v5913_v59 = vsel %vm992_vm9, %v5903_v20, %v5832_v7 }
 0x3c0   : > { %v15018_v60 = vpop.f32.mrf.mxu3 }
 0x3c1   : > { %v15020_v4 = vpop.f32.mrf.mxu1  ;;  %v7632_v17 = vadd.f32 %v7622_v35, %v7552_v9  ;;  %v15974_v9 = vld [vmem:[#allocation23_spill] sm:$0xff] }
 0x3c2   : > { %7957 = vmatmul.bf16.gmra.mxu0 %v5415_v29  ;;  %v5871_v29 = vpop.permute.xlu2 %5870 }
 0x3c3   : > { %v7640_v11 = vpack.c.bf16 %v7632_v17, %v7632_v17  ;;  %v7656_v6 = vadd.f32 %v7655_v19, %v7632_v17  ;;  %v7670_v24 = vmul.f32 %v7632_v17, %v7632_v17  ;;  %8891 = vmatmul.msk.bf16.gmra.mxu3 %vm979_vm8, %v15972_v26 }
 0x3c4   : > { %8000 = vmatmul.bf16.vlgmr.msrb.gmra.mxu1 %v15971_v49  ;;  %v5845_v63 = vpop.permute.xlu0 %5844 }
 0x3c5   : > { %8863 = vst.msk [vmem:[%s11657_s30 + $0xb8] sm:$0xf] %vm6406_vm15, %v7640_v11  ;;  %v7677_v37 = vadd.f32 %v7676_v45, %v7670_v24  ;;  %v5858_v39 = vpop.permute.xlu1 %5857  ;;  %v5921_v35 = vsel %vm1001_vm10, %v5913_v59, %v5845_v63  ;;  %v5897_v24 = vpack.c.b16 %v15960_v54, %v5863_v14  ;;  %v15976_v14 = vld [vmem:[#allocation13_spill] sm:$0xff] }
 0x3c6   : > { %v7594_v22 = vpop.f32.mrf.mxu0  ;;  %v5929_v11 = vsel %vm1010_vm11, %v5921_v35, %v5858_v39 }
 0x3c7   : > { %v7624_v52 = vadd.f32 %v14968_v28, %v7594_v22  ;;  %v15036_v33 = vpop.f32.mrf.mxu2 }
 0x3c8   : > { %v15038_v23 = vpop.f32.mrf.mxu3 }
 0x3c9   : > { %v15040_v2 = vpop.f32.mrf.mxu1  ;;  %v7633_v58 = vadd.f32 %v7624_v52, %v7554_v51 }
 0x3ca   : > { %v5814_v45 = vpop.permute.xlu2 %5813 }
 0x3cb   : > { %v7641_v53 = vpack.c.bf16 %v7633_v58, %v7633_v58  ;;  %v7657_v40 = vadd.f32 %v7656_v6, %v7633_v58  ;;  %v7671_v36 = vmul.f32 %v7633_v58, %v7633_v58  ;;  %v5906_v54 = vsel %vm979_vm8, %v15976_v14, %v5814_v45 }
 0x3cc   : > { %8895 = vmatmul.msk.bf16.gmra.mxu2 %vm979_vm8, %v14777_v3  ;;  %v5881_v21 = vpop.permute.xlu0 %5880  ;;  %v5951_v3 = vsel %vm1037_vm14, %v5943_v5, %v5889_v30 }
 0x3cd   : > { %8864 = vst.msk [vmem:[%s11657_s30 + $0xbc] sm:$0xf] %vm6406_vm15, %v7641_v53  ;;  %v7658_v28 = vrot.slane %v7657_v40, 4  ;;  %v7678_v18 = vadd.f32 %v7677_v37, %v7671_v36  ;;  %v5891_v31 = vpop.permute.xlu1 %5890  ;;  %v5937_v37 = vsel %vm1019_vm12, %v5929_v11, %v5871_v29 }
 0x3ce   : > { %v15051_v48 = vpop.f32.mrf.mxu0  ;;  %v5945_v10 = vsel %vm1028_vm13, %v5937_v37, %v5881_v21  ;;  %v7726_v37 = vadd.f32 %v14970_v8, %v15020_v4 }
 0x3cf   : > { %v7659_v42 = vadd.f32 %v7658_v28, %v7657_v40  ;;  %v7679_v41 = vrot.slane %v7678_v18, 4  ;;  %v15053_v43 = vpop.f32.mrf.mxu2  ;;  %v5954_v53 = vsel %vm1037_vm14, %v5945_v10, %v5891_v31 }
 0x3d0   : > { %v15059_v12 = vpop.f32.mrf.mxu3 }
 0x3d1   : > { %v15056_v19 = vpop.f32.mrf.mxu1  ;;  %v7660_v15 = vrot.slane %v7659_v42, 2  ;;  %v7680_v47 = vadd.f32 %v7679_v41, %v7678_v18 }
 0x3d2   : > { %8070 = vmatmul.bf16.vlgmr.msrb.gmra.mxu0 %v5951_v3  ;;  %v5860_v44 = vpop.permute.xlu2 %5859 }
 0x3d3   : > { %v7661_v50 = vadd.f32 %v7660_v15, %v7659_v42  ;;  %v7681_v56 = vrot.slane %v7680_v47, 2  ;;  %8892 = vmatmul.msk.bf16.gmra.mxu3 %vm979_vm8, %v15975_v13 }
 0x3d4   : > { %8005 = vmatmul.bf16.gmra.mxu1 %v15974_v9  ;;  %v5834_v17 = vpop.permute.xlu0 %5833 }
 0x3d5   : > { %v7662_v30 = vrot.slane %v7661_v50, 1  ;;  %v7682_v38 = vadd.f32 %v7681_v56, %v7680_v47  ;;  %v5847_v26 = vpop.permute.xlu1 %5846  ;;  %v5915_v40 = vsel %vm992_vm9, %v5906_v54, %v5834_v17 }
 0x3d6   : > { %v15065_v0 = vpop.f32.mrf.mxu0  ;;  %v5923_v21 = vsel %vm1001_vm10, %v5915_v40, %v5847_v26  ;;  %v7728_v40 = vadd.f32 %v14987_v32, %v15040_v2 }
 0x3d7   : > { %v7683_v7 = vrot.slane %v7682_v38, 1  ;;  %v15068_v6 = vpop.f32.mrf.mxu2  ;;  %v7663_v27 = vadd.f32 %v7662_v30, %v7661_v50  ;;  %v5931_v57 = vsel %vm1010_vm11, %v5923_v21, %v5860_v44 }
 0x3d8   : > { %v15077_v51 = vpop.f32.mrf.mxu3 }
 0x3d9   : > { %v15073_v49 = vpop.f32.mrf.mxu1  ;;  %v7684_v63 = vadd.f32 %v7683_v7, %v7682_v38 }
 0x3da   : > { %v5893_v5 = vpop.permute.xlu2 %5892 }
 0x3db   : > { %v7685_v22 = vsel %vm6449_vm0, %v7663_v27, %v7684_v63 }
 0x3dc   : > { %8896 = vmatmul.msk.bf16.gmra.mxu2 %vm979_vm8, %v5897_v24  ;;  %v15081_v39 = vadd.f32 %v7685_v22, %v14906_v25  ;;  %v5873_v58 = vpop.permute.xlu0 %5872  ;;  %v15977_v25 = vld [vmem:[#allocation42_spill] sm:$0xff] }
 0x3dd   : > { %v5883_v36 = vpop.permute.xlu1 %5882  ;;  %v5939_v31 = vsel %vm1019_vm12, %v5931_v57, %v5873_v58 }
 0x3de   : > { %v5947_v3 = vsel %vm1028_vm13, %v5939_v31, %v5883_v36 }
 0x3df   : > { %v15086_v52 = vpop.f32.mrf.mxu0  ;;  %v15088_v16 = vpop.f32.mrf.mxu2  ;;  %v5957_v9 = vsel %vm1037_vm14, %v5947_v3, %v5893_v5 }
 0x3e0   : > { %v15096_v28 = vpop.f32.mrf.mxu3 }
 0x3e1   : > { %v15090_v29 = vpop.f32.mrf.mxu1 }
 0x3e2   : > { %8075 = vmatmul.bf16.gmra.mxu0 %v5954_v53  ;;  %v5849_v45 = vpop.permute.xlu2 %5848 }
 0x3e4   : > { %8010 = vmatmul.bf16.gmra.mxu1 %v15977_v25 }
 0x3e5   : > { %v5816_v41 = vpop.permute.xlu0 %5815 }
 0x3e6   : > { %v5836_v59 = vpop.permute.xlu1 %5835  ;;  %v5909_v15 = vsel %vm979_vm8, %v14723_v46, %v5816_v41  ;;  %v7731_v41 = vadd.f32 %v15002_v34, %v15056_v19  ;;  %v7733_v19 = vadd.f32 %v15018_v60, %v15073_v49  ;;  %v7736_v60 = vadd.f32 %v15038_v23, %v15090_v29 }
 0x3e7   : > { %v15098_v18 = vpop.f32.mrf.mxu0  ;;  %v15101_v20 = vpop.f32.mrf.mxu2  ;;  %v5917_v13 = vsel %vm992_vm9, %v5909_v15, %v5836_v59 }
 0x3e8   : > { %v7853_v50 = vpop.f32.mrf.mxu3  ;;  %v5925_v38 = vsel %vm1001_vm10, %v5917_v13, %v5849_v45  ;;  %v7760_v2 = vadd.f32 %v15086_v52, %v7731_v41 }
 0x3e9   : > { %v15103_v42 = vpop.f32.mrf.mxu1 }
 0x3ea   : > { %v5885_v63 = vpop.permute.xlu2 %5884  ;;  %v7789_v13 = vadd.f32 %v15016_v55, %v7760_v2  ;;  %v7738_v23 = vadd.f32 %v15059_v12, %v15103_v42 }
 0x3ef   : > { %v15109_v47 = vpop.f32.mrf.mxu0  ;;  %v15114_v35 = vpop.f32.mrf.mxu2 }
 0x3f0   : > { %v5875_v7 = vpop.permute.xlu1 %5874  ;;  %v7855_v24 = vpop.f32.mrf.mxu3 }
 0x3f1   : > { %v15111_v56 = vpop.f32.mrf.mxu1 }
 0x3f2   : > { %8080 = vmatmul.bf16.gmra.mxu0 %v5957_v9 }
 0x3f4   : > { %v5862_v30 = vpop.permute.xlu0 %5861  ;;  %8015 = vmatmul.bf16.gmra.mxu1 %v14430_v61  ;;  %v7755_v61 = vadd.f32 %v15051_v48, %v7726_v37  ;;  %v7757_v48 = vadd.f32 %v15065_v0, %v7728_v40 }
 0x3f5   : > { %v5933_v46 = vsel %vm1010_vm11, %v5925_v38, %v5862_v30  ;;  %v7762_v30 = vadd.f32 %v15098_v18, %v7733_v19  ;;  %v7765_v18 = vadd.f32 %v15109_v47, %v7736_v60 }
 0x3f6   : > { %v5941_v27 = vsel %vm1019_vm12, %v5933_v46, %v5875_v7  ;;  %v7784_v58 = vadd.f32 %v14985_v1, %v7755_v61  ;;  %v7786_v1 = vadd.f32 %v15000_v62, %v7757_v48 }
 0x3f7   : > { %v15119_v17 = vpop.f32.mrf.mxu0  ;;  %v15125_v26 = vpop.f32.mrf.mxu2  ;;  %v5949_v22 = vsel %vm1028_vm13, %v5941_v27, %v5885_v63  ;;  %v7791_v55 = vadd.f32 %v15036_v33, %v7762_v30 }
 0x3f8   : > { %v7858_v8 = vpop.f32.mrf.mxu3  ;;  %v7767_v47 = vadd.f32 %v15119_v17, %v7738_v23 }
 0x3f9   : > { %v15122_v11 = vpop.f32.mrf.mxu1 }
 0x3fc   : > { %v5895_v44 = vpop.permute.xlu0 %5894 }
 0x3fd   : > { %v5960_v54 = vsel %vm1037_vm14, %v5949_v22, %v5895_v44 }
 0x3ff   : > { %v15131_v10 = vpop.f32.mrf.mxu0  ;;  %v15137_v4 = vpop.f32.mrf.mxu2 }
 0x400   : > { %v7860_v15 = vpop.f32.mrf.mxu3 }
 0x401   : > { %v7824_v14 = vpop.f32.mrf.mxu1 }
 0x402   : > { %v7854_v53 = vadd.f32 %v7853_v50, %v7824_v14  ;;  %8085 = vmatmul.bf16.gmra.mxu0 %v5960_v54 }
 0x404   : > { %v7873_v36 = vadd.f32 %v7854_v53, %v7784_v58 }
 0x406   : > { %v7881_v25 = vpack.c.bf16 %v7873_v36, %v7873_v36  ;;  %v7911_v31 = vmul.f32 %v7873_v36, %v7873_v36 }
 0x407   : > { %v15140_v21 = vpop.f32.mrf.mxu0  ;;  %v15150_v50 = vpop.f32.mrf.mxu2 }
 0x408   : > { %8877 = vst.msk [vmem:[%s11657_s30 + $0xc0] sm:$0xf] %vm6406_vm15, %v7881_v25  ;;  %v7863_v63 = vpop.f32.mrf.mxu3 }
 0x409   : > { %v7826_v5 = vpop.f32.mrf.mxu1 }
 0x40a   : > { %v7856_v57 = vadd.f32 %v7855_v24, %v7826_v5 }
 0x40c   : > { %v7874_v32 = vadd.f32 %v7856_v57, %v7786_v1 }
 0x40e   : > { %v7882_v3 = vpack.c.bf16 %v7874_v32, %v7874_v32  ;;  %v7898_v59 = vadd.f32 %v7874_v32, %v7873_v36  ;;  %v7912_v0 = vmul.f32 %v7874_v32, %v7874_v32  ;;  %v7794_v36 = vadd.f32 %v15053_v43, %v7765_v18 }
 0x40f   : > { %v15148_v45 = vpop.f32.mrf.mxu0  ;;  %v15162_v61 = vpop.f32.mrf.mxu2  ;;  %v7796_v32 = vadd.f32 %v15068_v6, %v7767_v47 }
 0x410   : > { %8878 = vst.msk [vmem:[%s11657_s30 + $0xc4] sm:$0xf] %vm6406_vm15, %v7882_v3  ;;  %v7919_v62 = vadd.f32 %v7912_v0, %v7911_v31  ;;  %v7741_v31 = vadd.f32 %v15077_v51, %v15111_v56  ;;  %v7743_v51 = vadd.f32 %v15096_v28, %v15122_v11 }
 0x411   : > { %v7829_v9 = vpop.f32.mrf.mxu1 }
 0x412   : > { %v7859_v34 = vadd.f32 %v7858_v8, %v7829_v9  ;;  %v7865_v8 = vpop.f32.mrf.mxu3  ;;  %v7770_v17 = vadd.f32 %v15131_v10, %v7741_v31  ;;  %v7772_v19 = vadd.f32 %v15140_v21, %v7743_v51 }
 0x414   : > { %v7875_v52 = vadd.f32 %v7859_v34, %v7789_v13  ;;  %v7799_v13 = vadd.f32 %v15088_v16, %v7770_v17 }
 0x416   : > { %v7883_v38 = vpack.c.bf16 %v7875_v52, %v7875_v52  ;;  %v7899_v46 = vadd.f32 %v7898_v59, %v7875_v52  ;;  %v7913_v7 = vmul.f32 %v7875_v52, %v7875_v52 }
 0x417   : > { %v15158_v24 = vpop.f32.mrf.mxu0  ;;  %v15173_v48 = vpop.f32.mrf.mxu2 }
 0x418   : > { %8879 = vst.msk [vmem:[%s11657_s30 + $0xc8] sm:$0xf] %vm6406_vm15, %v7883_v38  ;;  %v7920_v27 = vadd.f32 %v7919_v62, %v7913_v7 }
 0x419   : > { %v7831_v37 = vpop.f32.mrf.mxu1 }
 0x41a   : > { %v7861_v22 = vadd.f32 %v7860_v15, %v7831_v37  ;;  %v7868_v42 = vpop.f32.mrf.mxu3 }
 0x41c   : > { %v7876_v49 = vadd.f32 %v7861_v22, %v7791_v55 }
 0x41e   : > { %v7884_v44 = vpack.c.bf16 %v7876_v49, %v7876_v49  ;;  %v7900_v14 = vadd.f32 %v7899_v46, %v7876_v49  ;;  %v7914_v54 = vmul.f32 %v7876_v49, %v7876_v49 }
 0x41f   : > { %v15168_v58 = vpop.f32.mrf.mxu0  ;;  %v15185_v3 = vpop.f32.mrf.mxu2 }
 0x420   : > { %8880 = vst.msk [vmem:[%s11657_s30 + $0xcc] sm:$0xf] %vm6406_vm15, %v7884_v44  ;;  %v7921_v53 = vadd.f32 %v7920_v27, %v7914_v54 }
 0x421   : > { %v7834_v40 = vpop.f32.mrf.mxu1 }
 0x422   : > { %v7864_v33 = vadd.f32 %v7863_v63, %v7834_v40  ;;  %v7870_v38 = vpop.f32.mrf.mxu3  ;;  %v7801_v63 = vadd.f32 %v15101_v20, %v7772_v19  ;;  %v7978_v19 = vadd.f32 %v15137_v4, %v15168_v58 }
 0x424   : > { %v7877_v29 = vadd.f32 %v7864_v33, %v7794_v36 }
 0x426   : > { %v7885_v25 = vpack.c.bf16 %v7877_v29, %v7877_v29  ;;  %v7901_v5 = vadd.f32 %v7900_v14, %v7877_v29  ;;  %v7915_v1 = vmul.f32 %v7877_v29, %v7877_v29 }
 0x427   : > { %v15178_v57 = vpop.f32.mrf.mxu0  ;;  %v15198_v7 = vpop.f32.mrf.mxu2 }
 0x428   : > { %8881 = vst.msk [vmem:[%s11657_s30 + $0xd0] sm:$0xf] %vm6406_vm15, %v7885_v25  ;;  %v7922_v41 = vadd.f32 %v7921_v53, %v7915_v1 }
 0x429   : > { %v7836_v43 = vpop.f32.mrf.mxu1 }
 0x42a   : > { %v7866_v2 = vadd.f32 %v7865_v8, %v7836_v43  ;;  %v8030_v60 = vpop.f32.mrf.mxu3 }
 0x42c   : > { %v7878_v12 = vadd.f32 %v7866_v2, %v7796_v32 }
 0x42e   : > { %v7886_v59 = vpack.c.bf16 %v7878_v12, %v7878_v12  ;;  %v7902_v0 = vadd.f32 %v7901_v5, %v7878_v12  ;;  %v7916_v15 = vmul.f32 %v7878_v12, %v7878_v12  ;;  %v7973_v5 = vadd.f32 %v15114_v35, %v15148_v45 }
 0x42f   : > { %v15188_v62 = vpop.f32.mrf.mxu0  ;;  %v8100_v14 = vpop.f32.mrf.mxu2 }
 0x430   : > { %8882 = vst.msk [vmem:[%s11657_s30 + $0xd4] sm:$0xf] %vm6406_vm15, %v7886_v59  ;;  %v7923_v9 = vadd.f32 %v7922_v41, %v7916_v15  ;;  %v7975_v15 = vadd.f32 %v15125_v26, %v15158_v24 }
 0x431   : > { %v7839_v6 = vpop.f32.mrf.mxu1 }
 0x432   : > { %v7869_v34 = vadd.f32 %v7868_v42, %v7839_v6  ;;  %v8032_v25 = vpop.f32.mrf.mxu3 }
 0x434   : > { %v7879_v56 = vadd.f32 %v7869_v34, %v7799_v13 }
 0x436   : > { %v7887_v10 = vpack.c.bf16 %v7879_v56, %v7879_v56  ;;  %v7903_v52 = vadd.f32 %v7902_v0, %v7879_v56  ;;  %v7917_v30 = vmul.f32 %v7879_v56, %v7879_v56 }
 0x437   : > { %v15196_v46 = vpop.f32.mrf.mxu0  ;;  %v8102_v41 = vpop.f32.mrf.mxu2 }
 0x438   : > { %8883 = vst.msk [vmem:[%s11657_s30 + $0xd8] sm:$0xf] %vm6406_vm15, %v7887_v10  ;;  %v7924_v27 = vadd.f32 %v7923_v9, %v7917_v30 }
 0x439   : > { %v7841_v16 = vpop.f32.mrf.mxu1 }
 0x43a   : > { %v7871_v37 = vadd.f32 %v7870_v38, %v7841_v16  ;;  %v8035_v45 = vpop.f32.mrf.mxu3 }
 0x43c   : > { %v7880_v28 = vadd.f32 %v7871_v37, %v7801_v63  ;;  %v7980_v63 = vadd.f32 %v15150_v50, %v15178_v57 }
 0x43e   : > { %v7888_v11 = vpack.c.bf16 %v7880_v28, %v7880_v28  ;;  %v7904_v55 = vadd.f32 %v7903_v52, %v7880_v28  ;;  %v7918_v21 = vmul.f32 %v7880_v28, %v7880_v28 }
 0x43f   : > { %v15203_v22 = vpop.f32.mrf.mxu0  ;;  %v8105_v13 = vpop.f32.mrf.mxu2 }
 0x440   : > { %8884 = vst.msk [vmem:[%s11657_s30 + $0xdc] sm:$0xf] %vm6406_vm15, %v7888_v11  ;;  %v7905_v49 = vrot.slane %v7904_v55, 4  ;;  %v7925_v18 = vadd.f32 %v7924_v27, %v7918_v21 }
 0x441   : > { %v8001_v44 = vpop.f32.mrf.mxu1 }
 0x442   : > { %v7906_v54 = vadd.f32 %v7905_v49, %v7904_v55  ;;  %v7926_v53 = vrot.slane %v7925_v18, 4  ;;  %v8002_v2 = vadd.f32 %v8001_v44, %v7973_v5  ;;  %v8037_v52 = vpop.f32.mrf.mxu3 }
 0x444   : > { %v7907_v40 = vrot.slane %v7906_v54, 2  ;;  %v7927_v36 = vadd.f32 %v7926_v53, %v7925_v18  ;;  %v8031_v17 = vadd.f32 %v8030_v60, %v8002_v2  ;;  %v7983_v18 = vadd.f32 %v15162_v61, %v15188_v62 }
 0x446   : > { %v7908_v33 = vadd.f32 %v7907_v40, %v7906_v54  ;;  %v7928_v20 = vrot.slane %v7927_v36, 2 }
 0x447   : > { %v15207_v8 = vpop.f32.mrf.mxu0  ;;  %v8107_v38 = vpop.f32.mrf.mxu2 }
 0x448   : > { %v7909_v23 = vrot.slane %v7908_v33, 1  ;;  %v7929_v29 = vadd.f32 %v7928_v20, %v7927_v36 }
 0x449   : > { %v8003_v47 = vpop.f32.mrf.mxu1 }
 0x44a   : > { %v7930_v1 = vrot.slane %v7929_v29, 1  ;;  %v7910_v43 = vadd.f32 %v7909_v23, %v7908_v33  ;;  %v8004_v9 = vadd.f32 %v8003_v47, %v7975_v15  ;;  %v8040_v4 = vpop.f32.mrf.mxu3  ;;  %v7985_v33 = vadd.f32 %v15173_v48, %v15196_v46 }
 0x44c   : > { %v7931_v32 = vadd.f32 %v7930_v1, %v7929_v29  ;;  %v8033_v34 = vadd.f32 %v8032_v25, %v8004_v9  ;;  %v7988_v1 = vadd.f32 %v15185_v3, %v15203_v22  ;;  %v9117_v3 = vmov 0.0  }
 0x44d   : > { %8185 = vst [vmem:[%s15245_s16] sm:$0x3] %v9117_v3 }
 0x44e   : > { %v7932_v31 = vsel %vm6449_vm0, %v7910_v43, %v7931_v32 }
 0x44f   : > { %v15213_v12 = vadd.f32 %v7932_v31, %v15081_v39  ;;  %v8071_v42 = vpop.f32.mrf.mxu0  ;;  %v8110_v49 = vpop.f32.mrf.mxu2 }
 0x450   : > { %v8101_v59 = vadd.f32 %v8100_v14, %v8071_v42 }
 0x451   : > { %v8006_v0 = vpop.f32.mrf.mxu1 }
 0x452   : > { %v15217_v35 = vadd.f32 %v8101_v59, %v8031_v17  ;;  %v8007_v24 = vadd.f32 %v8006_v0, %v7978_v19  ;;  %v8042_v36 = vpop.f32.mrf.mxu3 }
 0x454   : > { %v8128_v6 = vpack.c.bf16 %v15217_v35, %v15217_v35  ;;  %v8036_v27 = vadd.f32 %v8035_v45, %v8007_v24  ;;  %v8158_v31 = vmul.f32 %v15217_v35, %v15217_v35 }
 0x456   : > { %8897 = vst.msk [vmem:[%s11657_s30 + $0xe0] sm:$0xf] %vm6406_vm15, %v8128_v6  ;;  %v7990_v6 = vadd.f32 %v15198_v7, %v15207_v8 }
 0x457   : > { %v8073_v39 = vpop.f32.mrf.mxu0  ;;  %v8112_v23 = vpop.f32.mrf.mxu2 }
 0x458   : > { %v8103_v51 = vadd.f32 %v8102_v41, %v8073_v39 }
 0x459   : > { %v8008_v56 = vpop.f32.mrf.mxu1 }
 0x45a   : > { %v8121_v26 = vadd.f32 %v8103_v51, %v8033_v34  ;;  %v8009_v11 = vadd.f32 %v8008_v56, %v7980_v63  ;;  %v8045_v43 = vpop.f32.mrf.mxu3 }
 0x45c   : > { %v8129_v10 = vpack.c.bf16 %v8121_v26, %v8121_v26  ;;  %v8038_v21 = vadd.f32 %v8037_v52, %v8009_v11  ;;  %v8159_v48 = vmul.f32 %v8121_v26, %v8121_v26  ;;  %v8145_v22 = vadd.f32 %v8121_v26, %v15217_v35 }
 0x45e   : > { %8898 = vst.msk [vmem:[%s11657_s30 + $0xe4] sm:$0xf] %vm6406_vm15, %v8129_v10  ;;  %v8166_v15 = vadd.f32 %v8159_v48, %v8158_v31 }
 0x45f   : > { %v8076_v30 = vpop.f32.mrf.mxu0  ;;  %v8115_v46 = vpop.f32.mrf.mxu2 }
 0x460   : > { %v8106_v16 = vadd.f32 %v8105_v13, %v8076_v30 }
 0x461   : > { %v8011_v28 = vpop.f32.mrf.mxu1 }
 0x462   : > { %v8122_v37 = vadd.f32 %v8106_v16, %v8036_v27  ;;  %v8012_v14 = vadd.f32 %v8011_v28, %v7983_v18  ;;  %v8047_v52 = vpop.f32.mrf.mxu3 }
 0x464   : > { %v8130_v55 = vpack.c.bf16 %v8122_v37, %v8122_v37  ;;  %v8041_v53 = vadd.f32 %v8040_v4, %v8012_v14  ;;  %v8160_v42 = vmul.f32 %v8122_v37, %v8122_v37  ;;  %v8146_v13 = vadd.f32 %v8145_v22, %v8122_v37 }
 0x466   : > { %8899 = vst.msk [vmem:[%s11657_s30 + $0xe8] sm:$0xf] %vm6406_vm15, %v8130_v55  ;;  %v8167_v34 = vadd.f32 %v8166_v15, %v8160_v42 }
 0x467   : > { %v8078_v58 = vpop.f32.mrf.mxu0 }
 0x468   : > { %v8108_v60 = vadd.f32 %v8107_v38, %v8078_v58  ;;  %v8117_v38 = vpop.f32.mrf.mxu2 }
 0x469   : > { %v8013_v50 = vpop.f32.mrf.mxu1 }
 0x46a   : > { %v8123_v44 = vadd.f32 %v8108_v60, %v8038_v21  ;;  %v8014_v29 = vadd.f32 %v8013_v50, %v7985_v33 }
 0x46c   : > { %v8131_v54 = vpack.c.bf16 %v8123_v44, %v8123_v44  ;;  %v8043_v25 = vadd.f32 %v8042_v36, %v8014_v29  ;;  %v8161_v45 = vmul.f32 %v8123_v44, %v8123_v44  ;;  %v8147_v56 = vadd.f32 %v8146_v13, %v8123_v44  ;;  %v8186_v29 = vld [vmem:[%s15245_s16] sm:$0x3] }
 0x46e   : > { %8900 = vst.msk [vmem:[%s11657_s30 + $0xec] sm:$0xf] %vm6406_vm15, %v8131_v54  ;;  %v8168_v10 = vadd.f32 %v8167_v34, %v8161_v45 }
 0x46f   : > { %v8081_v57 = vpop.f32.mrf.mxu0 }
 0x470   : > { %v8111_v40 = vadd.f32 %v8110_v49, %v8081_v57 }
 0x471   : > { %v8016_v61 = vpop.f32.mrf.mxu1 }
 0x472   : > { %v8124_v20 = vadd.f32 %v8111_v40, %v8041_v53  ;;  %v8017_v32 = vadd.f32 %v8016_v61, %v7988_v1 }
 0x474   : > { %v8132_v47 = vpack.c.bf16 %v8124_v20, %v8124_v20  ;;  %v8046_v59 = vadd.f32 %v8045_v43, %v8017_v32  ;;  %v8162_v51 = vmul.f32 %v8124_v20, %v8124_v20  ;;  %v8148_v30 = vadd.f32 %v8147_v56, %v8124_v20 }
 0x476   : > { %8901 = vst.msk [vmem:[%s11657_s30 + $0xf0] sm:$0xf] %vm6406_vm15, %v8132_v47  ;;  %v8169_v26 = vadd.f32 %v8168_v10, %v8162_v51 }
 0x477   : > { %v8083_v62 = vpop.f32.mrf.mxu0 }
 0x478   : > { %v8113_v5 = vadd.f32 %v8112_v23, %v8083_v62 }
 0x479   : > { %v8018_v9 = vpop.f32.mrf.mxu1 }
 0x47a   : > { %v8125_v41 = vadd.f32 %v8113_v5, %v8043_v25  ;;  %v8019_v19 = vadd.f32 %v8018_v9, %v7990_v6 }
 0x47c   : > { %v8133_v2 = vpack.c.bf16 %v8125_v41, %v8125_v41  ;;  %v8163_v35 = vmul.f32 %v8125_v41, %v8125_v41  ;;  %v8149_v16 = vadd.f32 %v8148_v30, %v8125_v41  ;;  %v8048_v63 = vadd.f32 %v8047_v52, %v8019_v19 }
 0x47e   : > { %8902 = vst.msk [vmem:[%s11657_s30 + $0xf4] sm:$0xf] %vm6406_vm15, %v8133_v2  ;;  %v8170_v37 = vadd.f32 %v8169_v26, %v8163_v35 }
 0x47f   : > { %v8086_v17 = vpop.f32.mrf.mxu0 }
 0x480   : > { %v8116_v0 = vadd.f32 %v8115_v46, %v8086_v17 }
 0x482   : > { %v8126_v39 = vadd.f32 %v8116_v0, %v8046_v59 }
 0x484   : > { %v8134_v24 = vpack.c.bf16 %v8126_v39, %v8126_v39  ;;  %v8164_v7 = vmul.f32 %v8126_v39, %v8126_v39  ;;  %v8150_v28 = vadd.f32 %v8149_v16, %v8126_v39 }
 0x486   : > { %8903 = vst.msk [vmem:[%s11657_s30 + $0xf8] sm:$0xf] %vm6406_vm15, %v8134_v24  ;;  %v8171_v55 = vadd.f32 %v8170_v37, %v8164_v7 }
 0x487   : > { %v8088_v27 = vpop.f32.mrf.mxu0 }
 0x488   : > { %v8118_v8 = vadd.f32 %v8117_v38, %v8088_v27 }
 0x48a   : > { %v8127_v11 = vadd.f32 %v8118_v8, %v8048_v63 }
 0x48c   : > { %v8135_v4 = vpack.c.bf16 %v8127_v11, %v8127_v11  ;;  %v8151_v58 = vadd.f32 %v8150_v28, %v8127_v11  ;;  %v8165_v21 = vmul.f32 %v8127_v11, %v8127_v11 }
 0x48e   : > { %8904 = vst.msk [vmem:[%s11657_s30 + $0xfc] sm:$0xf] %vm6406_vm15, %v8135_v4  ;;  %v8152_v60 = vrot.slane %v8151_v58, 4  ;;  %v8172_v49 = vadd.f32 %v8171_v55, %v8165_v21 }
 0x490   : > { %v8153_v18 = vadd.f32 %v8152_v60, %v8151_v58  ;;  %v8173_v44 = vrot.slane %v8172_v49, 4 }
 0x492   : > { %v8154_v14 = vrot.slane %v8153_v18, 2  ;;  %v8174_v54 = vadd.f32 %v8173_v44, %v8172_v49 }
 0x494   : > { %v8155_v50 = vadd.f32 %v8154_v14, %v8153_v18  ;;  %v8175_v57 = vrot.slane %v8174_v54, 2 }
 0x496   : > { %v8156_v53 = vrot.slane %v8155_v50, 1  ;;  %v8176_v40 = vadd.f32 %v8175_v57, %v8174_v54 }
 0x498   : > { %v8177_v36 = vrot.slane %v8176_v40, 1  ;;  %v8157_v33 = vadd.f32 %v8156_v53, %v8155_v50 }
 0x49a   : > { %v8178_v20 = vadd.f32 %v8177_v36, %v8176_v40 }
 0x49c   : > { %v8179_v23 = vsel %vm6449_vm0, %v8157_v33, %v8178_v20 }
 0x49d   : > { %v8180_v47 = vadd.f32 %v8179_v23, %v15213_v12 }
 0x49f   : > { %v8187_v61 = vadd.f32 %v8186_v29, %v8180_v47 }
 0x4a1   : > { %8188 = vst [vmem:[%s15245_s16] sm:$0x3] %v8187_v61 }
 0x4a2 PF: > { %s18_s26 = sadd.s32 1, %s9106_s26   ;;  %s15978_s24 = smov %s9102_s25 }
 0x4a3   : > { %p15_p5 = scmp.ge.s32.totalorder %s18_s26, 4   ;;  %s15979_s25 = smov %s15981_s27 }
 0x4a5   :  { %17 = sbr.rel (!%p15_p5) target bundleno = 2 (0x2), region = 112 }

</bundles_post_ra>
